<compile_context>
chip_gen: v7x
topology: tpu7x:2x2x1
jax: 0.10.0
libtpu: 0.0.40
codegen_flags: <defaults>
</compile_context>

<pallas_src>
import functools

import jax
import jax.numpy as jnp
from jax.experimental import pallas as pl
from jax.experimental.pallas import tpu as pltpu


# -----------------------------------------------------------------------------
# Host-side (XLA) parameter / constant re-layout helpers — tiny, run once.
# -----------------------------------------------------------------------------
def _band_conv_weights(w_oihw, W):
    """(Cout, Cin, 3, 3) -> (3, W*Cin, W*Cout) block-banded matrices (one per
    kernel row kh).  For interior padded rows r of the stacked slab:
    out[r] = sum_kh pad[r-1+kh] @ B[kh]; the kw taps / W-halo are folded into
    the band structure so no W padding is needed."""
    Cout, Cin, _, _ = w_oihw.shape
    taps = []
    for kh in range(3):
        b = jnp.zeros((W * Cin, W * Cout), jnp.float32)
        for kw in range(3):
            d = jnp.eye(W, k=1 - kw, dtype=jnp.float32)       # shift along W
            b = b + jnp.kron(d, w_oihw[:, :, kh, kw].T)        # (Cin,Cout) block
        taps.append(b)
    return jnp.stack(taps)                                     # (3, W*Cin, W*Cout)


def _interior_mask(B, H):
    """(B*(H+2)-2, 1) 0/1 mask: 0 on rows that are inter-image halo rows of the
    padded-stacked conv output, 1 on data rows."""
    P = H + 2
    r = jnp.arange(B * P - 2) % P
    return ((r != H) & (r != H + 1)).astype(jnp.float32).reshape(-1, 1)


def _pool_row_selectors_padded(B, H):
    """Row-pick selectors for 2x2/stride-2 max-pool acting on the *interior*
    conv output (B*(H+2)-2 rows), emitting a padded-stacked result
    (B*(H/2+2) rows) with zero halo rows per image (ready for the next conv)."""
    P_in, H2 = H + 2, H // 2
    P_out = H2 + 2
    L_in, L_out = B * P_in - 2, B * P_out
    b_idx = jnp.repeat(jnp.arange(B), H2)
    i_idx = jnp.tile(jnp.arange(H2), B)
    rows = b_idx * P_out + i_idx + 1
    cols_e = b_idx * P_in + 2 * i_idx
    re = jnp.zeros((L_out, L_in), jnp.float32).at[rows, cols_e].set(1.0)
    ro = jnp.zeros((L_out, L_in), jnp.float32).at[rows, cols_e + 1].set(1.0)
    return re, ro


def _pool_row_selectors_hpmajor(B, H):
    """Row-pick selectors for the final pool: input is the interior conv output
    (B*(H+2)-2 rows); output row hp*B + b holds pooled row hp of image b, so the
    classifier taps become contiguous 8-aligned (B, .) slices."""
    P_in, H2 = H + 2, H // 2
    L_in = B * P_in - 2
    hp_idx = jnp.repeat(jnp.arange(H2), B)
    b_idx = jnp.tile(jnp.arange(B), H2)
    rows = hp_idx * B + b_idx
    cols_e = b_idx * P_in + 2 * hp_idx
    re = jnp.zeros((H2 * B, L_in), jnp.float32).at[rows, cols_e].set(1.0)
    ro = jnp.zeros((H2 * B, L_in), jnp.float32).at[rows, cols_e + 1].set(1.0)
    return re, ro


def _pool_col_selectors(Win, C):
    """(Win*C, Win/2*C) 0/1 lane-group pick matrices (even / odd width groups)."""
    ee = jnp.eye(Win, dtype=jnp.float32)[:, 0::2]
    eo = jnp.eye(Win, dtype=jnp.float32)[:, 1::2]
    ic = jnp.eye(C, dtype=jnp.float32)
    return jnp.kron(ee, ic), jnp.kron(eo, ic)


def _fc_weight(wfc, C, Hp, Wp, out_pad):
    """Fold the PyTorch NCHW flatten into the FC weight and lane-pad the logits
    dimension: -> (Hp, Wp*C, out_pad)."""
    Out = wfc.shape[0]
    w4 = wfc.reshape(Out, C, Hp, Wp)                           # PyTorch (c,h,w)
    w4 = jnp.transpose(w4, (2, 3, 1, 0)).reshape(Hp, Wp * C, Out)
    return jnp.pad(w4, ((0, 0), (0, 0), (0, out_pad - Out)))


# -----------------------------------------------------------------------------
# Fused forward kernel: B images per grid step, everything in VMEM.
# -----------------------------------------------------------------------------
def fused_forward_kernel(x_ref,
                         w1_ref, b1_ref, w2_ref, b2_ref,
                         w3_ref, b3_ref, w4_ref, b4_ref,
                         m1_ref, m2_ref,
                         re1_ref, ro1_ref, ce1_ref, co1_ref,
                         re2_ref, ro2_ref, ce2_ref, co2_ref,
                         wfc_ref, bfc_ref,
                         o_ref,
                         a1_pad, p1_pad, a3_pad):
    f32 = jnp.float32

    def conv_relu_interior(src_ref, w_ref, b_ref):
        # src_ref: (L, K) padded-stacked slab with zero halo rows per image.
        # Returns interior conv+bias+relu rows, shape (L-2, N); result row j
        # corresponds to padded output row j+1.
        L = src_ref.shape[0]
        s = jnp.dot(src_ref[0:L - 2, :], w_ref[0], preferred_element_type=f32)
        s = s + jnp.dot(src_ref[1:L - 1, :], w_ref[1], preferred_element_type=f32)
        s = s + jnp.dot(src_ref[2:L, :], w_ref[2], preferred_element_type=f32)
        return jnp.maximum(s + b_ref[...], 0.0)

    def store_padded(dst_ref, interior):
        # Interior rows are already halo-masked; only the 2 outermost rows of
        # the slab need zeroing (done every step -> megacore-safe).
        L, Wd = dst_ref.shape
        zrow = jnp.zeros((1, Wd), f32)
        dst_ref[0:1, :] = zrow
        dst_ref[L - 1:L, :] = zrow
        dst_ref[1:L - 1, :] = interior

    def maxpool(a, re_ref, ro_ref, ce_ref, co_ref):
        rows = jnp.maximum(
            jnp.dot(re_ref[...], a, preferred_element_type=f32),
            jnp.dot(ro_ref[...], a, preferred_element_type=f32))
        return jnp.maximum(
            jnp.dot(rows, ce_ref[...], preferred_element_type=f32),
            jnp.dot(rows, co_ref[...], preferred_element_type=f32))

    # ---- block_1 ----
    a1 = conv_relu_interior(x_ref, w1_ref, b1_ref) * m1_ref[...]   # (L1-2, W*C)
    store_padded(a1_pad, a1)
    a2 = conv_relu_interior(a1_pad, w2_ref, b2_ref)                # halo rows unused
    p1 = maxpool(a2, re1_ref, ro1_ref, ce1_ref, co1_ref)           # (L2, W2*C), zero halos
    p1_pad[...] = p1

    # ---- block_2 ----
    a3 = conv_relu_interior(p1_pad, w3_ref, b3_ref) * m2_ref[...]  # (L2-2, W2*C)
    store_padded(a3_pad, a3)
    a4 = conv_relu_interior(a3_pad, w4_ref, b4_ref)                # halo rows unused
    p2 = maxpool(a4, re2_ref, ro2_ref, ce2_ref, co2_ref)           # (H4*B, W4*C), hp-major

    # ---- classifier (NCHW flatten folded into wfc layout; lane-padded out) ----
    B, OutP = o_ref.shape
    acc = jnp.zeros((B, OutP), f32)
    for hp in range(wfc_ref.shape[0]):                             # 7 static taps, M=B
        acc = acc + jnp.dot(p2[hp * B:(hp + 1) * B, :], wfc_ref[hp],
                            preferred_element_type=f32)
    o_ref[...] = acc + bfc_ref[...]


def _whole(a):
    nd = a.ndim
    return pl.BlockSpec(a.shape, lambda n: (0,) * nd)


@functools.partial(jax.jit, static_argnames=("block_batch",))
def fashion_mnist_v2_forward(x_nchw, params, block_batch=8):
    B = block_batch
    assert B % 8 == 0, "block_batch must be a multiple of 8 (sublane tiling)"
    N, Cin, H, W = x_nchw.shape
    C = params["b1"].shape[0]
    Out = params["bfc"].shape[0]
    H2, W2 = H // 2, W // 2
    H4, W4 = H2 // 2, W2 // 2
    OutP = 128                                        # lane-padded logits width

    # Pad batch to a multiple of the per-step block batch.
    N_pad = ((N + B - 1) // B) * B
    if N_pad != N:
        x_nchw = jnp.pad(x_nchw, ((0, N_pad - N), (0, 0), (0, 0), (0, 0)))

    # Channels-last slab with zero H-halo rows, flattened to a 2-D padded stack
    # of shape (N_pad*(H+2), W*Cin): image b occupies rows [b*(H+2), (b+1)*(H+2)).
    x_slab = jnp.transpose(x_nchw, (0, 2, 3, 1)).reshape(N_pad, H, W * Cin)
    x_slab = jnp.pad(x_slab, ((0, 0), (1, 1), (0, 0)))
    x2d = x_slab.reshape(N_pad * (H + 2), W * Cin).astype(jnp.float32)

    # Constant re-layout (tiny, done once in XLA outside the kernel).
    w1 = _band_conv_weights(params["w1"], W)
    w2 = _band_conv_weights(params["w2"], W)
    w3 = _band_conv_weights(params["w3"], W2)
    w4 = _band_conv_weights(params["w4"], W2)
    b1 = jnp.tile(params["b1"], W).reshape(1, W * C)
    b2 = jnp.tile(params["b2"], W).reshape(1, W * C)
    b3 = jnp.tile(params["b3"], W2).reshape(1, W2 * C)
    b4 = jnp.tile(params["b4"], W2).reshape(1, W2 * C)
    m1 = _interior_mask(B, H)
    m2 = _interior_mask(B, H2)
    re1, ro1 = _pool_row_selectors_padded(B, H)
    ce1, co1 = _pool_col_selectors(W, C)
    re2, ro2 = _pool_row_selectors_hpmajor(B, H2)
    ce2, co2 = _pool_col_selectors(W2, C)
    wfc = _fc_weight(params["wfc"], C, H4, W4, OutP)            # (7, 7*C, 128)
    bfc = jnp.pad(params["bfc"], (0, OutP - Out)).reshape(1, OutP)

    consts = [w1, b1, w2, b2, w3, b3, w4, b4, m1, m2,
              re1, ro1, ce1, co1, re2, ro2, ce2, co2, wfc, bfc]

    L1 = B * (H + 2)
    L2 = B * (H2 + 2)

    out = pl.pallas_call(
        fused_forward_kernel,
        out_shape=jax.ShapeDtypeStruct((N_pad, OutP), jnp.float32),
        grid_spec=pltpu.PrefetchScalarGridSpec(
            num_scalar_prefetch=0,
            grid=(N_pad // B,),
            in_specs=[pl.BlockSpec((L1, W * Cin), lambda n: (n, 0))]
                     + [_whole(a) for a in consts],
            out_specs=pl.BlockSpec((B, OutP), lambda n: (n, 0)),
            scratch_shapes=[
                pltpu.VMEM((L1, W * C), jnp.float32),     # a1 padded stack
                pltpu.VMEM((L2, W2 * C), jnp.float32),    # p1 padded stack
                pltpu.VMEM((L2, W2 * C), jnp.float32),    # a3 padded stack
            ],
        ),
        compiler_params=pltpu.CompilerParams(
            dimension_semantics=("parallel",)),
    )(x2d, *consts)

    return out[:N, :Out]


# -----------------------------------------------------------------------------
# Deterministic parameter init (shapes match the PyTorch module)
# -----------------------------------------------------------------------------
def init_params(key, in_channels, hidden_units, output_shape):
    ks = jax.random.split(key, 10)

    def conv_w(k, cin, cout):
        return (jax.random.normal(k, (cout, cin, 3, 3), jnp.float32)
                * jnp.sqrt(2.0 / (cin * 9)))

    def bias(k, n):
        return jax.random.normal(k, (n,), jnp.float32) * 0.01

    fc_in = hidden_units * 7 * 7
    return {
        "w1": conv_w(ks[0], in_channels, hidden_units),
        "b1": bias(ks[1], hidden_units),
        "w2": conv_w(ks[2], hidden_units, hidden_units),
        "b2": bias(ks[3], hidden_units),
        "w3": conv_w(ks[4], hidden_units, hidden_units),
        "b3": bias(ks[5], hidden_units),
        "w4": conv_w(ks[6], hidden_units, hidden_units),
        "b4": bias(ks[7], hidden_units),
        "wfc": (jax.random.normal(ks[8], (output_shape, fc_in), jnp.float32)
                * jnp.sqrt(1.0 / fc_in)),
        "bfc": bias(ks[9], output_shape),
    }


# -----------------------------------------------------------------------------
# Pure-JAX reference (for correctness check)
# -----------------------------------------------------------------------------
def reference_forward(x, p):
    def conv(x, w, b):
        y = jax.lax.conv_general_dilated(
            x, w, window_strides=(1, 1), padding=((1, 1), (1, 1)),
            dimension_numbers=("NCHW", "OIHW", "NCHW"))
        return jax.nn.relu(y + b[None, :, None, None])

    def pool(x):
        return jax.lax.reduce_window(x, -jnp.inf, jax.lax.max,
                                     (1, 1, 2, 2), (1, 1, 2, 2), "VALID")

    x = conv(x, p["w1"], p["b1"])
    x = conv(x, p["w2"], p["b2"])
    x = pool(x)
    x = conv(x, p["w3"], p["b3"])
    x = conv(x, p["w4"], p["b4"])
    x = pool(x)
    x = x.reshape(x.shape[0], -1)
    return x @ p["wfc"].T + p["bfc"][None, :]


if __name__ == "__main__":
    # FashionMNIST-like shapes: the hidden*7*7 classifier implies 28x28 input.
    # batch=16 with 8 images per grid step -> grid=(2,) (keeps both v7x cores busy).
    batch, in_channels, hidden_units, num_classes = 16, 1, 8, 10
    key = jax.random.PRNGKey(0)
    kx, kp = jax.random.split(key)

    x = jax.random.normal(kx, (batch, in_channels, 28, 28), jnp.float32)
    params = init_params(kp, in_channels, hidden_units, num_classes)

    out = fashion_mnist_v2_forward(x, params)
    out = jax.block_until_ready(out)

    assert out.shape == (batch, num_classes)
    ref = reference_forward(x, params)
    if not jnp.allclose(out, ref, atol=2e-2, rtol=2e-2):
        err = float(jnp.max(jnp.abs(out - ref)))
        raise AssertionError(f"Pallas output does not match JAX reference "
                             f"(max abs err {err:.3e})")

    print("KERNEL_OK")
</pallas_src>

<mosaic_0001>
module attributes {stable_mosaic.version = 11 : i64} {
  func.func @fused_forward_kernel(%arg0: i32, %arg1: memref<240x28xf32, #tpu.memory_space<vmem>>, %arg2: memref<3x28x224xf32, #tpu.memory_space<vmem>>, %arg3: memref<1x224xf32, #tpu.memory_space<vmem>>, %arg4: memref<3x224x224xf32, #tpu.memory_space<vmem>>, %arg5: memref<1x224xf32, #tpu.memory_space<vmem>>, %arg6: memref<3x112x112xf32, #tpu.memory_space<vmem>>, %arg7: memref<1x112xf32, #tpu.memory_space<vmem>>, %arg8: memref<3x112x112xf32, #tpu.memory_space<vmem>>, %arg9: memref<1x112xf32, #tpu.memory_space<vmem>>, %arg10: memref<238x1xf32, #tpu.memory_space<vmem>>, %arg11: memref<126x1xf32, #tpu.memory_space<vmem>>, %arg12: memref<128x238xf32, #tpu.memory_space<vmem>>, %arg13: memref<128x238xf32, #tpu.memory_space<vmem>>, %arg14: memref<224x112xf32, #tpu.memory_space<vmem>>, %arg15: memref<224x112xf32, #tpu.memory_space<vmem>>, %arg16: memref<56x126xf32, #tpu.memory_space<vmem>>, %arg17: memref<56x126xf32, #tpu.memory_space<vmem>>, %arg18: memref<112x56xf32, #tpu.memory_space<vmem>>, %arg19: memref<112x56xf32, #tpu.memory_space<vmem>>, %arg20: memref<7x56x128xf32, #tpu.memory_space<vmem>>, %arg21: memref<1x128xf32, #tpu.memory_space<vmem>>, %arg22: memref<8x128xf32, #tpu.memory_space<vmem>>, %arg23: memref<240x224xf32, #tpu.memory_space<vmem>>, %arg24: memref<128x112xf32, #tpu.memory_space<vmem>>, %arg25: memref<128x112xf32, #tpu.memory_space<vmem>>) attributes {dimension_semantics = [#tpu.dimension_semantics<parallel>], iteration_bounds = array<i64: 2>, scalar_prefetch = 0 : i64, scratch_operands = 3 : i64, tpu.core_type = #tpu.core_type<tc>, window_params = [{transform_indices = @transform_0, window_bounds = array<i64: 240, 28>}, {pipeline_mode = #tpu.pipeline_mode<synchronous>, transform_indices = @transform_1, window_bounds = array<i64: 3, 28, 224>}, {pipeline_mode = #tpu.pipeline_mode<synchronous>, transform_indices = @transform_2, window_bounds = array<i64: 1, 224>}, {pipeline_mode = #tpu.pipeline_mode<synchronous>, transform_indices = @transform_3, window_bounds = array<i64: 3, 224, 224>}, {pipeline_mode = #tpu.pipeline_mode<synchronous>, transform_indices = @transform_4, window_bounds = array<i64: 1, 224>}, {pipeline_mode = #tpu.pipeline_mode<synchronous>, transform_indices = @transform_5, window_bounds = array<i64: 3, 112, 112>}, {pipeline_mode = #tpu.pipeline_mode<synchronous>, transform_indices = @transform_6, window_bounds = array<i64: 1, 112>}, {pipeline_mode = #tpu.pipeline_mode<synchronous>, transform_indices = @transform_7, window_bounds = array<i64: 3, 112, 112>}, {pipeline_mode = #tpu.pipeline_mode<synchronous>, transform_indices = @transform_8, window_bounds = array<i64: 1, 112>}, {pipeline_mode = #tpu.pipeline_mode<synchronous>, transform_indices = @transform_9, window_bounds = array<i64: 238, 1>}, {pipeline_mode = #tpu.pipeline_mode<synchronous>, transform_indices = @transform_10, window_bounds = array<i64: 126, 1>}, {pipeline_mode = #tpu.pipeline_mode<synchronous>, transform_indices = @transform_11, window_bounds = array<i64: 128, 238>}, {pipeline_mode = #tpu.pipeline_mode<synchronous>, transform_indices = @transform_12, window_bounds = array<i64: 128, 238>}, {pipeline_mode = #tpu.pipeline_mode<synchronous>, transform_indices = @transform_13, window_bounds = array<i64: 224, 112>}, {pipeline_mode = #tpu.pipeline_mode<synchronous>, transform_indices = @transform_14, window_bounds = array<i64: 224, 112>}, {pipeline_mode = #tpu.pipeline_mode<synchronous>, transform_indices = @transform_15, window_bounds = array<i64: 56, 126>}, {pipeline_mode = #tpu.pipeline_mode<synchronous>, transform_indices = @transform_16, window_bounds = array<i64: 56, 126>}, {pipeline_mode = #tpu.pipeline_mode<synchronous>, transform_indices = @transform_17, window_bounds = array<i64: 112, 56>}, {pipeline_mode = #tpu.pipeline_mode<synchronous>, transform_indices = @transform_18, window_bounds = array<i64: 112, 56>}, {pipeline_mode = #tpu.pipeline_mode<synchronous>, transform_indices = @transform_19, window_bounds = array<i64: 7, 56, 128>}, {pipeline_mode = #tpu.pipeline_mode<synchronous>, transform_indices = @transform_20, window_bounds = array<i64: 1, 128>}, {transform_indices = @transform_21, window_bounds = array<i64: 8, 128>}]} {
    %c0 = arith.constant 0 : index
    %c0_0 = arith.constant 0 : index
    %0 = vector.load %arg1[%c0, %c0_0] : memref<240x28xf32, #tpu.memory_space<vmem>>, vector<238x28xf32>
    %c0_1 = arith.constant 0 : index
    %c0_2 = arith.constant 0 : index
    %c0_3 = arith.constant 0 : index
    %1 = vector.load %arg2[%c0_1, %c0_2, %c0_3] : memref<3x28x224xf32, #tpu.memory_space<vmem>>, vector<1x28x224xf32>
    %2 = vector.shape_cast %1 : vector<1x28x224xf32> to vector<28x224xf32>
    %cst = arith.constant dense<0.000000e+00> : vector<238x224xf32>
    %3 = tpu.matmul %0, %2, %cst {dimension_numbers = #tpu.dot_dimension_numbers<[1], [0], [0], [1], [0, 0, 1, 1], [], []>} : vector<238x28xf32>, vector<28x224xf32>, vector<238x224xf32> -> vector<238x224xf32>
    %c1 = arith.constant 1 : index
    %c0_4 = arith.constant 0 : index
    %4 = vector.load %arg1[%c1, %c0_4] : memref<240x28xf32, #tpu.memory_space<vmem>>, vector<238x28xf32>
    %c1_5 = arith.constant 1 : index
    %c0_6 = arith.constant 0 : index
    %c0_7 = arith.constant 0 : index
    %5 = vector.load %arg2[%c1_5, %c0_6, %c0_7] : memref<3x28x224xf32, #tpu.memory_space<vmem>>, vector<1x28x224xf32>
    %6 = vector.shape_cast %5 : vector<1x28x224xf32> to vector<28x224xf32>
    %cst_8 = arith.constant dense<0.000000e+00> : vector<238x224xf32>
    %7 = tpu.matmul %4, %6, %cst_8 {dimension_numbers = #tpu.dot_dimension_numbers<[1], [0], [0], [1], [0, 0, 1, 1], [], []>} : vector<238x28xf32>, vector<28x224xf32>, vector<238x224xf32> -> vector<238x224xf32>
    %8 = arith.addf %3, %7 : vector<238x224xf32>
    %c2 = arith.constant 2 : index
    %c0_9 = arith.constant 0 : index
    %9 = vector.load %arg1[%c2, %c0_9] : memref<240x28xf32, #tpu.memory_space<vmem>>, vector<238x28xf32>
    %c2_10 = arith.constant 2 : index
    %c0_11 = arith.constant 0 : index
    %c0_12 = arith.constant 0 : index
    %10 = vector.load %arg2[%c2_10, %c0_11, %c0_12] : memref<3x28x224xf32, #tpu.memory_space<vmem>>, vector<1x28x224xf32>
    %11 = vector.shape_cast %10 : vector<1x28x224xf32> to vector<28x224xf32>
    %cst_13 = arith.constant dense<0.000000e+00> : vector<238x224xf32>
    %12 = tpu.matmul %9, %11, %cst_13 {dimension_numbers = #tpu.dot_dimension_numbers<[1], [0], [0], [1], [0, 0, 1, 1], [], []>} : vector<238x28xf32>, vector<28x224xf32>, vector<238x224xf32> -> vector<238x224xf32>
    %13 = arith.addf %8, %12 : vector<238x224xf32>
    %c0_14 = arith.constant 0 : index
    %c0_15 = arith.constant 0 : index
    %14 = vector.load %arg3[%c0_14, %c0_15] : memref<1x224xf32, #tpu.memory_space<vmem>>, vector<1x224xf32>
    %15 = vector.broadcast %14 : vector<1x224xf32> to vector<238x224xf32>
    %16 = arith.addf %13, %15 : vector<238x224xf32>
    %cst_16 = arith.constant 0.000000e+00 : f32
    %17 = vector.broadcast %cst_16 : f32 to vector<238x224xf32>
    %18 = arith.maximumf %16, %17 : vector<238x224xf32>
    %c0_17 = arith.constant 0 : index
    %c0_18 = arith.constant 0 : index
    %19 = vector.load %arg10[%c0_17, %c0_18] : memref<238x1xf32, #tpu.memory_space<vmem>>, vector<238x1xf32>
    %20 = vector.broadcast %19 : vector<238x1xf32> to vector<238x224xf32>
    %21 = arith.mulf %18, %20 : vector<238x224xf32>
    %cst_19 = arith.constant 0.000000e+00 : f32
    %22 = vector.broadcast %cst_19 : f32 to vector<1x224xf32>
    %c0_20 = arith.constant 0 : index
    %c0_21 = arith.constant 0 : index
    %23 = vector.load %arg23[%c0_20, %c0_21] : memref<240x224xf32, #tpu.memory_space<vmem>>, vector<1x224xf32>
    tpu.vector_store %arg23[%c0_20, %c0_21], %22 {strides = array<i32>} : memref<240x224xf32, #tpu.memory_space<vmem>>, vector<1x224xf32>,
    %c239 = arith.constant 239 : index
    %c0_22 = arith.constant 0 : index
    %24 = vector.load %arg23[%c239, %c0_22] : memref<240x224xf32, #tpu.memory_space<vmem>>, vector<1x224xf32>
    tpu.vector_store %arg23[%c239, %c0_22], %22 {strides = array<i32>} : memref<240x224xf32, #tpu.memory_space<vmem>>, vector<1x224xf32>,
    %c1_23 = arith.constant 1 : index
    %c0_24 = arith.constant 0 : index
    %25 = vector.load %arg23[%c1_23, %c0_24] : memref<240x224xf32, #tpu.memory_space<vmem>>, vector<238x224xf32>
    tpu.vector_store %arg23[%c1_23, %c0_24], %21 {strides = array<i32>} : memref<240x224xf32, #tpu.memory_space<vmem>>, vector<238x224xf32>,
    %c0_25 = arith.constant 0 : index
    %c0_26 = arith.constant 0 : index
    %26 = vector.load %arg23[%c0_25, %c0_26] : memref<240x224xf32, #tpu.memory_space<vmem>>, vector<238x224xf32>
    %c0_27 = arith.constant 0 : index
    %c0_28 = arith.constant 0 : index
    %c0_29 = arith.constant 0 : index
    %27 = vector.load %arg4[%c0_27, %c0_28, %c0_29] : memref<3x224x224xf32, #tpu.memory_space<vmem>>, vector<1x224x224xf32>
    %28 = vector.shape_cast %27 : vector<1x224x224xf32> to vector<224x224xf32>
    %cst_30 = arith.constant dense<0.000000e+00> : vector<238x224xf32>
    %29 = tpu.matmul %26, %28, %cst_30 {dimension_numbers = #tpu.dot_dimension_numbers<[1], [0], [0], [1], [0, 0, 1, 1], [], []>} : vector<238x224xf32>, vector<224x224xf32>, vector<238x224xf32> -> vector<238x224xf32>
    %c1_31 = arith.constant 1 : index
    %c0_32 = arith.constant 0 : index
    %30 = vector.load %arg23[%c1_31, %c0_32] : memref<240x224xf32, #tpu.memory_space<vmem>>, vector<238x224xf32>
    %c1_33 = arith.constant 1 : index
    %c0_34 = arith.constant 0 : index
    %c0_35 = arith.constant 0 : index
    %31 = vector.load %arg4[%c1_33, %c0_34, %c0_35] : memref<3x224x224xf32, #tpu.memory_space<vmem>>, vector<1x224x224xf32>
    %32 = vector.shape_cast %31 : vector<1x224x224xf32> to vector<224x224xf32>
    %cst_36 = arith.constant dense<0.000000e+00> : vector<238x224xf32>
    %33 = tpu.matmul %30, %32, %cst_36 {dimension_numbers = #tpu.dot_dimension_numbers<[1], [0], [0], [1], [0, 0, 1, 1], [], []>} : vector<238x224xf32>, vector<224x224xf32>, vector<238x224xf32> -> vector<238x224xf32>
    %34 = arith.addf %29, %33 : vector<238x224xf32>
    %c2_37 = arith.constant 2 : index
    %c0_38 = arith.constant 0 : index
    %35 = vector.load %arg23[%c2_37, %c0_38] : memref<240x224xf32, #tpu.memory_space<vmem>>, vector<238x224xf32>
    %c2_39 = arith.constant 2 : index
    %c0_40 = arith.constant 0 : index
    %c0_41 = arith.constant 0 : index
    %36 = vector.load %arg4[%c2_39, %c0_40, %c0_41] : memref<3x224x224xf32, #tpu.memory_space<vmem>>, vector<1x224x224xf32>
    %37 = vector.shape_cast %36 : vector<1x224x224xf32> to vector<224x224xf32>
    %cst_42 = arith.constant dense<0.000000e+00> : vector<238x224xf32>
    %38 = tpu.matmul %35, %37, %cst_42 {dimension_numbers = #tpu.dot_dimension_numbers<[1], [0], [0], [1], [0, 0, 1, 1], [], []>} : vector<238x224xf32>, vector<224x224xf32>, vector<238x224xf32> -> vector<238x224xf32>
    %39 = arith.addf %34, %38 : vector<238x224xf32>
    %c0_43 = arith.constant 0 : index
    %c0_44 = arith.constant 0 : index
    %40 = vector.load %arg5[%c0_43, %c0_44] : memref<1x224xf32, #tpu.memory_space<vmem>>, vector<1x224xf32>
    %41 = vector.broadcast %40 : vector<1x224xf32> to vector<238x224xf32>
    %42 = arith.addf %39, %41 : vector<238x224xf32>
    %cst_45 = arith.constant 0.000000e+00 : f32
    %43 = vector.broadcast %cst_45 : f32 to vector<238x224xf32>
    %44 = arith.maximumf %42, %43 : vector<238x224xf32>
    %c0_46 = arith.constant 0 : index
    %c0_47 = arith.constant 0 : index
    %45 = vector.load %arg12[%c0_46, %c0_47] : memref<128x238xf32, #tpu.memory_space<vmem>>, vector<128x238xf32>
    %cst_48 = arith.constant dense<0.000000e+00> : vector<128x224xf32>
    %46 = tpu.matmul %45, %44, %cst_48 {dimension_numbers = #tpu.dot_dimension_numbers<[1], [0], [0], [1], [0, 0, 1, 1], [], []>} : vector<128x238xf32>, vector<238x224xf32>, vector<128x224xf32> -> vector<128x224xf32>
    %c0_49 = arith.constant 0 : index
    %c0_50 = arith.constant 0 : index
    %47 = vector.load %arg13[%c0_49, %c0_50] : memref<128x238xf32, #tpu.memory_space<vmem>>, vector<128x238xf32>
    %cst_51 = arith.constant dense<0.000000e+00> : vector<128x224xf32>
    %48 = tpu.matmul %47, %44, %cst_51 {dimension_numbers = #tpu.dot_dimension_numbers<[1], [0], [0], [1], [0, 0, 1, 1], [], []>} : vector<128x238xf32>, vector<238x224xf32>, vector<128x224xf32> -> vector<128x224xf32>
    %49 = arith.maximumf %46, %48 : vector<128x224xf32>
    %c0_52 = arith.constant 0 : index
    %c0_53 = arith.constant 0 : index
    %50 = vector.load %arg14[%c0_52, %c0_53] : memref<224x112xf32, #tpu.memory_space<vmem>>, vector<224x112xf32>
    %cst_54 = arith.constant dense<0.000000e+00> : vector<128x112xf32>
    %51 = tpu.matmul %49, %50, %cst_54 {dimension_numbers = #tpu.dot_dimension_numbers<[1], [0], [0], [1], [0, 0, 1, 1], [], []>} : vector<128x224xf32>, vector<224x112xf32>, vector<128x112xf32> -> vector<128x112xf32>
    %c0_55 = arith.constant 0 : index
    %c0_56 = arith.constant 0 : index
    %52 = vector.load %arg15[%c0_55, %c0_56] : memref<224x112xf32, #tpu.memory_space<vmem>>, vector<224x112xf32>
    %cst_57 = arith.constant dense<0.000000e+00> : vector<128x112xf32>
    %53 = tpu.matmul %49, %52, %cst_57 {dimension_numbers = #tpu.dot_dimension_numbers<[1], [0], [0], [1], [0, 0, 1, 1], [], []>} : vector<128x224xf32>, vector<224x112xf32>, vector<128x112xf32> -> vector<128x112xf32>
    %54 = arith.maximumf %51, %53 : vector<128x112xf32>
    %c0_58 = arith.constant 0 : index
    %c0_59 = arith.constant 0 : index
    %55 = vector.load %arg24[%c0_58, %c0_59] : memref<128x112xf32, #tpu.memory_space<vmem>>, vector<128x112xf32>
    tpu.vector_store %arg24[%c0_58, %c0_59], %54 {strides = array<i32>} : memref<128x112xf32, #tpu.memory_space<vmem>>, vector<128x112xf32>,
    %c0_60 = arith.constant 0 : index
    %c0_61 = arith.constant 0 : index
    %56 = vector.load %arg24[%c0_60, %c0_61] : memref<128x112xf32, #tpu.memory_space<vmem>>, vector<126x112xf32>
    %c0_62 = arith.constant 0 : index
    %c0_63 = arith.constant 0 : index
    %c0_64 = arith.constant 0 : index
    %57 = vector.load %arg6[%c0_62, %c0_63, %c0_64] : memref<3x112x112xf32, #tpu.memory_space<vmem>>, vector<1x112x112xf32>
    %58 = vector.shape_cast %57 : vector<1x112x112xf32> to vector<112x112xf32>
    %cst_65 = arith.constant dense<0.000000e+00> : vector<126x112xf32>
    %59 = tpu.matmul %56, %58, %cst_65 {dimension_numbers = #tpu.dot_dimension_numbers<[1], [0], [0], [1], [0, 0, 1, 1], [], []>} : vector<126x112xf32>, vector<112x112xf32>, vector<126x112xf32> -> vector<126x112xf32>
    %c1_66 = arith.constant 1 : index
    %c0_67 = arith.constant 0 : index
    %60 = vector.load %arg24[%c1_66, %c0_67] : memref<128x112xf32, #tpu.memory_space<vmem>>, vector<126x112xf32>
    %c1_68 = arith.constant 1 : index
    %c0_69 = arith.constant 0 : index
    %c0_70 = arith.constant 0 : index
    %61 = vector.load %arg6[%c1_68, %c0_69, %c0_70] : memref<3x112x112xf32, #tpu.memory_space<vmem>>, vector<1x112x112xf32>
    %62 = vector.shape_cast %61 : vector<1x112x112xf32> to vector<112x112xf32>
    %cst_71 = arith.constant dense<0.000000e+00> : vector<126x112xf32>
    %63 = tpu.matmul %60, %62, %cst_71 {dimension_numbers = #tpu.dot_dimension_numbers<[1], [0], [0], [1], [0, 0, 1, 1], [], []>} : vector<126x112xf32>, vector<112x112xf32>, vector<126x112xf32> -> vector<126x112xf32>
    %64 = arith.addf %59, %63 : vector<126x112xf32>
    %c2_72 = arith.constant 2 : index
    %c0_73 = arith.constant 0 : index
    %65 = vector.load %arg24[%c2_72, %c0_73] : memref<128x112xf32, #tpu.memory_space<vmem>>, vector<126x112xf32>
    %c2_74 = arith.constant 2 : index
    %c0_75 = arith.constant 0 : index
    %c0_76 = arith.constant 0 : index
    %66 = vector.load %arg6[%c2_74, %c0_75, %c0_76] : memref<3x112x112xf32, #tpu.memory_space<vmem>>, vector<1x112x112xf32>
    %67 = vector.shape_cast %66 : vector<1x112x112xf32> to vector<112x112xf32>
    %cst_77 = arith.constant dense<0.000000e+00> : vector<126x112xf32>
    %68 = tpu.matmul %65, %67, %cst_77 {dimension_numbers = #tpu.dot_dimension_numbers<[1], [0], [0], [1], [0, 0, 1, 1], [], []>} : vector<126x112xf32>, vector<112x112xf32>, vector<126x112xf32> -> vector<126x112xf32>
    %69 = arith.addf %64, %68 : vector<126x112xf32>
    %c0_78 = arith.constant 0 : index
    %c0_79 = arith.constant 0 : index
    %70 = vector.load %arg7[%c0_78, %c0_79] : memref<1x112xf32, #tpu.memory_space<vmem>>, vector<1x112xf32>
    %71 = vector.broadcast %70 : vector<1x112xf32> to vector<126x112xf32>
    %72 = arith.addf %69, %71 : vector<126x112xf32>
    %cst_80 = arith.constant 0.000000e+00 : f32
    %73 = vector.broadcast %cst_80 : f32 to vector<126x112xf32>
    %74 = arith.maximumf %72, %73 : vector<126x112xf32>
    %c0_81 = arith.constant 0 : index
    %c0_82 = arith.constant 0 : index
    %75 = vector.load %arg11[%c0_81, %c0_82] : memref<126x1xf32, #tpu.memory_space<vmem>>, vector<126x1xf32>
    %76 = vector.broadcast %75 : vector<126x1xf32> to vector<126x112xf32>
    %77 = arith.mulf %74, %76 : vector<126x112xf32>
    %cst_83 = arith.constant 0.000000e+00 : f32
    %78 = vector.broadcast %cst_83 : f32 to vector<1x112xf32>
    %c0_84 = arith.constant 0 : index
    %c0_85 = arith.constant 0 : index
    %79 = vector.load %arg25[%c0_84, %c0_85] : memref<128x112xf32, #tpu.memory_space<vmem>>, vector<1x112xf32>
    tpu.vector_store %arg25[%c0_84, %c0_85], %78 {strides = array<i32>} : memref<128x112xf32, #tpu.memory_space<vmem>>, vector<1x112xf32>,
    %c127 = arith.constant 127 : index
    %c0_86 = arith.constant 0 : index
    %80 = vector.load %arg25[%c127, %c0_86] : memref<128x112xf32, #tpu.memory_space<vmem>>, vector<1x112xf32>
    tpu.vector_store %arg25[%c127, %c0_86], %78 {strides = array<i32>} : memref<128x112xf32, #tpu.memory_space<vmem>>, vector<1x112xf32>,
    %c1_87 = arith.constant 1 : index
    %c0_88 = arith.constant 0 : index
    %81 = vector.load %arg25[%c1_87, %c0_88] : memref<128x112xf32, #tpu.memory_space<vmem>>, vector<126x112xf32>
    tpu.vector_store %arg25[%c1_87, %c0_88], %77 {strides = array<i32>} : memref<128x112xf32, #tpu.memory_space<vmem>>, vector<126x112xf32>,
    %c0_89 = arith.constant 0 : index
    %c0_90 = arith.constant 0 : index
    %82 = vector.load %arg25[%c0_89, %c0_90] : memref<128x112xf32, #tpu.memory_space<vmem>>, vector<126x112xf32>
    %c0_91 = arith.constant 0 : index
    %c0_92 = arith.constant 0 : index
    %c0_93 = arith.constant 0 : index
    %83 = vector.load %arg8[%c0_91, %c0_92, %c0_93] : memref<3x112x112xf32, #tpu.memory_space<vmem>>, vector<1x112x112xf32>
    %84 = vector.shape_cast %83 : vector<1x112x112xf32> to vector<112x112xf32>
    %cst_94 = arith.constant dense<0.000000e+00> : vector<126x112xf32>
    %85 = tpu.matmul %82, %84, %cst_94 {dimension_numbers = #tpu.dot_dimension_numbers<[1], [0], [0], [1], [0, 0, 1, 1], [], []>} : vector<126x112xf32>, vector<112x112xf32>, vector<126x112xf32> -> vector<126x112xf32>
    %c1_95 = arith.constant 1 : index
    %c0_96 = arith.constant 0 : index
    %86 = vector.load %arg25[%c1_95, %c0_96] : memref<128x112xf32, #tpu.memory_space<vmem>>, vector<126x112xf32>
    %c1_97 = arith.constant 1 : index
    %c0_98 = arith.constant 0 : index
    %c0_99 = arith.constant 0 : index
    %87 = vector.load %arg8[%c1_97, %c0_98, %c0_99] : memref<3x112x112xf32, #tpu.memory_space<vmem>>, vector<1x112x112xf32>
    %88 = vector.shape_cast %87 : vector<1x112x112xf32> to vector<112x112xf32>
    %cst_100 = arith.constant dense<0.000000e+00> : vector<126x112xf32>
    %89 = tpu.matmul %86, %88, %cst_100 {dimension_numbers = #tpu.dot_dimension_numbers<[1], [0], [0], [1], [0, 0, 1, 1], [], []>} : vector<126x112xf32>, vector<112x112xf32>, vector<126x112xf32> -> vector<126x112xf32>
    %90 = arith.addf %85, %89 : vector<126x112xf32>
    %c2_101 = arith.constant 2 : index
    %c0_102 = arith.constant 0 : index
    %91 = vector.load %arg25[%c2_101, %c0_102] : memref<128x112xf32, #tpu.memory_space<vmem>>, vector<126x112xf32>
    %c2_103 = arith.constant 2 : index
    %c0_104 = arith.constant 0 : index
    %c0_105 = arith.constant 0 : index
    %92 = vector.load %arg8[%c2_103, %c0_104, %c0_105] : memref<3x112x112xf32, #tpu.memory_space<vmem>>, vector<1x112x112xf32>
    %93 = vector.shape_cast %92 : vector<1x112x112xf32> to vector<112x112xf32>
    %cst_106 = arith.constant dense<0.000000e+00> : vector<126x112xf32>
    %94 = tpu.matmul %91, %93, %cst_106 {dimension_numbers = #tpu.dot_dimension_numbers<[1], [0], [0], [1], [0, 0, 1, 1], [], []>} : vector<126x112xf32>, vector<112x112xf32>, vector<126x112xf32> -> vector<126x112xf32>
    %95 = arith.addf %90, %94 : vector<126x112xf32>
    %c0_107 = arith.constant 0 : index
    %c0_108 = arith.constant 0 : index
    %96 = vector.load %arg9[%c0_107, %c0_108] : memref<1x112xf32, #tpu.memory_space<vmem>>, vector<1x112xf32>
    %97 = vector.broadcast %96 : vector<1x112xf32> to vector<126x112xf32>
    %98 = arith.addf %95, %97 : vector<126x112xf32>
    %cst_109 = arith.constant 0.000000e+00 : f32
    %99 = vector.broadcast %cst_109 : f32 to vector<126x112xf32>
    %100 = arith.maximumf %98, %99 : vector<126x112xf32>
    %c0_110 = arith.constant 0 : index
    %c0_111 = arith.constant 0 : index
    %101 = vector.load %arg16[%c0_110, %c0_111] : memref<56x126xf32, #tpu.memory_space<vmem>>, vector<56x126xf32>
    %cst_112 = arith.constant dense<0.000000e+00> : vector<56x112xf32>
    %102 = tpu.matmul %101, %100, %cst_112 {dimension_numbers = #tpu.dot_dimension_numbers<[1], [0], [0], [1], [0, 0, 1, 1], [], []>} : vector<56x126xf32>, vector<126x112xf32>, vector<56x112xf32> -> vector<56x112xf32>
    %c0_113 = arith.constant 0 : index
    %c0_114 = arith.constant 0 : index
    %103 = vector.load %arg17[%c0_113, %c0_114] : memref<56x126xf32, #tpu.memory_space<vmem>>, vector<56x126xf32>
    %cst_115 = arith.constant dense<0.000000e+00> : vector<56x112xf32>
    %104 = tpu.matmul %103, %100, %cst_115 {dimension_numbers = #tpu.dot_dimension_numbers<[1], [0], [0], [1], [0, 0, 1, 1], [], []>} : vector<56x126xf32>, vector<126x112xf32>, vector<56x112xf32> -> vector<56x112xf32>
    %105 = arith.maximumf %102, %104 : vector<56x112xf32>
    %c0_116 = arith.constant 0 : index
    %c0_117 = arith.constant 0 : index
    %106 = vector.load %arg18[%c0_116, %c0_117] : memref<112x56xf32, #tpu.memory_space<vmem>>, vector<112x56xf32>
    %cst_118 = arith.constant dense<0.000000e+00> : vector<56x56xf32>
    %107 = tpu.matmul %105, %106, %cst_118 {dimension_numbers = #tpu.dot_dimension_numbers<[1], [0], [0], [1], [0, 0, 1, 1], [], []>} : vector<56x112xf32>, vector<112x56xf32>, vector<56x56xf32> -> vector<56x56xf32>
    %c0_119 = arith.constant 0 : index
    %c0_120 = arith.constant 0 : index
    %108 = vector.load %arg19[%c0_119, %c0_120] : memref<112x56xf32, #tpu.memory_space<vmem>>, vector<112x56xf32>
    %cst_121 = arith.constant dense<0.000000e+00> : vector<56x56xf32>
    %109 = tpu.matmul %105, %108, %cst_121 {dimension_numbers = #tpu.dot_dimension_numbers<[1], [0], [0], [1], [0, 0, 1, 1], [], []>} : vector<56x112xf32>, vector<112x56xf32>, vector<56x56xf32> -> vector<56x56xf32>
    %110 = arith.maximumf %107, %109 : vector<56x56xf32>
    %cst_122 = arith.constant 0.000000e+00 : f32
    %111 = vector.broadcast %cst_122 : f32 to vector<8x128xf32>
    %112 = vector.extract_strided_slice %110 {offsets = [0, 0], sizes = [8, 56], strides = [1, 1]} : vector<56x56xf32> to vector<8x56xf32>
    %c0_123 = arith.constant 0 : index
    %c0_124 = arith.constant 0 : index
    %c0_125 = arith.constant 0 : index
    %113 = vector.load %arg20[%c0_123, %c0_124, %c0_125] : memref<7x56x128xf32, #tpu.memory_space<vmem>>, vector<1x56x128xf32>
    %114 = vector.shape_cast %113 : vector<1x56x128xf32> to vector<56x128xf32>
    %cst_126 = arith.constant dense<0.000000e+00> : vector<8x128xf32>
    %115 = tpu.matmul %112, %114, %cst_126 {dimension_numbers = #tpu.dot_dimension_numbers<[1], [0], [0], [1], [0, 0, 1, 1], [], []>} : vector<8x56xf32>, vector<56x128xf32>, vector<8x128xf32> -> vector<8x128xf32>
    %116 = arith.addf %111, %115 : vector<8x128xf32>
    %117 = vector.extract_strided_slice %110 {offsets = [8, 0], sizes = [8, 56], strides = [1, 1]} : vector<56x56xf32> to vector<8x56xf32>
    %c1_127 = arith.constant 1 : index
    %c0_128 = arith.constant 0 : index
    %c0_129 = arith.constant 0 : index
    %118 = vector.load %arg20[%c1_127, %c0_128, %c0_129] : memref<7x56x128xf32, #tpu.memory_space<vmem>>, vector<1x56x128xf32>
    %119 = vector.shape_cast %118 : vector<1x56x128xf32> to vector<56x128xf32>
    %cst_130 = arith.constant dense<0.000000e+00> : vector<8x128xf32>
    %120 = tpu.matmul %117, %119, %cst_130 {dimension_numbers = #tpu.dot_dimension_numbers<[1], [0], [0], [1], [0, 0, 1, 1], [], []>} : vector<8x56xf32>, vector<56x128xf32>, vector<8x128xf32> -> vector<8x128xf32>
    %121 = arith.addf %116, %120 : vector<8x128xf32>
    %122 = vector.extract_strided_slice %110 {offsets = [16, 0], sizes = [8, 56], strides = [1, 1]} : vector<56x56xf32> to vector<8x56xf32>
    %c2_131 = arith.constant 2 : index
    %c0_132 = arith.constant 0 : index
    %c0_133 = arith.constant 0 : index
    %123 = vector.load %arg20[%c2_131, %c0_132, %c0_133] : memref<7x56x128xf32, #tpu.memory_space<vmem>>, vector<1x56x128xf32>
    %124 = vector.shape_cast %123 : vector<1x56x128xf32> to vector<56x128xf32>
    %cst_134 = arith.constant dense<0.000000e+00> : vector<8x128xf32>
    %125 = tpu.matmul %122, %124, %cst_134 {dimension_numbers = #tpu.dot_dimension_numbers<[1], [0], [0], [1], [0, 0, 1, 1], [], []>} : vector<8x56xf32>, vector<56x128xf32>, vector<8x128xf32> -> vector<8x128xf32>
    %126 = arith.addf %121, %125 : vector<8x128xf32>
    %127 = vector.extract_strided_slice %110 {offsets = [24, 0], sizes = [8, 56], strides = [1, 1]} : vector<56x56xf32> to vector<8x56xf32>
    %c3 = arith.constant 3 : index
    %c0_135 = arith.constant 0 : index
    %c0_136 = arith.constant 0 : index
    %128 = vector.load %arg20[%c3, %c0_135, %c0_136] : memref<7x56x128xf32, #tpu.memory_space<vmem>>, vector<1x56x128xf32>
    %129 = vector.shape_cast %128 : vector<1x56x128xf32> to vector<56x128xf32>
    %cst_137 = arith.constant dense<0.000000e+00> : vector<8x128xf32>
    %130 = tpu.matmul %127, %129, %cst_137 {dimension_numbers = #tpu.dot_dimension_numbers<[1], [0], [0], [1], [0, 0, 1, 1], [], []>} : vector<8x56xf32>, vector<56x128xf32>, vector<8x128xf32> -> vector<8x128xf32>
    %131 = arith.addf %126, %130 : vector<8x128xf32>
    %132 = vector.extract_strided_slice %110 {offsets = [32, 0], sizes = [8, 56], strides = [1, 1]} : vector<56x56xf32> to vector<8x56xf32>
    %c4 = arith.constant 4 : index
    %c0_138 = arith.constant 0 : index
    %c0_139 = arith.constant 0 : index
    %133 = vector.load %arg20[%c4, %c0_138, %c0_139] : memref<7x56x128xf32, #tpu.memory_space<vmem>>, vector<1x56x128xf32>
    %134 = vector.shape_cast %133 : vector<1x56x128xf32> to vector<56x128xf32>
    %cst_140 = arith.constant dense<0.000000e+00> : vector<8x128xf32>
    %135 = tpu.matmul %132, %134, %cst_140 {dimension_numbers = #tpu.dot_dimension_numbers<[1], [0], [0], [1], [0, 0, 1, 1], [], []>} : vector<8x56xf32>, vector<56x128xf32>, vector<8x128xf32> -> vector<8x128xf32>
    %136 = arith.addf %131, %135 : vector<8x128xf32>
    %137 = vector.extract_strided_slice %110 {offsets = [40, 0], sizes = [8, 56], strides = [1, 1]} : vector<56x56xf32> to vector<8x56xf32>
    %c5 = arith.constant 5 : index
    %c0_141 = arith.constant 0 : index
    %c0_142 = arith.constant 0 : index
    %138 = vector.load %arg20[%c5, %c0_141, %c0_142] : memref<7x56x128xf32, #tpu.memory_space<vmem>>, vector<1x56x128xf32>
    %139 = vector.shape_cast %138 : vector<1x56x128xf32> to vector<56x128xf32>
    %cst_143 = arith.constant dense<0.000000e+00> : vector<8x128xf32>
    %140 = tpu.matmul %137, %139, %cst_143 {dimension_numbers = #tpu.dot_dimension_numbers<[1], [0], [0], [1], [0, 0, 1, 1], [], []>} : vector<8x56xf32>, vector<56x128xf32>, vector<8x128xf32> -> vector<8x128xf32>
    %141 = arith.addf %136, %140 : vector<8x128xf32>
    %142 = vector.extract_strided_slice %110 {offsets = [48, 0], sizes = [8, 56], strides = [1, 1]} : vector<56x56xf32> to vector<8x56xf32>
    %c6 = arith.constant 6 : index
    %c0_144 = arith.constant 0 : index
    %c0_145 = arith.constant 0 : index
    %143 = vector.load %arg20[%c6, %c0_144, %c0_145] : memref<7x56x128xf32, #tpu.memory_space<vmem>>, vector<1x56x128xf32>
    %144 = vector.shape_cast %143 : vector<1x56x128xf32> to vector<56x128xf32>
    %cst_146 = arith.constant dense<0.000000e+00> : vector<8x128xf32>
    %145 = tpu.matmul %142, %144, %cst_146 {dimension_numbers = #tpu.dot_dimension_numbers<[1], [0], [0], [1], [0, 0, 1, 1], [], []>} : vector<8x56xf32>, vector<56x128xf32>, vector<8x128xf32> -> vector<8x128xf32>
    %146 = arith.addf %141, %145 : vector<8x128xf32>
    %c0_147 = arith.constant 0 : index
    %c0_148 = arith.constant 0 : index
    %147 = vector.load %arg21[%c0_147, %c0_148] : memref<1x128xf32, #tpu.memory_space<vmem>>, vector<1x128xf32>
    %148 = vector.broadcast %147 : vector<1x128xf32> to vector<8x128xf32>
    %149 = arith.addf %146, %148 : vector<8x128xf32>
    %c0_149 = arith.constant 0 : index
    %c0_150 = arith.constant 0 : index
    %150 = vector.load %arg22[%c0_149, %c0_150] : memref<8x128xf32, #tpu.memory_space<vmem>>, vector<8x128xf32>
    tpu.vector_store %arg22[%c0_149, %c0_150], %149 {strides = array<i32>} : memref<8x128xf32, #tpu.memory_space<vmem>>, vector<8x128xf32>,
    return
  }
  func.func @transform_0(%arg0: i32) -> (i32, i32) {
    %c0_i32 = arith.constant 0 : i32
    %c0_i32_0 = arith.constant 0 : i32
    return %arg0, %c0_i32 : i32, i32
  }
  func.func @transform_1(%arg0: i32) -> (i32, i32, i32) {
    %c0_i32 = arith.constant 0 : i32
    %c0_i32_0 = arith.constant 0 : i32
    %c0_i32_1 = arith.constant 0 : i32
    %c0_i32_2 = arith.constant 0 : i32
    return %c0_i32, %c0_i32_0, %c0_i32_1 : i32, i32, i32
  }
  func.func @transform_2(%arg0: i32) -> (i32, i32) {
    %c0_i32 = arith.constant 0 : i32
    %c0_i32_0 = arith.constant 0 : i32
    %c0_i32_1 = arith.constant 0 : i32
    return %c0_i32, %c0_i32_0 : i32, i32
  }
  func.func @transform_3(%arg0: i32) -> (i32, i32, i32) {
    %c0_i32 = arith.constant 0 : i32
    %c0_i32_0 = arith.constant 0 : i32
    %c0_i32_1 = arith.constant 0 : i32
    %c0_i32_2 = arith.constant 0 : i32
    return %c0_i32, %c0_i32_0, %c0_i32_1 : i32, i32, i32
  }
  func.func @transform_4(%arg0: i32) -> (i32, i32) {
    %c0_i32 = arith.constant 0 : i32
    %c0_i32_0 = arith.constant 0 : i32
    %c0_i32_1 = arith.constant 0 : i32
    return %c0_i32, %c0_i32_0 : i32, i32
  }
  func.func @transform_5(%arg0: i32) -> (i32, i32, i32) {
    %c0_i32 = arith.constant 0 : i32
    %c0_i32_0 = arith.constant 0 : i32
    %c0_i32_1 = arith.constant 0 : i32
    %c0_i32_2 = arith.constant 0 : i32
    return %c0_i32, %c0_i32_0, %c0_i32_1 : i32, i32, i32
  }
  func.func @transform_6(%arg0: i32) -> (i32, i32) {
    %c0_i32 = arith.constant 0 : i32
    %c0_i32_0 = arith.constant 0 : i32
    %c0_i32_1 = arith.constant 0 : i32
    return %c0_i32, %c0_i32_0 : i32, i32
  }
  func.func @transform_7(%arg0: i32) -> (i32, i32, i32) {
    %c0_i32 = arith.constant 0 : i32
    %c0_i32_0 = arith.constant 0 : i32
    %c0_i32_1 = arith.constant 0 : i32
    %c0_i32_2 = arith.constant 0 : i32
    return %c0_i32, %c0_i32_0, %c0_i32_1 : i32, i32, i32
  }
  func.func @transform_8(%arg0: i32) -> (i32, i32) {
    %c0_i32 = arith.constant 0 : i32
    %c0_i32_0 = arith.constant 0 : i32
    %c0_i32_1 = arith.constant 0 : i32
    return %c0_i32, %c0_i32_0 : i32, i32
  }
  func.func @transform_9(%arg0: i32) -> (i32, i32) {
    %c0_i32 = arith.constant 0 : i32
    %c0_i32_0 = arith.constant 0 : i32
    %c0_i32_1 = arith.constant 0 : i32
    return %c0_i32, %c0_i32_0 : i32, i32
  }
  func.func @transform_10(%arg0: i32) -> (i32, i32) {
    %c0_i32 = arith.constant 0 : i32
    %c0_i32_0 = arith.constant 0 : i32
    %c0_i32_1 = arith.constant 0 : i32
    return %c0_i32, %c0_i32_0 : i32, i32
  }
  func.func @transform_11(%arg0: i32) -> (i32, i32) {
    %c0_i32 = arith.constant 0 : i32
    %c0_i32_0 = arith.constant 0 : i32
    %c0_i32_1 = arith.constant 0 : i32
    return %c0_i32, %c0_i32_0 : i32, i32
  }
  func.func @transform_12(%arg0: i32) -> (i32, i32) {
    %c0_i32 = arith.constant 0 : i32
    %c0_i32_0 = arith.constant 0 : i32
    %c0_i32_1 = arith.constant 0 : i32
    return %c0_i32, %c0_i32_0 : i32, i32
  }
  func.func @transform_13(%arg0: i32) -> (i32, i32) {
    %c0_i32 = arith.constant 0 : i32
    %c0_i32_0 = arith.constant 0 : i32
    %c0_i32_1 = arith.constant 0 : i32
    return %c0_i32, %c0_i32_0 : i32, i32
  }
  func.func @transform_14(%arg0: i32) -> (i32, i32) {
    %c0_i32 = arith.constant 0 : i32
    %c0_i32_0 = arith.constant 0 : i32
    %c0_i32_1 = arith.constant 0 : i32
    return %c0_i32, %c0_i32_0 : i32, i32
  }
  func.func @transform_15(%arg0: i32) -> (i32, i32) {
    %c0_i32 = arith.constant 0 : i32
    %c0_i32_0 = arith.constant 0 : i32
    %c0_i32_1 = arith.constant 0 : i32
    return %c0_i32, %c0_i32_0 : i32, i32
  }
  func.func @transform_16(%arg0: i32) -> (i32, i32) {
    %c0_i32 = arith.constant 0 : i32
    %c0_i32_0 = arith.constant 0 : i32
    %c0_i32_1 = arith.constant 0 : i32
    return %c0_i32, %c0_i32_0 : i32, i32
  }
  func.func @transform_17(%arg0: i32) -> (i32, i32) {
    %c0_i32 = arith.constant 0 : i32
    %c0_i32_0 = arith.constant 0 : i32
    %c0_i32_1 = arith.constant 0 : i32
    return %c0_i32, %c0_i32_0 : i32, i32
  }
  func.func @transform_18(%arg0: i32) -> (i32, i32) {
    %c0_i32 = arith.constant 0 : i32
    %c0_i32_0 = arith.constant 0 : i32
    %c0_i32_1 = arith.constant 0 : i32
    return %c0_i32, %c0_i32_0 : i32, i32
  }
  func.func @transform_19(%arg0: i32) -> (i32, i32, i32) {
    %c0_i32 = arith.constant 0 : i32
    %c0_i32_0 = arith.constant 0 : i32
    %c0_i32_1 = arith.constant 0 : i32
    %c0_i32_2 = arith.constant 0 : i32
    return %c0_i32, %c0_i32_0, %c0_i32_1 : i32, i32, i32
  }
  func.func @transform_20(%arg0: i32) -> (i32, i32) {
    %c0_i32 = arith.constant 0 : i32
    %c0_i32_0 = arith.constant 0 : i32
    %c0_i32_1 = arith.constant 0 : i32
    return %c0_i32, %c0_i32_0 : i32, i32
  }
  func.func @transform_21(%arg0: i32) -> (i32, i32) {
    %c0_i32 = arith.constant 0 : i32
    %c0_i32_0 = arith.constant 0 : i32
    return %arg0, %c0_i32 : i32, i32
  }
}

</mosaic_0001>

<bundles_post_ra>
// kernel: tile.33
= control target key start
LH: loop header
LB: loop body
LE: loop exit
PB: predicated region body
PF: predicated region fallthrough
CT: control target
= control target key end

     0   :  { %2 = vsyncpa [#allocation1], 0  ;;  %s53_s6 = smov [#allocation0]   ;;  %s88_s0 = inlined_call_operand.hbm [shape: f32[8], index: 0, kind: input, shape index: {}]   ;;  %s89_s1 = inlined_call_operand.vmem [shape: f32[28,8], index: 1, kind: output, shape index: {}]  }
   0x1   :  { %s9_s7 = sshll.u32 %s53_s6, 4  ;;  %s29_s10 = scalar_lea.hbm %s88_s0, 16  ;;  %s10_s7 = int_to_ptr.vmem [resolvable:$true] %s9_s7 }
   0x2   :  { %p30_p0 = scmp.ne.s32.totalorder %s88_s0, %s29_s10  ;;  %p33_p1 = scmp.lt.u32.totalorder %s29_s10, %s88_s0 }
   0x4   :  { %p35_p2 = pnand %p33_p1, %p30_p0 }
   0x6   :  { %38 = shalt.err (!%p35_p2)
}
   0x7   :  { %s39_s15 = scalar_lea.vmem %s10_s7, 16  ;;  %s43_s16 = scalar_lea.vmem %s10_s7, 32 }
   0x8   :  { %p40_p3 = scmp.ne.s32.totalorder %s10_s7, %s39_s15  ;;  %p44_p4 = scmp.lt.s32.totalorder %s10_s7, %s10_s7 }
   0x9   :  { %p45_p5 = scmp.lt.s32.totalorder %s43_s16, %s39_s15 }
   0xb   :  { %p46_p6 = por %p45_p5, %p44_p4 }
   0xd   :  { %p47_p7 = pnand %p46_p6, %p40_p3 }
   0xf   :  { %50 = shalt.err (!%p47_p7)
}
  0x10   :  { %12 = dma.hbm_to_vmem [thread:$0]  %s88_s0, 16, %s10_s7, [#allocation1]  }
  0x11   :  { %51 = dma.done.wait [#allocation1], 16  }
  0x12   :  { %52 = vsyncadd [#allocation1], 4294967280  ;;  %v16_v0 = vld [vmem:[#allocation0] ss:$0 sm:$0xff] }
  0x13   :  { %17 = vst [vmem:[%s89_s1] sm:$0xff] %v16_v0  ;;  %25 = vst [vmem:[%s89_s1 + $0x8] sm:$0xff] %v16_v0 }
  0x14   :  { %26 = vst [vmem:[%s89_s1 + $0x10] sm:$0xff] %v16_v0  ;;  %27 = vst [vmem:[%s89_s1 + $0x18] sm:$0xff] %v16_v0 }
  0x15   :  { %24 = vsyncpa [#allocation1], 1 }

// kernel: tile.34
= control target key start
LH: loop header
LB: loop body
LE: loop exit
PB: predicated region body
PF: predicated region fallthrough
CT: control target
= control target key end

     0   :  { %s149_s10 = smov 120   ;;  %s150_s11 = smov 104   ;;  %vm4_vm0 = vcmask 64512   ;;  %vm10_vm1 = vcmask 1048512   ;;  %vm16_vm2 = vcmask 982912   ;;  %vm22_vm3 = vcmask 917312   ;;  %s228_s0 = inlined_call_operand.vmem [shape: f32[28,8], index: 0, kind: input, shape index: {}]   ;;  %s229_s1 = inlined_call_operand.vmem [shape: f32[1,224], index: 1, kind: output, shape index: {}]  }
   0x1   :  { %v118_v0 = vld [vmem:[%s228_s0 + $0xf] sm:$0x1]   ;;  %v120_v1 = vld [vmem:[%s228_s0 + $0xd] sm:$0x1]   ;;  %v119_v2 = vld [vmem:[%s228_s0 + $0xe] sm:$0x1]  }
   0x2   :  { %8 = vrot.lane.b32.xlu0 %v118_v0, %s149_s10  ;;  %20 = vrot.lane.b32.xlu1 %v120_v1, %s150_s11  ;;  %v121_v3 = vld [vmem:[%s228_s0 + $0xc] sm:$0x1]   ;;  %s31_s16 = smov 3  ;;  %s38_s17 = smov 3  ;;  %vm28_vm4 = vcmask 851712   ;;  %vm35_vm5 = vcmask 786112  }
   0x3   :  { %s151_s18 = smov 112   ;;  %s152_s19 = smov 96   ;;  %v122_v4 = vld [vmem:[%s228_s0 + $0xb] ss:$16 sm:%s31_s16]   ;;  %v123_v5 = vld [vmem:[%s228_s0 + $0xa] ss:$16 sm:%s38_s17]  }
   0x4   :  { %s45_s24 = smov 3  ;;  %s52_s25 = smov 3  ;;  %vm42_vm6 = vcmask 720512   ;;  %vm49_vm7 = vcmask 654912   ;;  %vm56_vm8 = vcmask 589312   ;;  %vm63_vm9 = vcmask 523712  }
   0x5   :  { %s153_s26 = smov 88   ;;  %s154_s27 = smov 80   ;;  %v124_v6 = vld [vmem:[%s228_s0 + $0x9] ss:$16 sm:%s45_s24]   ;;  %v125_v7 = vld [vmem:[%s228_s0 + $0x8] ss:$16 sm:%s52_s25]  }
   0x6   :  { %14 = vrot.lane.b32.xlu0 %v119_v2, %s151_s18  ;;  %26 = vrot.lane.b32.xlu1 %v121_v3, %s152_s19  ;;  %s59_s3 = smov 3  ;;  %s66_s4 = smov 3  ;;  %vm70_vm10 = vcmask 458112   ;;  %vm77_vm11 = vcmask 392512   ;;  %vm84_vm12 = vcmask 326912   ;;  %vm91_vm13 = vcmask 261312  }
   0x7   :  { %s155_s5 = smov 72   ;;  %s156_s6 = smov 64   ;;  %v126_v8 = vld [vmem:[%s228_s0 + $0x7] ss:$16 sm:%s59_s3]   ;;  %v127_v9 = vld [vmem:[%s228_s0 + $0x6] ss:$16 sm:%s66_s4]  }
   0x8   :  { %s2_s9 = smov 3  ;;  %s73_s14 = smov 3  ;;  %vm98_vm14 = vcmask 195712   ;;  %vm105_vm15 = vcmask 130112  }
   0x9   :  { %v3_v10 = vld [vmem:[%s228_s0] ss:$16 sm:%s2_s9]   ;;  %s80_s15 = smov 3  ;;  %s157_s16 = smov 56   ;;  %v128_v11 = vld [vmem:[%s228_s0 + $0x5] ss:$16 sm:%s73_s14]  }
   0xa   :  { %33 = vrot.lane.b32.xlu0 %v122_v4, %s153_s26  ;;  %40 = vrot.lane.b32.xlu1 %v123_v5, %s154_s27  ;;  %5 = vst.msk [vmem:[#allocation0] ss:$8 sm:$0x3] %vm4_vm0, %v3_v10   ;;  %s158_s17 = smov 48   ;;  %v129_v12 = vld [vmem:[%s228_s0 + $0x4] ss:$16 sm:%s80_s15]  }
   0xb   :  { %s87_s22 = smov 3  ;;  %s94_s23 = smov 3 }
   0xc   :  { %s159_s24 = smov 40   ;;  %s160_s25 = smov 32   ;;  %v130_v13 = vld [vmem:[%s228_s0 + $0x3] ss:$16 sm:%s87_s22]   ;;  %v131_v14 = vld [vmem:[%s228_s0 + $0x2] ss:$16 sm:%s94_s23]  }
   0xd   :  { %s101_s30 = smov 3  ;;  %s161_s2 = smov 24  }
   0xe   :  { %47 = vrot.lane.b32.xlu0 %v124_v6, %s155_s5  ;;  %54 = vrot.lane.b32.xlu1 %v125_v7, %s156_s6  ;;  %s162_s3 = smov 16   ;;  %v132_v15 = vld [vmem:[%s228_s0 + $0x1] ss:$16 sm:%s101_s30]   ;;  %s163_s0 = smov 8  }
  0x12   :  { %61 = vrot.lane.b32.xlu0 %v126_v8, %s157_s16  ;;  %68 = vrot.lane.b32.xlu1 %v127_v9, %s158_s17 }
  0x16   :  { %75 = vrot.lane.b32.xlu0 %v128_v11, %s159_s24  ;;  %82 = vrot.lane.b32.xlu1 %v129_v12, %s160_s25 }
  0x1a   :  { %89 = vrot.lane.b32.xlu0 %v130_v13, %s161_s2  ;;  %96 = vrot.lane.b32.xlu1 %v131_v14, %s162_s3 }
  0x1e   :  { %103 = vrot.lane.b32.xlu0 %v132_v15, %s163_s0 }
  0x74   :  { %v9_v16 = vpop.permute.xlu0 %8   ;;  %v21_v17 = vpop.permute.xlu1 %20  }
  0x75   :  { %11 = vst.msk [vmem:[#allocation0] sm:$0x1] %vm10_vm1, %v9_v16  }
  0x78   :  { %v15_v18 = vpop.permute.xlu0 %14   ;;  %v27_v19 = vpop.permute.xlu1 %26  }
  0x79   :  { %17 = vst.msk [vmem:[#allocation0] sm:$0x1] %vm16_vm2, %v15_v18  }
  0x7a   :  { %23 = vst.msk [vmem:[#allocation0] sm:$0x1] %vm22_vm3, %v21_v17  }
  0x7b   :  { %29 = vst.msk [vmem:[#allocation0] sm:$0x1] %vm28_vm4, %v27_v19  }
  0x7c   :  { %v34_v20 = vpop.permute.xlu0 %33   ;;  %v41_v21 = vpop.permute.xlu1 %40  }
  0x7d   :  { %36 = vst.msk [vmem:[#allocation0] ss:$8 sm:$0x3] %vm35_vm5, %v34_v20  }
  0x7e   :  { %43 = vst.msk [vmem:[#allocation0] ss:$8 sm:$0x3] %vm42_vm6, %v41_v21  }
  0x80   :  { %v48_v22 = vpop.permute.xlu0 %47   ;;  %v55_v23 = vpop.permute.xlu1 %54  }
  0x81   :  { %50 = vst.msk [vmem:[#allocation0] ss:$8 sm:$0x3] %vm49_vm7, %v48_v22  }
  0x82   :  { %57 = vst.msk [vmem:[#allocation0] ss:$8 sm:$0x3] %vm56_vm8, %v55_v23  }
  0x84   :  { %v62_v24 = vpop.permute.xlu0 %61   ;;  %v69_v25 = vpop.permute.xlu1 %68  }
  0x85   :  { %64 = vst.msk [vmem:[#allocation0] ss:$8 sm:$0x3] %vm63_vm9, %v62_v24  }
  0x86   :  { %71 = vst.msk [vmem:[#allocation0] ss:$8 sm:$0x3] %vm70_vm10, %v69_v25  }
  0x88   :  { %v76_v26 = vpop.permute.xlu0 %75   ;;  %v83_v27 = vpop.permute.xlu1 %82  }
  0x89   :  { %78 = vst.msk [vmem:[#allocation0] ss:$8 sm:$0x3] %vm77_vm11, %v76_v26  }
  0x8a   :  { %85 = vst.msk [vmem:[#allocation0] ss:$8 sm:$0x3] %vm84_vm12, %v83_v27  }
  0x8c   :  { %v90_v28 = vpop.permute.xlu0 %89   ;;  %v97_v29 = vpop.permute.xlu1 %96  }
  0x8d   :  { %92 = vst.msk [vmem:[#allocation0] ss:$8 sm:$0x3] %vm91_vm13, %v90_v28  }
  0x8e   :  { %99 = vst.msk [vmem:[#allocation0] ss:$8 sm:$0x3] %vm98_vm14, %v97_v29  }
  0x90   :  { %v104_v30 = vpop.permute.xlu0 %103  }
  0x91   :  { %106 = vst.msk [vmem:[#allocation0] ss:$8 sm:$0x3] %vm105_vm15, %v104_v30  }
  0x98   :  { %v110_v31 = vld [vmem:[#allocation0] sm:$0x1]  ;;  %v114_v32 = vld [vmem:[#allocation0 + $0x8] sm:$0x1] }
  0x99   :  { %112 = vst [vmem:[%s229_s1] sm:$0x1] %v110_v31  ;;  %133 = vst [vmem:[%s229_s1 + $0x1] sm:$0x1] %v114_v32 }

// kernel: tile.43
= control target key start
LH: loop header
LB: loop body
LE: loop exit
PB: predicated region body
PF: predicated region fallthrough
CT: control target
= control target key end

     0   :  { %s28_s0 = inlined_call_operand.vmem [shape: f32[8], index: 0, kind: input, shape index: {}]   ;;  %s29_s1 = inlined_call_operand.vmem [shape: f32[14,8], index: 1, kind: output, shape index: {}]  }
   0x1   :  { %v4_v0 = vld [vmem:[%s28_s0] ss:$0 sm:$0xff] }
   0x2   :  { %5 = vst [vmem:[%s29_s1] sm:$0xff] %v4_v0  ;;  %8 = vst [vmem:[%s29_s1 + $0x8] sm:$0xff] %v4_v0 }

// kernel: tile.44
= control target key start
LH: loop header
LB: loop body
LE: loop exit
PB: predicated region body
PF: predicated region fallthrough
CT: control target
= control target key end

     0   :  { %s115_s10 = smov 104   ;;  %s116_s11 = smov 88   ;;  %vm3_vm0 = vcmask 64512   ;;  %vm9_vm1 = vcmask 917312   ;;  %vm15_vm2 = vcmask 851712   ;;  %vm21_vm3 = vcmask 786112   ;;  %s183_s0 = inlined_call_operand.vmem [shape: f32[14,8], index: 0, kind: input, shape index: {}]   ;;  %s184_s1 = inlined_call_operand.vmem [shape: f32[1,112], index: 1, kind: output, shape index: {}]  }
   0x1   :  { %v89_v0 = vld [vmem:[%s183_s0 + $0xd] sm:$0x1]   ;;  %v91_v1 = vld [vmem:[%s183_s0 + $0xb] sm:$0x1]   ;;  %v90_v2 = vld [vmem:[%s183_s0 + $0xc] sm:$0x1]  }
   0x2   :  { %7 = vrot.lane.b32.xlu0 %v89_v0, %s115_s10  ;;  %19 = vrot.lane.b32.xlu1 %v91_v1, %s116_s11  ;;  %v92_v3 = vld [vmem:[%s183_s0 + $0xa] sm:$0x1]   ;;  %s117_s16 = smov 96   ;;  %s118_s17 = smov 80   ;;  %v93_v4 = vld [vmem:[%s183_s0 + $0x9] sm:$0x1]  }
   0x3   :  { %v94_v5 = vld [vmem:[%s183_s0 + $0x8] sm:$0x1]   ;;  %v2_v6 = vld [vmem:[%s183_s0] sm:$0x1]   ;;  %s119_s24 = smov 72   ;;  %s120_s25 = smov 64  }
   0x4   :  { %4 = vst.msk [vmem:[#allocation0] sm:$0x1] %vm3_vm0, %v2_v6   ;;  %v95_v7 = vld [vmem:[%s183_s0 + $0x7] sm:$0x1]   ;;  %v96_v8 = vld [vmem:[%s183_s0 + $0x6] sm:$0x1]  }
   0x5   :  { %s121_s30 = smov 56   ;;  %s122_s2 = smov 48   ;;  %v97_v9 = vld [vmem:[%s183_s0 + $0x5] sm:$0x1]   ;;  %v98_v10 = vld [vmem:[%s183_s0 + $0x4] sm:$0x1]  }
   0x6   :  { %13 = vrot.lane.b32.xlu0 %v90_v2, %s117_s16  ;;  %25 = vrot.lane.b32.xlu1 %v92_v3, %s118_s17  ;;  %s123_s7 = smov 40   ;;  %s124_s8 = smov 32   ;;  %v99_v11 = vld [vmem:[%s183_s0 + $0x3] sm:$0x1]   ;;  %v100_v12 = vld [vmem:[%s183_s0 + $0x2] sm:$0x1]  }
   0x7   :  { %s125_s13 = smov 24   ;;  %s126_s14 = smov 16   ;;  %v101_v13 = vld [vmem:[%s183_s0 + $0x1] sm:$0x1]   ;;  %vm27_vm4 = vcmask 720512   ;;  %vm33_vm5 = vcmask 654912  }
   0x8   :  { %s127_s0 = smov 8   ;;  %vm39_vm6 = vcmask 589312   ;;  %vm45_vm7 = vcmask 523712   ;;  %vm51_vm8 = vcmask 458112   ;;  %vm57_vm9 = vcmask 392512  }
   0x9   :  { %vm63_vm10 = vcmask 326912   ;;  %vm69_vm11 = vcmask 261312   ;;  %vm75_vm12 = vcmask 195712   ;;  %vm81_vm13 = vcmask 130112  }
   0xa   :  { %31 = vrot.lane.b32.xlu0 %v93_v4, %s119_s24  ;;  %37 = vrot.lane.b32.xlu1 %v94_v5, %s120_s25 }
   0xe   :  { %43 = vrot.lane.b32.xlu0 %v95_v7, %s121_s30  ;;  %49 = vrot.lane.b32.xlu1 %v96_v8, %s122_s2 }
  0x12   :  { %55 = vrot.lane.b32.xlu0 %v97_v9, %s123_s7  ;;  %61 = vrot.lane.b32.xlu1 %v98_v10, %s124_s8 }
  0x16   :  { %67 = vrot.lane.b32.xlu0 %v99_v11, %s125_s13  ;;  %73 = vrot.lane.b32.xlu1 %v100_v12, %s126_s14 }
  0x1a   :  { %79 = vrot.lane.b32.xlu0 %v101_v13, %s127_s0 }
  0x74   :  { %v8_v14 = vpop.permute.xlu0 %7   ;;  %v20_v15 = vpop.permute.xlu1 %19  }
  0x75   :  { %10 = vst.msk [vmem:[#allocation0] sm:$0x1] %vm9_vm1, %v8_v14  }
  0x78   :  { %v14_v16 = vpop.permute.xlu0 %13   ;;  %v26_v17 = vpop.permute.xlu1 %25  }
  0x79   :  { %16 = vst.msk [vmem:[#allocation0] sm:$0x1] %vm15_vm2, %v14_v16  }
  0x7a   :  { %22 = vst.msk [vmem:[#allocation0] sm:$0x1] %vm21_vm3, %v20_v15  }
  0x7b   :  { %28 = vst.msk [vmem:[#allocation0] sm:$0x1] %vm27_vm4, %v26_v17  }
  0x7c   :  { %v32_v18 = vpop.permute.xlu0 %31   ;;  %v38_v19 = vpop.permute.xlu1 %37  }
  0x7d   :  { %34 = vst.msk [vmem:[#allocation0] sm:$0x1] %vm33_vm5, %v32_v18  }
  0x7e   :  { %40 = vst.msk [vmem:[#allocation0] sm:$0x1] %vm39_vm6, %v38_v19  }
  0x80   :  { %v44_v20 = vpop.permute.xlu0 %43   ;;  %v50_v21 = vpop.permute.xlu1 %49  }
  0x81   :  { %46 = vst.msk [vmem:[#allocation0] sm:$0x1] %vm45_vm7, %v44_v20  }
  0x82   :  { %52 = vst.msk [vmem:[#allocation0] sm:$0x1] %vm51_vm8, %v50_v21  }
  0x84   :  { %v56_v22 = vpop.permute.xlu0 %55   ;;  %v62_v23 = vpop.permute.xlu1 %61  }
  0x85   :  { %58 = vst.msk [vmem:[#allocation0] sm:$0x1] %vm57_vm9, %v56_v22  }
  0x86   :  { %64 = vst.msk [vmem:[#allocation0] sm:$0x1] %vm63_vm10, %v62_v23  }
  0x88   :  { %v68_v24 = vpop.permute.xlu0 %67   ;;  %v74_v25 = vpop.permute.xlu1 %73  }
  0x89   :  { %70 = vst.msk [vmem:[#allocation0] sm:$0x1] %vm69_vm11, %v68_v24  }
  0x8a   :  { %76 = vst.msk [vmem:[#allocation0] sm:$0x1] %vm75_vm12, %v74_v25  }
  0x8c   :  { %v80_v26 = vpop.permute.xlu0 %79  }
  0x8d   :  { %82 = vst.msk [vmem:[#allocation0] sm:$0x1] %vm81_vm13, %v80_v26  }
  0x94   :  { %v86_v27 = vld [vmem:[#allocation0] sm:$0x1] }
  0x95   :  { %88 = vst [vmem:[%s184_s1] sm:$0x1] %v86_v27 }

// kernel: fashion_mnist_v2_forward.1
= control target key start
LH: loop header
LB: loop body
LE: loop exit
PB: predicated region body
PF: predicated region fallthrough
CT: control target
= control target key end

     0   :  { %s14079_s0 = inlined_call_operand.vmem [shape: f32[480,28], index: 0, kind: input, shape index: {}]   ;;  %s14080_s1 = inlined_call_operand.vmem [shape: f32[3,28,224], index: 1, kind: input, shape index: {}]   ;;  %s14081_s2 = inlined_call_operand.vmem [shape: f32[1,224], index: 2, kind: input, shape index: {}]   ;;  %s14082_s3 = inlined_call_operand.vmem [shape: f32[3,224,224], index: 3, kind: input, shape index: {}]   ;;  %s14083_s4 = inlined_call_operand.vmem [shape: f32[1,224], index: 4, kind: input, shape index: {}]   ;;  %s14084_s5 = inlined_call_operand.vmem [shape: f32[3,112,112], index: 5, kind: input, shape index: {}]   ;;  %s14085_s6 = inlined_call_operand.vmem [shape: f32[1,112], index: 6, kind: input, shape index: {}]   ;;  %s14086_s7 = inlined_call_operand.vmem [shape: f32[3,112,112], index: 7, kind: input, shape index: {}]   ;;  %s14087_s8 = inlined_call_operand.vmem [shape: f32[1,112], index: 8, kind: input, shape index: {}]   ;;  %s14088_s9 = inlined_call_operand.vmem [shape: f32[238,1], index: 9, kind: input, shape index: {}]   ;;  %s14089_s10 = inlined_call_operand.vmem [shape: f32[126,1], index: 10, kind: input, shape index: {}]   ;;  %s14090_s11 = inlined_call_operand.vmem [shape: f32[128,238], index: 11, kind: input, shape index: {}]   ;;  %s14091_s12 = inlined_call_operand.vmem [shape: f32[128,238], index: 12, kind: input, shape index: {}]   ;;  %s14092_s13 = inlined_call_operand.vmem [shape: f32[224,112], index: 13, kind: input, shape index: {}]   ;;  %s14093_s14 = inlined_call_operand.vmem [shape: f32[224,112], index: 14, kind: input, shape index: {}]   ;;  %s14094_s15 = inlined_call_operand.vmem [shape: f32[56,126], index: 15, kind: input, shape index: {}]   ;;  %s14095_s16 = inlined_call_operand.vmem [shape: f32[56,126], index: 16, kind: input, shape index: {}]   ;;  %s14096_s17 = inlined_call_operand.vmem [shape: f32[112,56], index: 17, kind: input, shape index: {}]   ;;  %s14097_s18 = inlined_call_operand.vmem [shape: f32[112,56], index: 18, kind: input, shape index: {}]   ;;  %s14098_s19 = inlined_call_operand.vmem [shape: f32[7,56,128], index: 19, kind: input, shape index: {}]   ;;  %s14099_s20 = inlined_call_operand.vmem [shape: f32[1,128], index: 20, kind: input, shape index: {}]   ;;  %s14100_s21 = inlined_call_operand.hbm [shape: f32[16,128], index: 21, kind: output, shape index: {}]  }
   0x1   :  { %14117 = sst [smem:[#allocation15_spill]] %s14079_s0 }
   0x2   :  { %14118 = sst [smem:[#allocation16_spill]] %s14080_s1 }
   0x3   :  { %14119 = sst [smem:[#allocation17_spill]] %s14081_s2 }
   0x4   :  { %14120 = sst [smem:[#allocation18_spill]] %s14082_s3 }
   0x5   :  { %14121 = sst [smem:[#allocation19_spill]] %s14083_s4 }
   0x6   :  { %14122 = sst [smem:[#allocation20_spill]] %s14084_s5 }
   0x7   :  { %14123 = sst [smem:[#allocation21_spill]] %s14085_s6 }
   0x8   :  { %14124 = sst [smem:[#allocation22_spill]] %s14086_s7 }
   0x9   :  { %14125 = sst [smem:[#allocation23_spill]] %s14087_s8 }
   0xa   :  { %14126 = sst [smem:[#allocation24_spill]] %s14100_s21 }
   0xb   :  { %26 = vsyncpa [#allocation6], 0 }
   0xc   :  { %28 = vsyncpa [#allocation6 + $0x1], 0  ;;  %s10838_s2 = smov 0   ;;  %s10840_s25 = smov 0  }
   0xd   :  { %s10842_s26 = smov 0   ;;  %s10844_s27 = smov 0  }
   0xe LB: > { %14127 = sst [smem:[#allocation8_spill]] %s10708_s2  ;;  %s10859_s3 = sadd.s32 4294967295, %s10720_s27   ;;  %s10720_s27 = sphi %s10844_s27, %s14158_s27   ;;  %s10716_s26 = sphi %s10842_s26, %s14160_s26   ;;  %s10712_s25 = sphi %s10840_s25, %s14162_s25   ;;  %s10708_s2 = sphi %s10838_s2, %s14161_s2  }
   0xf   : > { %14128 = sst [smem:[#allocation9_spill]] %s10716_s26  ;;  %s7959_s28 = sadd.s32 4294967294, %s10720_s27  }
  0x10   : > { %14129 = sst [smem:[#allocation10_spill]] %s10720_s27  ;;  %s10863_s29 = sadd.s32 1, %s10720_s27  }
  0x11   : > { %14130 = sst [smem:[#allocation11_spill]] %s10863_s29  ;;  %s487_s0 = sadd.s32 1, %s10716_s26 }
  0x12   : > { %s484_s4 = ssub.s32 %s10720_s27, %s10863_s29  ;;  %p497_p0 = scmp.ne.s32.totalorder %s10716_s26, %s10712_s25 }
  0x13   : > { %p485_p1 = scmp.eq.s32.totalorder %s484_s4, 0  ;;  %p498_p2 = scmp.eq.s32.totalorder %s10859_s3, 1 }
  0x14   : > { %p503_p3 = scmp.ne.s32.totalorder %s10712_s25, %s10708_s2  ;;  %p504_p4 = scmp.eq.s32.totalorder %s7959_s28, 1 }
  0x15   : > { %s10874_s30 = scalar_select %p485_p1, %s10716_s26, %s487_s0  }
  0x16   : > { %p10876_p5 = por %p498_p2, %p497_p0  ;;  %p10880_p6 = por %p504_p4, %p503_p3 }
  0x17   : > { %14131 = sst [smem:[#allocation12_spill]] %s10874_s30  ;;  %p7962_p7 = scmp.ge.s32.totalorder %s10720_s27, 1 }
  0x18   : > { %s14133_s22 = scalar_select %p10880_p6, 1, 0 }
  0x19   : > { %p591_p8 = scmp.lt.s32.totalorder %s10720_s27, 3 }
  0x1a   : > { %14134 = sst [smem:[#allocation13_spill]] %s14133_s22 }
  0x1b   : > { %p592_p9 = pnand %p7962_p7, %p591_p8 }
  0x1d   : > { %595 = sbr.rel (%p592_p9) target bundleno = 2923 (0xb6b), region = 104 }
  0x24   : > { %s14135_s24 = sld [smem:[#allocation16_spill]]  ;;  %vm825_vm0 = vcmask 1043456   ;;  %v14111_v7 = vmov 0.0   ;;  %s651_s28 = smul.u32 30, %s10859_s3  ;;  %vm10723_vm1 = vmmov 1   ;;  %vm734_vm3 = vcmask 228352  }
  0x25   : > { %896 = vmatprep.mubr.f32.mxu0 %v14111_v7  ;;  %vm10907_vm2 = vmpackc.low %vm825_vm0, %vm10723_vm1  ;;  %s14138_s1 = sld [smem:[#allocation15_spill]]  ;;  %v10724_v58 = vmov 0   ;;  %v1990_v59 = vld [vmem:[%s14088_s9] sm:$0xff]  ;;  %v1997_v10 = vld [vmem:[%s14088_s9 + $0x38] sm:$0xff]  ;;  %s14139_s22 = sld [smem:[#allocation18_spill]]  ;;  %vm2479_vm5 = vcmask 785409  }
  0x26   : > { %p652_p10 = scmp.lt.s32.totalorder %s651_s28, 59  ;;  %10621 = vset.pattern.permute.xlu0 %v10724_v58  ;;  %10622 = vset.pattern.permute.xlu1 %v10724_v58  ;;  %v5930_v58 = vld [vmem:[%s14089_s10 + $0x30] sm:$0xff]  ;;  %s14141_s29 = sld [smem:[#allocation17_spill]]  ;;  %vm2299_vm6 = vcmask 1040384   ;;  %vm2482_vm7 = vcmask 785408   ;;  %vm2778_vm8 = vcmask 1046528  }
  0x27   : > { %2022 = vperm.xlu0 %10621, %v1990_v59   ;;  %vm2539_vm9 = vcmask 784384   ;;  %vm3604_vm10 = vcmask 1045504   ;;  %vm4282_vm11 = vcmask 900096   ;;  %s14148_s30 = sld [smem:[#allocation20_spill]]  ;;  %vm5181_vm13 = vcmask 916480   ;;  %s14149_s7 = sld [smem:[#allocation22_spill]] }
  0x28   : > { %s14164_s28 = smov (!%p652_p10, %s651_s28), 59  ;;  %vm12689_vm12 = vmpackc.low %vm3604_vm10, %vm10723_vm1  ;;  %vm6036_vm14 = vcmask 909312   ;;  %s14151_s6 = sld [smem:[#allocation21_spill]]  ;;  %vm6054_vm15 = vcmask 914432   ;;  %vm10726_vm0 = vmmov 0   ;;  %vm6789_vm1 = vcmask 1031168  }
  0x29   : > { %s7964_s23 = sshll.u32 %s14164_s28, 3  ;;  %s14142_s28 = sld [smem:[#allocation19_spill]] }
  0x2a   : > { %v7966_v0 = vld [vmem:[%s14135_s24 + $0x48] sm:$0xff]  ;;  %v7968_v1 = vld [vmem:[%s14135_s24 + $0x58] sm:$0xff]  ;;  %v7965_v2 = vld [vmem:[%s14135_s24 + $0x40] sm:$0xff]  ;;  %s14152_s8 = sld [smem:[#allocation23_spill]]  ;;  %s648_s0 = sand.u32 1, %s10712_s25  }
  0x2b   : > { %v9544_v3 = vpack.c.bf16 %v7968_v1, %v7966_v0  ;;  %v7967_v4 = vld [vmem:[%s14135_s24 + $0x50] sm:$0xff]  ;;  %v7970_v5 = vld [vmem:[%s14135_s24 + $0x68] sm:$0xff]  ;;  %v7972_v6 = vld [vmem:[%s14135_s24 + $0x78] sm:$0xf]  ;;  %s10942_s26 = scalar_lea.vmem %s14138_s1, %s7964_s23  ;;  %s7963_s4 = sshll.u32 %s648_s0, 3 }
  0x2c   : > { %v9546_v8 = vpack.c.bf16 %v7967_v4, %v7965_v2  ;;  %v9548_v9 = vpack.c.bf16 %v7972_v6, %v7970_v5  ;;  %v7969_v11 = vld [vmem:[%s14135_s24 + $0x60] sm:$0xff]  ;;  %v7971_v12 = vld [vmem:[%s14135_s24 + $0x70] sm:$0xf]  ;;  %v688_v13 = vld [vmem:[%s14135_s24 + $0x8] sm:$0xff]  ;;  %s14153_s27 = sld [smem:[#allocation24_spill]] }
  0x2d   : > { %9545 = vmatprep.subr.bf16.mxu0 %v9544_v3  ;;  %v690_v14 = vld [vmem:[%s14135_s24 + $0x18] sm:$0xff]  ;;  %v9551_v15 = vpack.c.bf16 %v7971_v12, %v7969_v11  ;;  %v687_v17 = vld [vmem:[%s14135_s24] sm:$0xff]  ;;  %v689_v18 = vld [vmem:[%s14135_s24 + $0x10] sm:$0xff] }
  0x2e   : > { %9547 = vmatpush1.bf16.msra.mxu0 %v9546_v8  ;;  %v9554_v16 = vpack.c.bf16 %v690_v14, %v688_v13  ;;  %v692_v19 = vld [vmem:[%s14135_s24 + $0x28] sm:$0xff]  ;;  %v694_v20 = vld [vmem:[%s14135_s24 + $0x38] sm:$0xf]  ;;  %v9556_v21 = vpack.c.bf16 %v689_v18, %v687_v17  ;;  %v691_v24 = vld [vmem:[%s14135_s24 + $0x20] sm:$0xff] }
  0x2f   : > { %9550 = vmatprep.subr.msk.bf16.mxu0 %vm10907_vm2, %v9548_v9  ;;  %v695_v22 = vld [vmem:[%s10942_s26 + $0x1] sm:$0xff]  ;;  %v9558_v23 = vpack.c.bf16 %v694_v20, %v692_v19  ;;  %v693_v25 = vld [vmem:[%s14135_s24 + $0x30] sm:$0xf]  ;;  %v8040_v27 = vld [vmem:[%s14135_s24 + $0x98] sm:$0xff] }
  0x30   : > { %v8038_v26 = vld [vmem:[%s14135_s24 + $0x88] sm:$0xff]  ;;  %v9561_v29 = vpack.c.bf16 %v693_v25, %v691_v24  ;;  %v697_v31 = vld [vmem:[%s10942_s26 + $0x11] sm:$0xff]  ;;  %v698_v32 = vld [vmem:[%s10942_s26 + $0x19] sm:$0xff] }
  0x31   : > { %v696_v28 = vld [vmem:[%s10942_s26 + $0x9] sm:$0xff]  ;;  %v9564_v30 = vpack.c.bf16 %v8040_v27, %v8038_v26  ;;  %v699_v33 = vld [vmem:[%s10942_s26 + $0x21] sm:$0xff]  ;;  %v701_v35 = vld [vmem:[%s10942_s26 + $0x31] sm:$0xff] }
  0x32   : > { %9553 = vmatpush1.bf16.msk.msra.mxu0 %vm10907_vm2, %v9551_v15  ;;  %v700_v34 = vld [vmem:[%s10942_s26 + $0x29] sm:$0xff]  ;;  %v702_v36 = vld [vmem:[%s10942_s26 + $0x39] sm:$0xff]  ;;  %v703_v37 = vld [vmem:[%s10942_s26 + $0x41] sm:$0xff] }
  0x33   : > { %9555 = vmatprep.subr.bf16.mxu0 %v9554_v16  ;;  %v704_v38 = vld [vmem:[%s10942_s26 + $0x49] sm:$0xff]  ;;  %v705_v39 = vld [vmem:[%s10942_s26 + $0x51] sm:$0xff]  ;;  %v706_v40 = vld [vmem:[%s10942_s26 + $0x59] sm:$0xff] }
  0x34   : > { %v707_v41 = vld [vmem:[%s10942_s26 + $0x61] sm:$0xff]  ;;  %v708_v42 = vld [vmem:[%s10942_s26 + $0x69] sm:$0xff]  ;;  %v709_v43 = vld [vmem:[%s10942_s26 + $0x71] sm:$0xff] }
  0x35   : > { %7975 = vmatmul.mubr.msk.f32.vlgmr.msra.gmra.mrb[0].mxu0 %vm734_vm3, %v695_v22  ;;  %v710_v44 = vld [vmem:[%s10942_s26 + $0x79] sm:$0xff]  ;;  %v711_v45 = vld [vmem:[%s10942_s26 + $0x81] sm:$0xff]  ;;  %v712_v46 = vld [vmem:[%s10942_s26 + $0x89] sm:$0xff] }
  0x36   : > { %902 = vmatprep.mubr.f32.mxu0 %v14111_v7  ;;  %9557 = vmatpush1.bf16.msra.mxu0 %v9556_v21  ;;  %v713_v47 = vld [vmem:[%s10942_s26 + $0x91] sm:$0xff]  ;;  %v714_v48 = vld [vmem:[%s10942_s26 + $0x99] sm:$0xff]  ;;  %v715_v49 = vld [vmem:[%s10942_s26 + $0xa1] sm:$0xff] }
  0x37   : > { %9560 = vmatprep.subr.msk.bf16.mxu0 %vm10907_vm2, %v9558_v23  ;;  %v716_v50 = vld [vmem:[%s10942_s26 + $0xa9] sm:$0xff]  ;;  %v717_v51 = vld [vmem:[%s10942_s26 + $0xb1] sm:$0xff]  ;;  %v718_v52 = vld [vmem:[%s10942_s26 + $0xb9] sm:$0xff] }
  0x38   : > { %v719_v53 = vld [vmem:[%s10942_s26 + $0xc1] sm:$0xff]  ;;  %v720_v54 = vld [vmem:[%s10942_s26 + $0xc9] sm:$0xff]  ;;  %v721_v55 = vld [vmem:[%s10942_s26 + $0xd1] sm:$0xff] }
  0x39   : > { %7976 = vmatmul.mubr.msk.f32.gmra.mrb[2].mxu0 %vm734_vm3, %v696_v28  ;;  %v722_v56 = vld [vmem:[%s10942_s26 + $0xd9] sm:$0xff]  ;;  %v723_v57 = vld [vmem:[%s10942_s26 + $0xe1] sm:$0xff]  ;;  %v724_v60 = vld [vmem:[%s10942_s26 + $0xe9] sm:$0x3f] }
  0x3a   : > { %908 = vmatprep.mubr.f32.mxu0 %v14111_v7  ;;  %9563 = vmatpush1.bf16.msk.msra.mxu0 %vm10907_vm2, %v9561_v29  ;;  %v8037_v61 = vld [vmem:[%s14135_s24 + $0x80] sm:$0xff]  ;;  %v8039_v62 = vld [vmem:[%s14135_s24 + $0x90] sm:$0xff]  ;;  %v8042_v63 = vld [vmem:[%s14135_s24 + $0xa8] sm:$0xff] }
  0x3b   : > { %9565 = vmatprep.subr.bf16.mxu0 %v9564_v30  ;;  %v8044_v0 = vld [vmem:[%s14135_s24 + $0xb8] sm:$0xf]  ;;  %v1991_v1 = vld [vmem:[%s14088_s9 + $0x8] sm:$0xff]  ;;  %v657_v2 = vld [vmem:[%s10942_s26] sm:$0xff]  ;;  %v9566_v3 = vpack.c.bf16 %v8039_v62, %v8037_v61 }
  0x3c   : > { %2027 = vperm.xlu0 %10621, %v1991_v1   ;;  %v9568_v4 = vpack.c.bf16 %v8044_v0, %v8042_v63  ;;  %v8041_v5 = vld [vmem:[%s14135_s24 + $0xa0] sm:$0xff]  ;;  %v8043_v6 = vld [vmem:[%s14135_s24 + $0xb0] sm:$0xf]  ;;  %v658_v11 = vld [vmem:[%s10942_s26 + $0x8] sm:$0xff] }
  0x3d   : > { %7977 = vmatmul.mubr.msk.f32.gmra.mrb[4].mxu0 %vm734_vm3, %v697_v31  ;;  %v1992_v8 = vld [vmem:[%s14088_s9 + $0x10] sm:$0xff]  ;;  %v1994_v9 = vld [vmem:[%s14088_s9 + $0x20] sm:$0xff]  ;;  %v9571_v12 = vpack.c.bf16 %v8043_v6, %v8041_v5  ;;  %v1993_v13 = vld [vmem:[%s14088_s9 + $0x18] sm:$0xff] }
  0x3e   : > { %914 = vmatprep.mubr.f32.mxu0 %v14111_v7  ;;  %2032 = vperm.xlu1 %10622, %v1992_v8   ;;  %v1996_v14 = vld [vmem:[%s14088_s9 + $0x30] sm:$0xff]  ;;  %v1995_v16 = vld [vmem:[%s14088_s9 + $0x28] sm:$0xff]  ;;  %v1998_v17 = vld [vmem:[%s14088_s9 + $0x40] sm:$0xff] }
  0x3f   : > { %v659_v15 = vld [vmem:[%s10942_s26 + $0x10] sm:$0xff]  ;;  %v660_v18 = vld [vmem:[%s10942_s26 + $0x18] sm:$0xff]  ;;  %v661_v20 = vld [vmem:[%s10942_s26 + $0x20] sm:$0xff] }
  0x40   : > { %2042 = vperm.xlu0 %10621, %v1994_v9   ;;  %v2000_v19 = vld [vmem:[%s14088_s9 + $0x50] sm:$0xff]  ;;  %v1999_v21 = vld [vmem:[%s14088_s9 + $0x48] sm:$0xff]  ;;  %v2002_v22 = vld [vmem:[%s14088_s9 + $0x60] sm:$0xff] }
  0x41   : > { %7978 = vmatmul.mubr.msk.f32.gmra.mrb[6].mxu0 %vm734_vm3, %v698_v32  ;;  %v662_v23 = vld [vmem:[%s10942_s26 + $0x28] sm:$0xff]  ;;  %v2001_v24 = vld [vmem:[%s14088_s9 + $0x58] sm:$0xff]  ;;  %v2004_v25 = vld [vmem:[%s14088_s9 + $0x70] sm:$0xff] }
  0x42   : > { %920 = vmatprep.mubr.f32.mxu0 %v14111_v7  ;;  %2037 = vperm.xlu1 %10622, %v1993_v13   ;;  %v663_v26 = vld [vmem:[%s10942_s26 + $0x30] sm:$0xff]  ;;  %v2003_v27 = vld [vmem:[%s14088_s9 + $0x68] sm:$0xff]  ;;  %v2006_v28 = vld [vmem:[%s14088_s9 + $0x80] sm:$0xff] }
  0x43   : > { %v664_v29 = vld [vmem:[%s10942_s26 + $0x38] sm:$0xff]  ;;  %v2008_v31 = vld [vmem:[%s14088_s9 + $0x90] sm:$0xff]  ;;  %v665_v32 = vld [vmem:[%s10942_s26 + $0x40] sm:$0xff] }
  0x44   : > { %2052 = vperm.xlu0 %10621, %v1996_v14   ;;  %v2005_v30 = vld [vmem:[%s14088_s9 + $0x78] sm:$0xff]  ;;  %v674_v59 = vld [vmem:[%s10942_s26 + $0x88] sm:$0xff]  ;;  %v5932_v61 = vld [vmem:[%s14089_s10 + $0x40] sm:$0xff] }
  0x45   : > { %7979 = vmatmul.mubr.msk.f32.gmra.mrb[8].mxu0 %vm734_vm3, %v699_v33  ;;  %v2007_v33 = vld [vmem:[%s14088_s9 + $0x88] sm:$0xff]  ;;  %v675_v62 = vld [vmem:[%s10942_s26 + $0x90] sm:$0xff]  ;;  %v5931_v63 = vld [vmem:[%s14089_s10 + $0x38] sm:$0xff] }
  0x46   : > { %926 = vmatprep.mubr.f32.mxu0 %v14111_v7  ;;  %2047 = vperm.xlu1 %10622, %v1995_v16   ;;  %v5934_v0 = vld [vmem:[%s14089_s10 + $0x50] sm:$0xff]  ;;  %v676_v1 = vld [vmem:[%s10942_s26 + $0x98] sm:$0xff]  ;;  %v678_v8 = vld [vmem:[%s10942_s26 + $0xa8] sm:$0xff] }
  0x47   : > { %v5935_v5 = vld [vmem:[%s14089_s10 + $0x58] sm:$0xff]  ;;  %v5938_v6 = vld [vmem:[%s14089_s10 + $0x70] sm:$0xff]  ;;  %v5937_v9 = vld [vmem:[%s14089_s10 + $0x68] sm:$0xff] }
  0x48   : > { %2062 = vperm.xlu0 %10621, %v1998_v17   ;;  %v680_v13 = vld [vmem:[%s10942_s26 + $0xb8] sm:$0xff]  ;;  %v681_v14 = vld [vmem:[%s10942_s26 + $0xc0] sm:$0xff]  ;;  %v683_v16 = vld [vmem:[%s10942_s26 + $0xd0] sm:$0xff] }
  0x49   : > { %7980 = vmatmul.mubr.msk.f32.gmra.mrb[10].mxu0 %vm734_vm3, %v700_v34  ;;  %v2010_v34 = vld [vmem:[%s14088_s9 + $0xa0] sm:$0xff]  ;;  %v684_v17 = vld [vmem:[%s10942_s26 + $0xd8] sm:$0xff] }
  0x4a   : > { %932 = vmatprep.mubr.f32.mxu0 %v14111_v7  ;;  %2057 = vperm.xlu1 %10622, %v1997_v10   ;;  %v8078_v10 = vld [vmem:[%s14139_s22 + $0x1c8] sm:$0xff] }
  0x4c   : > { %2072 = vperm.xlu0 %10621, %v2000_v19   ;;  %v8080_v19 = vld [vmem:[%s14139_s22 + $0x1d8] sm:$0xff] }
  0x4d   : > { %7981 = vmatmul.mubr.msk.f32.gmra.mrb[12].mxu0 %vm734_vm3, %v701_v35  ;;  %v666_v35 = vld [vmem:[%s10942_s26 + $0x48] sm:$0xff] }
  0x4e   : > { %938 = vmatprep.mubr.f32.mxu0 %v14111_v7  ;;  %2067 = vperm.xlu1 %10622, %v1999_v21   ;;  %v9574_v21 = vpack.c.bf16 %v8080_v19, %v8078_v10  ;;  %v1435_v10 = vld [vmem:[%s10942_s26 + $0x8a] sm:$0xff]  ;;  %v1436_v19 = vld [vmem:[%s10942_s26 + $0x92] sm:$0xff] }
  0x50   : > { %2082 = vperm.xlu0 %10621, %v2002_v22   ;;  %v8079_v22 = vld [vmem:[%s14139_s22 + $0x1d0] sm:$0xff]  ;;  %9575 = vmatprep.subr.bf16.mxu1 %v9574_v21  ;;  %v1438_v21 = vld [vmem:[%s10942_s26 + $0xa2] sm:$0xff] }
  0x51   : > { %7982 = vmatmul.mubr.msk.f32.gmra.mrb[14].mxu0 %vm734_vm3, %v702_v36  ;;  %v2009_v36 = vld [vmem:[%s14088_s9 + $0x98] sm:$0xff] }
  0x52   : > { %944 = vmatprep.mubr.f32.mxu0 %v14111_v7  ;;  %2077 = vperm.xlu1 %10622, %v2001_v24   ;;  %v8084_v24 = vld [vmem:[%s14139_s22 + $0x1f8] sm:$0xff] }
  0x54   : > { %2092 = vperm.xlu0 %10621, %v2004_v25  }
  0x55   : > { %7983 = vmatmul.mubr.msk.f32.gmra.mrb[16].mxu0 %vm734_vm3, %v703_v37  ;;  %v2012_v37 = vld [vmem:[%s14088_s9 + $0xb0] sm:$0xff] }
  0x56   : > { %950 = vmatprep.mubr.f32.mxu0 %v14111_v7  ;;  %2087 = vperm.xlu1 %10622, %v2003_v27   ;;  %v8081_v27 = vld [vmem:[%s14139_s22 + $0x1e0] sm:$0xff] }
  0x58   : > { %2102 = vperm.xlu0 %10621, %v2006_v28   ;;  %v8083_v28 = vld [vmem:[%s14139_s22 + $0x1f0] sm:$0xff] }
  0x59   : > { %7984 = vmatmul.mubr.msk.f32.gmra.mrb[18].mxu0 %vm734_vm3, %v704_v38  ;;  %v667_v38 = vld [vmem:[%s10942_s26 + $0x50] sm:$0xff] }
  0x5a   : > { %956 = vmatprep.mubr.f32.mxu0 %v14111_v7  ;;  %2097 = vperm.xlu1 %10622, %v2005_v30   ;;  %v8088_v30 = vld [vmem:[%s14139_s22 + $0x218] sm:$0xff] }
  0x5c   : > { %2112 = vperm.xlu0 %10621, %v2008_v31   ;;  %v9580_v31 = vpack.c.bf16 %v8083_v28, %v8081_v27  ;;  %v8112_v27 = vld [vmem:[%s14139_s22 + $0x2d8] sm:$0xff] }
  0x5d   : > { %7985 = vmatmul.mubr.msk.f32.gmra.mrb[20].mxu0 %vm734_vm3, %v705_v39  ;;  %v2011_v39 = vld [vmem:[%s14088_s9 + $0xa8] sm:$0xff] }
  0x5e   : > { %962 = vmatprep.mubr.f32.mxu0 %v14111_v7  ;;  %2107 = vperm.xlu1 %10622, %v2007_v33  }
  0x60   : > { %2122 = vperm.xlu0 %10621, %v2010_v34   ;;  %v8085_v34 = vld [vmem:[%s14139_s22 + $0x200] sm:$0xff] }
  0x61   : > { %7986 = vmatmul.mubr.msk.f32.gmra.mrb[22].mxu0 %vm734_vm3, %v706_v40  ;;  %v2014_v40 = vld [vmem:[%s14088_s9 + $0xc0] sm:$0xff] }
  0x62   : > { %968 = vmatprep.mubr.f32.mxu0 %v14111_v7  ;;  %2117 = vperm.xlu1 %10622, %v2009_v36   ;;  %v8090_v36 = vld [vmem:[%s14139_s22 + $0x228] sm:$0xff] }
  0x64   : > { %2132 = vperm.xlu0 %10621, %v2012_v37   ;;  %v8092_v37 = vld [vmem:[%s14139_s22 + $0x238] sm:$0xff] }
  0x65   : > { %7987 = vmatmul.mubr.msk.f32.gmra.mrb[24].mxu0 %vm734_vm3, %v707_v41  ;;  %v668_v41 = vld [vmem:[%s10942_s26 + $0x58] sm:$0xff] }
  0x66   : > { %974 = vmatprep.mubr.f32.mxu0 %v14111_v7  ;;  %2127 = vperm.xlu1 %10622, %v2011_v39   ;;  %v1418_v39 = vld [vmem:[%s10942_s26 + $0x2] sm:$0xff] }
  0x68   : > { %2142 = vperm.xlu0 %10621, %v2014_v40   ;;  %v9586_v40 = vpack.c.bf16 %v8092_v37, %v8090_v36  ;;  %v8113_v36 = vld [vmem:[%s14139_s22 + $0x2e0] sm:$0xff]  ;;  %v8115_v37 = vld [vmem:[%s14139_s22 + $0x2f0] sm:$0xff] }
  0x69   : > { %7988 = vmatmul.mubr.msk.f32.gmra.mrb[26].mxu0 %vm734_vm3, %v708_v42  ;;  %v2013_v42 = vld [vmem:[%s14088_s9 + $0xb8] sm:$0xff] }
  0x6a   : > { %980 = vmatprep.mubr.f32.mxu0 %v14111_v7  ;;  %2137 = vperm.xlu1 %10622, %v2013_v42   ;;  %v8091_v42 = vld [vmem:[%s14139_s22 + $0x230] sm:$0xff] }
  0x6d   : > { %7989 = vmatmul.mubr.msk.f32.gmra.mrb[28].mxu0 %vm734_vm3, %v709_v43  ;;  %v2016_v43 = vld [vmem:[%s14088_s9 + $0xd0] sm:$0xff] }
  0x6e   : > { %986 = vmatprep.mubr.f32.mxu0 %v14111_v7  ;;  %2152 = vperm.xlu0 %10621, %v2016_v43   ;;  %v8094_v43 = vld [vmem:[%s14139_s22 + $0x248] sm:$0xff] }
  0x71   : > { %7990 = vmatmul.mubr.msk.f32.gmra.mrb[30].mxu0 %vm734_vm3, %v710_v44  ;;  %v669_v44 = vld [vmem:[%s10942_s26 + $0x60] sm:$0xff] }
  0x72   : > { %992 = vmatprep.mubr.f32.mxu0 %v14111_v7 }
  0x75   : > { %7991 = vmatmul.mubr.msk.f32.gmra.mrb[32].mxu0 %vm734_vm3, %v711_v45  ;;  %v2015_v45 = vld [vmem:[%s14088_s9 + $0xc8] sm:$0xff] }
  0x76   : > { %998 = vmatprep.mubr.f32.mxu0 %v14111_v7  ;;  %2147 = vperm.xlu1 %10622, %v2015_v45  }
  0x79   : > { %7992 = vmatmul.mubr.msk.f32.gmra.mrb[34].mxu0 %vm734_vm3, %v712_v46  ;;  %v2018_v46 = vld [vmem:[%s14088_s9 + $0xe0] sm:$0xff] }
  0x7a   : > { %1004 = vmatprep.mubr.f32.mxu0 %v14111_v7  ;;  %2162 = vperm.xlu0 %10621, %v2018_v46   ;;  %v1419_v46 = vld [vmem:[%s10942_s26 + $0xa] sm:$0xff] }
  0x7d   : > { %7993 = vmatmul.mubr.msk.f32.gmra.mrb[36].mxu0 %vm734_vm3, %v713_v47  ;;  %v670_v47 = vld [vmem:[%s10942_s26 + $0x68] sm:$0xff] }
  0x7e   : > { %1010 = vmatprep.mubr.f32.mxu0 %v14111_v7 }
  0x81   : > { %7994 = vmatmul.mubr.msk.f32.gmra.mrb[38].mxu0 %vm734_vm3, %v714_v48  ;;  %v2017_v48 = vld [vmem:[%s14088_s9 + $0xd8] sm:$0xff] }
  0x82   : > { %1016 = vmatprep.mubr.f32.mxu0 %v14111_v7  ;;  %2157 = vperm.xlu1 %10622, %v2017_v48   ;;  %v8093_v48 = vld [vmem:[%s14139_s22 + $0x240] sm:$0xff] }
  0x85   : > { %7995 = vmatmul.mubr.msk.f32.gmra.mrb[40].mxu0 %vm734_vm3, %v715_v49  ;;  %v5924_v49 = vld [vmem:[%s14089_s10] sm:$0xff] }
  0x86   : > { %1022 = vmatprep.mubr.f32.mxu0 %v14111_v7  ;;  %5942 = vperm.xlu0 %10621, %v5924_v49   ;;  %v8095_v49 = vld [vmem:[%s14139_s22 + $0x250] sm:$0xff] }
  0x89   : > { %7996 = vmatmul.mubr.msk.f32.gmra.mrb[42].mxu0 %vm734_vm3, %v716_v50  ;;  %v671_v50 = vld [vmem:[%s10942_s26 + $0x70] sm:$0xff] }
  0x8a   : > { %1028 = vmatprep.mubr.f32.mxu0 %v14111_v7 }
  0x8d   : > { %7997 = vmatmul.mubr.msk.f32.gmra.mrb[44].mxu0 %vm734_vm3, %v717_v51  ;;  %v2019_v51 = vld [vmem:[%s14088_s9 + $0xe8] sm:$0x3f] }
  0x8e   : > { %1034 = vmatprep.mubr.f32.mxu0 %v14111_v7  ;;  %2167 = vperm.xlu1 %10622, %v2019_v51   ;;  %v8100_v51 = vld [vmem:[%s14139_s22 + $0x278] sm:$0xff] }
  0x91   : > { %7998 = vmatmul.mubr.msk.f32.gmra.mrb[46].mxu0 %vm734_vm3, %v718_v52  ;;  %v5926_v52 = vld [vmem:[%s14089_s10 + $0x10] sm:$0xff] }
  0x92   : > { %1040 = vmatprep.mubr.f32.mxu0 %v14111_v7  ;;  %5952 = vperm.xlu0 %10621, %v5926_v52   ;;  %v9592_v52 = vpack.c.bf16 %v8095_v49, %v8093_v48  ;;  %v8122_v48 = vld [vmem:[%s14139_s22 + $0x328] sm:$0xff]  ;;  %v8124_v49 = vld [vmem:[%s14139_s22 + $0x338] sm:$0xff] }
  0x95   : > { %7999 = vmatmul.mubr.msk.f32.gmra.mrb[48].mxu0 %vm734_vm3, %v719_v53  ;;  %v672_v53 = vld [vmem:[%s10942_s26 + $0x78] sm:$0xff] }
  0x96   : > { %1046 = vmatprep.mubr.f32.mxu0 %v14111_v7 }
  0x99   : > { %8000 = vmatmul.mubr.msk.f32.gmra.mrb[50].mxu0 %vm734_vm3, %v720_v54  ;;  %v5925_v54 = vld [vmem:[%s14089_s10 + $0x8] sm:$0xff] }
  0x9a   : > { %1052 = vmatprep.mubr.f32.mxu0 %v14111_v7  ;;  %5947 = vperm.xlu1 %10622, %v5925_v54  }
  0x9d   : > { %8001 = vmatmul.mubr.msk.f32.gmra.mrb[52].mxu0 %vm734_vm3, %v721_v55  ;;  %v5928_v55 = vld [vmem:[%s14089_s10 + $0x20] sm:$0xff] }
  0x9e   : > { %1058 = vmatprep.mubr.f32.mxu0 %v14111_v7  ;;  %5962 = vperm.xlu0 %10621, %v5928_v55   ;;  %v8097_v55 = vld [vmem:[%s14139_s22 + $0x260] sm:$0xff] }
  0xa1   : > { %8002 = vmatmul.mubr.msk.f32.gmra.mrb[54].mxu0 %vm734_vm3, %v722_v56  ;;  %v673_v56 = vld [vmem:[%s10942_s26 + $0x80] sm:$0xff] }
  0xa2   : > { %1064 = vmatprep.mubr.f32.mxu0 %v14111_v7  ;;  %5972 = vperm.xlu0 %10621, %v5930_v58   ;;  %v8104_v58 = vld [vmem:[%s14139_s22 + $0x298] sm:$0xff] }
  0xa5   : > { %8003 = vmatmul.mubr.msk.f32.gmra.mrb[56].mxu0 %vm734_vm3, %v723_v57  ;;  %v5927_v57 = vld [vmem:[%s14089_s10 + $0x18] sm:$0xff] }
  0xa6   : > { %1070 = vmatprep.mubr.f32.mxu0 %v14111_v7  ;;  %5957 = vperm.xlu1 %10622, %v5927_v57   ;;  %v8102_v57 = vld [vmem:[%s14139_s22 + $0x288] sm:$0xff] }
  0xa7   : > { %5982 = vperm.xlu0 %10621, %v5932_v61   ;;  %v9598_v61 = vpack.c.bf16 %v8104_v58, %v8102_v57  ;;  %v8125_v58 = vld [vmem:[%s14139_s22 + $0x340] sm:$0xff] }
  0xa9   : > { %8004 = vmatmul.mubr.msk.f32.gmra.mrb[58].mxu0 %vm734_vm3, %v724_v60  ;;  %v5929_v60 = vld [vmem:[%s14089_s10 + $0x28] sm:$0xff] }
  0xaa   : > { %1237 = vmatprep.mubr.f32.mxu0 %v14111_v7  ;;  %5967 = vperm.xlu1 %10622, %v5929_v60   ;;  %v1421_v60 = vld [vmem:[%s10942_s26 + $0x1a] sm:$0xff] }
  0xab   : > { %5992 = vperm.xlu0 %10621, %v5934_v0   ;;  %v8106_v0 = vld [vmem:[%s14139_s22 + $0x2a8] sm:$0xff] }
  0xad   : > { %8007 = vmatmul.mubr.msk.f32.vlgmr.msra.gmra.mrb[0].mxu0 %vm734_vm3, %v657_v2  ;;  %v5933_v2 = vld [vmem:[%s14089_s10 + $0x48] sm:$0xff] }
  0xae   : > { %1243 = vmatprep.mubr.f32.mxu0 %v14111_v7  ;;  %9567 = vmatpush1.bf16.msra.mxu0 %v9566_v3  ;;  %v5936_v3 = vld [vmem:[%s14089_s10 + $0x60] sm:$0xff] }
  0xaf   : > { %9570 = vmatprep.subr.msk.bf16.mxu0 %vm10907_vm2, %v9568_v4  ;;  %5977 = vperm.xlu1 %10622, %v5931_v63   ;;  %v677_v4 = vld [vmem:[%s10942_s26 + $0xa0] sm:$0xff]  ;;  %v8103_v63 = vld [vmem:[%s14139_s22 + $0x290] sm:$0xff] }
  0xb0   : > { %6002 = vperm.xlu0 %10621, %v5936_v3   ;;  %v1422_v3 = vld [vmem:[%s10942_s26 + $0x22] sm:$0xff] }
  0xb1   : > { %8008 = vmatmul.mubr.msk.f32.gmra.mrb[2].mxu0 %vm734_vm3, %v658_v11  ;;  %v679_v11 = vld [vmem:[%s10942_s26 + $0xb0] sm:$0xff] }
  0xb2   : > { %1249 = vmatprep.mubr.f32.mxu0 %v14111_v7  ;;  %9573 = vmatpush1.bf16.msk.msra.mxu0 %vm10907_vm2, %v9571_v12  ;;  %v5939_v12 = vld [vmem:[%s14089_s10 + $0x78] sm:$0x3f]  ;;  %vm7320_vm2 = vcmask 457728  }
  0xb3   : > { %5987 = vperm.xlu1 %10622, %v5933_v2  }
  0xb4   : > { %6012 = vperm.xlu0 %10621, %v5938_v6   ;;  %v1424_v6 = vld [vmem:[%s10942_s26 + $0x32] sm:$0xff] }
  0xb5   : > { %8009 = vmatmul.mubr.msk.f32.gmra.mrb[4].mxu0 %vm734_vm3, %v659_v15  ;;  %v682_v15 = vld [vmem:[%s10942_s26 + $0xc8] sm:$0xff] }
  0xb6   : > { %1255 = vmatprep.mubr.f32.mxu0 %v14111_v7 }
  0xb7   : > { %5997 = vperm.xlu1 %10622, %v5935_v5   ;;  %v1423_v5 = vld [vmem:[%s10942_s26 + $0x2a] sm:$0xff] }
  0xb9   : > { %8010 = vmatmul.mubr.msk.f32.gmra.mrb[6].mxu0 %vm734_vm3, %v660_v18  ;;  %v685_v18 = vld [vmem:[%s10942_s26 + $0xe0] sm:$0xff] }
  0xba   : > { %1261 = vmatprep.mubr.f32.mxu0 %v14111_v7 }
  0xbb   : > { %6007 = vperm.xlu1 %10622, %v5937_v9   ;;  %v1426_v9 = vld [vmem:[%s10942_s26 + $0x42] sm:$0xff] }
  0xbd   : > { %8011 = vmatmul.mubr.msk.f32.gmra.mrb[8].mxu0 %vm734_vm3, %v661_v20  ;;  %v8077_v20 = vld [vmem:[%s14139_s22 + $0x1c0] sm:$0xff] }
  0xbe   : > { %1267 = vmatprep.mubr.f32.mxu0 %v14111_v7  ;;  %v9576_v25 = vpack.c.bf16 %v8079_v22, %v8077_v20  ;;  %v1437_v20 = vld [vmem:[%s10942_s26 + $0x9a] sm:$0xff] }
  0xbf   : > { %6017 = vperm.xlu1 %10622, %v5939_v12   ;;  %v1428_v12 = vld [vmem:[%s10942_s26 + $0x52] sm:$0xff]  ;;  %v8105_v22 = vld [vmem:[%s14139_s22 + $0x2a0] sm:$0xff] }
  0xc0   : > { %9577 = vmatpush1.bf16.msra.mxu1 %v9576_v25 }
  0xc1   : > { %8012 = vmatmul.mubr.msk.f32.gmra.mrb[10].mxu0 %vm734_vm3, %v662_v23  ;;  %v8082_v23 = vld [vmem:[%s14139_s22 + $0x1e8] sm:$0xff] }
  0xc2   : > { %1273 = vmatprep.mubr.f32.mxu0 %v14111_v7 }
  0xc5   : > { %8013 = vmatmul.mubr.msk.f32.gmra.mrb[12].mxu0 %vm734_vm3, %v663_v26  ;;  %v9578_v26 = vpack.c.bf16 %v8084_v24, %v8082_v23  ;;  %v8107_v23 = vld [vmem:[%s14139_s22 + $0x2b0] sm:$0xff] }
  0xc6   : > { %1279 = vmatprep.mubr.f32.mxu0 %v14111_v7  ;;  %v1439_v24 = vld [vmem:[%s10942_s26 + $0xaa] sm:$0xff]  ;;  %v9604_v25 = vpack.c.bf16 %v8107_v23, %v8105_v22 }
  0xc7   : > { %9579 = vmatprep.subr.bf16.mxu1 %v9578_v26  ;;  %v8110_v26 = vld [vmem:[%s14139_s22 + $0x2c8] sm:$0xff] }
  0xc8   : > { %9581 = vmatpush1.bf16.msra.mxu1 %v9580_v31  ;;  %v9606_v28 = vpack.c.bf16 %v8112_v27, %v8110_v26  ;;  %v1440_v31 = vld [vmem:[%s10942_s26 + $0xb2] sm:$0xff] }
  0xc9   : > { %8014 = vmatmul.mubr.msk.f32.gmra.mrb[14].mxu0 %vm734_vm3, %v664_v29  ;;  %v8086_v29 = vld [vmem:[%s14139_s22 + $0x208] sm:$0xff] }
  0xca   : > { %1285 = vmatprep.mubr.f32.mxu0 %v14111_v7  ;;  %v9582_v33 = vpack.c.bf16 %v8088_v30, %v8086_v29  ;;  %v8109_v29 = vld [vmem:[%s14139_s22 + $0x2c0] sm:$0xff]  ;;  %v8111_v30 = vld [vmem:[%s14139_s22 + $0x2d0] sm:$0xff] }
  0xcc   : > { %9583 = vmatprep.subr.bf16.mxu1 %v9582_v33  ;;  %v8114_v33 = vld [vmem:[%s14139_s22 + $0x2e8] sm:$0xff] }
  0xcd   : > { %8015 = vmatmul.mubr.msk.f32.gmra.mrb[16].mxu0 %vm734_vm3, %v665_v32  ;;  %v686_v32 = vld [vmem:[%s10942_s26 + $0xe8] sm:$0x3f] }
  0xce   : > { %1291 = vmatprep.mubr.f32.mxu0 %v14111_v7 }
  0xd1   : > { %8016 = vmatmul.mubr.msk.f32.gmra.mrb[18].mxu0 %vm734_vm3, %v666_v35  ;;  %v8087_v35 = vld [vmem:[%s14139_s22 + $0x210] sm:$0xff] }
  0xd2   : > { %1297 = vmatprep.mubr.f32.mxu0 %v14111_v7 }
  0xd5   : > { %8017 = vmatmul.mubr.msk.f32.gmra.mrb[20].mxu0 %vm734_vm3, %v667_v38  ;;  %v9584_v38 = vpack.c.bf16 %v8087_v35, %v8085_v34  ;;  %v8116_v34 = vld [vmem:[%s14139_s22 + $0x2f8] sm:$0xff] }
  0xd6   : > { %1303 = vmatprep.mubr.f32.mxu0 %v14111_v7  ;;  %v9610_v35 = vpack.c.bf16 %v8116_v34, %v8114_v33 }
  0xd7   : > { %9585 = vmatpush1.bf16.msra.mxu1 %v9584_v38  ;;  %v1441_v38 = vld [vmem:[%s10942_s26 + $0xba] sm:$0xff] }
  0xd8   : > { %9587 = vmatprep.subr.bf16.mxu1 %v9586_v40  ;;  %v1860_v40 = vlaneseq }
  0xd9   : > { %8018 = vmatmul.mubr.msk.f32.gmra.mrb[22].mxu0 %vm734_vm3, %v668_v41  ;;  %v8089_v41 = vld [vmem:[%s14139_s22 + $0x220] sm:$0xff] }
  0xda   : > { %1309 = vmatprep.mubr.f32.mxu0 %v14111_v7  ;;  %v9588_v45 = vpack.c.bf16 %v8091_v42, %v8089_v41  ;;  %v8118_v41 = vld [vmem:[%s14139_s22 + $0x308] sm:$0xff]  ;;  %v8120_v42 = vld [vmem:[%s14139_s22 + $0x318] sm:$0xff]  ;;  %vm2232_vm4 = vcmp.lt.s32.totalorder %v1860_v40, 224 }
  0xdb   : > { %2234 = vst.msk [vmem:[#allocation2] ss:$8 sm:$0x3] %vm2232_vm4, %v14111_v7  ;;  %2237 = vst.msk [vmem:[#allocation2 + $0x1d7] ss:$8 sm:$0x3] %vm2232_vm4, %v14111_v7 }
  0xdc   : > { %9589 = vmatpush1.bf16.msra.mxu1 %v9588_v45  ;;  %v8119_v45 = vld [vmem:[%s14139_s22 + $0x310] sm:$0xff] }
  0xdd   : > { %8019 = vmatmul.mubr.msk.f32.gmra.mrb[24].mxu0 %vm734_vm3, %v669_v44  ;;  %v8096_v44 = vld [vmem:[%s14139_s22 + $0x258] sm:$0xff] }
  0xde   : > { %1315 = vmatprep.mubr.f32.mxu0 %v14111_v7 }
  0xe1   : > { %8020 = vmatmul.mubr.msk.f32.gmra.mrb[26].mxu0 %vm734_vm3, %v670_v47  ;;  %v9590_v47 = vpack.c.bf16 %v8096_v44, %v8094_v43  ;;  %v9614_v43 = vpack.c.bf16 %v8120_v42, %v8118_v41  ;;  %v8117_v44 = vld [vmem:[%s14139_s22 + $0x300] sm:$0xff] }
  0xe2   : > { %1321 = vmatprep.mubr.f32.mxu0 %v14111_v7 }
  0xe3   : > { %9591 = vmatprep.subr.bf16.mxu1 %v9590_v47  ;;  %v9616_v47 = vpack.c.bf16 %v8119_v45, %v8117_v44 }
  0xe4   : > { %9593 = vmatpush1.bf16.msra.mxu1 %v9592_v52  ;;  %v8123_v52 = vld [vmem:[%s14139_s22 + $0x330] sm:$0xff] }
  0xe5   : > { %8021 = vmatmul.mubr.msk.f32.gmra.mrb[28].mxu0 %vm734_vm3, %v671_v50  ;;  %v8098_v50 = vld [vmem:[%s14139_s22 + $0x268] sm:$0xff] }
  0xe6   : > { %1327 = vmatprep.mubr.f32.mxu0 %v14111_v7  ;;  %v9594_v54 = vpack.c.bf16 %v8100_v51, %v8098_v50  ;;  %v9618_v50 = vpack.c.bf16 %v8124_v49, %v8122_v48  ;;  %v8121_v51 = vld [vmem:[%s14139_s22 + $0x320] sm:$0xff] }
  0xe8   : > { %9595 = vmatprep.subr.bf16.mxu1 %v9594_v54  ;;  %v9620_v54 = vpack.c.bf16 %v8123_v52, %v8121_v51 }
  0xe9   : > { %8022 = vmatmul.mubr.msk.f32.gmra.mrb[30].mxu0 %vm734_vm3, %v672_v53  ;;  %v1420_v53 = vld [vmem:[%s10942_s26 + $0x12] sm:$0xff] }
  0xea   : > { %1333 = vmatprep.mubr.f32.mxu0 %v14111_v7 }
  0xed   : > { %8023 = vmatmul.mubr.msk.f32.gmra.mrb[32].mxu0 %vm734_vm3, %v673_v56  ;;  %v8099_v56 = vld [vmem:[%s14139_s22 + $0x270] sm:$0xff] }
  0xee   : > { %1339 = vmatprep.mubr.f32.mxu0 %v14111_v7 }
  0xf1   : > { %8024 = vmatmul.mubr.msk.f32.gmra.mrb[34].mxu0 %vm734_vm3, %v674_v59  ;;  %v9596_v59 = vpack.c.bf16 %v8099_v56, %v8097_v55  ;;  %v8126_v55 = vld [vmem:[%s14139_s22 + $0x348] sm:$0xff]  ;;  %v8128_v56 = vld [vmem:[%s14139_s22 + $0x358] sm:$0xff] }
  0xf2   : > { %1345 = vmatprep.mubr.f32.mxu0 %v14111_v7  ;;  %v9622_v57 = vpack.c.bf16 %v8128_v56, %v8126_v55 }
  0xf3   : > { %9597 = vmatpush1.bf16.msra.mxu1 %v9596_v59  ;;  %v8127_v59 = vld [vmem:[%s14139_s22 + $0x350] sm:$0xff] }
  0xf4   : > { %9599 = vmatprep.subr.bf16.mxu1 %v9598_v61  ;;  %v9624_v61 = vpack.c.bf16 %v8127_v59, %v8125_v58 }
  0xf5   : > { %8025 = vmatmul.mubr.msk.f32.gmra.mrb[36].mxu0 %vm734_vm3, %v675_v62  ;;  %v8101_v62 = vld [vmem:[%s14139_s22 + $0x280] sm:$0xff] }
  0xf6   : > { %1351 = vmatprep.mubr.f32.mxu0 %v14111_v7  ;;  %v9600_v2 = vpack.c.bf16 %v8103_v63, %v8101_v62  ;;  %v8130_v62 = vld [vmem:[%s14139_s22 + $0x368] sm:$0xff]  ;;  %v8132_v63 = vld [vmem:[%s14139_s22 + $0x378] sm:$0xff] }
  0xf8   : > { %9601 = vmatpush1.bf16.msra.mxu1 %v9600_v2  ;;  %v8131_v2 = vld [vmem:[%s14139_s22 + $0x370] sm:$0xff] }
  0xf9   : > { %8026 = vmatmul.mubr.msk.f32.gmra.mrb[38].mxu0 %vm734_vm3, %v676_v1  ;;  %v8108_v1 = vld [vmem:[%s14139_s22 + $0x2b8] sm:$0xff] }
  0xfa   : > { %1357 = vmatprep.mubr.f32.mxu0 %v14111_v7 }
  0xfd   : > { %8027 = vmatmul.mubr.msk.f32.gmra.mrb[40].mxu0 %vm734_vm3, %v677_v4  ;;  %v9602_v4 = vpack.c.bf16 %v8108_v1, %v8106_v0  ;;  %v9626_v0 = vpack.c.bf16 %v8132_v63, %v8130_v62  ;;  %v8129_v1 = vld [vmem:[%s14139_s22 + $0x360] sm:$0xff] }
  0xfe   : > { %1363 = vmatprep.mubr.f32.mxu0 %v14111_v7 }
  0xff   : > { %9603 = vmatprep.subr.bf16.mxu1 %v9602_v4  ;;  %v9628_v4 = vpack.c.bf16 %v8131_v2, %v8129_v1  ;;  %v11606_v1 = vld [vmem:[%s14139_s22 + $0x10] sm:$0xff] }
 0x100   : > { %9605 = vmatpush1.bf16.msra.mxu1 %v9604_v25 }
 0x101   : > { %8028 = vmatmul.mubr.msk.f32.gmra.mrb[42].mxu0 %vm734_vm3, %v678_v8  ;;  %v1425_v8 = vld [vmem:[%s10942_s26 + $0x3a] sm:$0xff]  ;;  %9607 = vmatprep.subr.bf16.mxu1 %v9606_v28 }
 0x102   : > { %1369 = vmatprep.mubr.f32.mxu0 %v14111_v7 }
 0x105   : > { %8029 = vmatmul.mubr.msk.f32.gmra.mrb[44].mxu0 %vm734_vm3, %v679_v11  ;;  %v1427_v11 = vld [vmem:[%s10942_s26 + $0x4a] sm:$0xff] }
 0x106   : > { %1375 = vmatprep.mubr.f32.mxu0 %v14111_v7 }
 0x109   : > { %8030 = vmatmul.mubr.msk.f32.gmra.mrb[46].mxu0 %vm734_vm3, %v680_v13  ;;  %v1429_v13 = vld [vmem:[%s10942_s26 + $0x5a] sm:$0xff] }
 0x10a   : > { %1381 = vmatprep.mubr.f32.mxu0 %v14111_v7 }
 0x10d   : > { %8031 = vmatmul.mubr.msk.f32.gmra.mrb[48].mxu0 %vm734_vm3, %v681_v14  ;;  %v1430_v14 = vld [vmem:[%s10942_s26 + $0x62] sm:$0xff] }
 0x10e   : > { %1387 = vmatprep.mubr.f32.mxu0 %v14111_v7 }
 0x111   : > { %8032 = vmatmul.mubr.msk.f32.gmra.mrb[50].mxu0 %vm734_vm3, %v682_v15  ;;  %v1431_v15 = vld [vmem:[%s10942_s26 + $0x6a] sm:$0xff] }
 0x112   : > { %1393 = vmatprep.mubr.f32.mxu0 %v14111_v7 }
 0x115   : > { %8033 = vmatmul.mubr.msk.f32.gmra.mrb[52].mxu0 %vm734_vm3, %v683_v16  ;;  %v1432_v16 = vld [vmem:[%s10942_s26 + $0x72] sm:$0xff] }
 0x116   : > { %1399 = vmatprep.mubr.f32.mxu0 %v14111_v7 }
 0x119   : > { %8034 = vmatmul.mubr.msk.f32.gmra.mrb[54].mxu0 %vm734_vm3, %v684_v17  ;;  %v1433_v17 = vld [vmem:[%s10942_s26 + $0x7a] sm:$0xff] }
 0x11a   : > { %1405 = vmatprep.mubr.f32.mxu0 %v14111_v7 }
 0x11d   : > { %8035 = vmatmul.mubr.msk.f32.gmra.mrb[56].mxu0 %vm734_vm3, %v685_v18  ;;  %v1434_v18 = vld [vmem:[%s10942_s26 + $0x82] sm:$0xff] }
 0x11e   : > { %1411 = vmatprep.mubr.f32.mxu0 %v14111_v7 }
 0x121   : > { %8036 = vmatmul.mubr.msk.f32.gmra.mrb[58].mxu0 %vm734_vm3, %v686_v32  ;;  %v9608_v32 = vpack.c.bf16 %v8111_v30, %v8109_v29 }
 0x122   : > { %1617 = vmatprep.mubr.f32.mxu0 %v14111_v7 }
 0x123   : > { %9609 = vmatpush1.bf16.msra.mxu1 %v9608_v32 }
 0x124   : > { %9611 = vmatprep.subr.bf16.mxu1 %v9610_v35 }
 0x125   : > { %8047 = vmatmul.mubr.msk.f32.vlgmr.msra.gmra.mrb[0].mxu0 %vm734_vm3, %v1418_v39  ;;  %v9612_v39 = vpack.c.bf16 %v8115_v37, %v8113_v36 }
 0x126   : > { %1623 = vmatprep.mubr.f32.mxu0 %v14111_v7 }
 0x127   : > { %9613 = vmatpush1.bf16.msra.mxu1 %v9612_v39  ;;  %v2033_v39 = vpop.permute.xlu1 %2032 }
 0x128   : > { %9615 = vmatprep.subr.bf16.mxu1 %v9614_v43 }
 0x129   : > { %8048 = vmatmul.mubr.msk.f32.gmra.mrb[2].mxu0 %vm734_vm3, %v1419_v46  ;;  %v1442_v46 = vld [vmem:[%s10942_s26 + $0xc2] sm:$0xff] }
 0x12a   : > { %1629 = vmatprep.mubr.f32.mxu0 %v14111_v7 }
 0x12b   : > { %9617 = vmatpush1.bf16.msra.mxu1 %v9616_v47  ;;  %v2038_v56 = vpop.permute.xlu1 %2037 }
 0x12c   : > { %9619 = vmatprep.subr.bf16.mxu1 %v9618_v50 }
 0x12d   : > { %8049 = vmatmul.mubr.msk.f32.gmra.mrb[4].mxu0 %vm734_vm3, %v1420_v53  ;;  %v1443_v53 = vld [vmem:[%s10942_s26 + $0xca] sm:$0xff] }
 0x12e   : > { %1635 = vmatprep.mubr.f32.mxu0 %v14111_v7 }
 0x12f   : > { %9621 = vmatpush1.bf16.msra.mxu1 %v9620_v54 }
 0x130   : > { %9623 = vmatprep.subr.bf16.mxu1 %v9622_v57 }
 0x131   : > { %8050 = vmatmul.mubr.msk.f32.gmra.mrb[6].mxu0 %vm734_vm3, %v1421_v60  ;;  %v1444_v60 = vld [vmem:[%s10942_s26 + $0xd2] sm:$0xff] }
 0x132   : > { %1641 = vmatprep.mubr.f32.mxu0 %v14111_v7 }
 0x133   : > { %9625 = vmatpush1.bf16.msra.mxu1 %v9624_v61 }
 0x134   : > { %9627 = vmatprep.subr.bf16.mxu1 %v9626_v0  ;;  %v11601_v0 = vld [vmem:[%s14139_s22] sm:$0xff] }
 0x135   : > { %8051 = vmatmul.mubr.msk.f32.gmra.mrb[8].mxu0 %vm734_vm3, %v1422_v3  ;;  %v1445_v3 = vld [vmem:[%s10942_s26 + $0xda] sm:$0xff] }
 0x136   : > { %1647 = vmatprep.mubr.f32.mxu0 %v14111_v7 }
 0x137   : > { %9629 = vmatpush1.bf16.msra.mxu1 %v9628_v4 }
 0x139   : > { %8052 = vmatmul.mubr.msk.f32.gmra.mrb[10].mxu0 %vm734_vm3, %v1423_v5  ;;  %v1446_v5 = vld [vmem:[%s10942_s26 + $0xe2] sm:$0xff] }
 0x13a   : > { %1653 = vmatprep.mubr.f32.mxu0 %v14111_v7 }
 0x13d   : > { %8053 = vmatmul.mubr.msk.f32.gmra.mrb[12].mxu0 %vm734_vm3, %v1424_v6  ;;  %v1447_v6 = vld [vmem:[%s10942_s26 + $0xea] sm:$0x3f]  ;;  %s650_s26 = scalar_lea.vmem [#allocation5], %s7963_s4 }
 0x13e   : > { %1659 = vmatprep.mubr.f32.mxu0 %v14111_v7  ;;  %s7900_s2 = sshll.u32 %s650_s26, 4  ;;  %s14039_s2 = int_to_ptr.vmem [resolvable:$true] %s7900_s2 }
 0x13f   : > { %s10658_s23 = scalar_lea.vmem %s14039_s2, 128 }
 0x140   : > { %p10659_p11 = scmp.ne.s32.totalorder %s14039_s2, %s10658_s23 }
 0x141   : > { %8054 = vmatmul.mubr.msk.f32.gmra.mrb[14].mxu0 %vm734_vm3, %v1425_v8  ;;  %v2602_v8 = vld [vmem:[%s14139_s22 + $0x8] sm:$0xff] }
 0x142   : > { %1665 = vmatprep.mubr.f32.mxu0 %v14111_v7  ;;  %p10660_p12 = pnand %p10659_p11, %p10876_p5 }
 0x144   : > { %p10661_p13 = pneg %p10660_p12 }
 0x145   : > { %8055 = vmatmul.mubr.msk.f32.gmra.mrb[16].mxu0 %vm734_vm3, %v1426_v9  ;;  %v2604_v9 = vld [vmem:[%s14139_s22 + $0x18] sm:$0xff] }
 0x146   : > { %1671 = vmatprep.mubr.f32.mxu0 %v14111_v7 }
 0x149   : > { %8056 = vmatmul.mubr.msk.f32.gmra.mrb[18].mxu0 %vm734_vm3, %v1427_v11  ;;  %v9630_v11 = vpack.c.bf16 %v2604_v9, %v2602_v8 }
 0x14a   : > { %1677 = vmatprep.mubr.f32.mxu0 %v14111_v7 }
 0x14b   : > { %9631 = vmatprep.subr.bf16.mxu1 %v9630_v11 }
 0x14d   : > { %8057 = vmatmul.mubr.msk.f32.gmra.mrb[20].mxu0 %vm734_vm3, %v1428_v12  ;;  %v11565_v12 = vshrl.u32 %v1860_v40, 7 }
 0x14e   : > { %1683 = vmatprep.mubr.f32.mxu0 %v14111_v7 }
 0x14f   : > { %14140 = vst [vmem:[#allocation14_spill] sm:$0xff] %v11565_v12 }
 0x151   : > { %8058 = vmatmul.mubr.msk.f32.gmra.mrb[22].mxu0 %vm734_vm3, %v1429_v13  ;;  %v14114_v13 = vsub.s32 0, %v11565_v12 }
 0x152   : > { %1689 = vmatprep.mubr.f32.mxu0 %v14111_v7 }
 0x155   : > { %8059 = vmatmul.mubr.msk.f32.gmra.mrb[24].mxu0 %vm734_vm3, %v1430_v14  ;;  %v1858_v14 = vld [vmem:[%s14141_s29] sm:$0x3]  ;;  %s8582_s29 = sshll.u32 %s10859_s3, 7  ;;  %s10727_s3 = smov [#allocation5]  }
 0x156   : > { %1695 = vmatprep.mubr.f32.mxu0 %v14111_v7  ;;  %s10662_s4 = sshll.u32 %s10727_s3, 4  ;;  %s10663_s4 = int_to_ptr.vmem [resolvable:$false] %s10662_s4 }
 0x157   : > { %s10664_s1 = scalar_lea.vmem %s10663_s4, 256  ;;  %p10665_p0 = scmp.lt.s32.totalorder %s14039_s2, %s10663_s4 }
 0x158   : > { %p10666_p1 = scmp.lt.s32.totalorder %s10664_s1, %s10658_s23 }
 0x159   : > { %8060 = vmatmul.mubr.msk.f32.gmra.mrb[26].mxu0 %vm734_vm3, %v1431_v15  ;;  %v14113_v15 = vsub.s32 1, %v11565_v12  ;;  %v8244_v12 = vld [vmem:[%s14139_s22 + $0x518] sm:$0xff] }
 0x15a   : > { %1701 = vmatprep.mubr.f32.mxu0 %v14111_v7  ;;  %p10667_p2 = por %p10666_p1, %p10665_p0 }
 0x15c   : > { %p10668_p3 = pnand %p10667_p2, %p10661_p13 }
 0x15d   : > { %8061 = vmatmul.mubr.msk.f32.gmra.mrb[28].mxu0 %vm734_vm3, %v1432_v16  ;;  %v11574_v16 = vrot.slane %v1858_v14, %v14114_v13  ;;  %v8242_v13 = vld [vmem:[%s14139_s22 + $0x508] sm:$0xff] }
 0x15e   : > { %1707 = vmatprep.mubr.f32.mxu0 %v14111_v7 }
 0x161   : > { %8062 = vmatmul.mubr.msk.f32.gmra.mrb[30].mxu0 %vm734_vm3, %v1433_v17  ;;  %v11578_v17 = vrot.slane %v1858_v14, %v14113_v15  ;;  %v8240_v15 = vld [vmem:[%s14139_s22 + $0x4f8] sm:$0xff] }
 0x162   : > { %1713 = vmatprep.mubr.f32.mxu0 %v14111_v7 }
 0x165   : > { %8063 = vmatmul.mubr.msk.f32.gmra.mrb[32].mxu0 %vm734_vm3, %v1434_v18 }
 0x166   : > { %1719 = vmatprep.mubr.f32.mxu0 %v14111_v7 }
 0x169   : > { %8064 = vmatmul.mubr.msk.f32.gmra.mrb[34].mxu0 %vm734_vm3, %v1435_v10 }
 0x16a   : > { %1725 = vmatprep.mubr.f32.mxu0 %v14111_v7 }
 0x16d   : > { %8065 = vmatmul.mubr.msk.f32.gmra.mrb[36].mxu0 %vm734_vm3, %v1436_v19 }
 0x16e   : > { %1731 = vmatprep.mubr.f32.mxu0 %v14111_v7 }
 0x171   : > { %8066 = vmatmul.mubr.msk.f32.gmra.mrb[38].mxu0 %vm734_vm3, %v1437_v20  ;;  %v2023_v20 = vpop.permute.xlu0 %2022 }
 0x172   : > { %1737 = vmatprep.mubr.f32.mxu0 %v14111_v7 }
 0x175   : > { %8067 = vmatmul.mubr.msk.f32.gmra.mrb[40].mxu0 %vm734_vm3, %v1438_v21  ;;  %v2028_v32 = vpop.permute.xlu0 %2027 }
 0x176   : > { %1743 = vmatprep.mubr.f32.mxu0 %v14111_v7 }
 0x179   : > { %8068 = vmatmul.mubr.msk.f32.gmra.mrb[42].mxu0 %vm734_vm3, %v1439_v24  ;;  %v2043_v14 = vpop.permute.xlu0 %2042 }
 0x17a   : > { %1749 = vmatprep.mubr.f32.mxu0 %v14111_v7 }
 0x17d   : > { %8069 = vmatmul.mubr.msk.f32.gmra.mrb[44].mxu0 %vm734_vm3, %v1440_v31 }
 0x17e   : > { %1755 = vmatprep.mubr.f32.mxu0 %v14111_v7 }
 0x181   : > { %8070 = vmatmul.mubr.msk.f32.gmra.mrb[46].mxu0 %vm734_vm3, %v1441_v38 }
 0x182   : > { %1761 = vmatprep.mubr.f32.mxu0 %v14111_v7 }
 0x185   : > { %8071 = vmatmul.mubr.msk.f32.gmra.mrb[48].mxu0 %vm734_vm3, %v1442_v46 }
 0x186   : > { %1767 = vmatprep.mubr.f32.mxu0 %v14111_v7 }
 0x189   : > { %8072 = vmatmul.mubr.msk.f32.gmra.mrb[50].mxu0 %vm734_vm3, %v1443_v53 }
 0x18a   : > { %1773 = vmatprep.mubr.f32.mxu0 %v14111_v7 }
 0x18d   : > { %8073 = vmatmul.mubr.msk.f32.gmra.mrb[52].mxu0 %vm734_vm3, %v1444_v60 }
 0x18e   : > { %1779 = vmatprep.mubr.f32.mxu0 %v14111_v7 }
 0x191   : > { %8074 = vmatmul.mubr.msk.f32.gmra.mrb[54].mxu0 %vm734_vm3, %v1445_v3 }
 0x192   : > { %1785 = vmatprep.mubr.f32.mxu0 %v14111_v7 }
 0x195   : > { %8075 = vmatmul.mubr.msk.f32.gmra.mrb[56].mxu0 %vm734_vm3, %v1446_v5  ;;  %v11614_v5 = vld [vmem:[%s14139_s22 + $0x28] sm:$0xff] }
 0x196   : > { %1791 = vmatprep.mubr.f32.mxu0 %v14111_v7  ;;  %v8238_v7 = vld [vmem:[%s14139_s22 + $0x4e8] sm:$0xff] }
 0x199   : > { %8076 = vmatmul.mubr.msk.f32.gmra.mrb[58].mxu0 %vm734_vm3, %v1447_v6  ;;  %v11619_v6 = vld [vmem:[%s14139_s22 + $0x38] sm:$0xff] }
 0x1f8   : > { %v1619_v18 = vpop.f32.mrb[0].mxu0 }
 0x1f9   : > { %v1870_v10 = vadd.f32 %v11574_v16, %v1619_v18  ;;  %v1621_v19 = vpop.f32.mrb[1].mxu0 }
 0x1fa   : > { %v1871_v21 = vadd.f32 %v11578_v17, %v1621_v19 }
 0x1fb   : > { %v1930_v22 = vmax.f32 %v1870_v10, 0.0 }
 0x1fc   : > { %v1931_v23 = vmax.f32 %v1871_v21, 0.0  ;;  %v1625_v24 = vpop.f32.mrb[2].mxu0  ;;  %v9632_v21 = vpack.c.bf16 %v11606_v1, %v11601_v0 }
 0x1fd   : > { %v2170_v25 = vmul.f32 %v2023_v20, %v1930_v22  ;;  %v1872_v26 = vadd.f32 %v11574_v16, %v1625_v24  ;;  %v1627_v27 = vpop.f32.mrb[3].mxu0 }
 0x1fe   : > { %v2171_v28 = vmul.f32 %v2023_v20, %v1931_v23  ;;  %v1873_v29 = vadd.f32 %v11578_v17, %v1627_v27 }
 0x1ff   : > { %v2300_v30 = vrot.slane %v2170_v25, 7  ;;  %v1932_v31 = vmax.f32 %v1872_v26, 0.0  ;;  %v9634_v26 = vpack.c.bf16 %v11619_v6, %v11614_v5 }
 0x200   : > { %v2301_v33 = vrot.slane %v2171_v28, 7  ;;  %v1933_v34 = vmax.f32 %v1873_v29, 0.0  ;;  %v1631_v35 = vpop.f32.mrb[4].mxu0 }
 0x201   : > { %2478 = vst [vmem:[#allocation2] sm:$0xfe] %v2300_v30  ;;  %v2172_v36 = vmul.f32 %v2028_v32, %v1932_v31  ;;  %v1874_v37 = vadd.f32 %v11574_v16, %v1631_v35  ;;  %v1633_v38 = vpop.f32.mrb[5].mxu0 }
 0x202   : > { %2480 = vst.msk [vmem:[#allocation2 + $0x8] sm:$0xfe] %vm2479_vm5, %v2301_v33  ;;  %v2173_v40 = vmul.f32 %v2028_v32, %v1933_v34  ;;  %v1875_v41 = vadd.f32 %v11578_v17, %v1633_v38 }
 0x203   : > { %v2302_v42 = vrot.slane %v2172_v36, 7  ;;  %v1934_v43 = vmax.f32 %v1874_v37, 0.0  ;;  %v11637_v36 = vld [vmem:[%s14139_s22 + $0x20] sm:$0xff]  ;;  %v2048_v37 = vpop.permute.xlu1 %2047 }
 0x204   : > { %v2304_v44 = vrot.slane %v2173_v40, 7  ;;  %v1935_v45 = vmax.f32 %v1875_v41, 0.0  ;;  %v1637_v46 = vpop.f32.mrb[6].mxu0 }
 0x205   : > { %v11587_v47 = vsel %vm2299_vm6, %v2300_v30, %v2302_v42  ;;  %v2174_v48 = vmul.f32 %v2033_v39, %v1934_v43  ;;  %v1876_v49 = vadd.f32 %v11574_v16, %v1637_v46  ;;  %v1639_v50 = vpop.f32.mrb[7].mxu0  ;;  %v2607_v43 = vld [vmem:[%s14139_s22 + $0x30] sm:$0xff] }
 0x206   : > { %2481 = vst [vmem:[#allocation2 + $0x10] sm:$0xff] %v11587_v47  ;;  %v2305_v51 = vsel %vm2299_vm6, %v2301_v33, %v2304_v44  ;;  %v2175_v52 = vmul.f32 %v2033_v39, %v1935_v45  ;;  %v1877_v53 = vadd.f32 %v11578_v17, %v1639_v50  ;;  %v2780_v41 = vrot.slane %v11587_v47, 1  ;;  %v2610_v50 = vld [vmem:[%s14139_s22 + $0x48] sm:$0xff]  ;;  %v2612_v47 = vld [vmem:[%s14139_s22 + $0x58] sm:$0xff] }
 0x207   : > { %2483 = vst.msk [vmem:[#allocation2 + $0x18] sm:$0xff] %vm2482_vm7, %v2305_v51  ;;  %v2306_v54 = vrot.slane %v2174_v48, 7  ;;  %v1936_v55 = vmax.f32 %v1876_v49, 0.0 }
 0x208   : > { %v2308_v57 = vrot.slane %v2175_v52, 7  ;;  %v1937_v58 = vmax.f32 %v1877_v53, 0.0  ;;  %v1643_v59 = vpop.f32.mrb[8].mxu0  ;;  %v2657_v11 = vld [vmem:[#allocation2] sm:$0xfe] }
 0x209   : > { %v11595_v60 = vsel %vm2299_vm6, %v2302_v42, %v2306_v54  ;;  %v2176_v61 = vmul.f32 %v2038_v56, %v1936_v55  ;;  %v1878_v62 = vadd.f32 %v11574_v16, %v1643_v59  ;;  %v1645_v63 = vpop.f32.mrb[9].mxu0  ;;  %v2658_v20 = vld [vmem:[#allocation2 + $0x8] sm:$0xfe]  ;;  %v2779_v31 = vrot.slane %v2657_v11, 1 }
 0x20a   : > { %2484 = vst [vmem:[#allocation2 + $0x20] sm:$0xff] %v11595_v60  ;;  %v2309_v2 = vsel %vm2299_vm6, %v2304_v44, %v2308_v57  ;;  %v2177_v3 = vmul.f32 %v2038_v56, %v1937_v58  ;;  %v1879_v4 = vadd.f32 %v11578_v17, %v1645_v63  ;;  %v2782_v34 = vrot.slane %v2658_v20, 1 }
 0x20b   : > { %2485 = vst.msk [vmem:[#allocation2 + $0x28] sm:$0xff] %vm2482_vm7, %v2309_v2  ;;  %v2310_v8 = vrot.slane %v2176_v61, 7  ;;  %v1938_v9 = vmax.f32 %v1878_v62, 0.0  ;;  %v2785_v42 = vrot.slane %v11595_v60, 1  ;;  %v9636_v59 = vpack.c.bf16 %v2607_v43, %v11637_v36  ;;  %v2053_v61 = vpop.permute.xlu0 %2052 }
 0x20c   : > { %v2312_v18 = vrot.slane %v2177_v3, 7  ;;  %v1939_v10 = vmax.f32 %v1879_v4, 0.0  ;;  %v1649_v19 = vpop.f32.mrb[10].mxu0  ;;  %v9638_v2 = vpack.c.bf16 %v2612_v47, %v2610_v50  ;;  %v2609_v3 = vld [vmem:[%s14139_s22 + $0x40] sm:$0xff]  ;;  %v2611_v4 = vld [vmem:[%s14139_s22 + $0x50] sm:$0xff] }
 0x20d   : > { %v11625_v22 = vsel %vm2299_vm6, %v2306_v54, %v2310_v8  ;;  %v2178_v23 = vmul.f32 %v2043_v14, %v1938_v9  ;;  %v1880_v24 = vadd.f32 %v11574_v16, %v1649_v19  ;;  %v1651_v25 = vpop.f32.mrb[11].mxu0  ;;  %v2781_v54 = vsel %vm2778_vm8, %v2779_v31, %v2780_v41 }
 0x20e   : > { %2486 = vst [vmem:[#allocation2 + $0x30] sm:$0xff] %v11625_v22  ;;  %v2313_v27 = vsel %vm2299_vm6, %v2308_v57, %v2312_v18  ;;  %v2179_v28 = vmul.f32 %v2043_v14, %v1939_v10  ;;  %v1881_v29 = vadd.f32 %v11578_v17, %v1651_v25  ;;  %v2544_v30 = vld [vmem:[#allocation2 + $0x18] sm:$0xff]  ;;  %v2786_v1 = vsel %vm2778_vm8, %v2780_v41, %v2785_v42  ;;  %v2614_v14 = vld [vmem:[%s14139_s22 + $0x68] sm:$0xff] }
 0x20f   : > { %2487 = vst.msk [vmem:[#allocation2 + $0x38] sm:$0xff] %vm2482_vm7, %v2313_v27  ;;  %v2314_v32 = vrot.slane %v2178_v23, 7  ;;  %v1940_v33 = vmax.f32 %v1880_v24, 0.0  ;;  %v2783_v35 = vrot.slane %v2544_v30, 1  ;;  %v2789_v23 = vrot.slane %v11625_v22, 1  ;;  %v2615_v22 = vld [vmem:[%s14139_s22 + $0x70] sm:$0xff] }
 0x210   : > { %v2316_v38 = vrot.slane %v2179_v28, 7  ;;  %v1941_v39 = vmax.f32 %v1881_v29, 0.0  ;;  %v1655_v40 = vpop.f32.mrb[12].mxu0  ;;  %v9640_v27 = vpack.c.bf16 %v2611_v4, %v2609_v3  ;;  %v2058_v28 = vpop.permute.xlu1 %2057  ;;  %v2620_v41 = vld [vmem:[%s14139_s22 + $0x98] sm:$0xff] }
 0x211   : > { %v11645_v44 = vsel %vm2299_vm6, %v2310_v8, %v2314_v32  ;;  %v2180_v45 = vmul.f32 %v2048_v37, %v1940_v33  ;;  %v1882_v46 = vadd.f32 %v11574_v16, %v1655_v40  ;;  %v1657_v48 = vpop.f32.mrb[13].mxu0  ;;  %v2784_v49 = vsel %vm2778_vm8, %v2782_v34, %v2783_v35  ;;  %v2613_v34 = vld [vmem:[%s14139_s22 + $0x60] sm:$0xff]  ;;  %v2618_v40 = vld [vmem:[%s14139_s22 + $0x88] sm:$0xff] }
 0x212   : > { %2488 = vst [vmem:[#allocation2 + $0x40] sm:$0xff] %v11645_v44  ;;  %v2317_v51 = vsel %vm2299_vm6, %v2312_v18, %v2316_v38  ;;  %v2181_v52 = vmul.f32 %v2048_v37, %v1941_v39  ;;  %v1883_v53 = vadd.f32 %v11578_v17, %v1657_v48  ;;  %8133 = vmatprep.mubr.msk.f32.mxu1 %vm2482_vm7, %v2784_v49  ;;  %v2546_v55 = vld [vmem:[#allocation2 + $0x28] sm:$0xff]  ;;  %v2616_v18 = vld [vmem:[%s14139_s22 + $0x78] sm:$0xff] }
 0x213   : > { %2489 = vst.msk [vmem:[#allocation2 + $0x48] sm:$0xff] %vm2482_vm7, %v2317_v51  ;;  %v2318_v56 = vrot.slane %v2180_v45, 7  ;;  %v1942_v57 = vmax.f32 %v1882_v46, 0.0  ;;  %3052 = vmatmul.mubr.f32.vlgmr.msra.gmra.mrb[0].mxu1 %v2781_v54  ;;  %v2787_v58 = vrot.slane %v2546_v55, 1  ;;  %v9642_v33 = vpack.c.bf16 %v2616_v18, %v2614_v14 }
 0x214   : > { %v2320_v62 = vrot.slane %v2181_v52, 7  ;;  %v1943_v63 = vmax.f32 %v1883_v53, 0.0  ;;  %v1661_v0 = vpop.f32.mrb[14].mxu0  ;;  %9633 = vmatpush1.bf16.msra.mxu1 %v9632_v21  ;;  %v2790_v48 = vsel %vm2778_vm8, %v2785_v42, %v2789_v23  ;;  %v9644_v52 = vpack.c.bf16 %v2615_v22, %v2613_v34  ;;  %v2063_v53 = vpop.permute.xlu0 %2062  ;;  %v2617_v42 = vld [vmem:[%s14139_s22 + $0x80] sm:$0xff]  ;;  %v2628_v34 = vld [vmem:[%s14139_s22 + $0xd8] sm:$0xff] }
 0x215   : > { %v11672_v5 = vsel %vm2299_vm6, %v2314_v32, %v2318_v56  ;;  %v2182_v6 = vmul.f32 %v2053_v61, %v1942_v57  ;;  %v1884_v8 = vadd.f32 %v11574_v16, %v1661_v0  ;;  %v1663_v9 = vpop.f32.mrb[15].mxu0  ;;  %v2788_v11 = vsel %vm2778_vm8, %v2783_v35, %v2787_v58  ;;  %9635 = vmatprep.subr.bf16.mxu1 %v9634_v26 }
 0x216   : > { %2490 = vst [vmem:[#allocation2 + $0x50] sm:$0xff] %v11672_v5  ;;  %v2321_v10 = vsel %vm2299_vm6, %v2316_v38, %v2320_v62  ;;  %v2183_v19 = vmul.f32 %v2053_v61, %v1943_v63  ;;  %v1885_v20 = vadd.f32 %v11578_v17, %v1663_v9  ;;  %8134 = vmatprep.mubr.msk.f32.mxu1 %vm2482_vm7, %v2788_v11  ;;  %v2548_v21 = vld [vmem:[#allocation2 + $0x38] sm:$0xff]  ;;  %v2793_v32 = vrot.slane %v11645_v44, 1 }
 0x217   : > { %2491 = vst.msk [vmem:[#allocation2 + $0x58] sm:$0xff] %vm2482_vm7, %v2321_v10  ;;  %v2322_v24 = vrot.slane %v2182_v6, 7  ;;  %v1944_v25 = vmax.f32 %v1884_v8, 0.0  ;;  %3058 = vmatmul.mubr.f32.gmra.mrb[2].mxu1 %v2786_v1  ;;  %v2791_v26 = vrot.slane %v2548_v21, 1  ;;  %v9646_v60 = vpack.c.bf16 %v2620_v41, %v2618_v40  ;;  %v2622_v1 = vld [vmem:[%s14139_s22 + $0xa8] sm:$0xff] }
 0x218   : > { %v2324_v29 = vrot.slane %v2183_v19, 7  ;;  %v1945_v30 = vmax.f32 %v1885_v20, 0.0  ;;  %v1667_v31 = vpop.f32.mrb[16].mxu0  ;;  %9637 = vmatpush1.bf16.msra.mxu1 %v9636_v59  ;;  %v2794_v57 = vsel %vm2778_vm8, %v2789_v23, %v2793_v32  ;;  %v2797_v9 = vrot.slane %v11672_v5, 1  ;;  %v2068_v19 = vpop.permute.xlu1 %2067  ;;  %v2623_v5 = vld [vmem:[%s14139_s22 + $0xb0] sm:$0xff] }
 0x219   : > { %v11696_v35 = vsel %vm2299_vm6, %v2318_v56, %v2322_v24  ;;  %v2184_v36 = vmul.f32 %v2058_v28, %v1944_v25  ;;  %v1886_v37 = vadd.f32 %v11574_v16, %v1667_v31  ;;  %v1669_v38 = vpop.f32.mrb[17].mxu0  ;;  %v2792_v39 = vsel %vm2778_vm8, %v2787_v58, %v2791_v26  ;;  %9639 = vmatprep.subr.bf16.mxu1 %v9638_v2  ;;  %v2619_v58 = vld [vmem:[%s14139_s22 + $0x90] sm:$0xff]  ;;  %v2624_v2 = vld [vmem:[%s14139_s22 + $0xb8] sm:$0xff] }
 0x21a   : > { %2492 = vst [vmem:[#allocation2 + $0x60] sm:$0xff] %v11696_v35  ;;  %v2325_v43 = vsel %vm2299_vm6, %v2320_v62, %v2324_v29  ;;  %v2185_v45 = vmul.f32 %v2058_v28, %v1945_v30  ;;  %v1887_v46 = vadd.f32 %v11578_v17, %v1669_v38  ;;  %8135 = vmatprep.mubr.msk.f32.mxu1 %vm2482_vm7, %v2792_v39  ;;  %v2550_v49 = vld [vmem:[#allocation2 + $0x48] sm:$0xff] }
 0x21b   : > { %2493 = vst.msk [vmem:[#allocation2 + $0x68] sm:$0xff] %vm2482_vm7, %v2325_v43  ;;  %v2326_v50 = vrot.slane %v2184_v36, 7  ;;  %v1946_v47 = vmax.f32 %v1886_v37, 0.0  ;;  %3064 = vmatmul.mubr.f32.gmra.mrb[4].mxu1 %v2790_v48  ;;  %v2795_v51 = vrot.slane %v2550_v49, 1  ;;  %v9648_v10 = vpack.c.bf16 %v2619_v58, %v2617_v42 }
 0x21c   : > { %v2328_v54 = vrot.slane %v2185_v45, 7  ;;  %v1947_v55 = vmax.f32 %v1887_v46, 0.0  ;;  %v1673_v56 = vpop.f32.mrb[18].mxu0  ;;  %9641 = vmatpush1.bf16.msra.mxu1 %v9640_v27  ;;  %v9650_v25 = vpack.c.bf16 %v2624_v2, %v2622_v1  ;;  %v2798_v38 = vsel %vm2778_vm8, %v2793_v32, %v2797_v9  ;;  %v2073_v46 = vpop.permute.xlu0 %2072  ;;  %v2625_v32 = vld [vmem:[%s14139_s22 + $0xc0] sm:$0xff] }
 0x21d   : > { %v11724_v59 = vsel %vm2299_vm6, %v2322_v24, %v2326_v50  ;;  %v2186_v61 = vmul.f32 %v2063_v53, %v1946_v47  ;;  %v1888_v62 = vadd.f32 %v11574_v16, %v1673_v56  ;;  %v1675_v63 = vpop.f32.mrb[19].mxu0  ;;  %v2796_v0 = vsel %vm2778_vm8, %v2791_v26, %v2795_v51  ;;  %9643 = vmatprep.subr.bf16.mxu1 %v9642_v33  ;;  %v2621_v26 = vld [vmem:[%s14139_s22 + $0xa0] sm:$0xff]  ;;  %v2626_v33 = vld [vmem:[%s14139_s22 + $0xc8] sm:$0xff] }
 0x21e   : > { %2494 = vst [vmem:[#allocation2 + $0x70] sm:$0xff] %v11724_v59  ;;  %v2329_v3 = vsel %vm2299_vm6, %v2324_v29, %v2328_v54  ;;  %v2187_v4 = vmul.f32 %v2063_v53, %v1947_v55  ;;  %v1889_v6 = vadd.f32 %v11578_v17, %v1675_v63  ;;  %8136 = vmatprep.mubr.msk.f32.mxu1 %vm2482_vm7, %v2796_v0  ;;  %v2552_v8 = vld [vmem:[#allocation2 + $0x58] sm:$0xff]  ;;  %v2801_v24 = vrot.slane %v11696_v35, 1 }
 0x21f   : > { %2495 = vst.msk [vmem:[#allocation2 + $0x78] sm:$0xff] %vm2482_vm7, %v2329_v3  ;;  %v2330_v11 = vrot.slane %v2186_v61, 7  ;;  %v1948_v14 = vmax.f32 %v1888_v62, 0.0  ;;  %3070 = vmatmul.mubr.f32.gmra.mrb[6].mxu1 %v2794_v57  ;;  %v2799_v18 = vrot.slane %v2552_v8, 1  ;;  %v9652_v45 = vpack.c.bf16 %v2623_v5, %v2621_v26  ;;  %v2630_v57 = vld [vmem:[%s14139_s22 + $0xe8] sm:$0xff]  ;;  %v2636_v26 = vld [vmem:[%s14139_s22 + $0x118] sm:$0xff] }
 0x220   : > { %v2332_v20 = vrot.slane %v2187_v4, 7  ;;  %v1949_v21 = vmax.f32 %v1889_v6, 0.0  ;;  %v1679_v23 = vpop.f32.mrb[20].mxu0  ;;  %9645 = vmatpush1.bf16.msra.mxu1 %v9644_v52  ;;  %v2802_v47 = vsel %vm2778_vm8, %v2797_v9, %v2801_v24  ;;  %v9654_v44 = vpack.c.bf16 %v2628_v34, %v2626_v33  ;;  %v2078_v4 = vpop.permute.xlu1 %2077 }
 0x221   : > { %v11748_v27 = vsel %vm2299_vm6, %v2326_v50, %v2330_v11  ;;  %v2188_v28 = vmul.f32 %v2068_v19, %v1948_v14  ;;  %v1890_v29 = vadd.f32 %v11574_v16, %v1679_v23  ;;  %v1681_v30 = vpop.f32.mrb[21].mxu0  ;;  %v2800_v31 = vsel %vm2778_vm8, %v2795_v51, %v2799_v18  ;;  %9647 = vmatprep.subr.bf16.mxu1 %v9646_v60  ;;  %v2627_v51 = vld [vmem:[%s14139_s22 + $0xd0] sm:$0xff]  ;;  %v2632_v60 = vld [vmem:[%s14139_s22 + $0xf8] sm:$0xff] }
 0x222   : > { %2496 = vst [vmem:[#allocation2 + $0x80] sm:$0xff] %v11748_v27  ;;  %v2333_v22 = vsel %vm2299_vm6, %v2328_v54, %v2332_v20  ;;  %v2189_v36 = vmul.f32 %v2068_v19, %v1949_v21  ;;  %v1891_v37 = vadd.f32 %v11578_v17, %v1681_v30  ;;  %8137 = vmatprep.mubr.msk.f32.mxu1 %vm2482_vm7, %v2800_v31  ;;  %v2554_v39 = vld [vmem:[#allocation2 + $0x68] sm:$0xff]  ;;  %v2805_v63 = vrot.slane %v11724_v59, 1  ;;  %v2631_v59 = vld [vmem:[%s14139_s22 + $0xf0] sm:$0xff] }
 0x223   : > { %2497 = vst.msk [vmem:[#allocation2 + $0x88] sm:$0xff] %vm2482_vm7, %v2333_v22  ;;  %v2334_v40 = vrot.slane %v2188_v28, 7  ;;  %v1950_v41 = vmax.f32 %v1890_v29, 0.0  ;;  %3076 = vmatmul.mubr.f32.gmra.mrb[8].mxu1 %v2798_v38  ;;  %v2803_v43 = vrot.slane %v2554_v39, 1  ;;  %v9656_v3 = vpack.c.bf16 %v2627_v51, %v2625_v32 }
 0x224   : > { %v2336_v48 = vrot.slane %v2189_v36, 7  ;;  %v1951_v49 = vmax.f32 %v1891_v37, 0.0  ;;  %v1685_v50 = vpop.f32.mrb[22].mxu0  ;;  %9649 = vmatpush1.bf16.msra.mxu1 %v9648_v10  ;;  %v9658_v14 = vpack.c.bf16 %v2632_v60, %v2630_v57  ;;  %v2806_v30 = vsel %vm2778_vm8, %v2801_v24, %v2805_v63  ;;  %v2083_v37 = vpop.permute.xlu0 %2082  ;;  %v2633_v24 = vld [vmem:[%s14139_s22 + $0x100] sm:$0xff] }
 0x225   : > { %v11776_v52 = vsel %vm2299_vm6, %v2330_v11, %v2334_v40  ;;  %v2190_v53 = vmul.f32 %v2073_v46, %v1950_v41  ;;  %v1892_v54 = vadd.f32 %v11574_v16, %v1685_v50  ;;  %v1687_v55 = vpop.f32.mrb[23].mxu0  ;;  %v2804_v56 = vsel %vm2778_vm8, %v2799_v18, %v2803_v43  ;;  %9651 = vmatprep.subr.bf16.mxu1 %v9650_v25  ;;  %v2629_v18 = vld [vmem:[%s14139_s22 + $0xe0] sm:$0xff]  ;;  %v2634_v25 = vld [vmem:[%s14139_s22 + $0x108] sm:$0xff] }
 0x226   : > { %2498 = vst [vmem:[#allocation2 + $0x90] sm:$0xff] %v11776_v52  ;;  %v2337_v42 = vsel %vm2299_vm6, %v2332_v20, %v2336_v48  ;;  %v2191_v58 = vmul.f32 %v2073_v46, %v1951_v49  ;;  %v1893_v61 = vadd.f32 %v11578_v17, %v1687_v55  ;;  %8138 = vmatprep.mubr.msk.f32.mxu1 %vm2482_vm7, %v2804_v56  ;;  %v2556_v62 = vld [vmem:[#allocation2 + $0x78] sm:$0xff]  ;;  %v2809_v11 = vrot.slane %v11748_v27, 1 }
 0x227   : > { %2499 = vst.msk [vmem:[#allocation2 + $0x98] sm:$0xff] %vm2482_vm7, %v2337_v42  ;;  %v2338_v0 = vrot.slane %v2190_v53, 7  ;;  %v1952_v1 = vmax.f32 %v1892_v54, 0.0  ;;  %3082 = vmatmul.mubr.f32.gmra.mrb[10].mxu1 %v2802_v47  ;;  %v2807_v2 = vrot.slane %v2556_v62, 1  ;;  %v9660_v36 = vpack.c.bf16 %v2631_v59, %v2629_v18  ;;  %v2638_v47 = vld [vmem:[%s14139_s22 + $0x128] sm:$0xff]  ;;  %v2644_v18 = vld [vmem:[%s14139_s22 + $0x158] sm:$0xff] }
 0x228   : > { %v2340_v6 = vrot.slane %v2191_v58, 7  ;;  %v1953_v8 = vmax.f32 %v1893_v61, 0.0  ;;  %v1691_v9 = vpop.f32.mrb[24].mxu0  ;;  %9653 = vmatpush1.bf16.msra.mxu1 %v9652_v45  ;;  %v2810_v41 = vsel %vm2778_vm8, %v2805_v63, %v2809_v11  ;;  %v9662_v35 = vpack.c.bf16 %v2636_v26, %v2634_v25  ;;  %v2088_v58 = vpop.permute.xlu1 %2087 }
 0x229   : > { %v11800_v10 = vsel %vm2299_vm6, %v2334_v40, %v2338_v0  ;;  %v2192_v19 = vmul.f32 %v2078_v4, %v1952_v1  ;;  %v1894_v20 = vadd.f32 %v11574_v16, %v1691_v9  ;;  %v1693_v21 = vpop.f32.mrb[25].mxu0  ;;  %v2808_v23 = vsel %vm2778_vm8, %v2803_v43, %v2807_v2  ;;  %9655 = vmatprep.subr.bf16.mxu1 %v9654_v44  ;;  %v2635_v43 = vld [vmem:[%s14139_s22 + $0x110] sm:$0xff]  ;;  %v2640_v44 = vld [vmem:[%s14139_s22 + $0x138] sm:$0xff] }
 0x22a   : > { %2500 = vst [vmem:[#allocation2 + $0xa0] sm:$0xff] %v11800_v10  ;;  %v2341_v5 = vsel %vm2299_vm6, %v2336_v48, %v2340_v6  ;;  %v2193_v28 = vmul.f32 %v2078_v4, %v1953_v8  ;;  %v1895_v29 = vadd.f32 %v11578_v17, %v1693_v21  ;;  %8139 = vmatprep.mubr.msk.f32.mxu1 %vm2482_vm7, %v2808_v23  ;;  %v2558_v31 = vld [vmem:[#allocation2 + $0x88] sm:$0xff]  ;;  %v2813_v55 = vrot.slane %v11776_v52, 1  ;;  %v2639_v52 = vld [vmem:[%s14139_s22 + $0x130] sm:$0xff] }
 0x22b   : > { %2501 = vst.msk [vmem:[#allocation2 + $0xa8] sm:$0xff] %vm2482_vm7, %v2341_v5  ;;  %v2342_v33 = vrot.slane %v2192_v19, 7  ;;  %v1954_v34 = vmax.f32 %v1894_v20, 0.0  ;;  %3088 = vmatmul.mubr.f32.gmra.mrb[12].mxu1 %v2806_v30  ;;  %v2811_v22 = vrot.slane %v2558_v31, 1  ;;  %v9664_v42 = vpack.c.bf16 %v2635_v43, %v2633_v24 }
 0x22c   : > { %v2344_v38 = vrot.slane %v2193_v28, 7  ;;  %v1955_v39 = vmax.f32 %v1895_v29, 0.0  ;;  %v1697_v40 = vpop.f32.mrb[26].mxu0  ;;  %9657 = vmatpush1.bf16.msra.mxu1 %v9656_v3  ;;  %v9666_v1 = vpack.c.bf16 %v2640_v44, %v2638_v47  ;;  %v2814_v21 = vsel %vm2778_vm8, %v2809_v11, %v2813_v55  ;;  %v2093_v29 = vpop.permute.xlu0 %2092  ;;  %v2641_v11 = vld [vmem:[%s14139_s22 + $0x140] sm:$0xff] }
 0x22d   : > { %v11828_v45 = vsel %vm2299_vm6, %v2338_v0, %v2342_v33  ;;  %v2194_v46 = vmul.f32 %v2083_v37, %v1954_v34  ;;  %v1896_v48 = vadd.f32 %v11574_v16, %v1697_v40  ;;  %v1699_v49 = vpop.f32.mrb[27].mxu0  ;;  %v2812_v50 = vsel %vm2778_vm8, %v2807_v2, %v2811_v22  ;;  %9659 = vmatprep.subr.bf16.mxu1 %v9658_v14  ;;  %v2637_v2 = vld [vmem:[%s14139_s22 + $0x120] sm:$0xff]  ;;  %v2642_v14 = vld [vmem:[%s14139_s22 + $0x148] sm:$0xff] }
 0x22e   : > { %2502 = vst [vmem:[#allocation2 + $0xb0] sm:$0xff] %v11828_v45  ;;  %v2345_v32 = vsel %vm2299_vm6, %v2340_v6, %v2344_v38  ;;  %v2195_v51 = vmul.f32 %v2083_v37, %v1955_v39  ;;  %v1897_v53 = vadd.f32 %v11578_v17, %v1699_v49  ;;  %8140 = vmatprep.mubr.msk.f32.mxu1 %vm2482_vm7, %v2812_v50  ;;  %v2560_v54 = vld [vmem:[#allocation2 + $0x98] sm:$0xff]  ;;  %v2817_v0 = vrot.slane %v11800_v10, 1 }
 0x22f   : > { %2503 = vst.msk [vmem:[#allocation2 + $0xb8] sm:$0xff] %vm2482_vm7, %v2345_v32  ;;  %v2346_v56 = vrot.slane %v2194_v46, 7  ;;  %v1956_v57 = vmax.f32 %v1896_v48, 0.0  ;;  %3094 = vmatmul.mubr.f32.gmra.mrb[14].mxu1 %v2810_v41  ;;  %v2815_v60 = vrot.slane %v2560_v54, 1  ;;  %v9668_v28 = vpack.c.bf16 %v2639_v52, %v2637_v2  ;;  %v2646_v41 = vld [vmem:[%s14139_s22 + $0x168] sm:$0xff]  ;;  %v2652_v2 = vld [vmem:[%s14139_s22 + $0x198] sm:$0xff] }
 0x230   : > { %v2348_v61 = vrot.slane %v2195_v51, 7  ;;  %v1957_v62 = vmax.f32 %v1897_v53, 0.0  ;;  %v1703_v63 = vpop.f32.mrb[28].mxu0  ;;  %9661 = vmatpush1.bf16.msra.mxu1 %v9660_v36  ;;  %v2818_v34 = vsel %vm2778_vm8, %v2813_v55, %v2817_v0  ;;  %v9670_v27 = vpack.c.bf16 %v2644_v18, %v2642_v14  ;;  %v2098_v51 = vpop.permute.xlu1 %2097 }
 0x231   : > { %v11852_v3 = vsel %vm2299_vm6, %v2342_v33, %v2346_v56  ;;  %v2196_v4 = vmul.f32 %v2088_v58, %v1956_v57  ;;  %v1898_v6 = vadd.f32 %v11574_v16, %v1703_v63  ;;  %v1705_v8 = vpop.f32.mrb[29].mxu0  ;;  %v2816_v9 = vsel %vm2778_vm8, %v2811_v22, %v2815_v60  ;;  %9663 = vmatprep.subr.bf16.mxu1 %v9662_v35  ;;  %v2643_v22 = vld [vmem:[%s14139_s22 + $0x150] sm:$0xff]  ;;  %v2648_v35 = vld [vmem:[%s14139_s22 + $0x178] sm:$0xff] }
 0x232   : > { %2504 = vst [vmem:[#allocation2 + $0xc0] sm:$0xff] %v11852_v3  ;;  %v2349_v59 = vsel %vm2299_vm6, %v2344_v38, %v2348_v61  ;;  %v2197_v19 = vmul.f32 %v2088_v58, %v1957_v62  ;;  %v1899_v20 = vadd.f32 %v11578_v17, %v1705_v8  ;;  %8141 = vmatprep.mubr.msk.f32.mxu1 %vm2482_vm7, %v2816_v9  ;;  %v2562_v23 = vld [vmem:[#allocation2 + $0xa8] sm:$0xff]  ;;  %v2821_v49 = vrot.slane %v11828_v45, 1  ;;  %v2645_v45 = vld [vmem:[%s14139_s22 + $0x160] sm:$0xff] }
 0x233   : > { %2505 = vst.msk [vmem:[#allocation2 + $0xc8] sm:$0xff] %vm2482_vm7, %v2349_v59  ;;  %v2350_v25 = vrot.slane %v2196_v4, 7  ;;  %v1958_v26 = vmax.f32 %v1898_v6, 0.0  ;;  %3100 = vmatmul.mubr.f32.gmra.mrb[16].mxu1 %v2814_v21  ;;  %v2819_v5 = vrot.slane %v2562_v23, 1  ;;  %v9672_v32 = vpack.c.bf16 %v2643_v22, %v2641_v11 }
 0x234   : > { %v2352_v30 = vrot.slane %v2197_v19, 7  ;;  %v1959_v31 = vmax.f32 %v1899_v20, 0.0  ;;  %v1709_v33 = vpop.f32.mrb[30].mxu0  ;;  %9665 = vmatpush1.bf16.msra.mxu1 %v9664_v42  ;;  %v9674_v57 = vpack.c.bf16 %v2648_v35, %v2646_v41  ;;  %v2822_v8 = vsel %vm2778_vm8, %v2817_v0, %v2821_v49  ;;  %v2103_v20 = vpop.permute.xlu0 %2102 }
 0x235   : > { %v11880_v36 = vsel %vm2299_vm6, %v2346_v56, %v2350_v25  ;;  %v2198_v37 = vmul.f32 %v2093_v29, %v1958_v26  ;;  %v1900_v38 = vadd.f32 %v11574_v16, %v1709_v33  ;;  %v1711_v39 = vpop.f32.mrb[31].mxu0  ;;  %v2820_v40 = vsel %vm2778_vm8, %v2815_v60, %v2819_v5  ;;  %9667 = vmatprep.subr.bf16.mxu1 %v9666_v1  ;;  %v2647_v60 = vld [vmem:[%s14139_s22 + $0x170] sm:$0xff]  ;;  %v2650_v1 = vld [vmem:[%s14139_s22 + $0x188] sm:$0xff]  ;;  %v2649_v26 = vld [vmem:[%s14139_s22 + $0x180] sm:$0xff] }
 0x236   : > { %2506 = vst [vmem:[#allocation2 + $0xd0] sm:$0xff] %v11880_v36  ;;  %v2353_v24 = vsel %vm2299_vm6, %v2348_v61, %v2352_v30  ;;  %v2199_v43 = vmul.f32 %v2093_v29, %v1959_v31  ;;  %v1901_v46 = vadd.f32 %v11578_v17, %v1711_v39  ;;  %8142 = vmatprep.mubr.msk.f32.mxu1 %vm2482_vm7, %v2820_v40  ;;  %v11894_v48 = vld [vmem:[#allocation2 + $0xb8] sm:$0xff]  ;;  %v2825_v56 = vrot.slane %v11852_v3, 1 }
 0x237   : > { %2507 = vst.msk [vmem:[#allocation2 + $0xd8] sm:$0xff] %vm2482_vm7, %v2353_v24  ;;  %v2354_v50 = vrot.slane %v2198_v37, 7  ;;  %v1960_v47 = vmax.f32 %v1900_v38, 0.0  ;;  %3106 = vmatmul.mubr.f32.gmra.mrb[18].mxu1 %v2818_v34  ;;  %v2823_v44 = vrot.slane %v11894_v48, 1  ;;  %v9676_v19 = vpack.c.bf16 %v2647_v60, %v2645_v45  ;;  %v2654_v34 = vld [vmem:[%s14139_s22 + $0x1a8] sm:$0xff]  ;;  %v8196_v60 = vld [vmem:[%s14139_s22 + $0x398] sm:$0xff] }
 0x238   : > { %v2356_v53 = vrot.slane %v2199_v43, 7  ;;  %v1961_v54 = vmax.f32 %v1901_v46, 0.0  ;;  %v1715_v55 = vpop.f32.mrb[32].mxu0  ;;  %9669 = vmatpush1.bf16.msra.mxu1 %v9668_v28  ;;  %v2826_v10 = vsel %vm2778_vm8, %v2821_v49, %v2825_v56  ;;  %v9678_v0 = vpack.c.bf16 %v2652_v2, %v2650_v1  ;;  %v2108_v43 = vpop.permute.xlu1 %2107  ;;  %v8194_v45 = vld [vmem:[%s14139_s22 + $0x388] sm:$0xff] }
 0x239   : > { %v11907_v42 = vsel %vm2299_vm6, %v2350_v25, %v2354_v50  ;;  %v2200_v58 = vmul.f32 %v2098_v51, %v1960_v47  ;;  %v1902_v61 = vadd.f32 %v11574_v16, %v1715_v55  ;;  %v1717_v62 = vpop.f32.mrb[33].mxu0  ;;  %v2824_v63 = vsel %vm2778_vm8, %v2819_v5, %v2823_v44  ;;  %9671 = vmatprep.subr.bf16.mxu1 %v9670_v27  ;;  %v2651_v5 = vld [vmem:[%s14139_s22 + $0x190] sm:$0xff]  ;;  %v2656_v27 = vld [vmem:[%s14139_s22 + $0x1b8] sm:$0xff] }
 0x23a   : > { %2508 = vst [vmem:[#allocation2 + $0xe0] sm:$0xff] %v11907_v42  ;;  %v2357_v52 = vsel %vm2299_vm6, %v2352_v30, %v2356_v53  ;;  %v2201_v4 = vmul.f32 %v2098_v51, %v1961_v54  ;;  %v1903_v6 = vadd.f32 %v11578_v17, %v1717_v62  ;;  %8143 = vmatprep.mubr.msk.f32.mxu1 %vm2482_vm7, %v2824_v63  ;;  %v11924_v9 = vld [vmem:[#allocation2 + $0xc8] sm:$0xff]  ;;  %v2829_v39 = vrot.slane %v11880_v36, 1  ;;  %v2653_v36 = vld [vmem:[%s14139_s22 + $0x1a0] sm:$0xff] }
 0x23b   : > { %2509 = vst.msk [vmem:[#allocation2 + $0xe8] sm:$0xff] %vm2482_vm7, %v2357_v52  ;;  %v2358_v14 = vrot.slane %v2200_v58, 7  ;;  %v1962_v18 = vmax.f32 %v1902_v61, 0.0  ;;  %3112 = vmatmul.mubr.f32.gmra.mrb[20].mxu1 %v2822_v8  ;;  %v2827_v59 = vrot.slane %v11924_v9, 1  ;;  %v9680_v24 = vpack.c.bf16 %v2651_v5, %v2649_v26  ;;  %v2113_v8 = vpop.permute.xlu0 %2112 }
 0x23c   : > { %v2360_v21 = vrot.slane %v2201_v4, 7  ;;  %v1963_v23 = vmax.f32 %v1903_v6, 0.0  ;;  %v1721_v25 = vpop.f32.mrb[34].mxu0  ;;  %9673 = vmatpush1.bf16.msra.mxu1 %v9672_v32  ;;  %v2833_v47 = vrot.slane %v11907_v42, 1  ;;  %v2655_v32 = vld [vmem:[%s14139_s22 + $0x1b0] sm:$0xff]  ;;  %v2830_v63 = vsel %vm2778_vm8, %v2825_v56, %v2829_v39 }
 0x23d   : > { %v11938_v28 = vsel %vm2299_vm6, %v2354_v50, %v2358_v14  ;;  %v2202_v29 = vmul.f32 %v2103_v20, %v1962_v18  ;;  %v1904_v30 = vadd.f32 %v11574_v16, %v1721_v25  ;;  %v1723_v31 = vpop.f32.mrb[35].mxu0  ;;  %v2828_v33 = vsel %vm2778_vm8, %v2823_v44, %v2827_v59  ;;  %9675 = vmatprep.subr.bf16.mxu1 %v9674_v57 }
 0x23e   : > { %2510 = vst [vmem:[#allocation2 + $0xf0] sm:$0xff] %v11938_v28  ;;  %v2361_v11 = vsel %vm2299_vm6, %v2356_v53, %v2360_v21  ;;  %v2203_v22 = vmul.f32 %v2103_v20, %v1963_v23  ;;  %v1905_v37 = vadd.f32 %v11578_v17, %v1723_v31  ;;  %8144 = vmatprep.mubr.msk.f32.mxu1 %vm2482_vm7, %v2828_v33  ;;  %v11952_v38 = vld [vmem:[#allocation2 + $0xd8] sm:$0xff] }
 0x23f   : > { %2511 = vst.msk [vmem:[#allocation2 + $0xf8] sm:$0xff] %vm2482_vm7, %v2361_v11  ;;  %v2362_v40 = vrot.slane %v2202_v29, 7  ;;  %v1964_v41 = vmax.f32 %v1904_v30, 0.0  ;;  %3118 = vmatmul.mubr.f32.gmra.mrb[22].mxu1 %v2826_v10  ;;  %v2831_v35 = vrot.slane %v11952_v38, 1  ;;  %v9682_v44 = vpack.c.bf16 %v2656_v27, %v2654_v34  ;;  %v2118_v34 = vpop.permute.xlu1 %2117 }
 0x240   : > { %v2364_v46 = vrot.slane %v2203_v22, 7  ;;  %v1965_v49 = vmax.f32 %v1905_v37, 0.0  ;;  %v1727_v50 = vpop.f32.mrb[36].mxu0  ;;  %9677 = vmatpush1.bf16.msra.mxu1 %v9676_v19  ;;  %v9684_v6 = vpack.c.bf16 %v2655_v32, %v2653_v36  ;;  %v2834_v3 = vsel %vm2778_vm8, %v2829_v39, %v2833_v47 }
 0x241   : > { %v11965_v51 = vsel %vm2299_vm6, %v2358_v14, %v2362_v40  ;;  %v2204_v53 = vmul.f32 %v2108_v43, %v1964_v41  ;;  %v1906_v54 = vadd.f32 %v11574_v16, %v1727_v50  ;;  %v1729_v55 = vpop.f32.mrb[37].mxu0  ;;  %v2832_v57 = vsel %vm2778_vm8, %v2827_v59, %v2831_v35  ;;  %9679 = vmatprep.subr.bf16.mxu1 %v9678_v0 }
 0x242   : > { %2512 = vst [vmem:[#allocation2 + $0x100] sm:$0xff] %v11965_v51  ;;  %v2365_v58 = vsel %vm2299_vm6, %v2360_v21, %v2364_v46  ;;  %v2205_v61 = vmul.f32 %v2108_v43, %v1965_v49  ;;  %v1907_v62 = vadd.f32 %v11578_v17, %v1729_v55  ;;  %8145 = vmatprep.mubr.msk.f32.mxu1 %vm2482_vm7, %v2832_v57  ;;  %v11982_v1 = vld [vmem:[#allocation2 + $0xe8] sm:$0xff]  ;;  %v2837_v29 = vrot.slane %v11938_v28, 1 }
 0x243   : > { %2513 = vst.msk [vmem:[#allocation2 + $0x108] sm:$0xff] %vm2482_vm7, %v2365_v58  ;;  %v2366_v2 = vrot.slane %v2204_v53, 7  ;;  %v1966_v52 = vmax.f32 %v1906_v54, 0.0  ;;  %3124 = vmatmul.mubr.f32.gmra.mrb[24].mxu1 %v2830_v63  ;;  %v2835_v4 = vrot.slane %v11982_v1, 1  ;;  %v9686_v56 = vpack.c.bf16 %v8196_v60, %v8194_v45  ;;  %v2123_v54 = vpop.permute.xlu0 %2122 }
 0x244   : > { %v2368_v14 = vrot.slane %v2205_v61, 7  ;;  %v1967_v18 = vmax.f32 %v1907_v62, 0.0  ;;  %v1733_v59 = vpop.f32.mrb[38].mxu0  ;;  %9681 = vmatpush1.bf16.msra.mxu1 %v9680_v24  ;;  %v2841_v37 = vrot.slane %v11965_v51, 1  ;;  %v2838_v50 = vsel %vm2778_vm8, %v2833_v47, %v2837_v29 }
 0x245   : > { %v11990_v19 = vsel %vm2299_vm6, %v2362_v40, %v2366_v2  ;;  %v2206_v20 = vmul.f32 %v2113_v8, %v1966_v52  ;;  %v1908_v21 = vadd.f32 %v11574_v16, %v1733_v59  ;;  %v1735_v23 = vpop.f32.mrb[39].mxu0  ;;  %v2836_v25 = vsel %vm2778_vm8, %v2831_v35, %v2835_v4  ;;  %9683 = vmatprep.subr.bf16.mxu1 %v9682_v44 }
 0x246   : > { %2514 = vst [vmem:[#allocation2 + $0x110] sm:$0xff] %v11990_v19  ;;  %v2369_v10 = vsel %vm2299_vm6, %v2364_v46, %v2368_v14  ;;  %v2207_v0 = vmul.f32 %v2113_v8, %v1967_v18  ;;  %v1909_v26 = vadd.f32 %v11578_v17, %v1735_v23  ;;  %8146 = vmatprep.mubr.msk.f32.mxu1 %vm2482_vm7, %v2836_v25  ;;  %v11998_v5 = vld [vmem:[#allocation2 + $0xf8] sm:$0xff]  ;;  %v2845_v8 = vrot.slane %v11990_v19, 1 }
 0x247   : > { %2515 = vst.msk [vmem:[#allocation2 + $0x118] sm:$0xff] %vm2482_vm7, %v2369_v10  ;;  %v2370_v30 = vrot.slane %v2206_v20, 7  ;;  %v1968_v31 = vmax.f32 %v1908_v21, 0.0  ;;  %3130 = vmatmul.mubr.f32.gmra.mrb[26].mxu1 %v2834_v3  ;;  %v2839_v33 = vrot.slane %v11998_v5, 1  ;;  %v2842_v60 = vsel %vm2778_vm8, %v2837_v29, %v2841_v37  ;;  %v2128_v3 = vpop.permute.xlu1 %2127 }
 0x248   : > { %v2372_v27 = vrot.slane %v2207_v0, 7  ;;  %v1969_v11 = vmax.f32 %v1909_v26, 0.0  ;;  %v1739_v22 = vpop.f32.mrb[40].mxu0  ;;  %9685 = vmatpush1.bf16.msra.mxu1 %v9684_v6 }
 0x249   : > { %v12005_v39 = vsel %vm2299_vm6, %v2366_v2, %v2370_v30  ;;  %v2208_v40 = vmul.f32 %v2118_v34, %v1968_v31  ;;  %v1910_v41 = vadd.f32 %v11574_v16, %v1739_v22  ;;  %v1741_v35 = vpop.f32.mrb[41].mxu0  ;;  %v2840_v24 = vsel %vm2778_vm8, %v2835_v4, %v2839_v33  ;;  %9687 = vmatprep.subr.bf16.mxu1 %v9686_v56 }
 0x24a   : > { %2516 = vst [vmem:[#allocation2 + $0x120] sm:$0xff] %v12005_v39  ;;  %v2373_v43 = vsel %vm2299_vm6, %v2368_v14, %v2372_v27  ;;  %v2209_v46 = vmul.f32 %v2118_v34, %v1969_v11  ;;  %v1911_v49 = vadd.f32 %v11578_v17, %v1741_v35  ;;  %8147 = vmatprep.mubr.msk.f32.mxu1 %vm2482_vm7, %v2840_v24  ;;  %v12016_v44 = vld [vmem:[#allocation2 + $0x108] sm:$0xff]  ;;  %v2849_v23 = vrot.slane %v12005_v39, 1 }
 0x24b   : > { %2517 = vst.msk [vmem:[#allocation2 + $0x128] sm:$0xff] %vm2482_vm7, %v2373_v43  ;;  %v2374_v36 = vrot.slane %v2208_v40, 7  ;;  %v1970_v32 = vmax.f32 %v1910_v41, 0.0  ;;  %3136 = vmatmul.mubr.f32.gmra.mrb[28].mxu1 %v2838_v50  ;;  %v2843_v53 = vrot.slane %v12016_v44, 1  ;;  %v2846_v34 = vsel %vm2778_vm8, %v2841_v37, %v2845_v8  ;;  %v2133_v41 = vpop.permute.xlu0 %2132 }
 0x24c   : > { %v2376_v55 = vrot.slane %v2209_v46, 7  ;;  %v1971_v57 = vmax.f32 %v1911_v49, 0.0  ;;  %v1745_v45 = vpop.f32.mrb[42].mxu0  ;;  %v2850_v46 = vsel %vm2778_vm8, %v2845_v8, %v2849_v23 }
 0x24d   : > { %v12022_v58 = vsel %vm2299_vm6, %v2370_v30, %v2374_v36  ;;  %v2210_v61 = vmul.f32 %v2123_v54, %v1970_v32  ;;  %v1912_v47 = vadd.f32 %v11574_v16, %v1745_v45  ;;  %v1747_v62 = vpop.f32.mrb[43].mxu0  ;;  %v2844_v63 = vsel %vm2778_vm8, %v2839_v33, %v2843_v53 }
 0x24e   : > { %2518 = vst [vmem:[#allocation2 + $0x130] sm:$0xff] %v12022_v58  ;;  %v2377_v2 = vsel %vm2299_vm6, %v2372_v27, %v2376_v55  ;;  %v2211_v52 = vmul.f32 %v2123_v54, %v1971_v57  ;;  %v1913_v4 = vadd.f32 %v11578_v17, %v1747_v62  ;;  %8148 = vmatprep.mubr.msk.f32.mxu1 %vm2482_vm7, %v2844_v63  ;;  %v12030_v6 = vld [vmem:[#allocation2 + $0x118] sm:$0xff]  ;;  %v2853_v45 = vrot.slane %v12022_v58, 1  ;;  %v2138_v62 = vpop.permute.xlu1 %2137 }
 0x24f   : > { %2519 = vst.msk [vmem:[#allocation2 + $0x138] sm:$0xff] %vm2482_vm7, %v2377_v2  ;;  %v2378_v14 = vrot.slane %v2210_v61, 7  ;;  %v1972_v18 = vmax.f32 %v1912_v47, 0.0  ;;  %3142 = vmatmul.mubr.f32.gmra.mrb[30].mxu1 %v2842_v60  ;;  %v2847_v59 = vrot.slane %v12030_v6, 1 }
 0x250   : > { %v2380_v56 = vrot.slane %v2211_v52, 7  ;;  %v1973_v20 = vmax.f32 %v1913_v4, 0.0  ;;  %v1751_v21 = vpop.f32.mrb[44].mxu0 }
 0x251   : > { %v12037_v25 = vsel %vm2299_vm6, %v2374_v36, %v2378_v14  ;;  %v2212_v10 = vmul.f32 %v2128_v3, %v1972_v18  ;;  %v1914_v0 = vadd.f32 %v11574_v16, %v1751_v21  ;;  %v1753_v26 = vpop.f32.mrb[45].mxu0  ;;  %v2848_v29 = vsel %vm2778_vm8, %v2843_v53, %v2847_v59 }
 0x252   : > { %v2381_v30 = vsel %vm2299_vm6, %v2376_v55, %v2380_v56  ;;  %v2213_v31 = vmul.f32 %v2128_v3, %v1973_v20  ;;  %v1915_v33 = vadd.f32 %v11578_v17, %v1753_v26  ;;  %8149 = vmatprep.mubr.msk.f32.mxu1 %vm2482_vm7, %v2848_v29  ;;  %v12045_v27 = vld [vmem:[#allocation2 + $0x128] sm:$0xff]  ;;  %v2857_v4 = vrot.slane %v12037_v25, 1 }
 0x253   : > { %2521 = vst.msk [vmem:[#allocation2 + $0x148] sm:$0xff] %vm2482_vm7, %v2381_v30  ;;  %v2382_v11 = vrot.slane %v2212_v10, 7  ;;  %v1974_v22 = vmax.f32 %v1914_v0, 0.0  ;;  %3148 = vmatmul.mubr.f32.gmra.mrb[32].mxu1 %v2846_v34  ;;  %v2851_v40 = vrot.slane %v12045_v27, 1  ;;  %v2854_v10 = vsel %vm2778_vm8, %v2849_v23, %v2853_v45 }
 0x254   : > { %v2384_v35 = vrot.slane %v2213_v31, 7  ;;  %v1975_v24 = vmax.f32 %v1915_v33, 0.0  ;;  %v1757_v43 = vpop.f32.mrb[46].mxu0  ;;  %v2143_v31 = vpop.permute.xlu0 %2142 }
 0x255   : > { %v12051_v49 = vsel %vm2299_vm6, %v2378_v14, %v2382_v11  ;;  %v2214_v50 = vmul.f32 %v2133_v41, %v1974_v22  ;;  %v1916_v37 = vadd.f32 %v11574_v16, %v1757_v43  ;;  %v1759_v36 = vpop.f32.mrb[47].mxu0  ;;  %v2852_v32 = vsel %vm2778_vm8, %v2847_v59, %v2851_v40 }
 0x256   : > { %v2385_v53 = vsel %vm2299_vm6, %v2380_v56, %v2384_v35  ;;  %v2215_v54 = vmul.f32 %v2133_v41, %v1975_v24  ;;  %v1917_v55 = vadd.f32 %v11578_v17, %v1759_v36  ;;  %8150 = vmatprep.mubr.msk.f32.mxu1 %vm2482_vm7, %v2852_v32  ;;  %v12058_v57 = vld [vmem:[#allocation2 + $0x138] sm:$0xff]  ;;  %v2858_v22 = vsel %vm2778_vm8, %v2853_v45, %v2857_v4 }
 0x257   : > { %2523 = vst.msk [vmem:[#allocation2 + $0x158] sm:$0xff] %vm2482_vm7, %v2385_v53  ;;  %v2386_v60 = vrot.slane %v2214_v50, 7  ;;  %v1976_v61 = vmax.f32 %v1916_v37, 0.0  ;;  %3154 = vmatmul.mubr.f32.gmra.mrb[34].mxu1 %v2850_v46  ;;  %v2855_v47 = vrot.slane %v12058_v57, 1  ;;  %v2861_v36 = vrot.slane %v12051_v49, 1 }
 0x258   : > { %v2388_v63 = vrot.slane %v2215_v54, 7  ;;  %v1977_v2 = vmax.f32 %v1917_v55, 0.0  ;;  %v1763_v52 = vpop.f32.mrb[48].mxu0  ;;  %v2148_v55 = vpop.permute.xlu1 %2147 }
 0x259   : > { %v12065_v8 = vsel %vm2299_vm6, %v2382_v11, %v2386_v60  ;;  %v2216_v14 = vmul.f32 %v2138_v62, %v1976_v61  ;;  %v1918_v18 = vadd.f32 %v11574_v16, %v1763_v52  ;;  %v1765_v59 = vpop.f32.mrb[49].mxu0  ;;  %v2856_v3 = vsel %vm2778_vm8, %v2851_v40, %v2855_v47 }
 0x25a   : > { %v2389_v56 = vsel %vm2299_vm6, %v2384_v35, %v2388_v63  ;;  %v2217_v20 = vmul.f32 %v2138_v62, %v1977_v2  ;;  %v1919_v21 = vadd.f32 %v11578_v17, %v1765_v59  ;;  %8151 = vmatprep.mubr.msk.f32.mxu1 %vm2482_vm7, %v2856_v3  ;;  %v12073_v0 = vld [vmem:[#allocation2 + $0x148] sm:$0xff] }
 0x25b   : > { %2525 = vst.msk [vmem:[#allocation2 + $0x168] sm:$0xff] %vm2482_vm7, %v2389_v56  ;;  %v2390_v26 = vrot.slane %v2216_v14, 7  ;;  %v1978_v29 = vmax.f32 %v1918_v18, 0.0  ;;  %3160 = vmatmul.mubr.f32.gmra.mrb[36].mxu1 %v2854_v10  ;;  %v2859_v30 = vrot.slane %v12073_v0, 1  ;;  %v2862_v56 = vsel %vm2778_vm8, %v2857_v4, %v2861_v36 }
 0x25c   : > { %v2392_v33 = vrot.slane %v2217_v20, 7  ;;  %v1979_v34 = vmax.f32 %v1919_v21, 0.0  ;;  %v1769_v11 = vpop.f32.mrb[50].mxu0 }
 0x25d   : > { %v12079_v40 = vsel %vm2299_vm6, %v2386_v60, %v2390_v26  ;;  %v2218_v41 = vmul.f32 %v2143_v31, %v1978_v29  ;;  %v1920_v23 = vadd.f32 %v11574_v16, %v1769_v11  ;;  %v1771_v35 = vpop.f32.mrb[51].mxu0  ;;  %v2860_v24 = vsel %vm2778_vm8, %v2855_v47, %v2859_v30  ;;  %v2153_v29 = vpop.permute.xlu0 %2152 }
 0x25e   : > { %v2393_v43 = vsel %vm2299_vm6, %v2388_v63, %v2392_v33  ;;  %v2219_v46 = vmul.f32 %v2143_v31, %v1979_v34  ;;  %v1921_v50 = vadd.f32 %v11578_v17, %v1771_v35  ;;  %8152 = vmatprep.mubr.msk.f32.mxu1 %vm2482_vm7, %v2860_v24  ;;  %v12086_v37 = vld [vmem:[#allocation2 + $0x158] sm:$0xff]  ;;  %v2865_v47 = vrot.slane %v12065_v8, 1 }
 0x25f   : > { %2527 = vst.msk [vmem:[#allocation2 + $0x178] sm:$0xff] %vm2482_vm7, %v2393_v43  ;;  %v2394_v32 = vrot.slane %v2218_v41, 7  ;;  %v1980_v53 = vmax.f32 %v1920_v23, 0.0  ;;  %3166 = vmatmul.mubr.f32.gmra.mrb[38].mxu1 %v2858_v22  ;;  %v2863_v54 = vrot.slane %v12086_v37, 1 }
 0x260   : > { %v2396_v45 = vrot.slane %v2219_v46, 7  ;;  %v1981_v60 = vmax.f32 %v1921_v50, 0.0  ;;  %v1775_v61 = vpop.f32.mrb[52].mxu0  ;;  %v2866_v34 = vsel %vm2778_vm8, %v2861_v36, %v2865_v47  ;;  %v2869_v50 = vrot.slane %v12079_v40, 1 }
 0x261   : > { %v12093_v62 = vsel %vm2299_vm6, %v2390_v26, %v2394_v32  ;;  %v2220_v63 = vmul.f32 %v2148_v55, %v1980_v53  ;;  %v1922_v2 = vadd.f32 %v11574_v16, %v1775_v61  ;;  %v1777_v52 = vpop.f32.mrb[53].mxu0  ;;  %v2864_v14 = vsel %vm2778_vm8, %v2859_v30, %v2863_v54 }
 0x262   : > { %v2397_v18 = vsel %vm2299_vm6, %v2392_v33, %v2396_v45  ;;  %v2221_v59 = vmul.f32 %v2148_v55, %v1981_v60  ;;  %v1923_v3 = vadd.f32 %v11578_v17, %v1777_v52  ;;  %8153 = vmatprep.mubr.msk.f32.mxu1 %vm2482_vm7, %v2864_v14  ;;  %v12101_v20 = vld [vmem:[#allocation2 + $0x168] sm:$0xff]  ;;  %v2158_v55 = vpop.permute.xlu1 %2157  ;;  %v2873_v61 = vrot.slane %v12093_v62, 1 }
 0x263   : > { %2529 = vst.msk [vmem:[#allocation2 + $0x188] sm:$0xff] %vm2482_vm7, %v2397_v18  ;;  %v2398_v21 = vrot.slane %v2220_v63, 7  ;;  %v1982_v10 = vmax.f32 %v1922_v2, 0.0  ;;  %3172 = vmatmul.mubr.f32.gmra.mrb[40].mxu1 %v2862_v56  ;;  %v2867_v26 = vrot.slane %v12101_v20, 1 }
 0x264   : > { %v2400_v30 = vrot.slane %v2221_v59, 7  ;;  %v1983_v31 = vmax.f32 %v1923_v3, 0.0  ;;  %v1781_v33 = vpop.f32.mrb[54].mxu0 }
 0x265   : > { %v12107_v11 = vsel %vm2299_vm6, %v2394_v32, %v2398_v21  ;;  %v2222_v22 = vmul.f32 %v2153_v29, %v1982_v10  ;;  %v1924_v4 = vadd.f32 %v11574_v16, %v1781_v33  ;;  %v1783_v41 = vpop.f32.mrb[55].mxu0  ;;  %v2868_v23 = vsel %vm2778_vm8, %v2863_v54, %v2867_v26 }
 0x266   : > { %v2401_v35 = vsel %vm2299_vm6, %v2396_v45, %v2400_v30  ;;  %v2223_v24 = vmul.f32 %v2153_v29, %v1983_v31  ;;  %v1925_v43 = vadd.f32 %v11578_v17, %v1783_v41  ;;  %8154 = vmatprep.mubr.msk.f32.mxu1 %vm2482_vm7, %v2868_v23  ;;  %v12114_v46 = vld [vmem:[#allocation2 + $0x178] sm:$0xff]  ;;  %v2870_v10 = vsel %vm2778_vm8, %v2865_v47, %v2869_v50 }
 0x267   : > { %2531 = vst.msk [vmem:[#allocation2 + $0x198] sm:$0xff] %vm2482_vm7, %v2401_v35  ;;  %v2402_v36 = vrot.slane %v2222_v22, 7  ;;  %v1984_v32 = vmax.f32 %v1924_v4, 0.0  ;;  %3178 = vmatmul.mubr.f32.gmra.mrb[42].mxu1 %v2866_v34  ;;  %v2871_v53 = vrot.slane %v12114_v46, 1  ;;  %v2163_v34 = vpop.permute.xlu0 %2162  ;;  %v2874_v4 = vsel %vm2778_vm8, %v2869_v50, %v2873_v61 }
 0x268   : > { %v2404_v54 = vrot.slane %v2223_v24, 7  ;;  %v1985_v60 = vmax.f32 %v1925_v43, 0.0  ;;  %v1787_v45 = vpop.f32.mrb[56].mxu0  ;;  %v2877_v50 = vrot.slane %v12107_v11, 1 }
 0x269   : > { %v12121_v63 = vsel %vm2299_vm6, %v2398_v21, %v2402_v36  ;;  %v2224_v2 = vmul.f32 %v2158_v55, %v1984_v32  ;;  %v1926_v52 = vadd.f32 %v11574_v16, %v1787_v45  ;;  %v1789_v14 = vpop.f32.mrb[57].mxu0  ;;  %v2872_v18 = vsel %vm2778_vm8, %v2867_v26, %v2871_v53 }
 0x26a   : > { %v2405_v59 = vsel %vm2299_vm6, %v2400_v30, %v2404_v54  ;;  %v2225_v3 = vmul.f32 %v2158_v55, %v1985_v60  ;;  %v1927_v56 = vadd.f32 %v11578_v17, %v1789_v14  ;;  %8155 = vmatprep.mubr.msk.f32.mxu1 %vm2482_vm7, %v2872_v18  ;;  %v12129_v29 = vld [vmem:[#allocation2 + $0x188] sm:$0xff] }
 0x26b   : > { %2533 = vst.msk [vmem:[#allocation2 + $0x1a8] sm:$0xff] %vm2482_vm7, %v2405_v59  ;;  %v2406_v21 = vrot.slane %v2224_v2, 7  ;;  %v1986_v31 = vmax.f32 %v1926_v52, 0.0  ;;  %3184 = vmatmul.mubr.f32.gmra.mrb[44].mxu1 %v2870_v10  ;;  %v2875_v33 = vrot.slane %v12129_v29, 1  ;;  %v2168_v2 = vpop.permute.xlu1 %2167  ;;  %v2881_v10 = vrot.slane %v12121_v63, 1 }
 0x26c   : > { %v2408_v26 = vrot.slane %v2225_v3, 7  ;;  %v1987_v22 = vmax.f32 %v1927_v56, 0.0  ;;  %v1793_v30 = vpop.f32.mrb[58].mxu0  ;;  %v2878_v3 = vsel %vm2778_vm8, %v2873_v61, %v2877_v50 }
 0x26d   : > { %v12135_v41 = vsel %vm2299_vm6, %v2402_v36, %v2406_v21  ;;  %v2226_v23 = vmul.f32 %v2163_v34, %v1986_v31  ;;  %v1928_v47 = vadd.f32 %v11574_v16, %v1793_v30  ;;  %v1795_v35 = vpop.f32.mrb[59].mxu0  ;;  %v2876_v24 = vsel %vm2778_vm8, %v2871_v53, %v2875_v33 }
 0x26e   : > { %v2409_v43 = vsel %vm2299_vm6, %v2404_v54, %v2408_v26  ;;  %v2227_v32 = vmul.f32 %v2163_v34, %v1987_v22  ;;  %v1929_v55 = vadd.f32 %v11578_v17, %v1795_v35  ;;  %8156 = vmatprep.mubr.msk.f32.mxu1 %vm2482_vm7, %v2876_v24  ;;  %v12142_v60 = vld [vmem:[#allocation2 + $0x198] sm:$0xff]  ;;  %v2882_v61 = vsel %vm2778_vm8, %v2877_v50, %v2881_v10 }
 0x26f   : > { %2535 = vst.msk [vmem:[#allocation2 + $0x1b8] sm:$0xff] %vm2482_vm7, %v2409_v43  ;;  %v2410_v36 = vrot.slane %v2226_v23, 7  ;;  %v1988_v45 = vmax.f32 %v1928_v47, 0.0  ;;  %3190 = vmatmul.mubr.f32.gmra.mrb[46].mxu1 %v2874_v4  ;;  %v2879_v16 = vrot.slane %v12142_v60, 1  ;;  %v2885_v4 = vrot.slane %v12135_v41, 1 }
 0x270   : > { %v2412_v53 = vrot.slane %v2227_v32, 7  ;;  %v1989_v52 = vmax.f32 %v1929_v55, 0.0 }
 0x271   : > { %v12148_v54 = vsel %vm2299_vm6, %v2406_v21, %v2410_v36  ;;  %v2228_v17 = vmul.f32 %v2168_v2, %v1988_v45  ;;  %v2880_v14 = vsel %vm2778_vm8, %v2875_v33, %v2879_v16  ;;  %v2886_v35 = vsel %vm2778_vm8, %v2881_v10, %v2885_v4 }
 0x272   : > { %v2413_v18 = vsel %vm2299_vm6, %v2408_v26, %v2412_v53  ;;  %v2229_v59 = vmul.f32 %v2168_v2, %v1989_v52  ;;  %8157 = vmatprep.mubr.msk.f32.mxu1 %vm2482_vm7, %v2880_v14  ;;  %v12154_v56 = vld [vmem:[#allocation2 + $0x1a8] sm:$0xff]  ;;  %v2889_v43 = vrot.slane %v12148_v54, 1  ;;  %v8195_v14 = vld [vmem:[%s14139_s22 + $0x390] sm:$0xff] }
 0x273   : > { %2537 = vst.msk [vmem:[#allocation2 + $0x1c8] sm:$0xff] %vm2482_vm7, %v2413_v18  ;;  %v2414_v31 = vrot.slane %v2228_v17, 7  ;;  %3196 = vmatmul.mubr.f32.gmra.mrb[48].mxu1 %v2878_v3  ;;  %v2883_v21 = vrot.slane %v12154_v56, 1  ;;  %v8193_v17 = vld [vmem:[%s14139_s22 + $0x380] sm:$0xff]  ;;  %v8198_v18 = vld [vmem:[%s14139_s22 + $0x3a8] sm:$0xff] }
 0x274   : > { %v2416_v34 = vrot.slane %v2229_v59, 7  ;;  %v8200_v59 = vld [vmem:[%s14139_s22 + $0x3b8] sm:$0xff]  ;;  %v2542_v3 = vld [vmem:[#allocation2 + $0x8] sm:$0xff]  ;;  %v9688_v10 = vpack.c.bf16 %v8195_v14, %v8193_v17  ;;  %v12242_v17 = vld [vmem:[#allocation2 + $0x20] sm:$0xff] }
 0x275   : > { %v2415_v33 = vsel %vm2299_vm6, %v2410_v36, %v2414_v31  ;;  %v2884_v26 = vsel %vm2778_vm8, %v2879_v16, %v2883_v21  ;;  %v2890_v36 = vsel %vm2778_vm8, %v2885_v4, %v2889_v43  ;;  %v9690_v31 = vpack.c.bf16 %v8200_v59, %v8198_v18  ;;  %v12245_v14 = vld [vmem:[#allocation2 + $0x38] sm:$0xff] }
 0x276   : > { %2538 = vst [vmem:[#allocation2 + $0x1d0] sm:$0x7f] %v2415_v33  ;;  %v2417_v22 = vsel %vm2299_vm6, %v2412_v53, %v2416_v34  ;;  %8158 = vmatprep.mubr.msk.f32.mxu1 %vm2482_vm7, %v2884_v26  ;;  %v12164_v30 = vld [vmem:[#allocation2 + $0x1b8] sm:$0xff]  ;;  %v8199_v34 = vld [vmem:[%s14139_s22 + $0x3b0] sm:$0xff]  ;;  %v2541_v33 = vld [vmem:[#allocation2] sm:$0xff] }
 0x277   : > { %2540 = vst.msk [vmem:[#allocation2 + $0x1d8] sm:$0x7f] %vm2539_vm9, %v2417_v22  ;;  %3202 = vmatmul.mubr.f32.gmra.mrb[50].mxu1 %v2882_v61  ;;  %v2887_v23 = vrot.slane %v12164_v30, 1  ;;  %v8202_v26 = vld [vmem:[%s14139_s22 + $0x3c8] sm:$0xff]  ;;  %v8204_v22 = vld [vmem:[%s14139_s22 + $0x3d8] sm:$0xff] }
 0x278   : > { %v12207_v61 = vld [vmem:[#allocation2 + $0x18] sm:$0xff] }
 0x279   : > { %v2888_v47 = vsel %vm2778_vm8, %v2883_v21, %v2887_v23  ;;  %v8197_v21 = vld [vmem:[%s14139_s22 + $0x3a0] sm:$0xff] }
 0x27a   : > { %8159 = vmatprep.mubr.msk.f32.mxu1 %vm2482_vm7, %v2888_v47  ;;  %v12171_v24 = vld [vmem:[#allocation2 + $0x1c8] sm:$0xff]  ;;  %v9692_v4 = vpack.c.bf16 %v8199_v34, %v8197_v21  ;;  %v8201_v47 = vld [vmem:[%s14139_s22 + $0x3c0] sm:$0xff]  ;;  %v8216_v21 = vld [vmem:[%s14139_s22 + $0x438] sm:$0xff] }
 0x27b   : > { %3208 = vmatmul.mubr.f32.gmra.mrb[52].mxu1 %v2886_v35  ;;  %v2891_v32 = vrot.slane %v12171_v24, 1  ;;  %v8203_v35 = vld [vmem:[%s14139_s22 + $0x3d0] sm:$0xff] }
 0x27c   : > { %v12261_v34 = vld [vmem:[#allocation2 + $0x30] sm:$0xff] }
 0x27d   : > { %v2892_v55 = vsel %vm2778_vm8, %v2887_v23, %v2891_v32  ;;  %v2659_v50 = vld [vmem:[#allocation2 + $0x1d0] sm:$0x7f]  ;;  %v9694_v23 = vpack.c.bf16 %v8204_v22, %v8202_v26 }
 0x27e   : > { %8160 = vmatprep.mubr.msk.f32.mxu1 %vm2482_vm7, %v2892_v55  ;;  %v2660_v45 = vld [vmem:[#allocation2 + $0x1d8] sm:$0x7f]  ;;  %v2893_v16 = vrot.slane %v2659_v50, 1  ;;  %v12223_v55 = vld [vmem:[#allocation2 + $0x10] sm:$0xff]  ;;  %v12226_v50 = vld [vmem:[#allocation2 + $0x28] sm:$0xff] }
 0x27f   : > { %3214 = vmatmul.mubr.f32.gmra.mrb[54].mxu1 %v2890_v36  ;;  %v2895_v2 = vrot.slane %v2660_v45, 1  ;;  %v9696_v36 = vpack.c.bf16 %v8203_v35, %v8201_v47  ;;  %v8218_v47 = vld [vmem:[%s14139_s22 + $0x448] sm:$0xff]  ;;  %v8220_v35 = vld [vmem:[%s14139_s22 + $0x458] sm:$0xff] }
 0x280   : > { %v2894_v52 = vsel %vm2778_vm8, %v2889_v43, %v2893_v16  ;;  %v8206_v43 = vld [vmem:[%s14139_s22 + $0x3e8] sm:$0xff] }
 0x281   : > { %v2896_v53 = vsel %vm2778_vm8, %v2891_v32, %v2895_v2  ;;  %v8208_v32 = vld [vmem:[%s14139_s22 + $0x3f8] sm:$0xff] }
 0x282   : > { %8161 = vmatprep.mubr.msk.f32.mxu1 %vm2482_vm7, %v2896_v53  ;;  %v9698_v45 = vpack.c.bf16 %v8208_v32, %v8206_v43  ;;  %v8210_v53 = vld [vmem:[%s14139_s22 + $0x408] sm:$0xff]  ;;  %v12280_v43 = vld [vmem:[#allocation2 + $0x40] sm:$0xff]  ;;  %v12283_v32 = vld [vmem:[#allocation2 + $0x58] sm:$0xff] }
 0x283   : > { %3220 = vmatmul.mubr.f32.gmra.mrb[56].mxu1 %v2894_v52  ;;  %v8212_v52 = vld [vmem:[%s14139_s22 + $0x418] sm:$0xff] }
 0x284   : > { %8162 = vmatprep.mubr.msk.f32.mxu1 %vm2482_vm7, %v2895_v2  ;;  %v8207_v2 = vld [vmem:[%s14139_s22 + $0x3f0] sm:$0xff]  ;;  %v9702_v59 = vpack.c.bf16 %v8212_v52, %v8210_v53  ;;  %v8222_v53 = vld [vmem:[%s14139_s22 + $0x468] sm:$0xff]  ;;  %v8224_v52 = vld [vmem:[%s14139_s22 + $0x478] sm:$0xff] }
 0x287   : > { %3226 = vmatmul.mubr.f32.gmra.mrb[58].mxu1 %v2893_v16  ;;  %v8205_v16 = vld [vmem:[%s14139_s22 + $0x3e0] sm:$0xff] }
 0x288   : > { %8163 = vmatprep.mubr.msk.f32.mxu1 %vm2482_vm7, %v2542_v3  ;;  %v9700_v18 = vpack.c.bf16 %v8207_v2, %v8205_v16  ;;  %v8209_v3 = vld [vmem:[%s14139_s22 + $0x400] sm:$0xff]  ;;  %v8219_v2 = vld [vmem:[%s14139_s22 + $0x450] sm:$0xff] }
 0x289   : > { %v8217_v16 = vld [vmem:[%s14139_s22 + $0x440] sm:$0xff] }
 0x28b   : > { %3359 = vmatmul.mubr.f32.vlgmr.msra.gmra.mrb[0].mxu1 %v2541_v33  ;;  %v12264_v33 = vld [vmem:[#allocation2 + $0x48] sm:$0xff] }
 0x28c   : > { %8164 = vmatprep.mubr.msk.f32.mxu1 %vm2482_vm7, %v12207_v61  ;;  %9689 = vmatpush1.bf16.msra.mxu1 %v9688_v10  ;;  %v8211_v10 = vld [vmem:[%s14139_s22 + $0x410] sm:$0xff] }
 0x28d   : > { %9691 = vmatprep.subr.bf16.mxu1 %v9690_v31  ;;  %v8214_v31 = vld [vmem:[%s14139_s22 + $0x428] sm:$0xff]  ;;  %v9704_v26 = vpack.c.bf16 %v8211_v10, %v8209_v3  ;;  %v9712_v3 = vpack.c.bf16 %v8219_v2, %v8217_v16  ;;  %v9714_v10 = vpack.c.bf16 %v8224_v52, %v8222_v53  ;;  %v8232_v2 = vld [vmem:[%s14139_s22 + $0x4b8] sm:$0xff]  ;;  %v12337_v53 = vld [vmem:[#allocation2 + $0x70] sm:$0xff] }
 0x28e   : > { %v9706_v22 = vpack.c.bf16 %v8216_v21, %v8214_v31  ;;  %v8221_v31 = vld [vmem:[%s14139_s22 + $0x460] sm:$0xff]  ;;  %v8223_v21 = vld [vmem:[%s14139_s22 + $0x470] sm:$0xff]  ;;  %v8230_v16 = vld [vmem:[%s14139_s22 + $0x4a8] sm:$0xff] }
 0x28f   : > { %3365 = vmatmul.mubr.f32.gmra.mrb[2].mxu1 %v12223_v55  ;;  %v12340_v52 = vld [vmem:[#allocation2 + $0x88] sm:$0xff] }
 0x290   : > { %8165 = vmatprep.mubr.msk.f32.mxu1 %vm2482_vm7, %v12226_v50  ;;  %9693 = vmatpush1.bf16.msra.mxu1 %v9692_v4  ;;  %v8213_v4 = vld [vmem:[%s14139_s22 + $0x420] sm:$0xff] }
 0x291   : > { %9695 = vmatprep.subr.bf16.mxu1 %v9694_v23  ;;  %v8215_v23 = vld [vmem:[%s14139_s22 + $0x430] sm:$0xff] }
 0x293   : > { %3371 = vmatmul.mubr.f32.gmra.mrb[4].mxu1 %v12242_v17 }
 0x294   : > { %8166 = vmatprep.mubr.msk.f32.mxu1 %vm2482_vm7, %v12245_v14  ;;  %9697 = vmatpush1.bf16.msra.mxu1 %v9696_v36  ;;  %v9708_v36 = vpack.c.bf16 %v8215_v23, %v8213_v4  ;;  %v12318_v4 = vld [vmem:[#allocation2 + $0x60] sm:$0xff]  ;;  %v12321_v23 = vld [vmem:[#allocation2 + $0x78] sm:$0xff] }
 0x295   : > { %9699 = vmatprep.subr.bf16.mxu1 %v9698_v45  ;;  %v9710_v45 = vpack.c.bf16 %v8220_v35, %v8218_v47  ;;  %v9716_v47 = vpack.c.bf16 %v8223_v21, %v8221_v31  ;;  %v8229_v31 = vld [vmem:[%s14139_s22 + $0x4a0] sm:$0xff]  ;;  %v8231_v21 = vld [vmem:[%s14139_s22 + $0x4b0] sm:$0xff] }
 0x297   : > { %3377 = vmatmul.mubr.f32.gmra.mrb[6].mxu1 %v12261_v34 }
 0x298   : > { %8167 = vmatprep.mubr.msk.f32.mxu1 %vm2482_vm7, %v12264_v33  ;;  %9701 = vmatpush1.bf16.msra.mxu1 %v9700_v18  ;;  %v12299_v18 = vld [vmem:[#allocation2 + $0x50] sm:$0xff] }
 0x299   : > { %9703 = vmatprep.subr.bf16.mxu1 %v9702_v59  ;;  %v12302_v59 = vld [vmem:[#allocation2 + $0x68] sm:$0xff] }
 0x29b   : > { %3383 = vmatmul.mubr.f32.gmra.mrb[8].mxu1 %v12280_v43 }
 0x29c   : > { %8168 = vmatprep.mubr.msk.f32.mxu1 %vm2482_vm7, %v12283_v32  ;;  %9705 = vmatpush1.bf16.msra.mxu1 %v9704_v26  ;;  %v8226_v26 = vld [vmem:[%s14139_s22 + $0x488] sm:$0xff] }
 0x29d   : > { %9707 = vmatprep.subr.bf16.mxu1 %v9706_v22  ;;  %v8228_v22 = vld [vmem:[%s14139_s22 + $0x498] sm:$0xff] }
 0x29e   : > { %v9718_v35 = vpack.c.bf16 %v8228_v22, %v8226_v26  ;;  %v8234_v26 = vld [vmem:[%s14139_s22 + $0x4c8] sm:$0xff]  ;;  %v8236_v22 = vld [vmem:[%s14139_s22 + $0x4d8] sm:$0xff] }
 0x29f   : > { %3389 = vmatmul.mubr.f32.gmra.mrb[10].mxu1 %v12299_v18 }
 0x2a0   : > { %8169 = vmatprep.mubr.msk.f32.mxu1 %vm2482_vm7, %v12302_v59  ;;  %9709 = vmatpush1.bf16.msra.mxu1 %v9708_v36  ;;  %v8225_v36 = vld [vmem:[%s14139_s22 + $0x480] sm:$0xff] }
 0x2a1   : > { %9711 = vmatprep.subr.bf16.mxu1 %v9710_v45  ;;  %v8227_v45 = vld [vmem:[%s14139_s22 + $0x490] sm:$0xff] }
 0x2a3   : > { %3395 = vmatmul.mubr.f32.gmra.mrb[12].mxu1 %v12318_v4 }
 0x2a4   : > { %8170 = vmatprep.mubr.msk.f32.mxu1 %vm2482_vm7, %v12321_v23  ;;  %9713 = vmatpush1.bf16.msra.mxu1 %v9712_v3  ;;  %v9720_v3 = vpack.c.bf16 %v8227_v45, %v8225_v36  ;;  %v9724_v36 = vpack.c.bf16 %v8231_v21, %v8229_v31  ;;  %v9726_v45 = vpack.c.bf16 %v8236_v22, %v8234_v26  ;;  %v8237_v26 = vld [vmem:[%s14139_s22 + $0x4e0] sm:$0xff]  ;;  %v8239_v22 = vld [vmem:[%s14139_s22 + $0x4f0] sm:$0xff] }
 0x2a5   : > { %9715 = vmatprep.subr.bf16.mxu1 %v9714_v10  ;;  %v9722_v10 = vpack.c.bf16 %v8232_v2, %v8230_v16  ;;  %v8233_v16 = vld [vmem:[%s14139_s22 + $0x4c0] sm:$0xff]  ;;  %v8235_v2 = vld [vmem:[%s14139_s22 + $0x4d0] sm:$0xff]  ;;  %v9730_v21 = vpack.c.bf16 %v8240_v15, %v8238_v7  ;;  %v9732_v7 = vpack.c.bf16 %v8239_v22, %v8237_v26  ;;  %v9734_v15 = vpack.c.bf16 %v8244_v12, %v8242_v13 }
 0x2a6   : > { %v9728_v31 = vpack.c.bf16 %v8235_v2, %v8233_v16  ;;  %v8243_v16 = vld [vmem:[%s14139_s22 + $0x510] sm:$0xff]  ;;  %v8246_v2 = vld [vmem:[%s14139_s22 + $0x528] sm:$0xff]  ;;  %v12422_v22 = vld [vmem:[#allocation2 + $0xc0] sm:$0xff] }
 0x2a7   : > { %3401 = vmatmul.mubr.f32.gmra.mrb[14].mxu1 %v12337_v53  ;;  %v8247_v26 = vld [vmem:[%s14139_s22 + $0x530] sm:$0xff] }
 0x2a8   : > { %8171 = vmatprep.mubr.msk.f32.mxu1 %vm2482_vm7, %v12340_v52  ;;  %9717 = vmatpush1.bf16.msra.mxu1 %v9716_v47  ;;  %v12356_v47 = vld [vmem:[#allocation2 + $0x80] sm:$0xff] }
 0x2a9   : > { %9719 = vmatprep.subr.bf16.mxu1 %v9718_v35  ;;  %v12359_v35 = vld [vmem:[#allocation2 + $0x98] sm:$0xff] }
 0x2ab   : > { %3407 = vmatmul.mubr.f32.gmra.mrb[16].mxu1 %v12356_v47 }
 0x2ac   : > { %8172 = vmatprep.mubr.msk.f32.mxu1 %vm2482_vm7, %v12359_v35  ;;  %9721 = vmatpush1.bf16.msra.mxu1 %v9720_v3  ;;  %v12375_v3 = vld [vmem:[#allocation2 + $0x90] sm:$0xff] }
 0x2ad   : > { %9723 = vmatprep.subr.bf16.mxu1 %v9722_v10  ;;  %v12378_v10 = vld [vmem:[#allocation2 + $0xa8] sm:$0xff] }
 0x2af   : > { %3413 = vmatmul.mubr.f32.gmra.mrb[18].mxu1 %v12375_v3 }
 0x2b0   : > { %8173 = vmatprep.mubr.msk.f32.mxu1 %vm2482_vm7, %v12378_v10  ;;  %9725 = vmatpush1.bf16.msra.mxu1 %v9724_v36  ;;  %v12394_v36 = vld [vmem:[#allocation2 + $0xa0] sm:$0xff] }
 0x2b1   : > { %9727 = vmatprep.subr.bf16.mxu1 %v9726_v45  ;;  %v8241_v45 = vld [vmem:[%s14139_s22 + $0x500] sm:$0xff] }
 0x2b2   : > { %v9736_v12 = vpack.c.bf16 %v8243_v16, %v8241_v45  ;;  %v3617_v16 = vrot.slane %v12245_v14, 2 }
 0x2b3   : > { %3419 = vmatmul.mubr.f32.gmra.mrb[20].mxu1 %v12394_v36 }
 0x2b4   : > { %8174 = vmatprep.mubr.msk.f32.mxu1 %vm2482_vm7, %v11894_v48  ;;  %9729 = vmatpush1.bf16.msra.mxu1 %v9728_v31  ;;  %v8248_v48 = vld [vmem:[%s14139_s22 + $0x538] sm:$0xff]  ;;  %v12411_v31 = vld [vmem:[#allocation2 + $0xb0] sm:$0xff] }
 0x2b5   : > { %9731 = vmatprep.subr.bf16.mxu1 %v9730_v21  ;;  %v9738_v13 = vpack.c.bf16 %v8248_v48, %v8246_v2  ;;  %v8245_v21 = vld [vmem:[%s14139_s22 + $0x520] sm:$0xff]  ;;  %v3615_v48 = vrot.slane %v12261_v34, 2 }
 0x2b7   : > { %3425 = vmatmul.mubr.f32.gmra.mrb[22].mxu1 %v12411_v31 }
 0x2b8   : > { %8175 = vmatprep.mubr.msk.f32.mxu1 %vm2482_vm7, %v11924_v9  ;;  %9733 = vmatpush1.bf16.msra.mxu1 %v9732_v7  ;;  %v9740_v9 = vpack.c.bf16 %v8247_v26, %v8245_v21  ;;  %v12427_v7 = vld [vmem:[#allocation2 + $0xd0] sm:$0xff]  ;;  %v3623_v21 = vrot.slane %v12299_v18, 2  ;;  %v3629_v26 = vrot.slane %v12302_v59, 2 }
 0x2b9   : > { %9735 = vmatprep.subr.bf16.mxu1 %v9734_v15 }
 0x2bb   : > { %3431 = vmatmul.mubr.f32.gmra.mrb[24].mxu1 %v12422_v22 }
 0x2bc   : > { %8176 = vmatprep.mubr.msk.f32.mxu1 %vm2482_vm7, %v11952_v38  ;;  %9737 = vmatpush1.bf16.msra.mxu1 %v9736_v12  ;;  %v3609_v38 = vrot.slane %v12207_v61, 2  ;;  %v3611_v61 = vrot.slane %v12242_v17, 2  ;;  %v3619_v12 = vrot.slane %v12280_v43, 2 }
 0x2bd   : > { %9739 = vmatprep.subr.bf16.mxu1 %v9738_v13  ;;  %v3625_v13 = vrot.slane %v12283_v32, 2 }
 0x2be   : > { %v3616_v17 = vsel %vm3604_vm10, %v3611_v61, %v3615_v48  ;;  %v3620_v34 = vsel %vm3604_vm10, %v3615_v48, %v3619_v12  ;;  %v3624_v43 = vsel %vm3604_vm10, %v3619_v12, %v3623_v21  ;;  %v10648_v48 = vld [vmem:[#allocation2 + $0xd8] sm:$0xff]  ;;  %v10649_v12 = vld [vmem:[#allocation2 + $0xe8] sm:$0xff] }
 0x2bf   : > { %3437 = vmatmul.mubr.f32.gmra.mrb[26].mxu1 %v12427_v7  ;;  %v3630_v32 = vsel %vm3604_vm10, %v3625_v13, %v3629_v26 }
 0x2c0   : > { %8177 = vmatprep.mubr.msk.f32.mxu1 %vm2482_vm7, %v11982_v1  ;;  %9741 = vmatpush1.bf16.msra.mxu1 %v9740_v9  ;;  %v3627_v9 = vrot.slane %v12318_v4, 2 }
 0x2c2   : > { %v3628_v18 = vsel %vm3604_vm10, %v3623_v21, %v3627_v9 }
 0x2c3   : > { %3443 = vmatmul.mubr.f32.gmra.mrb[28].mxu1 %v11907_v42  ;;  %v3540_v42 = vld [vmem:[#allocation2 + $0x8] sm:$0xfc] }
 0x2c4   : > { %8178 = vmatprep.mubr.msk.f32.mxu1 %vm2482_vm7, %v11998_v5  ;;  %v3608_v1 = vrot.slane %v3540_v42, 2  ;;  %v3633_v42 = vrot.slane %v12321_v23, 2 }
 0x2c6   : > { %v3634_v59 = vsel %vm3604_vm10, %v3629_v26, %v3633_v42 }
 0x2c7   : > { %3449 = vmatmul.mubr.f32.gmra.mrb[30].mxu1 %v11938_v28  ;;  %v2600_v28 = vld [vmem:[#allocation2 + $0x1d8] sm:$0x3f] }
 0x2c8   : > { %8179 = vmatprep.mubr.msk.f32.mxu1 %vm2482_vm7, %v12016_v44  ;;  %v3613_v44 = vrot.slane %v12226_v50, 2 }
 0x2ca   : > { %v3614_v45 = vsel %vm3604_vm10, %v3609_v38, %v3613_v44  ;;  %v3618_v50 = vsel %vm3604_vm10, %v3613_v44, %v3617_v16  ;;  %v10646_v44 = vld [vmem:[#allocation2 + $0xb8] sm:$0xff] }
 0x2cb   : > { %3455 = vmatmul.mubr.f32.gmra.mrb[32].mxu1 %v11965_v51  ;;  %v3539_v51 = vld [vmem:[#allocation2] sm:$0xfc] }
 0x2cc   : > { %8180 = vmatprep.mubr.msk.f32.mxu1 %vm2482_vm7, %v12030_v6  ;;  %v3605_v5 = vrot.slane %v3539_v51, 2  ;;  %v3635_v51 = vrot.slane %v12356_v47, 2 }
 0x2cf   : > { %3461 = vmatmul.mubr.f32.gmra.mrb[34].mxu1 %v11990_v19  ;;  %v2599_v19 = vld [vmem:[#allocation2 + $0x1d0] sm:$0x3f] }
 0x2d0   : > { %8181 = vmatprep.mubr.msk.f32.mxu1 %vm2482_vm7, %v12045_v27 }
 0x2d3   : > { %3467 = vmatmul.mubr.f32.gmra.mrb[36].mxu1 %v12005_v39  ;;  %v3610_v39 = vsel %vm3604_vm10, %v3608_v1, %v3609_v38  ;;  %v3637_v38 = vrot.slane %v12340_v52, 2  ;;  %v3641_v1 = vrot.slane %v12359_v35, 2 }
 0x2d4   : > { %8182 = vmatprep.mubr.msk.f32.mxu1 %vm2482_vm7, %v12058_v57 }
 0x2d5   : > { %v3638_v23 = vsel %vm3604_vm10, %v3633_v42, %v3637_v38  ;;  %v3642_v52 = vsel %vm3604_vm10, %v3637_v38, %v3641_v1  ;;  %v10653_v42 = vld [vmem:[#allocation2 + $0x108] sm:$0xff] }
 0x2d7   : > { %3473 = vmatmul.mubr.f32.gmra.mrb[38].mxu1 %v12022_v58  ;;  %v3606_v58 = vrot.slane %v12223_v55, 2  ;;  %v3621_v55 = vrot.slane %v12264_v33, 2 }
 0x2d8   : > { %8183 = vmatprep.mubr.msk.f32.mxu1 %vm2482_vm7, %v12073_v0 }
 0x2d9   : > { %v3607_v15 = vsel %vm3604_vm10, %v3605_v5, %v3606_v58  ;;  %v3612_v2 = vsel %vm3604_vm10, %v3606_v58, %v3611_v61  ;;  %v3622_v14 = vsel %vm3604_vm10, %v3617_v16, %v3621_v55  ;;  %v3626_v33 = vsel %vm3604_vm10, %v3621_v55, %v3625_v13  ;;  %v10647_v61 = vld [vmem:[#allocation2 + $0xc8] sm:$0xff]  ;;  %v10650_v13 = vld [vmem:[#allocation2 + $0xe0] sm:$0xff] }
 0x2da   : > { %v3645_v5 = vrot.slane %v12378_v10, 2  ;;  %v3649_v58 = vrot.slane %v10646_v44, 2  ;;  %v3651_v16 = vrot.slane %v12422_v22, 2  ;;  %v3655_v55 = vrot.slane %v12427_v7, 2 }
 0x2db   : > { %3479 = vmatmul.mubr.f32.gmra.mrb[40].mxu1 %v12037_v25 }
 0x2dc   : > { %8184 = vmatprep.mubr.msk.f32.mxu1 %vm2482_vm7, %v12086_v37  ;;  %v3646_v35 = vsel %vm3604_vm10, %v3641_v1, %v3645_v5  ;;  %v3650_v10 = vsel %vm3604_vm10, %v3645_v5, %v3649_v58  ;;  %v3656_v22 = vsel %vm3604_vm10, %v3651_v16, %v3655_v55  ;;  %v10655_v1 = vld [vmem:[#allocation2 + $0x110] sm:$0xff] }
 0x2df   : > { %3485 = vmatmul.mubr.f32.gmra.mrb[42].mxu1 %v12051_v49 }
 0x2e0   : > { %8185 = vmatprep.mubr.msk.f32.mxu1 %vm2482_vm7, %v12101_v20 }
 0x2e3   : > { %3491 = vmatmul.mubr.f32.gmra.mrb[44].mxu1 %v12065_v8 }
 0x2e4   : > { %8186 = vmatprep.mubr.msk.f32.mxu1 %vm2482_vm7, %v12114_v46 }
 0x2e7   : > { %3497 = vmatmul.mubr.f32.gmra.mrb[46].mxu1 %v12079_v40 }
 0x2e8   : > { %8187 = vmatprep.mubr.msk.f32.mxu1 %vm2482_vm7, %v12129_v29 }
 0x2eb   : > { %3503 = vmatmul.mubr.f32.gmra.mrb[48].mxu1 %v12093_v62 }
 0x2ec   : > { %8188 = vmatprep.mubr.msk.f32.mxu1 %vm2482_vm7, %v12142_v60 }
 0x2ef   : > { %3509 = vmatmul.mubr.f32.gmra.mrb[50].mxu1 %v12107_v11 }
 0x2f0   : > { %8189 = vmatprep.mubr.msk.f32.mxu1 %vm2482_vm7, %v12154_v56 }
 0x2f3   : > { %3515 = vmatmul.mubr.f32.gmra.mrb[52].mxu1 %v12121_v63 }
 0x2f4   : > { %8190 = vmatprep.mubr.msk.f32.mxu1 %vm2482_vm7, %v12164_v30 }
 0x2f7   : > { %3521 = vmatmul.mubr.f32.gmra.mrb[54].mxu1 %v12135_v41 }
 0x2f8   : > { %8191 = vmatprep.mubr.msk.f32.mxu1 %vm2482_vm7, %v12171_v24 }
 0x2fb   : > { %3527 = vmatmul.mubr.f32.gmra.mrb[56].mxu1 %v12148_v54 }
 0x2fc   : > { %8192 = vmatprep.mubr.msk.f32.mxu1 %vm2482_vm7, %v2600_v28  ;;  %v3631_v28 = vrot.slane %v12337_v53, 2 }
 0x2fe   : > { %v3632_v4 = vsel %vm3604_vm10, %v3627_v9, %v3631_v28  ;;  %v3636_v53 = vsel %vm3604_vm10, %v3631_v28, %v3635_v51 }
 0x2ff   : > { %3533 = vmatmul.mubr.f32.gmra.mrb[58].mxu1 %v2599_v19  ;;  %v3639_v19 = vrot.slane %v12375_v3, 2 }
 0x300   : > { %8249 = vmatprep.mubr.msk.f32.mxu1 %vm2482_vm7, %v3610_v39  ;;  %v3643_v39 = vrot.slane %v12394_v36, 2 }
 0x301   : > { %v3640_v47 = vsel %vm3604_vm10, %v3635_v51, %v3639_v19  ;;  %v3673_v51 = vrot.slane %v12030_v6, 2 }
 0x302   : > { %v3644_v3 = vsel %vm3604_vm10, %v3639_v19, %v3643_v39 }
 0x303   : > { %3878 = vmatmul.mubr.f32.vlgmr.msra.gmra.mrb[0].mxu1 %v3607_v15  ;;  %v3647_v15 = vrot.slane %v12411_v31, 2 }
 0x304   : > { %8250 = vmatprep.mubr.msk.f32.mxu1 %vm2482_vm7, %v3614_v45  ;;  %v3653_v45 = vrot.slane %v10647_v61, 2  ;;  %v3683_v61 = vrot.slane %v12037_v25, 2 }
 0x305   : > { %v3648_v36 = vsel %vm3604_vm10, %v3643_v39, %v3647_v15  ;;  %v3652_v31 = vsel %vm3604_vm10, %v3647_v15, %v3651_v16  ;;  %v3685_v15 = vrot.slane %v12073_v0, 2  ;;  %v3687_v16 = vrot.slane %v12051_v49, 2 }
 0x307   : > { %3884 = vmatmul.mubr.f32.gmra.mrb[2].mxu1 %v3612_v2  ;;  %v3654_v2 = vsel %vm3604_vm10, %v3649_v58, %v3653_v45  ;;  %v10657_v58 = vld [vmem:[#allocation2 + $0x130] sm:$0xff]  ;;  %v3688_v25 = vsel %vm3604_vm10, %v3683_v61, %v3687_v16 }
 0x308   : > { %8251 = vmatprep.mubr.msk.f32.mxu1 %vm2482_vm7, %v3618_v50  ;;  %v3657_v50 = vrot.slane %v10648_v48, 2  ;;  %v3691_v48 = vrot.slane %v12065_v8, 2 }
 0x30a   : > { %v3692_v49 = vsel %vm3604_vm10, %v3687_v16, %v3691_v48 }
 0x30b   : > { %3890 = vmatmul.mubr.f32.gmra.mrb[4].mxu1 %v3616_v17  ;;  %v3658_v17 = vsel %vm3604_vm10, %v3653_v45, %v3657_v50  ;;  %v3689_v45 = vrot.slane %v12086_v37, 2 }
 0x30c   : > { %8252 = vmatprep.mubr.msk.f32.mxu1 %vm2482_vm7, %v3622_v14  ;;  %v3661_v14 = vrot.slane %v10649_v12, 2  ;;  %v3705_v12 = vrot.slane %v12142_v60, 2 }
 0x30d   : > { %v3690_v0 = vsel %vm3604_vm10, %v3685_v15, %v3689_v45 }
 0x30e   : > { %v3662_v21 = vsel %vm3604_vm10, %v3657_v50, %v3661_v14  ;;  %v3697_v50 = vrot.slane %v12114_v46, 2 }
 0x30f   : > { %3896 = vmatmul.mubr.f32.gmra.mrb[6].mxu1 %v3620_v34  ;;  %v3659_v34 = vrot.slane %v10650_v13, 2  ;;  %v3707_v13 = vrot.slane %v12121_v63, 2 }
 0x310   : > { %8253 = vmatprep.mubr.msk.f32.mxu1 %vm2482_vm7, %v3626_v33  ;;  %v10651_v33 = vld [vmem:[#allocation2 + $0xf8] sm:$0xff] }
 0x311   : > { %v3665_v26 = vrot.slane %v10651_v33, 2  ;;  %v3660_v7 = vsel %vm3604_vm10, %v3655_v55, %v3659_v34  ;;  %v3701_v55 = vrot.slane %v12129_v29, 2  ;;  %v3717_v33 = vrot.slane %v12171_v24, 2 }
 0x313   : > { %3902 = vmatmul.mubr.f32.gmra.mrb[8].mxu1 %v3624_v43  ;;  %v10652_v43 = vld [vmem:[#allocation2 + $0xf0] sm:$0xff]  ;;  %v3702_v46 = vsel %vm3604_vm10, %v3697_v50, %v3701_v55  ;;  %v3706_v29 = vsel %vm3604_vm10, %v3701_v55, %v3705_v12 }
 0x314   : > { %8254 = vmatprep.mubr.msk.f32.mxu1 %vm2482_vm7, %v3630_v32  ;;  %v3663_v9 = vrot.slane %v10652_v43, 2  ;;  %v3666_v32 = vsel %vm3604_vm10, %v3661_v14, %v3665_v26  ;;  %v3703_v14 = vrot.slane %v12107_v11, 2 }
 0x316   : > { %v3664_v28 = vsel %vm3604_vm10, %v3659_v34, %v3663_v9  ;;  %v3713_v34 = vrot.slane %v12164_v30, 2  ;;  %v3708_v11 = vsel %vm3604_vm10, %v3703_v14, %v3707_v13 }
 0x317   : > { %3908 = vmatmul.mubr.f32.gmra.mrb[10].mxu1 %v3628_v18  ;;  %v3669_v18 = vrot.slane %v10653_v42, 2 }
 0x318   : > { %8255 = vmatprep.mubr.msk.f32.mxu1 %vm2482_vm7, %v3634_v59  ;;  %v10654_v59 = vld [vmem:[#allocation2 + $0x100] sm:$0xff]  ;;  %v3718_v30 = vsel %vm3604_vm10, %v3713_v34, %v3717_v33 }
 0x319   : > { %v3667_v38 = vrot.slane %v10654_v59, 2  ;;  %v3674_v19 = vsel %vm3604_vm10, %v3669_v18, %v3673_v51  ;;  %v14143_v59 = vld [vmem:[#allocation14_spill] sm:$0xff] }
 0x31b   : > { %3914 = vmatmul.mubr.f32.gmra.mrb[12].mxu1 %v3632_v4  ;;  %v3670_v4 = vsel %vm3604_vm10, %v3665_v26, %v3669_v18  ;;  %v3542_v26 = vld [vmem:[#allocation2 + $0x1d8] sm:$0xff]  ;;  %v4251_v18 = vld [vmem:[%s14090_s11 + $0x8] sm:$0xff] }
 0x31c   : > { %8256 = vmatprep.mubr.msk.f32.mxu1 %vm2482_vm7, %v3638_v23  ;;  %v3668_v23 = vsel %vm3604_vm10, %v3663_v9, %v3667_v38  ;;  %v3721_v43 = vrot.slane %v3542_v26, 2  ;;  %v3541_v9 = vld [vmem:[#allocation2 + $0x1d0] sm:$0xff]  ;;  %8281 = vmatprep.mubr.msk.f32.mxu0 %vm4282_vm11, %v4251_v18 }
 0x31e   : > { %v3722_v24 = vsel %vm3604_vm10, %v3717_v33, %v3721_v43 }
 0x31f   : > { %3920 = vmatmul.mubr.f32.gmra.mrb[14].mxu1 %v3636_v53  ;;  %v3671_v53 = vrot.slane %v10655_v1, 2 }
 0x320   : > { %8257 = vmatprep.mubr.msk.f32.mxu1 %vm2482_vm7, %v3642_v52  ;;  %v3677_v52 = vrot.slane %v12045_v27, 2 }
 0x321   : > { %v3672_v5 = vsel %vm3604_vm10, %v3667_v38, %v3671_v53  ;;  %v14144_v38 = vsub.s32 0, %v14143_v59 }
 0x322   : > { %v3678_v6 = vsel %vm3604_vm10, %v3673_v51, %v3677_v52 }
 0x323   : > { %3926 = vmatmul.mubr.f32.gmra.mrb[16].mxu1 %v3640_v47  ;;  %v10656_v47 = vld [vmem:[#allocation2 + $0x120] sm:$0xff] }
 0x324   : > { %8258 = vmatprep.mubr.msk.f32.mxu1 %vm2482_vm7, %v3646_v35  ;;  %v3675_v39 = vrot.slane %v10656_v47, 2  ;;  %v3681_v35 = vrot.slane %v12058_v57, 2 }
 0x326   : > { %v3676_v44 = vsel %vm3604_vm10, %v3671_v53, %v3675_v39  ;;  %v3682_v27 = vsel %vm3604_vm10, %v3677_v52, %v3681_v35  ;;  %v3686_v57 = vsel %vm3604_vm10, %v3681_v35, %v3685_v15 }
 0x327   : > { %3932 = vmatmul.mubr.f32.gmra.mrb[18].mxu1 %v3644_v3  ;;  %v3679_v3 = vrot.slane %v10657_v58, 2 }
 0x328   : > { %8259 = vmatprep.mubr.msk.f32.mxu1 %vm2482_vm7, %v3650_v10 }
 0x329   : > { %v3680_v10 = vsel %vm3604_vm10, %v3675_v39, %v3679_v3 }
 0x32b   : > { %3938 = vmatmul.mubr.f32.gmra.mrb[20].mxu1 %v3648_v36  ;;  %v3684_v36 = vsel %vm3604_vm10, %v3679_v3, %v3683_v61 }
 0x32c   : > { %8260 = vmatprep.mubr.msk.f32.mxu1 %vm2482_vm7, %v3654_v2  ;;  %v3693_v2 = vrot.slane %v12101_v20, 2 }
 0x32e   : > { %v3694_v37 = vsel %vm3604_vm10, %v3689_v45, %v3693_v2  ;;  %v3698_v20 = vsel %vm3604_vm10, %v3693_v2, %v3697_v50 }
 0x32f   : > { %3944 = vmatmul.mubr.f32.gmra.mrb[22].mxu1 %v3652_v31  ;;  %v3695_v31 = vrot.slane %v12079_v40, 2 }
 0x330   : > { %8261 = vmatprep.mubr.msk.f32.mxu1 %vm2482_vm7, %v3658_v17  ;;  %v3699_v17 = vrot.slane %v12093_v62, 2 }
 0x331   : > { %v3696_v8 = vsel %vm3604_vm10, %v3691_v48, %v3695_v31 }
 0x332   : > { %v3700_v40 = vsel %vm3604_vm10, %v3695_v31, %v3699_v17  ;;  %v3704_v62 = vsel %vm3604_vm10, %v3699_v17, %v3703_v14 }
 0x333   : > { %3950 = vmatmul.mubr.f32.gmra.mrb[24].mxu1 %v3656_v22  ;;  %v3709_v22 = vrot.slane %v12154_v56, 2 }
 0x334   : > { %8262 = vmatprep.mubr.msk.f32.mxu1 %vm2482_vm7, %v3662_v21  ;;  %v3711_v21 = vrot.slane %v12135_v41, 2 }
 0x335   : > { %v3710_v60 = vsel %vm3604_vm10, %v3705_v12, %v3709_v22  ;;  %v3714_v56 = vsel %vm3604_vm10, %v3709_v22, %v3713_v34 }
 0x336   : > { %v3712_v63 = vsel %vm3604_vm10, %v3707_v13, %v3711_v21 }
 0x337   : > { %3956 = vmatmul.mubr.f32.gmra.mrb[26].mxu1 %v3660_v7  ;;  %v3715_v7 = vrot.slane %v12148_v54, 2  ;;  %v4118_v54 = vld [vmem:[%s14142_s28] sm:$0x3] }
 0x338   : > { %8263 = vmatprep.mubr.msk.f32.mxu1 %vm2482_vm7, %v3666_v32  ;;  %v3719_v32 = vrot.slane %v3541_v9, 2 }
 0x339   : > { %v3716_v41 = vsel %vm3604_vm10, %v3711_v21, %v3715_v7 }
 0x33a   : > { %v3720_v42 = vsel %vm3604_vm10, %v3715_v7, %v3719_v32 }
 0x33b   : > { %3962 = vmatmul.mubr.f32.gmra.mrb[28].mxu1 %v3664_v28  ;;  %v4499_v28 = vld [vmem:[%s14091_s12 + $0x8] sm:$0xff] }
 0x33c   : > { %8264 = vmatprep.mubr.msk.f32.mxu1 %vm2482_vm7, %v3670_v4  ;;  %v12621_v4 = vrot.slane %v4118_v54, %v14144_v38 }
 0x33f   : > { %3968 = vmatmul.mubr.f32.gmra.mrb[30].mxu1 %v3668_v23  ;;  %v14145_v23 = vsub.s32 1, %v14143_v59 }
 0x340   : > { %8265 = vmatprep.mubr.msk.f32.mxu1 %vm2482_vm7, %v3674_v19 }
 0x341   : > { %v12625_v1 = vrot.slane %v4118_v54, %v14145_v23 }
 0x343   : > { %3974 = vmatmul.mubr.f32.gmra.mrb[32].mxu1 %v3672_v5 }
 0x344   : > { %8266 = vmatprep.mubr.msk.f32.mxu1 %vm2482_vm7, %v3678_v6 }
 0x347   : > { %3980 = vmatmul.mubr.f32.gmra.mrb[34].mxu1 %v3676_v44 }
 0x348   : > { %8267 = vmatprep.mubr.msk.f32.mxu1 %vm2482_vm7, %v3682_v27 }
 0x34b   : > { %3986 = vmatmul.mubr.f32.gmra.mrb[36].mxu1 %v3680_v10 }
 0x34c   : > { %8268 = vmatprep.mubr.msk.f32.mxu1 %vm2482_vm7, %v3686_v57 }
 0x34f   : > { %3992 = vmatmul.mubr.f32.gmra.mrb[38].mxu1 %v3684_v36 }
 0x350   : > { %8269 = vmatprep.mubr.msk.f32.mxu1 %vm2482_vm7, %v3690_v0 }
 0x353   : > { %3998 = vmatmul.mubr.f32.gmra.mrb[40].mxu1 %v3688_v25 }
 0x354   : > { %8270 = vmatprep.mubr.msk.f32.mxu1 %vm2482_vm7, %v3694_v37 }
 0x357   : > { %4004 = vmatmul.mubr.f32.gmra.mrb[42].mxu1 %v3692_v49 }
 0x358   : > { %8271 = vmatprep.mubr.msk.f32.mxu1 %vm2482_vm7, %v3698_v20 }
 0x35b   : > { %4010 = vmatmul.mubr.f32.gmra.mrb[44].mxu1 %v3696_v8 }
 0x35c   : > { %8272 = vmatprep.mubr.msk.f32.mxu1 %vm2482_vm7, %v3702_v46 }
 0x35f   : > { %4016 = vmatmul.mubr.f32.gmra.mrb[46].mxu1 %v3700_v40 }
 0x360   : > { %8273 = vmatprep.mubr.msk.f32.mxu1 %vm2482_vm7, %v3706_v29 }
 0x363   : > { %4022 = vmatmul.mubr.f32.gmra.mrb[48].mxu1 %v3704_v62 }
 0x364   : > { %8274 = vmatprep.mubr.msk.f32.mxu1 %vm2482_vm7, %v3710_v60 }
 0x367   : > { %4028 = vmatmul.mubr.f32.gmra.mrb[50].mxu1 %v3708_v11 }
 0x368   : > { %8275 = vmatprep.mubr.msk.f32.mxu1 %vm2482_vm7, %v3714_v56 }
 0x36b   : > { %4034 = vmatmul.mubr.f32.gmra.mrb[52].mxu1 %v3712_v63 }
 0x36c   : > { %8276 = vmatprep.mubr.msk.f32.mxu1 %vm2482_vm7, %v3718_v30 }
 0x36f   : > { %4040 = vmatmul.mubr.f32.gmra.mrb[54].mxu1 %v3716_v41 }
 0x370   : > { %8277 = vmatprep.mubr.msk.f32.mxu1 %vm2482_vm7, %v3722_v24 }
 0x373   : > { %4046 = vmatmul.mubr.f32.gmra.mrb[56].mxu1 %v3720_v42 }
 0x374   : > { %8278 = vmatprep.mubr.msk.f32.mxu1 %vm2482_vm7, %v3721_v43 }
 0x377   : > { %4052 = vmatmul.mubr.f32.gmra.mrb[58].mxu1 %v3719_v32 }
 0x378   : > { %8299 = vmatprep.mubr.msk.f32.mxu1 %vm4282_vm11, %v4499_v28 }
 0x3d6   : > { %v3879_v51 = vpop.f32.mrb[0].mxu1 }
 0x3d7   : > { %v3881_v53 = vpop.f32.mrb[1].mxu1  ;;  %v4130_v19 = vadd.f32 %v12621_v4, %v3879_v51 }
 0x3d8   : > { %v4131_v52 = vadd.f32 %v12625_v1, %v3881_v53 }
 0x3d9   : > { %v4190_v35 = vmax.f32 %v4130_v19, 0.0 }
 0x3da   : > { %v3885_v5 = vpop.f32.mrb[2].mxu1  ;;  %v4191_v58 = vmax.f32 %v4131_v52, 0.0 }
 0x3db   : > { %v4132_v47 = vadd.f32 %v12621_v4, %v3885_v5  ;;  %v3887_v39 = vpop.f32.mrb[3].mxu1 }
 0x3dc   : > { %v4133_v6 = vadd.f32 %v12625_v1, %v3887_v39 }
 0x3dd   : > { %v4192_v44 = vmax.f32 %v4132_v47, 0.0 }
 0x3de   : > { %v4193_v3 = vmax.f32 %v4133_v6, 0.0  ;;  %v3891_v27 = vpop.f32.mrb[4].mxu1 }
 0x3df   : > { %v9744_v15 = vpack.c.bf16 %v4192_v44, %v4190_v35  ;;  %v3893_v10 = vpop.f32.mrb[5].mxu1  ;;  %v4134_v57 = vadd.f32 %v12621_v4, %v3891_v27 }
 0x3e0   : > { %v9742_v61 = vpack.c.bf16 %v4193_v3, %v4191_v58  ;;  %v4135_v45 = vadd.f32 %v12625_v1, %v3893_v10 }
 0x3e1   : > { %v4194_v25 = vmax.f32 %v4134_v57, 0.0 }
 0x3e2   : > { %v3897_v36 = vpop.f32.mrb[6].mxu1  ;;  %9743 = vmatprep.subr.bf16.mxu0 %v9742_v61  ;;  %9805 = vmatprep.subr.bf16.mxu1 %v9742_v61  ;;  %v4195_v37 = vmax.f32 %v4135_v45, 0.0 }
 0x3e3   : > { %v4136_v16 = vadd.f32 %v12621_v4, %v3897_v36  ;;  %v3899_v0 = vpop.f32.mrb[7].mxu1  ;;  %9745 = vmatpush1.bf16.msra.mxu0 %v9744_v15  ;;  %9807 = vmatpush1.bf16.msra.mxu1 %v9744_v15 }
 0x3e4   : > { %v4137_v2 = vadd.f32 %v12625_v1, %v3899_v0 }
 0x3e5   : > { %v4196_v48 = vmax.f32 %v4136_v16, 0.0 }
 0x3e6   : > { %v4197_v50 = vmax.f32 %v4137_v2, 0.0  ;;  %v3903_v49 = vpop.f32.mrb[8].mxu1 }
 0x3e7   : > { %v9748_v31 = vpack.c.bf16 %v4196_v48, %v4194_v25  ;;  %v3905_v20 = vpop.f32.mrb[9].mxu1  ;;  %v4138_v8 = vadd.f32 %v12621_v4, %v3903_v49 }
 0x3e8   : > { %v9746_v55 = vpack.c.bf16 %v4197_v50, %v4195_v37  ;;  %v4139_v17 = vadd.f32 %v12625_v1, %v3905_v20 }
 0x3e9   : > { %v4198_v29 = vmax.f32 %v4138_v8, 0.0 }
 0x3ea   : > { %v3909_v46 = vpop.f32.mrb[10].mxu1  ;;  %9747 = vmatprep.subr.bf16.mxu0 %v9746_v55  ;;  %9809 = vmatprep.subr.bf16.mxu1 %v9746_v55  ;;  %v4199_v62 = vmax.f32 %v4139_v17, 0.0 }
 0x3eb   : > { %v4140_v12 = vadd.f32 %v12621_v4, %v3909_v46  ;;  %v3911_v40 = vpop.f32.mrb[11].mxu1  ;;  %9749 = vmatpush1.bf16.msra.mxu0 %v9748_v31  ;;  %9811 = vmatpush1.bf16.msra.mxu1 %v9748_v31 }
 0x3ec   : > { %v4141_v14 = vadd.f32 %v12625_v1, %v3911_v40 }
 0x3ed   : > { %v4200_v22 = vmax.f32 %v4140_v12, 0.0 }
 0x3ee   : > { %v4201_v13 = vmax.f32 %v4141_v14, 0.0  ;;  %v3915_v60 = vpop.f32.mrb[12].mxu1 }
 0x3ef   : > { %v9752_v34 = vpack.c.bf16 %v4200_v22, %v4198_v29  ;;  %v3917_v11 = vpop.f32.mrb[13].mxu1  ;;  %v4142_v56 = vadd.f32 %v12621_v4, %v3915_v60 }
 0x3f0   : > { %v9750_v21 = vpack.c.bf16 %v4201_v13, %v4199_v62  ;;  %v4143_v33 = vadd.f32 %v12625_v1, %v3917_v11 }
 0x3f1   : > { %v4202_v43 = vmax.f32 %v4142_v56, 0.0 }
 0x3f2   : > { %v3921_v26 = vpop.f32.mrb[14].mxu1  ;;  %9751 = vmatprep.subr.bf16.mxu0 %v9750_v21  ;;  %9813 = vmatprep.subr.bf16.mxu1 %v9750_v21  ;;  %v4203_v41 = vmax.f32 %v4143_v33, 0.0 }
 0x3f3   : > { %v4144_v63 = vadd.f32 %v12621_v4, %v3921_v26  ;;  %v3923_v7 = vpop.f32.mrb[15].mxu1  ;;  %9753 = vmatpush1.bf16.msra.mxu0 %v9752_v34  ;;  %9815 = vmatpush1.bf16.msra.mxu1 %v9752_v34 }
 0x3f4   : > { %v4145_v30 = vadd.f32 %v12625_v1, %v3923_v7 }
 0x3f5   : > { %v4204_v9 = vmax.f32 %v4144_v63, 0.0 }
 0x3f6   : > { %v4205_v32 = vmax.f32 %v4145_v30, 0.0  ;;  %v3927_v24 = vpop.f32.mrb[16].mxu1 }
 0x3f7   : > { %v9756_v42 = vpack.c.bf16 %v4204_v9, %v4202_v43  ;;  %v3929_v54 = vpop.f32.mrb[17].mxu1  ;;  %v4146_v28 = vadd.f32 %v12621_v4, %v3927_v24 }
 0x3f8   : > { %v9754_v18 = vpack.c.bf16 %v4205_v32, %v4203_v41  ;;  %v4147_v59 = vadd.f32 %v12625_v1, %v3929_v54 }
 0x3f9   : > { %v4206_v19 = vmax.f32 %v4146_v28, 0.0 }
 0x3fa   : > { %v3933_v38 = vpop.f32.mrb[18].mxu1  ;;  %9755 = vmatprep.subr.bf16.mxu0 %v9754_v18  ;;  %9817 = vmatprep.subr.bf16.mxu1 %v9754_v18  ;;  %v4207_v5 = vmax.f32 %v4147_v59, 0.0 }
 0x3fb   : > { %v4148_v51 = vadd.f32 %v12621_v4, %v3933_v38  ;;  %v3935_v23 = vpop.f32.mrb[19].mxu1  ;;  %9757 = vmatpush1.bf16.msra.mxu0 %v9756_v42  ;;  %9819 = vmatpush1.bf16.msra.mxu1 %v9756_v42 }
 0x3fc   : > { %v4149_v53 = vadd.f32 %v12625_v1, %v3935_v23 }
 0x3fd   : > { %v4208_v52 = vmax.f32 %v4148_v51, 0.0 }
 0x3fe   : > { %v4209_v47 = vmax.f32 %v4149_v53, 0.0  ;;  %v3939_v39 = vpop.f32.mrb[20].mxu1 }
 0x3ff   : > { %v9760_v6 = vpack.c.bf16 %v4208_v52, %v4206_v19  ;;  %v3941_v35 = vpop.f32.mrb[21].mxu1  ;;  %v4150_v58 = vadd.f32 %v12621_v4, %v3939_v39 }
 0x400   : > { %v9758_v44 = vpack.c.bf16 %v4209_v47, %v4207_v5  ;;  %v4151_v3 = vadd.f32 %v12625_v1, %v3941_v35 }
 0x401   : > { %v4210_v57 = vmax.f32 %v4150_v58, 0.0 }
 0x402   : > { %v3945_v27 = vpop.f32.mrb[22].mxu1  ;;  %9759 = vmatprep.subr.bf16.mxu0 %v9758_v44  ;;  %9821 = vmatprep.subr.bf16.mxu1 %v9758_v44  ;;  %v4211_v36 = vmax.f32 %v4151_v3, 0.0 }
 0x403   : > { %v4152_v15 = vadd.f32 %v12621_v4, %v3945_v27  ;;  %v3947_v10 = vpop.f32.mrb[23].mxu1  ;;  %9761 = vmatpush1.bf16.msra.mxu0 %v9760_v6  ;;  %9823 = vmatpush1.bf16.msra.mxu1 %v9760_v6 }
 0x404   : > { %v4153_v61 = vadd.f32 %v12625_v1, %v3947_v10 }
 0x405   : > { %v4212_v45 = vmax.f32 %v4152_v15, 0.0 }
 0x406   : > { %v4213_v16 = vmax.f32 %v4153_v61, 0.0  ;;  %v3951_v0 = vpop.f32.mrb[24].mxu1 }
 0x407   : > { %v9764_v2 = vpack.c.bf16 %v4212_v45, %v4210_v57  ;;  %v3953_v25 = vpop.f32.mrb[25].mxu1  ;;  %v4154_v37 = vadd.f32 %v12621_v4, %v3951_v0 }
 0x408   : > { %v9762_v48 = vpack.c.bf16 %v4213_v16, %v4211_v36  ;;  %v4155_v50 = vadd.f32 %v12625_v1, %v3953_v25 }
 0x409   : > { %v4214_v8 = vmax.f32 %v4154_v37, 0.0 }
 0x40a   : > { %v3957_v49 = vpop.f32.mrb[26].mxu1  ;;  %9763 = vmatprep.subr.bf16.mxu0 %v9762_v48  ;;  %9825 = vmatprep.subr.bf16.mxu1 %v9762_v48  ;;  %v4215_v46 = vmax.f32 %v4155_v50, 0.0 }
 0x40b   : > { %v4156_v31 = vadd.f32 %v12621_v4, %v3957_v49  ;;  %v3959_v20 = vpop.f32.mrb[27].mxu1  ;;  %9765 = vmatpush1.bf16.msra.mxu0 %v9764_v2  ;;  %9827 = vmatpush1.bf16.msra.mxu1 %v9764_v2 }
 0x40c   : > { %v4157_v55 = vadd.f32 %v12625_v1, %v3959_v20 }
 0x40d   : > { %v4216_v17 = vmax.f32 %v4156_v31, 0.0 }
 0x40e   : > { %v4217_v12 = vmax.f32 %v4157_v55, 0.0  ;;  %v3963_v40 = vpop.f32.mrb[28].mxu1 }
 0x40f   : > { %v9768_v14 = vpack.c.bf16 %v4216_v17, %v4214_v8  ;;  %v3965_v29 = vpop.f32.mrb[29].mxu1  ;;  %v4158_v62 = vadd.f32 %v12621_v4, %v3963_v40 }
 0x410   : > { %v9766_v22 = vpack.c.bf16 %v4217_v12, %v4215_v46  ;;  %v4159_v13 = vadd.f32 %v12625_v1, %v3965_v29 }
 0x411   : > { %v4218_v56 = vmax.f32 %v4158_v62, 0.0 }
 0x412   : > { %v3969_v60 = vpop.f32.mrb[30].mxu1  ;;  %9767 = vmatprep.subr.bf16.mxu0 %v9766_v22  ;;  %9829 = vmatprep.subr.bf16.mxu1 %v9766_v22  ;;  %v4219_v26 = vmax.f32 %v4159_v13, 0.0 }
 0x413   : > { %v4160_v34 = vadd.f32 %v12621_v4, %v3969_v60  ;;  %v3971_v11 = vpop.f32.mrb[31].mxu1  ;;  %9769 = vmatpush1.bf16.msra.mxu0 %v9768_v14  ;;  %9831 = vmatpush1.bf16.msra.mxu1 %v9768_v14 }
 0x414   : > { %v4161_v21 = vadd.f32 %v12625_v1, %v3971_v11 }
 0x415   : > { %v4220_v33 = vmax.f32 %v4160_v34, 0.0 }
 0x416   : > { %v4221_v63 = vmax.f32 %v4161_v21, 0.0  ;;  %v3975_v7 = vpop.f32.mrb[32].mxu1 }
 0x417   : > { %v9772_v30 = vpack.c.bf16 %v4220_v33, %v4218_v56  ;;  %v3977_v43 = vpop.f32.mrb[33].mxu1  ;;  %v4162_v41 = vadd.f32 %v12621_v4, %v3975_v7 }
 0x418   : > { %v9770_v9 = vpack.c.bf16 %v4221_v63, %v4219_v26  ;;  %v4163_v32 = vadd.f32 %v12625_v1, %v3977_v43 }
 0x419   : > { %v4222_v28 = vmax.f32 %v4162_v41, 0.0 }
 0x41a   : > { %v3981_v24 = vpop.f32.mrb[34].mxu1  ;;  %9771 = vmatprep.subr.bf16.mxu0 %v9770_v9  ;;  %9833 = vmatprep.subr.bf16.mxu1 %v9770_v9  ;;  %v4223_v38 = vmax.f32 %v4163_v32, 0.0 }
 0x41b   : > { %v4164_v42 = vadd.f32 %v12621_v4, %v3981_v24  ;;  %v3983_v54 = vpop.f32.mrb[35].mxu1  ;;  %9773 = vmatpush1.bf16.msra.mxu0 %v9772_v30  ;;  %9835 = vmatpush1.bf16.msra.mxu1 %v9772_v30 }
 0x41c   : > { %v4165_v18 = vadd.f32 %v12625_v1, %v3983_v54 }
 0x41d   : > { %v4224_v59 = vmax.f32 %v4164_v42, 0.0 }
 0x41e   : > { %v4225_v51 = vmax.f32 %v4165_v18, 0.0  ;;  %v3987_v23 = vpop.f32.mrb[36].mxu1 }
 0x41f   : > { %v9776_v53 = vpack.c.bf16 %v4224_v59, %v4222_v28  ;;  %v3989_v19 = vpop.f32.mrb[37].mxu1  ;;  %v4166_v5 = vadd.f32 %v12621_v4, %v3987_v23 }
 0x420   : > { %v9774_v52 = vpack.c.bf16 %v4225_v51, %v4223_v38  ;;  %v4167_v47 = vadd.f32 %v12625_v1, %v3989_v19 }
 0x421   : > { %v4226_v58 = vmax.f32 %v4166_v5, 0.0 }
 0x422   : > { %v3993_v39 = vpop.f32.mrb[38].mxu1  ;;  %9775 = vmatprep.subr.bf16.mxu0 %v9774_v52  ;;  %9837 = vmatprep.subr.bf16.mxu1 %v9774_v52  ;;  %v4227_v27 = vmax.f32 %v4167_v47, 0.0 }
 0x423   : > { %v4168_v6 = vadd.f32 %v12621_v4, %v3993_v39  ;;  %v3995_v35 = vpop.f32.mrb[39].mxu1  ;;  %9777 = vmatpush1.bf16.msra.mxu0 %v9776_v53  ;;  %9839 = vmatpush1.bf16.msra.mxu1 %v9776_v53 }
 0x424   : > { %v4169_v44 = vadd.f32 %v12625_v1, %v3995_v35 }
 0x425   : > { %v4228_v3 = vmax.f32 %v4168_v6, 0.0 }
 0x426   : > { %v4229_v15 = vmax.f32 %v4169_v44, 0.0  ;;  %v3999_v10 = vpop.f32.mrb[40].mxu1 }
 0x427   : > { %v9780_v61 = vpack.c.bf16 %v4228_v3, %v4226_v58  ;;  %v4001_v57 = vpop.f32.mrb[41].mxu1  ;;  %v4170_v36 = vadd.f32 %v12621_v4, %v3999_v10 }
 0x428   : > { %v9778_v45 = vpack.c.bf16 %v4229_v15, %v4227_v27  ;;  %v4171_v16 = vadd.f32 %v12625_v1, %v4001_v57 }
 0x429   : > { %v4230_v37 = vmax.f32 %v4170_v36, 0.0 }
 0x42a   : > { %v4005_v0 = vpop.f32.mrb[42].mxu1  ;;  %9779 = vmatprep.subr.bf16.mxu0 %v9778_v45  ;;  %9841 = vmatprep.subr.bf16.mxu1 %v9778_v45  ;;  %v4231_v49 = vmax.f32 %v4171_v16, 0.0 }
 0x42b   : > { %v4172_v2 = vadd.f32 %v12621_v4, %v4005_v0  ;;  %v4007_v25 = vpop.f32.mrb[43].mxu1  ;;  %9781 = vmatpush1.bf16.msra.mxu0 %v9780_v61  ;;  %9843 = vmatpush1.bf16.msra.mxu1 %v9780_v61 }
 0x42c   : > { %v4173_v48 = vadd.f32 %v12625_v1, %v4007_v25 }
 0x42d   : > { %v4232_v50 = vmax.f32 %v4172_v2, 0.0 }
 0x42e   : > { %v4233_v31 = vmax.f32 %v4173_v48, 0.0  ;;  %v4011_v20 = vpop.f32.mrb[44].mxu1  ;;  %v6916_v48 = vld [vmem:[%s14095_s16 + $0x10] sm:$0xff] }
 0x42f   : > { %v9784_v55 = vpack.c.bf16 %v4232_v50, %v4230_v37  ;;  %v4013_v8 = vpop.f32.mrb[45].mxu1  ;;  %v4174_v46 = vadd.f32 %v12621_v4, %v4011_v20  ;;  %v4992_v50 = vld [vmem:[%s14093_s14] sm:$0xff] }
 0x430   : > { %v9782_v17 = vpack.c.bf16 %v4233_v31, %v4231_v49  ;;  %v4175_v12 = vadd.f32 %v12625_v1, %v4013_v8  ;;  %v4993_v49 = vld [vmem:[%s14093_s14 + $0x8] sm:$0xff]  ;;  %v4250_v31 = vld [vmem:[%s14090_s11] sm:$0xff]  ;;  %v4501_v8 = vld [vmem:[%s14091_s12 + $0x18] sm:$0xff] }
 0x431   : > { %v4234_v62 = vmax.f32 %v4174_v46, 0.0  ;;  %v4498_v20 = vld [vmem:[%s14091_s12] sm:$0xff] }
 0x432   : > { %v4017_v40 = vpop.f32.mrb[46].mxu1  ;;  %9783 = vmatprep.subr.bf16.mxu0 %v9782_v17  ;;  %9845 = vmatprep.subr.bf16.mxu1 %v9782_v17  ;;  %v4235_v60 = vmax.f32 %v4175_v12, 0.0  ;;  %v10725_v17 = vmov 0.0|0.0   ;;  %v9909_v12 = vpack.c.bf16 %v4993_v49, %v4992_v50  ;;  %v4262_v50 = vld [vmem:[%s14090_s11 + $0x60] sm:$0xff] }
 0x433   : > { %v4176_v14 = vadd.f32 %v12621_v4, %v4017_v40  ;;  %v4019_v29 = vpop.f32.mrb[47].mxu1  ;;  %9785 = vmatpush1.bf16.msra.mxu0 %v9784_v55  ;;  %9847 = vmatpush1.bf16.msra.mxu1 %v9784_v55  ;;  %v4253_v55 = vld [vmem:[%s14090_s11 + $0x18] sm:$0xff]  ;;  %v4773_v40 = vld [vmem:[%s14092_s13 + $0x10] sm:$0xff]  ;;  %v4510_v49 = vld [vmem:[%s14091_s12 + $0x60] sm:$0xff] }
 0x434   : > { %v4177_v22 = vadd.f32 %v12625_v1, %v4019_v29  ;;  %v4994_v29 = vld [vmem:[%s14093_s14 + $0x10] sm:$0xff] }
 0x435   : > { %v4236_v13 = vmax.f32 %v4176_v14, 0.0  ;;  %v4774_v14 = vld [vmem:[%s14092_s13 + $0x18] sm:$0xff] }
 0x436   : > { %v4237_v34 = vmax.f32 %v4177_v22, 0.0  ;;  %v4023_v11 = vpop.f32.mrb[48].mxu1  ;;  %v4995_v22 = vld [vmem:[%s14093_s14 + $0x18] sm:$0xff] }
 0x437   : > { %v9788_v21 = vpack.c.bf16 %v4236_v13, %v4234_v62  ;;  %v4025_v56 = vpop.f32.mrb[49].mxu1  ;;  %v4178_v26 = vadd.f32 %v12621_v4, %v4023_v11  ;;  %v4252_v62 = vld [vmem:[%s14090_s11 + $0x10] sm:$0xff]  ;;  %v9870_v11 = vpack.c.bf16 %v4774_v14, %v4773_v40  ;;  %v5007_v14 = vld [vmem:[%s14093_s14 + $0x78] sm:$0xff] }
 0x438   : > { %v9786_v33 = vpack.c.bf16 %v4237_v34, %v4235_v60  ;;  %v4179_v63 = vadd.f32 %v12625_v1, %v4025_v56  ;;  %v4500_v13 = vld [vmem:[%s14091_s12 + $0x10] sm:$0xff]  ;;  %v4255_v60 = vld [vmem:[%s14090_s11 + $0x28] sm:$0xff]  ;;  %v4775_v56 = vld [vmem:[%s14092_s13 + $0x20] sm:$0xff] }
 0x439   : > { %v4238_v41 = vmax.f32 %v4178_v26, 0.0  ;;  %v4503_v34 = vld [vmem:[%s14091_s12 + $0x28] sm:$0xff]  ;;  %v4996_v26 = vld [vmem:[%s14093_s14 + $0x20] sm:$0xff]  ;;  %v5006_v40 = vld [vmem:[%s14093_s14 + $0x70] sm:$0xff] }
 0x43a   : > { %v4029_v7 = vpop.f32.mrb[50].mxu1  ;;  %9787 = vmatprep.subr.bf16.mxu0 %v9786_v33  ;;  %9849 = vmatprep.subr.bf16.mxu1 %v9786_v33  ;;  %v4239_v24 = vmax.f32 %v4179_v63, 0.0  ;;  %v4776_v33 = vld [vmem:[%s14092_s13 + $0x28] sm:$0xff] }
 0x43b   : > { %v4180_v30 = vadd.f32 %v12621_v4, %v4029_v7  ;;  %v4031_v43 = vpop.f32.mrb[51].mxu1  ;;  %9789 = vmatpush1.bf16.msra.mxu0 %v9788_v21  ;;  %9851 = vmatpush1.bf16.msra.mxu1 %v9788_v21  ;;  %v9912_v21 = vpack.c.bf16 %v4995_v22, %v4994_v29  ;;  %v4997_v63 = vld [vmem:[%s14093_s14 + $0x28] sm:$0xff]  ;;  %v4254_v7 = vld [vmem:[%s14090_s11 + $0x20] sm:$0xff]  ;;  %v4264_v29 = vld [vmem:[%s14090_s11 + $0x70] sm:$0xff] }
 0x43c   : > { %v4181_v9 = vadd.f32 %v12625_v1, %v4031_v43  ;;  %v4257_v43 = vld [vmem:[%s14090_s11 + $0x38] sm:$0xff]  ;;  %v4512_v22 = vld [vmem:[%s14091_s12 + $0x70] sm:$0xff] }
 0x43d   : > { %v4240_v32 = vmax.f32 %v4180_v30, 0.0  ;;  %v4502_v30 = vld [vmem:[%s14091_s12 + $0x20] sm:$0xff] }
 0x43e   : > { %v4241_v42 = vmax.f32 %v4181_v9, 0.0  ;;  %v4035_v54 = vpop.f32.mrb[52].mxu1  ;;  %v4505_v9 = vld [vmem:[%s14091_s12 + $0x38] sm:$0xff] }
 0x43f   : > { %v9792_v18 = vpack.c.bf16 %v4240_v32, %v4238_v41  ;;  %v4037_v28 = vpop.f32.mrb[53].mxu1  ;;  %v4182_v38 = vadd.f32 %v12621_v4, %v4035_v54  ;;  %v9873_v41 = vpack.c.bf16 %v4776_v33, %v4775_v56  ;;  %v9915_v32 = vpack.c.bf16 %v4997_v63, %v4996_v26  ;;  %v4998_v54 = vld [vmem:[%s14093_s14 + $0x30] sm:$0xff]  ;;  %v5008_v56 = vld [vmem:[%s14093_s14 + $0x80] sm:$0xff]  ;;  %v5009_v33 = vld [vmem:[%s14093_s14 + $0x88] sm:$0xff] }
 0x440   : > { %v9790_v59 = vpack.c.bf16 %v4241_v42, %v4239_v24  ;;  %v4183_v51 = vadd.f32 %v12625_v1, %v4037_v28  ;;  %v4777_v24 = vld [vmem:[%s14092_s13 + $0x30] sm:$0xff]  ;;  %v4778_v42 = vld [vmem:[%s14092_s13 + $0x38] sm:$0xff]  ;;  %v4266_v26 = vld [vmem:[%s14090_s11 + $0x80] sm:$0xff] }
 0x441   : > { %v4242_v5 = vmax.f32 %v4182_v38, 0.0  ;;  %v4256_v28 = vld [vmem:[%s14090_s11 + $0x30] sm:$0xff]  ;;  %v4259_v38 = vld [vmem:[%s14090_s11 + $0x48] sm:$0xff]  ;;  %v4514_v63 = vld [vmem:[%s14091_s12 + $0x80] sm:$0xff] }
 0x442   : > { %v4041_v23 = vpop.f32.mrb[54].mxu1  ;;  %9791 = vmatprep.subr.bf16.mxu0 %v9790_v59  ;;  %9853 = vmatprep.subr.bf16.mxu1 %v9790_v59  ;;  %v4243_v39 = vmax.f32 %v4183_v51, 0.0  ;;  %v4504_v59 = vld [vmem:[%s14091_s12 + $0x30] sm:$0xff]  ;;  %v4507_v51 = vld [vmem:[%s14091_s12 + $0x48] sm:$0xff] }
 0x443   : > { %v4184_v53 = vadd.f32 %v12621_v4, %v4041_v23  ;;  %v4043_v19 = vpop.f32.mrb[55].mxu1  ;;  %9793 = vmatpush1.bf16.msra.mxu0 %v9792_v18  ;;  %9855 = vmatpush1.bf16.msra.mxu1 %v9792_v18  ;;  %v4999_v18 = vld [vmem:[%s14093_s14 + $0x38] sm:$0xff]  ;;  %v9876_v23 = vpack.c.bf16 %v4778_v42, %v4777_v24  ;;  %v5010_v24 = vld [vmem:[%s14093_s14 + $0x90] sm:$0xff] }
 0x444   : > { %v4185_v52 = vadd.f32 %v12625_v1, %v4043_v19  ;;  %v4779_v19 = vld [vmem:[%s14092_s13 + $0x40] sm:$0xff]  ;;  %v5011_v42 = vld [vmem:[%s14093_s14 + $0x98] sm:$0xff] }
 0x445   : > { %v4244_v47 = vmax.f32 %v4184_v53, 0.0  ;;  %v9918_v53 = vpack.c.bf16 %v4999_v18, %v4998_v54  ;;  %v4268_v54 = vld [vmem:[%s14090_s11 + $0x90] sm:$0xff] }
 0x446   : > { %v4245_v6 = vmax.f32 %v4185_v52, 0.0  ;;  %v4047_v35 = vpop.f32.mrb[56].mxu1  ;;  %v4780_v52 = vld [vmem:[%s14092_s13 + $0x48] sm:$0xff]  ;;  %v4516_v18 = vld [vmem:[%s14091_s12 + $0x90] sm:$0xff] }
 0x447   : > { %v9796_v44 = vpack.c.bf16 %v4244_v47, %v4242_v5  ;;  %v4049_v58 = vpop.f32.mrb[57].mxu1  ;;  %v4186_v27 = vadd.f32 %v12621_v4, %v4047_v35  ;;  %v5000_v5 = vld [vmem:[%s14093_s14 + $0x40] sm:$0xff]  ;;  %v5001_v47 = vld [vmem:[%s14093_s14 + $0x48] sm:$0xff]  ;;  %v4261_v35 = vld [vmem:[%s14090_s11 + $0x58] sm:$0xff] }
 0x448   : > { %v9794_v3 = vpack.c.bf16 %v4245_v6, %v4243_v39  ;;  %v4187_v15 = vadd.f32 %v12625_v1, %v4049_v58  ;;  %v4258_v39 = vld [vmem:[%s14090_s11 + $0x40] sm:$0xff]  ;;  %v9879_v58 = vpack.c.bf16 %v4780_v52, %v4779_v19  ;;  %v5013_v52 = vld [vmem:[%s14093_s14 + $0xa8] sm:$0xff] }
 0x449   : > { %v4246_v36 = vmax.f32 %v4186_v27, 0.0  ;;  %v4506_v6 = vld [vmem:[%s14091_s12 + $0x40] sm:$0xff]  ;;  %v4781_v27 = vld [vmem:[%s14092_s13 + $0x50] sm:$0xff] }
 0x44a   : > { %v4053_v10 = vpop.f32.mrb[58].mxu1  ;;  %9795 = vmatprep.subr.bf16.mxu0 %v9794_v3  ;;  %9857 = vmatprep.subr.bf16.mxu1 %v9794_v3  ;;  %v4247_v0 = vmax.f32 %v4187_v15, 0.0  ;;  %v9921_v3 = vpack.c.bf16 %v5001_v47, %v5000_v5  ;;  %v4782_v15 = vld [vmem:[%s14092_s13 + $0x58] sm:$0xff]  ;;  %v5012_v19 = vld [vmem:[%s14093_s14 + $0xa0] sm:$0xff] }
 0x44b   : > { %v4188_v61 = vadd.f32 %v12621_v4, %v4053_v10  ;;  %v4055_v57 = vpop.f32.mrb[59].mxu1  ;;  %9797 = vmatpush1.bf16.msra.mxu0 %v9796_v44  ;;  %9859 = vmatpush1.bf16.msra.mxu1 %v9796_v44  ;;  %v4771_v4 = vld [vmem:[%s14092_s13] sm:$0xff]  ;;  %v4509_v44 = vld [vmem:[%s14091_s12 + $0x58] sm:$0xff]  ;;  %v5002_v10 = vld [vmem:[%s14093_s14 + $0x50] sm:$0xff] }
 0x44c   : > { %v4189_v45 = vadd.f32 %v12625_v1, %v4055_v57  ;;  %v4772_v1 = vld [vmem:[%s14092_s13 + $0x8] sm:$0xff]  ;;  %v4260_v57 = vld [vmem:[%s14090_s11 + $0x50] sm:$0xff]  ;;  %v4270_v5 = vld [vmem:[%s14090_s11 + $0xa0] sm:$0xff] }
 0x44d   : > { %v4248_v16 = vmax.f32 %v4188_v61, 0.0  ;;  %v9867_v46 = vpack.c.bf16 %v4772_v1, %v4771_v4  ;;  %v5003_v61 = vld [vmem:[%s14093_s14 + $0x58] sm:$0xff]  ;;  %v5004_v4 = vld [vmem:[%s14093_s14 + $0x60] sm:$0xff]  ;;  %v5005_v1 = vld [vmem:[%s14093_s14 + $0x68] sm:$0xff] }
 0x44e   : > { %v4249_v2 = vmax.f32 %v4189_v45, 0.0  ;;  %v4508_v45 = vld [vmem:[%s14091_s12 + $0x50] sm:$0xff]  ;;  %v4518_v47 = vld [vmem:[%s14091_s12 + $0xa0] sm:$0xff] }
 0x44f   : > { %v9801_v25 = vpack.c.bf16 %v4248_v16, %v4246_v36  ;;  %v4263_v36 = vld [vmem:[%s14090_s11 + $0x68] sm:$0xff] }
 0x450   : > { %v9798_v37 = vpack.c.bf16 %v4249_v2, %v4247_v0  ;;  %v4511_v16 = vld [vmem:[%s14091_s12 + $0x68] sm:$0xff]  ;;  %v9882_v0 = vpack.c.bf16 %v4782_v15, %v4781_v27  ;;  %v9924_v2 = vpack.c.bf16 %v5003_v61, %v5002_v10  ;;  %v5014_v27 = vld [vmem:[%s14093_s14 + $0xb0] sm:$0xff]  ;;  %v5015_v15 = vld [vmem:[%s14093_s14 + $0xb8] sm:$0xff] }
 0x451   : > { %v4272_v10 = vld [vmem:[%s14090_s11 + $0xb0] sm:$0xff] }
 0x452   : > { %9800 = vmatprep.subr.msk.bf16.mxu0 %vm12689_vm12, %v9798_v37  ;;  %9862 = vmatprep.subr.msk.bf16.mxu1 %vm12689_vm12, %v9798_v37  ;;  %v4784_v37 = vld [vmem:[%s14092_s13 + $0x68] sm:$0xff]  ;;  %v4520_v61 = vld [vmem:[%s14091_s12 + $0xb0] sm:$0xff] }
 0x453   : > { %9803 = vmatpush1.bf16.msk.msra.mxu0 %vm12689_vm12, %v9801_v25  ;;  %9865 = vmatpush1.bf16.msk.msra.mxu1 %vm12689_vm12, %v9801_v25  ;;  %v4783_v25 = vld [vmem:[%s14092_s13 + $0x60] sm:$0xff] }
 0x454   : > { %9866 = vmatprep.subr.bf16.mxu0 %v10725_v17  ;;  %9908 = vmatprep.subr.bf16.mxu1 %v10725_v17 }
 0x456   : > { %4402 = vmatmul.mubr.f32.vlgmr.msra.gmra.mrb[60].mxu0 %v4250_v31  ;;  %4643 = vmatmul.mubr.f32.vlgmr.msra.gmra.mrb[60].mxu1 %v4498_v20  ;;  %v4265_v31 = vld [vmem:[%s14090_s11 + $0x78] sm:$0xff] }
 0x457   : > { %8282 = vmatprep.mubr.msk.f32.mxu0 %vm4282_vm11, %v4253_v55  ;;  %8300 = vmatprep.mubr.msk.f32.mxu1 %vm4282_vm11, %v4501_v8  ;;  %v4513_v20 = vld [vmem:[%s14091_s12 + $0x78] sm:$0xff]  ;;  %v9885_v55 = vpack.c.bf16 %v4784_v37, %v4783_v25  ;;  %v9927_v8 = vpack.c.bf16 %v5005_v1, %v5004_v4  ;;  %v5016_v25 = vld [vmem:[%s14093_s14 + $0xc0] sm:$0xff]  ;;  %v5017_v37 = vld [vmem:[%s14093_s14 + $0xc8] sm:$0xff] }
 0x458   : > { %9868 = vmatpush1.bf16.msra.mxu0 %v9867_v46  ;;  %9910 = vmatpush1.bf16.msra.mxu1 %v9909_v12  ;;  %v4785_v46 = vld [vmem:[%s14092_s13 + $0x70] sm:$0xff]  ;;  %v4786_v12 = vld [vmem:[%s14092_s13 + $0x78] sm:$0xff]  ;;  %v4274_v4 = vld [vmem:[%s14090_s11 + $0xc0] sm:$0xff] }
 0x459   : > { %9869 = vmatprep.subr.bf16.mxu0 %v10725_v17  ;;  %9911 = vmatprep.subr.bf16.mxu1 %v10725_v17  ;;  %v4522_v1 = vld [vmem:[%s14091_s12 + $0xc0] sm:$0xff] }
 0x45a   : > { %4408 = vmatmul.mubr.f32.gmra.mrb[62].mxu0 %v4252_v62  ;;  %4649 = vmatmul.mubr.f32.gmra.mrb[62].mxu1 %v4500_v13  ;;  %v4267_v62 = vld [vmem:[%s14090_s11 + $0x88] sm:$0xff] }
 0x45b   : > { %8283 = vmatprep.mubr.msk.f32.mxu0 %vm4282_vm11, %v4255_v60  ;;  %8301 = vmatprep.mubr.msk.f32.mxu1 %vm4282_vm11, %v4503_v34  ;;  %v4515_v13 = vld [vmem:[%s14091_s12 + $0x88] sm:$0xff]  ;;  %v9888_v60 = vpack.c.bf16 %v4786_v12, %v4785_v46  ;;  %v9930_v34 = vpack.c.bf16 %v5007_v14, %v5006_v40  ;;  %v4278_v40 = vld [vmem:[%s14090_s11 + $0xe0] sm:$0xff] }
 0x45c   : > { %9871 = vmatpush1.bf16.msra.mxu0 %v9870_v11  ;;  %9913 = vmatpush1.bf16.msra.mxu1 %v9912_v21  ;;  %v4787_v11 = vld [vmem:[%s14092_s13 + $0x80] sm:$0xff]  ;;  %v4788_v21 = vld [vmem:[%s14092_s13 + $0x88] sm:$0xff] }
 0x45d   : > { %9872 = vmatprep.subr.bf16.mxu0 %v10725_v17  ;;  %9914 = vmatprep.subr.bf16.mxu1 %v10725_v17  ;;  %v4279_v46 = vld [vmem:[%s14090_s11 + $0xe8] sm:$0xff]  ;;  %v4526_v14 = vld [vmem:[%s14091_s12 + $0xe0] sm:$0xff] }
 0x45e   : > { %4414 = vmatmul.mubr.f32.gmra.mrb[64].mxu0 %v4254_v7  ;;  %4655 = vmatmul.mubr.f32.gmra.mrb[64].mxu1 %v4502_v30  ;;  %v4269_v7 = vld [vmem:[%s14090_s11 + $0x98] sm:$0xff]  ;;  %v4527_v12 = vld [vmem:[%s14091_s12 + $0xe8] sm:$0xff] }
 0x45f   : > { %8284 = vmatprep.mubr.msk.f32.mxu0 %vm4282_vm11, %v4257_v43  ;;  %8302 = vmatprep.mubr.msk.f32.mxu1 %vm4282_vm11, %v4505_v9  ;;  %v4517_v30 = vld [vmem:[%s14091_s12 + $0x98] sm:$0xff]  ;;  %v9891_v43 = vpack.c.bf16 %v4788_v21, %v4787_v11  ;;  %v9933_v9 = vpack.c.bf16 %v5009_v33, %v5008_v56  ;;  %v5018_v11 = vld [vmem:[%s14093_s14 + $0xd0] sm:$0xff] }
 0x460   : > { %9874 = vmatpush1.bf16.msra.mxu0 %v9873_v41  ;;  %9916 = vmatpush1.bf16.msra.mxu1 %v9915_v32  ;;  %v4789_v41 = vld [vmem:[%s14092_s13 + $0x90] sm:$0xff]  ;;  %v4790_v32 = vld [vmem:[%s14092_s13 + $0x98] sm:$0xff] }
 0x461   : > { %9875 = vmatprep.subr.bf16.mxu0 %v10725_v17  ;;  %9917 = vmatprep.subr.bf16.mxu1 %v10725_v17  ;;  %v5019_v56 = vld [vmem:[%s14093_s14 + $0xd8] sm:$0xff] }
 0x462   : > { %4420 = vmatmul.mubr.f32.gmra.mrb[66].mxu0 %v4256_v28  ;;  %4661 = vmatmul.mubr.f32.gmra.mrb[66].mxu1 %v4504_v59  ;;  %v4271_v28 = vld [vmem:[%s14090_s11 + $0xa8] sm:$0xff]  ;;  %v9948_v33 = vpack.c.bf16 %v5019_v56, %v5018_v11 }
 0x463   : > { %8285 = vmatprep.mubr.msk.f32.mxu0 %vm4282_vm11, %v4259_v38  ;;  %8303 = vmatprep.mubr.msk.f32.mxu1 %vm4282_vm11, %v4507_v51  ;;  %v4519_v59 = vld [vmem:[%s14091_s12 + $0xa8] sm:$0xff]  ;;  %v9894_v38 = vpack.c.bf16 %v4790_v32, %v4789_v41  ;;  %v9936_v51 = vpack.c.bf16 %v5011_v42, %v5010_v24 }
 0x464   : > { %9877 = vmatpush1.bf16.msra.mxu0 %v9876_v23  ;;  %9919 = vmatpush1.bf16.msra.mxu1 %v9918_v53  ;;  %v4791_v23 = vld [vmem:[%s14092_s13 + $0xa0] sm:$0xff]  ;;  %v4792_v53 = vld [vmem:[%s14092_s13 + $0xa8] sm:$0xff] }
 0x465   : > { %9878 = vmatprep.subr.bf16.mxu0 %v10725_v17  ;;  %9920 = vmatprep.subr.bf16.mxu1 %v10725_v17  ;;  %v8350_v41 = vld [vmem:[%s14148_s30 + $0x88] sm:$0xff] }
 0x466   : > { %4426 = vmatmul.mubr.f32.gmra.mrb[68].mxu0 %v4258_v39  ;;  %4667 = vmatmul.mubr.f32.gmra.mrb[68].mxu1 %v4506_v6  ;;  %v4273_v39 = vld [vmem:[%s14090_s11 + $0xb8] sm:$0xff] }
 0x467   : > { %8286 = vmatprep.mubr.msk.f32.mxu0 %vm4282_vm11, %v4261_v35  ;;  %8304 = vmatprep.mubr.msk.f32.mxu1 %vm4282_vm11, %v4509_v44  ;;  %v4521_v6 = vld [vmem:[%s14091_s12 + $0xb8] sm:$0xff]  ;;  %v9897_v35 = vpack.c.bf16 %v4792_v53, %v4791_v23  ;;  %v9939_v44 = vpack.c.bf16 %v5013_v52, %v5012_v19 }
 0x468   : > { %9880 = vmatpush1.bf16.msra.mxu0 %v9879_v58  ;;  %9922 = vmatpush1.bf16.msra.mxu1 %v9921_v3  ;;  %v4793_v58 = vld [vmem:[%s14092_s13 + $0xb0] sm:$0xff]  ;;  %v4794_v3 = vld [vmem:[%s14092_s13 + $0xb8] sm:$0xff] }
 0x469   : > { %9881 = vmatprep.subr.bf16.mxu0 %v10725_v17  ;;  %9923 = vmatprep.subr.bf16.mxu1 %v10725_v17 }
 0x46a   : > { %4432 = vmatmul.mubr.f32.gmra.mrb[70].mxu0 %v4260_v57  ;;  %4673 = vmatmul.mubr.f32.gmra.mrb[70].mxu1 %v4508_v45  ;;  %v4275_v57 = vld [vmem:[%s14090_s11 + $0xc8] sm:$0xff] }
 0x46b   : > { %8287 = vmatprep.mubr.msk.f32.mxu0 %vm4282_vm11, %v4263_v36  ;;  %8305 = vmatprep.mubr.msk.f32.mxu1 %vm4282_vm11, %v4511_v16  ;;  %v4523_v45 = vld [vmem:[%s14091_s12 + $0xc8] sm:$0xff]  ;;  %v9900_v36 = vpack.c.bf16 %v4794_v3, %v4793_v58  ;;  %v9942_v16 = vpack.c.bf16 %v5015_v15, %v5014_v27 }
 0x46c   : > { %9883 = vmatpush1.bf16.msra.mxu0 %v9882_v0  ;;  %9925 = vmatpush1.bf16.msra.mxu1 %v9924_v2  ;;  %v4795_v0 = vld [vmem:[%s14092_s13 + $0xc0] sm:$0xff]  ;;  %v4796_v2 = vld [vmem:[%s14092_s13 + $0xc8] sm:$0xff] }
 0x46d   : > { %9884 = vmatprep.subr.bf16.mxu0 %v10725_v17  ;;  %9926 = vmatprep.subr.bf16.mxu1 %v10725_v17 }
 0x46e   : > { %4438 = vmatmul.mubr.f32.gmra.mrb[72].mxu0 %v4262_v50  ;;  %4679 = vmatmul.mubr.f32.gmra.mrb[72].mxu1 %v4510_v49  ;;  %v4277_v50 = vld [vmem:[%s14090_s11 + $0xd8] sm:$0xff] }
 0x46f   : > { %8288 = vmatprep.mubr.msk.f32.mxu0 %vm4282_vm11, %v4265_v31  ;;  %8306 = vmatprep.mubr.msk.f32.mxu1 %vm4282_vm11, %v4513_v20  ;;  %v4525_v49 = vld [vmem:[%s14091_s12 + $0xd8] sm:$0xff]  ;;  %v9903_v31 = vpack.c.bf16 %v4796_v2, %v4795_v0  ;;  %v9945_v20 = vpack.c.bf16 %v5017_v37, %v5016_v25 }
 0x470   : > { %9886 = vmatpush1.bf16.msra.mxu0 %v9885_v55  ;;  %9928 = vmatpush1.bf16.msra.mxu1 %v9927_v8  ;;  %v4276_v55 = vld [vmem:[%s14090_s11 + $0xd0] sm:$0xff] }
 0x471   : > { %9887 = vmatprep.subr.bf16.mxu0 %v10725_v17  ;;  %9929 = vmatprep.subr.bf16.mxu1 %v10725_v17  ;;  %v4524_v8 = vld [vmem:[%s14091_s12 + $0xd0] sm:$0xff] }
 0x472   : > { %4444 = vmatmul.mubr.f32.gmra.mrb[74].mxu0 %v4264_v29  ;;  %4685 = vmatmul.mubr.f32.gmra.mrb[74].mxu1 %v4512_v22  ;;  %v4281_v29 = vld [vmem:[%s14090_s11 + $0xf8] sm:$0xff] }
 0x473   : > { %8289 = vmatprep.mubr.msk.f32.mxu0 %vm4282_vm11, %v4267_v62  ;;  %8307 = vmatprep.mubr.msk.f32.mxu1 %vm4282_vm11, %v4515_v13  ;;  %v4529_v22 = vld [vmem:[%s14091_s12 + $0xf8] sm:$0xff]  ;;  %v4280_v62 = vld [vmem:[%s14090_s11 + $0xf0] sm:$0xff] }
 0x474   : > { %9889 = vmatpush1.bf16.msra.mxu0 %v9888_v60  ;;  %9931 = vmatpush1.bf16.msra.mxu1 %v9930_v34  ;;  %v4528_v13 = vld [vmem:[%s14091_s12 + $0xf0] sm:$0xff]  ;;  %v4798_v34 = vld [vmem:[%s14092_s13 + $0xd8] sm:$0xff] }
 0x475   : > { %9890 = vmatprep.subr.bf16.mxu0 %v10725_v17  ;;  %9932 = vmatprep.subr.bf16.mxu1 %v10725_v17  ;;  %v4797_v60 = vld [vmem:[%s14092_s13 + $0xd0] sm:$0xff] }
 0x476   : > { %4450 = vmatmul.mubr.f32.gmra.mrb[76].mxu0 %v4266_v26  ;;  %4691 = vmatmul.mubr.f32.gmra.mrb[76].mxu1 %v4514_v63  ;;  %v9906_v21 = vpack.c.bf16 %v4798_v34, %v4797_v60  ;;  %v8347_v26 = vld [vmem:[%s14148_s30 + $0x70] sm:$0xff]  ;;  %v8348_v63 = vld [vmem:[%s14148_s30 + $0x78] sm:$0xff] }
 0x477   : > { %8290 = vmatprep.mubr.msk.f32.mxu0 %vm4282_vm11, %v4269_v7  ;;  %8308 = vmatprep.mubr.msk.f32.mxu1 %vm4282_vm11, %v4517_v30  ;;  %v9950_v7 = vpack.c.bf16 %v8348_v63, %v8347_v26 }
 0x478   : > { %9892 = vmatpush1.bf16.msra.mxu0 %v9891_v43  ;;  %9934 = vmatpush1.bf16.msra.mxu1 %v9933_v9  ;;  %v8349_v9 = vld [vmem:[%s14148_s30 + $0x80] sm:$0xff] }
 0x479   : > { %9893 = vmatprep.subr.bf16.mxu0 %v10725_v17  ;;  %9935 = vmatprep.subr.bf16.mxu1 %v10725_v17 }
 0x47a   : > { %4456 = vmatmul.mubr.f32.gmra.mrb[78].mxu0 %v4268_v54  ;;  %4697 = vmatmul.mubr.f32.gmra.mrb[78].mxu1 %v4516_v18  ;;  %v9954_v18 = vpack.c.bf16 %v8350_v41, %v8349_v9 }
 0x47b   : > { %8291 = vmatprep.mubr.msk.f32.mxu0 %vm4282_vm11, %v4271_v28  ;;  %8309 = vmatprep.mubr.msk.f32.mxu1 %vm4282_vm11, %v4519_v59 }
 0x47c   : > { %9895 = vmatpush1.bf16.msra.mxu0 %v9894_v38  ;;  %9937 = vmatpush1.bf16.msra.mxu1 %v9936_v51  ;;  %v8351_v38 = vld [vmem:[%s14148_s30 + $0x90] sm:$0xff]  ;;  %v8352_v51 = vld [vmem:[%s14148_s30 + $0x98] sm:$0xff] }
 0x47d   : > { %9896 = vmatprep.subr.bf16.mxu0 %v10725_v17  ;;  %9938 = vmatprep.subr.bf16.mxu1 %v10725_v17 }
 0x47e   : > { %4462 = vmatmul.mubr.f32.gmra.mrb[80].mxu0 %v4270_v5  ;;  %4703 = vmatmul.mubr.f32.gmra.mrb[80].mxu1 %v4518_v47  ;;  %v9958_v5 = vpack.c.bf16 %v8352_v51, %v8351_v38 }
 0x47f   : > { %8292 = vmatprep.mubr.msk.f32.mxu0 %vm4282_vm11, %v4273_v39  ;;  %8310 = vmatprep.mubr.msk.f32.mxu1 %vm4282_vm11, %v4521_v6 }
 0x480   : > { %9898 = vmatpush1.bf16.msra.mxu0 %v9897_v35  ;;  %9940 = vmatpush1.bf16.msra.mxu1 %v9939_v44 }
 0x481   : > { %9899 = vmatprep.subr.bf16.mxu0 %v10725_v17  ;;  %9941 = vmatprep.subr.bf16.mxu1 %v10725_v17 }
 0x482   : > { %4468 = vmatmul.mubr.f32.gmra.mrb[82].mxu0 %v4272_v10  ;;  %4709 = vmatmul.mubr.f32.gmra.mrb[82].mxu1 %v4520_v61 }
 0x483   : > { %8293 = vmatprep.mubr.msk.f32.mxu0 %vm4282_vm11, %v4275_v57  ;;  %8311 = vmatprep.mubr.msk.f32.mxu1 %vm4282_vm11, %v4523_v45 }
 0x484   : > { %9901 = vmatpush1.bf16.msra.mxu0 %v9900_v36  ;;  %9943 = vmatpush1.bf16.msra.mxu1 %v9942_v16 }
 0x485   : > { %9902 = vmatprep.subr.bf16.mxu0 %v10725_v17  ;;  %9944 = vmatprep.subr.bf16.mxu1 %v10725_v17 }
 0x486   : > { %4474 = vmatmul.mubr.f32.gmra.mrb[84].mxu0 %v4274_v4  ;;  %4715 = vmatmul.mubr.f32.gmra.mrb[84].mxu1 %v4522_v1 }
 0x487   : > { %8294 = vmatprep.mubr.msk.f32.mxu0 %vm4282_vm11, %v4277_v50  ;;  %8312 = vmatprep.mubr.msk.f32.mxu1 %vm4282_vm11, %v4525_v49 }
 0x488   : > { %9904 = vmatpush1.bf16.msra.mxu0 %v9903_v31  ;;  %9946 = vmatpush1.bf16.msra.mxu1 %v9945_v20 }
 0x489   : > { %9905 = vmatprep.subr.bf16.mxu0 %v10725_v17  ;;  %9947 = vmatprep.subr.bf16.mxu1 %v10725_v17 }
 0x48a   : > { %4480 = vmatmul.mubr.f32.gmra.mrb[86].mxu0 %v4276_v55  ;;  %4721 = vmatmul.mubr.f32.gmra.mrb[86].mxu1 %v4524_v8 }
 0x48b   : > { %8295 = vmatprep.mubr.msk.f32.mxu0 %vm4282_vm11, %v4279_v46  ;;  %8313 = vmatprep.mubr.msk.f32.mxu1 %vm4282_vm11, %v4527_v12 }
 0x48c   : > { %9907 = vmatpush1.bf16.msra.mxu0 %v9906_v21  ;;  %9949 = vmatpush1.bf16.msra.mxu1 %v9948_v33 }
 0x48d   : > { %9951 = vmatprep.subr.bf16.mxu0 %v9950_v7 }
 0x48e   : > { %4486 = vmatmul.mubr.f32.gmra.mrb[88].mxu0 %v4278_v40  ;;  %4727 = vmatmul.mubr.f32.gmra.mrb[88].mxu1 %v4526_v14 }
 0x48f   : > { %8296 = vmatprep.mubr.msk.f32.mxu0 %vm4282_vm11, %v4281_v29  ;;  %8314 = vmatprep.mubr.msk.f32.mxu1 %vm4282_vm11, %v4529_v22 }
 0x492   : > { %4492 = vmatmul.mubr.f32.gmra.mrb[90].mxu0 %v4280_v62  ;;  %4733 = vmatmul.mubr.f32.gmra.mrb[90].mxu1 %v4528_v13 }
 0x529   : > { %v4403_v30 = vpop.f32.mrb[60].mxu0  ;;  %v4644_v43 = vpop.f32.mrb[60].mxu1 }
 0x52a   : > { %v4739_v32 = vmax.f32 %v4403_v30, %v4644_v43  ;;  %v4405_v24 = vpop.f32.mrb[61].mxu0  ;;  %v4646_v42 = vpop.f32.mrb[61].mxu1 }
 0x52b   : > { %v4740_v54 = vmax.f32 %v4405_v24, %v4646_v42 }
 0x52d   : > { %v4409_v28 = vpop.f32.mrb[62].mxu0  ;;  %v4650_v59 = vpop.f32.mrb[62].mxu1  ;;  %8315 = vmatprep.mubr.msk.f32.mxu0 %vm2482_vm7, %v4740_v54  ;;  %8331 = vmatprep.mubr.msk.f32.mxu1 %vm2482_vm7, %v4740_v54 }
 0x52e   : > { %v4741_v23 = vmax.f32 %v4409_v28, %v4650_v59  ;;  %v4411_v53 = vpop.f32.mrb[63].mxu0  ;;  %v4652_v19 = vpop.f32.mrb[63].mxu1  ;;  %4912 = vmatmul.mubr.f32.vlgmr.msra.gmra.mrb[92].mxu0 %v4739_v32  ;;  %5085 = vmatmul.mubr.f32.vlgmr.msra.gmra.mrb[92].mxu1 %v4739_v32 }
 0x52f   : > { %v4742_v52 = vmax.f32 %v4411_v53, %v4652_v19  ;;  %9953 = vmatpush3.bf16.msra.mxu0 %v9950_v7 }
 0x530   : > { %9955 = vmatprep.subr.bf16.mxu0 %v9954_v18 }
 0x531   : > { %v4415_v47 = vpop.f32.mrb[64].mxu0  ;;  %v4656_v39 = vpop.f32.mrb[64].mxu1  ;;  %8316 = vmatprep.mubr.msk.f32.mxu0 %vm2482_vm7, %v4742_v52  ;;  %8332 = vmatprep.mubr.msk.f32.mxu1 %vm2482_vm7, %v4742_v52 }
 0x532   : > { %v4743_v6 = vmax.f32 %v4415_v47, %v4656_v39  ;;  %v4417_v35 = vpop.f32.mrb[65].mxu0  ;;  %v4658_v44 = vpop.f32.mrb[65].mxu1  ;;  %4917 = vmatmul.mubr.f32.gmra.mrb[94].mxu0 %v4741_v23  ;;  %5090 = vmatmul.mubr.f32.gmra.mrb[94].mxu1 %v4741_v23 }
 0x533   : > { %v4744_v58 = vmax.f32 %v4417_v35, %v4658_v44  ;;  %9957 = vmatpush3.bf16.msra.mxu0 %v9954_v18 }
 0x534   : > { %9959 = vmatprep.subr.bf16.mxu0 %v9958_v5 }
 0x535   : > { %v4421_v3 = vpop.f32.mrb[66].mxu0  ;;  %v4662_v27 = vpop.f32.mrb[66].mxu1  ;;  %8317 = vmatprep.mubr.msk.f32.mxu0 %vm2482_vm7, %v4744_v58  ;;  %8333 = vmatprep.mubr.msk.f32.mxu1 %vm2482_vm7, %v4744_v58 }
 0x536   : > { %v4745_v15 = vmax.f32 %v4421_v3, %v4662_v27  ;;  %v4423_v10 = vpop.f32.mrb[67].mxu0  ;;  %v4664_v61 = vpop.f32.mrb[67].mxu1  ;;  %4922 = vmatmul.mubr.f32.gmra.mrb[96].mxu0 %v4743_v6  ;;  %5095 = vmatmul.mubr.f32.gmra.mrb[96].mxu1 %v4743_v6 }
 0x537   : > { %v4746_v57 = vmax.f32 %v4423_v10, %v4664_v61  ;;  %9961 = vmatpush3.bf16.msra.mxu0 %v9958_v5 }
 0x539   : > { %v4427_v45 = vpop.f32.mrb[68].mxu0  ;;  %v4668_v36 = vpop.f32.mrb[68].mxu1  ;;  %8318 = vmatprep.mubr.msk.f32.mxu0 %vm2482_vm7, %v4746_v57  ;;  %8334 = vmatprep.mubr.msk.f32.mxu1 %vm2482_vm7, %v4746_v57 }
 0x53a   : > { %v4747_v16 = vmax.f32 %v4427_v45, %v4668_v36  ;;  %v4429_v0 = vpop.f32.mrb[69].mxu0  ;;  %v4670_v2 = vpop.f32.mrb[69].mxu1  ;;  %4927 = vmatmul.mubr.f32.gmra.mrb[98].mxu0 %v4745_v15  ;;  %5100 = vmatmul.mubr.f32.gmra.mrb[98].mxu1 %v4745_v15 }
 0x53b   : > { %v4748_v25 = vmax.f32 %v4429_v0, %v4670_v2 }
 0x53d   : > { %v4433_v37 = vpop.f32.mrb[70].mxu0  ;;  %v4674_v4 = vpop.f32.mrb[70].mxu1  ;;  %8319 = vmatprep.mubr.msk.f32.mxu0 %vm2482_vm7, %v4748_v25  ;;  %8335 = vmatprep.mubr.msk.f32.mxu1 %vm2482_vm7, %v4748_v25 }
 0x53e   : > { %v4749_v1 = vmax.f32 %v4433_v37, %v4674_v4  ;;  %v4435_v50 = vpop.f32.mrb[71].mxu0  ;;  %v4676_v49 = vpop.f32.mrb[71].mxu1  ;;  %4932 = vmatmul.mubr.f32.gmra.mrb[100].mxu0 %v4747_v16  ;;  %5105 = vmatmul.mubr.f32.gmra.mrb[100].mxu1 %v4747_v16 }
 0x53f   : > { %v4750_v31 = vmax.f32 %v4435_v50, %v4676_v49  ;;  %v8353_v49 = vld [vmem:[%s14148_s30 + $0xa0] sm:$0xff] }
 0x541   : > { %v4439_v20 = vpop.f32.mrb[72].mxu0  ;;  %v4680_v55 = vpop.f32.mrb[72].mxu1  ;;  %8320 = vmatprep.mubr.msk.f32.mxu0 %vm2482_vm7, %v4750_v31  ;;  %8336 = vmatprep.mubr.msk.f32.mxu1 %vm2482_vm7, %v4750_v31  ;;  %v8354_v31 = vld [vmem:[%s14148_s30 + $0xa8] sm:$0xff] }
 0x542   : > { %v4751_v8 = vmax.f32 %v4439_v20, %v4680_v55  ;;  %v4441_v46 = vpop.f32.mrb[73].mxu0  ;;  %v4682_v12 = vpop.f32.mrb[73].mxu1  ;;  %4937 = vmatmul.mubr.f32.gmra.mrb[102].mxu0 %v4749_v1  ;;  %5110 = vmatmul.mubr.f32.gmra.mrb[102].mxu1 %v4749_v1  ;;  %v9962_v20 = vpack.c.bf16 %v8354_v31, %v8353_v49  ;;  %v8355_v55 = vld [vmem:[%s14148_s30 + $0xb0] sm:$0xff] }
 0x543   : > { %v4752_v40 = vmax.f32 %v4441_v46, %v4682_v12  ;;  %v8357_v12 = vld [vmem:[%s14148_s30 + $0xc0] sm:$0xff] }
 0x544   : > { %9963 = vmatprep.subr.bf16.mxu0 %v9962_v20 }
 0x545   : > { %v4445_v14 = vpop.f32.mrb[74].mxu0  ;;  %v4686_v29 = vpop.f32.mrb[74].mxu1  ;;  %8321 = vmatprep.mubr.msk.f32.mxu0 %vm2482_vm7, %v4752_v40  ;;  %8337 = vmatprep.mubr.msk.f32.mxu1 %vm2482_vm7, %v4752_v40  ;;  %v8358_v40 = vld [vmem:[%s14148_s30 + $0xc8] sm:$0xff] }
 0x546   : > { %v4753_v22 = vmax.f32 %v4445_v14, %v4686_v29  ;;  %v4447_v62 = vpop.f32.mrb[75].mxu0  ;;  %v4688_v13 = vpop.f32.mrb[75].mxu1  ;;  %4942 = vmatmul.mubr.f32.gmra.mrb[104].mxu0 %v4751_v8  ;;  %5115 = vmatmul.mubr.f32.gmra.mrb[104].mxu1 %v4751_v8  ;;  %v8356_v8 = vld [vmem:[%s14148_s30 + $0xb8] sm:$0xff]  ;;  %v9970_v14 = vpack.c.bf16 %v8358_v40, %v8357_v12  ;;  %v8359_v29 = vld [vmem:[%s14148_s30 + $0xd0] sm:$0xff] }
 0x547   : > { %v4754_v60 = vmax.f32 %v4447_v62, %v4688_v13  ;;  %9965 = vmatpush3.bf16.msra.mxu0 %v9962_v20  ;;  %v9966_v46 = vpack.c.bf16 %v8356_v8, %v8355_v55  ;;  %v5214_v13 = vld [vmem:[%s14148_s30] sm:$0xff]  ;;  %v5220_v40 = vld [vmem:[%s14148_s30 + $0x30] sm:$0xff] }
 0x549   : > { %v4451_v34 = vpop.f32.mrb[76].mxu0  ;;  %v4692_v11 = vpop.f32.mrb[76].mxu1  ;;  %8322 = vmatprep.mubr.msk.f32.mxu0 %vm2482_vm7, %v4754_v60  ;;  %8338 = vmatprep.mubr.msk.f32.mxu1 %vm2482_vm7, %v4754_v60  ;;  %v5215_v60 = vld [vmem:[%s14148_s30 + $0x8] sm:$0xff] }
 0x54a   : > { %v4755_v21 = vmax.f32 %v4451_v34, %v4692_v11  ;;  %v4453_v56 = vpop.f32.mrb[77].mxu0  ;;  %v4694_v33 = vpop.f32.mrb[77].mxu1  ;;  %4947 = vmatmul.mubr.f32.gmra.mrb[106].mxu0 %v4753_v22  ;;  %5120 = vmatmul.mubr.f32.gmra.mrb[106].mxu1 %v4753_v22  ;;  %v8360_v22 = vld [vmem:[%s14148_s30 + $0xd8] sm:$0xff]  ;;  %v9978_v34 = vpack.c.bf16 %v5215_v60, %v5214_v13 }
 0x54b   : > { %v4756_v26 = vmax.f32 %v4453_v56, %v4694_v33  ;;  %9967 = vmatprep.subr.bf16.mxu0 %v9966_v46  ;;  %v9974_v62 = vpack.c.bf16 %v8360_v22, %v8359_v29 }
 0x54c   : > { %9969 = vmatpush3.bf16.msra.mxu0 %v9966_v46 }
 0x54d   : > { %v4457_v63 = vpop.f32.mrb[78].mxu0  ;;  %v4698_v7 = vpop.f32.mrb[78].mxu1  ;;  %8323 = vmatprep.mubr.msk.f32.mxu0 %vm2482_vm7, %v4756_v26  ;;  %8339 = vmatprep.mubr.msk.f32.mxu1 %vm2482_vm7, %v4756_v26 }
 0x54e   : > { %v4757_v30 = vmax.f32 %v4457_v63, %v4698_v7  ;;  %v4459_v43 = vpop.f32.mrb[79].mxu0  ;;  %v4700_v9 = vpop.f32.mrb[79].mxu1  ;;  %4952 = vmatmul.mubr.f32.gmra.mrb[108].mxu0 %v4755_v21  ;;  %5125 = vmatmul.mubr.f32.gmra.mrb[108].mxu1 %v4755_v21 }
 0x54f   : > { %v4758_v41 = vmax.f32 %v4459_v43, %v4700_v9  ;;  %9971 = vmatprep.subr.bf16.mxu0 %v9970_v14 }
 0x550   : > { %9973 = vmatpush3.bf16.msra.mxu0 %v9970_v14  ;;  %v5221_v14 = vld [vmem:[%s14148_s30 + $0x38] sm:$0xff] }
 0x551   : > { %v4463_v32 = vpop.f32.mrb[80].mxu0  ;;  %v4704_v24 = vpop.f32.mrb[80].mxu1  ;;  %8324 = vmatprep.mubr.msk.f32.mxu0 %vm2482_vm7, %v4758_v41  ;;  %8340 = vmatprep.mubr.msk.f32.mxu1 %vm2482_vm7, %v4758_v41 }
 0x552   : > { %v4759_v42 = vmax.f32 %v4463_v32, %v4704_v24  ;;  %v4465_v54 = vpop.f32.mrb[81].mxu0  ;;  %v4706_v18 = vpop.f32.mrb[81].mxu1  ;;  %4957 = vmatmul.mubr.f32.gmra.mrb[110].mxu0 %v4757_v30  ;;  %5130 = vmatmul.mubr.f32.gmra.mrb[110].mxu1 %v4757_v30  ;;  %v8424_v24 = vld [vmem:[%s14149_s7 + $0x70] sm:$0xff] }
 0x553   : > { %v4760_v28 = vmax.f32 %v4465_v54, %v4706_v18  ;;  %9975 = vmatprep.subr.bf16.mxu0 %v9974_v62  ;;  %v8426_v54 = vld [vmem:[%s14149_s7 + $0x80] sm:$0xff] }
 0x554   : > { %9977 = vmatpush3.bf16.msra.mxu0 %v9974_v62 }
 0x555   : > { %v4469_v59 = vpop.f32.mrb[82].mxu0  ;;  %v4710_v38 = vpop.f32.mrb[82].mxu1  ;;  %8325 = vmatprep.mubr.msk.f32.mxu0 %vm2482_vm7, %v4760_v28  ;;  %8341 = vmatprep.mubr.msk.f32.mxu1 %vm2482_vm7, %v4760_v28 }
 0x556   : > { %v4761_v51 = vmax.f32 %v4469_v59, %v4710_v38  ;;  %v4471_v23 = vpop.f32.mrb[83].mxu0  ;;  %v4712_v53 = vpop.f32.mrb[83].mxu1  ;;  %4962 = vmatmul.mubr.f32.gmra.mrb[112].mxu0 %v4759_v42  ;;  %5135 = vmatmul.mubr.f32.gmra.mrb[112].mxu1 %v4759_v42  ;;  %v8425_v42 = vld [vmem:[%s14149_s7 + $0x78] sm:$0xff] }
 0x557   : > { %v4762_v19 = vmax.f32 %v4471_v23, %v4712_v53  ;;  %9979 = vmatprep.subr.bf16.mxu0 %v9978_v34  ;;  %v10034_v38 = vpack.c.bf16 %v8425_v42, %v8424_v24  ;;  %v8428_v53 = vld [vmem:[%s14149_s7 + $0x90] sm:$0xff] }
 0x559   : > { %v4475_v52 = vpop.f32.mrb[84].mxu0  ;;  %v4716_v5 = vpop.f32.mrb[84].mxu1  ;;  %8326 = vmatprep.mubr.msk.f32.mxu0 %vm2482_vm7, %v4762_v19  ;;  %8342 = vmatprep.mubr.msk.f32.mxu1 %vm2482_vm7, %v4762_v19  ;;  %v8429_v19 = vld [vmem:[%s14149_s7 + $0x98] sm:$0xff] }
 0x55a   : > { %v4763_v47 = vmax.f32 %v4475_v52, %v4716_v5  ;;  %v4477_v39 = vpop.f32.mrb[85].mxu0  ;;  %v4718_v6 = vpop.f32.mrb[85].mxu1  ;;  %4967 = vmatmul.mubr.f32.gmra.mrb[114].mxu0 %v4761_v51  ;;  %5140 = vmatmul.mubr.f32.gmra.mrb[114].mxu1 %v4761_v51  ;;  %v8427_v51 = vld [vmem:[%s14149_s7 + $0x88] sm:$0xff] }
 0x55b   : > { %v4764_v35 = vmax.f32 %v4477_v39, %v4718_v6  ;;  %v10038_v23 = vpack.c.bf16 %v8427_v51, %v8426_v54  ;;  %10035 = vmatprep.subr.bf16.mxu1 %v10034_v38  ;;  %v5226_v51 = vld [vmem:[%s14148_s30 + $0x60] sm:$0xff] }
 0x55c   : > { %10037 = vmatpush3.bf16.msra.mxu1 %v10034_v38 }
 0x55d   : > { %v4481_v44 = vpop.f32.mrb[86].mxu0  ;;  %v4722_v58 = vpop.f32.mrb[86].mxu1  ;;  %8327 = vmatprep.mubr.msk.f32.mxu0 %vm2482_vm7, %v4764_v35  ;;  %8343 = vmatprep.mubr.msk.f32.mxu1 %vm2482_vm7, %v4764_v35  ;;  %v5216_v35 = vld [vmem:[%s14148_s30 + $0x10] sm:$0xff] }
 0x55e   : > { %v4765_v3 = vmax.f32 %v4481_v44, %v4722_v58  ;;  %v4483_v27 = vpop.f32.mrb[87].mxu0  ;;  %v4724_v15 = vpop.f32.mrb[87].mxu1  ;;  %4972 = vmatmul.mubr.f32.gmra.mrb[116].mxu0 %v4763_v47  ;;  %5145 = vmatmul.mubr.f32.gmra.mrb[116].mxu1 %v4763_v47  ;;  %v5217_v44 = vld [vmem:[%s14148_s30 + $0x18] sm:$0xff]  ;;  %v10042_v58 = vpack.c.bf16 %v8429_v19, %v8428_v53 }
 0x55f   : > { %v4766_v10 = vmax.f32 %v4483_v27, %v4724_v15  ;;  %10039 = vmatprep.subr.bf16.mxu1 %v10038_v23  ;;  %v8430_v27 = vld [vmem:[%s14149_s7 + $0xa0] sm:$0xff]  ;;  %v8431_v15 = vld [vmem:[%s14149_s7 + $0xa8] sm:$0xff] }
 0x560   : > { %10041 = vmatpush3.bf16.msra.mxu1 %v10038_v23  ;;  %v5227_v23 = vld [vmem:[%s14148_s30 + $0x68] sm:$0xff] }
 0x561   : > { %v4487_v61 = vpop.f32.mrb[88].mxu0  ;;  %v4728_v57 = vpop.f32.mrb[88].mxu1  ;;  %8328 = vmatprep.mubr.msk.f32.mxu0 %vm2482_vm7, %v4766_v10  ;;  %8344 = vmatprep.mubr.msk.f32.mxu1 %vm2482_vm7, %v4766_v10 }
 0x562   : > { %v4767_v45 = vmax.f32 %v4487_v61, %v4728_v57  ;;  %v4489_v36 = vpop.f32.mrb[89].mxu0  ;;  %v4730_v16 = vpop.f32.mrb[89].mxu1  ;;  %4977 = vmatmul.mubr.f32.gmra.mrb[118].mxu0 %v4765_v3  ;;  %5150 = vmatmul.mubr.f32.gmra.mrb[118].mxu1 %v4765_v3 }
 0x563   : > { %v4768_v0 = vmax.f32 %v4489_v36, %v4730_v16  ;;  %v9982_v16 = vpack.c.bf16 %v5217_v44, %v5216_v35  ;;  %10043 = vmatprep.subr.bf16.mxu1 %v10042_v58  ;;  %v8393_v35 = vld [vmem:[%s14148_s30 + $0xe0] sm:$0xff]  ;;  %v8394_v44 = vld [vmem:[%s14148_s30 + $0xe8] sm:$0xff] }
 0x564   : > { %10045 = vmatpush3.bf16.msra.mxu1 %v10042_v58 }
 0x565   : > { %v4493_v2 = vpop.f32.mrb[90].mxu0  ;;  %v4734_v25 = vpop.f32.mrb[90].mxu1  ;;  %8329 = vmatprep.mubr.msk.f32.mxu0 %vm2482_vm7, %v4768_v0  ;;  %8345 = vmatprep.mubr.msk.f32.mxu1 %vm2482_vm7, %v4768_v0  ;;  %v5218_v0 = vld [vmem:[%s14148_s30 + $0x20] sm:$0xff] }
 0x566   : > { %v4769_v37 = vmax.f32 %v4493_v2, %v4734_v25  ;;  %v4495_v4 = vpop.f32.mrb[91].mxu0  ;;  %v4736_v1 = vpop.f32.mrb[91].mxu1  ;;  %4982 = vmatmul.mubr.f32.gmra.mrb[120].mxu0 %v4767_v45  ;;  %5155 = vmatmul.mubr.f32.gmra.mrb[120].mxu1 %v4767_v45  ;;  %v5219_v2 = vld [vmem:[%s14148_s30 + $0x28] sm:$0xff]  ;;  %v10046_v25 = vpack.c.bf16 %v8431_v15, %v8430_v27 }
 0x567   : > { %v4770_v50 = vmax.f32 %v4495_v4, %v4736_v1  ;;  %v8432_v4 = vld [vmem:[%s14149_s7 + $0xb0] sm:$0xff]  ;;  %v8433_v1 = vld [vmem:[%s14149_s7 + $0xb8] sm:$0xff]  ;;  %v9986_v8 = vpack.c.bf16 %v5219_v2, %v5218_v0 }
 0x568   : > { %10047 = vmatprep.subr.bf16.mxu1 %v10046_v25  ;;  %v10050_v46 = vpack.c.bf16 %v8433_v1, %v8432_v4 }
 0x569   : > { %8330 = vmatprep.mubr.msk.f32.mxu0 %vm2482_vm7, %v4770_v50  ;;  %8346 = vmatprep.mubr.msk.f32.mxu1 %vm2482_vm7, %v4770_v50 }
 0x56a   : > { %4987 = vmatmul.mubr.f32.gmra.mrb[122].mxu0 %v4769_v37  ;;  %5160 = vmatmul.mubr.f32.gmra.mrb[122].mxu1 %v4769_v37 }
 0x56b   : > { %10049 = vmatpush3.bf16.msra.mxu1 %v10046_v25 }
 0x56c   : > { %10051 = vmatprep.subr.bf16.mxu1 %v10050_v46 }
 0x56f   : > { %10053 = vmatpush3.bf16.msra.mxu1 %v10050_v46 }
 0x601   : > { %v4913_v11 = vpop.f32.mrb[92].mxu0  ;;  %v5086_v21 = vpop.f32.mrb[92].mxu1 }
 0x602   : > { %v5165_v56 = vmax.f32 %v4913_v11, %v5086_v21  ;;  %v4915_v33 = vpop.f32.mrb[93].mxu0  ;;  %v5088_v26 = vpop.f32.mrb[93].mxu1  ;;  %v5222_v21 = vld [vmem:[%s14148_s30 + $0x40] sm:$0xff] }
 0x604   : > { %5182 = vst.msk [vmem:[#allocation3] sm:$0xff] %vm5181_vm13, %v5165_v56  ;;  %v5223_v56 = vld [vmem:[%s14148_s30 + $0x48] sm:$0xff] }
 0x605   : > { %v4918_v63 = vpop.f32.mrb[94].mxu0  ;;  %v5091_v7 = vpop.f32.mrb[94].mxu1 }
 0x606   : > { %v5166_v30 = vmax.f32 %v4918_v63, %v5091_v7  ;;  %v4920_v43 = vpop.f32.mrb[95].mxu0  ;;  %v5093_v9 = vpop.f32.mrb[95].mxu1 }
 0x607   : > { %v9994_v43 = vpack.c.bf16 %v5223_v56, %v5222_v21 }
 0x608   : > { %5183 = vst.msk [vmem:[#allocation3 + $0x8] sm:$0xff] %vm5181_vm13, %v5166_v30 }
 0x609   : > { %v4923_v41 = vpop.f32.mrb[96].mxu0  ;;  %v5096_v32 = vpop.f32.mrb[96].mxu1 }
 0x60a   : > { %v5167_v18 = vmax.f32 %v4923_v41, %v5096_v32  ;;  %v4925_v28 = vpop.f32.mrb[97].mxu0  ;;  %v5098_v59 = vpop.f32.mrb[97].mxu1  ;;  %v5224_v41 = vld [vmem:[%s14148_s30 + $0x50] sm:$0xff]  ;;  %v5225_v32 = vld [vmem:[%s14148_s30 + $0x58] sm:$0xff] }
 0x60b   : > { %v9998_v59 = vpack.c.bf16 %v5225_v32, %v5224_v41  ;;  %v5198_v41 = vld [vmem:[#allocation3] sm:$0xff] }
 0x60c   : > { %5184 = vst.msk [vmem:[#allocation3 + $0x10] sm:$0xff] %vm5181_vm13, %v5167_v18 }
 0x60d   : > { %v4928_v52 = vpop.f32.mrb[98].mxu0  ;;  %v5101_v5 = vpop.f32.mrb[98].mxu1 }
 0x60e   : > { %v5168_v47 = vmax.f32 %v4928_v52, %v5101_v5  ;;  %v4930_v39 = vpop.f32.mrb[99].mxu0  ;;  %v5103_v6 = vpop.f32.mrb[99].mxu1 }
 0x60f   : > { %v5228_v3 = vld [vmem:[#allocation3 + $0x1] sm:$0xff]  ;;  %v10002_v39 = vpack.c.bf16 %v5227_v23, %v5226_v51  ;;  %v8400_v51 = vld [vmem:[%s14148_s30 + $0x118] sm:$0xff] }
 0x610   : > { %5185 = vst.msk [vmem:[#allocation3 + $0x18] sm:$0xff] %vm5181_vm13, %v5168_v47  ;;  %8937 = vmatprep.mubr.msk.f32.mxu0 %vm5181_vm13, %v5228_v3 }
 0x611   : > { %v4933_v10 = vpop.f32.mrb[100].mxu0  ;;  %v5106_v61 = vpop.f32.mrb[100].mxu1 }
 0x612   : > { %v5169_v57 = vmax.f32 %v4933_v10, %v5106_v61  ;;  %v4935_v45 = vpop.f32.mrb[101].mxu0  ;;  %v5108_v36 = vpop.f32.mrb[101].mxu1  ;;  %v13282_v61 = vpack.c.bf16 %v8394_v44, %v8393_v35  ;;  %v8403_v35 = vld [vmem:[%s14148_s30 + $0x130] sm:$0xff]  ;;  %v8404_v44 = vld [vmem:[%s14148_s30 + $0x138] sm:$0xff] }
 0x613   : > { %v5229_v37 = vld [vmem:[#allocation3 + $0x9] sm:$0xff] }
 0x614   : > { %5186 = vst.msk [vmem:[#allocation3 + $0x20] sm:$0xff] %vm5181_vm13, %v5169_v57  ;;  %8938 = vmatmul.mubr.msk.f32.vlgmr.msra.gmra.mrb[124].mxu0 %vm5181_vm13, %v5229_v37 }
 0x615   : > { %v4938_v50 = vpop.f32.mrb[102].mxu0  ;;  %v5111_v49 = vpop.f32.mrb[102].mxu1  ;;  %9981 = vmatpush3.bf16.msra.mxu0 %v9978_v34  ;;  %v9990_v34 = vpack.c.bf16 %v5221_v14, %v5220_v40 }
 0x616   : > { %v5170_v31 = vmax.f32 %v4938_v50, %v5111_v49  ;;  %v4940_v20 = vpop.f32.mrb[103].mxu0  ;;  %v5113_v55 = vpop.f32.mrb[103].mxu1  ;;  %9983 = vmatprep.subr.bf16.mxu0 %v9982_v16 }
 0x617   : > { %v5230_v12 = vld [vmem:[#allocation3 + $0x11] sm:$0xff] }
 0x618   : > { %5187 = vst.msk [vmem:[#allocation3 + $0x28] sm:$0xff] %vm5181_vm13, %v5170_v31  ;;  %8940 = vmatprep.mubr.msk.f32.mxu0 %vm5181_vm13, %v5230_v12 }
 0x619   : > { %v4943_v29 = vpop.f32.mrb[104].mxu0  ;;  %v5116_v22 = vpop.f32.mrb[104].mxu1  ;;  %9985 = vmatpush3.bf16.msra.mxu0 %v9982_v16 }
 0x61a   : > { %v5171_v62 = vmax.f32 %v4943_v29, %v5116_v22  ;;  %v4945_v13 = vpop.f32.mrb[105].mxu0  ;;  %v5118_v60 = vpop.f32.mrb[105].mxu1  ;;  %9987 = vmatprep.subr.bf16.mxu0 %v9986_v8 }
 0x61b   : > { %v5231_v11 = vld [vmem:[#allocation3 + $0x19] sm:$0xff] }
 0x61c   : > { %5188 = vst.msk [vmem:[#allocation3 + $0x30] sm:$0xff] %vm5181_vm13, %v5171_v62  ;;  %8941 = vmatmul.mubr.msk.f32.gmra.mrb[126].mxu0 %vm5181_vm13, %v5231_v11  ;;  %v5202_v23 = vld [vmem:[#allocation3 + $0x20] sm:$0xff] }
 0x61d   : > { %v4948_v33 = vpop.f32.mrb[106].mxu0  ;;  %v5121_v26 = vpop.f32.mrb[106].mxu1  ;;  %9989 = vmatpush3.bf16.msra.mxu0 %v9986_v8 }
 0x61e   : > { %v5172_v63 = vmax.f32 %v4948_v33, %v5121_v26  ;;  %v4950_v7 = vpop.f32.mrb[107].mxu0  ;;  %v5123_v30 = vpop.f32.mrb[107].mxu1  ;;  %9991 = vmatprep.subr.bf16.mxu0 %v9990_v34 }
 0x61f   : > { %v5232_v9 = vld [vmem:[#allocation3 + $0x21] sm:$0xff] }
 0x620   : > { %5189 = vst.msk [vmem:[#allocation3 + $0x38] sm:$0xff] %vm5181_vm13, %v5172_v63  ;;  %8943 = vmatprep.mubr.msk.f32.mxu0 %vm5181_vm13, %v5232_v9  ;;  %v8396_v9 = vld [vmem:[%s14148_s30 + $0xf8] sm:$0xff] }
 0x621   : > { %v4953_v24 = vpop.f32.mrb[108].mxu0  ;;  %v5126_v42 = vpop.f32.mrb[108].mxu1  ;;  %9993 = vmatpush3.bf16.msra.mxu0 %v9990_v34 }
 0x622   : > { %v5173_v54 = vmax.f32 %v4953_v24, %v5126_v42  ;;  %v4955_v18 = vpop.f32.mrb[109].mxu0  ;;  %v5128_v28 = vpop.f32.mrb[109].mxu1  ;;  %9995 = vmatprep.subr.bf16.mxu0 %v9994_v43  ;;  %v5199_v24 = vld [vmem:[#allocation3 + $0x8] sm:$0xff]  ;;  %v8397_v42 = vld [vmem:[%s14148_s30 + $0x100] sm:$0xff] }
 0x623   : > { %v5233_v38 = vld [vmem:[#allocation3 + $0x29] sm:$0xff] }
 0x624   : > { %5190 = vst.msk [vmem:[#allocation3 + $0x40] sm:$0xff] %vm5181_vm13, %v5173_v54  ;;  %8944 = vmatmul.mubr.msk.f32.gmra.mrb[128].mxu0 %vm5181_vm13, %v5233_v38  ;;  %v8398_v54 = vld [vmem:[%s14148_s30 + $0x108] sm:$0xff]  ;;  %v5200_v18 = vld [vmem:[#allocation3 + $0x10] sm:$0xff] }
 0x625   : > { %v4958_v53 = vpop.f32.mrb[110].mxu0  ;;  %v5131_v19 = vpop.f32.mrb[110].mxu1  ;;  %9997 = vmatpush3.bf16.msra.mxu0 %v9994_v43  ;;  %v8395_v43 = vld [vmem:[%s14148_s30 + $0xf0] sm:$0xff]  ;;  %v10014_v28 = vpack.c.bf16 %v8398_v54, %v8397_v42 }
 0x626   : > { %v5174_v52 = vmax.f32 %v4958_v53, %v5131_v19  ;;  %v4960_v5 = vpop.f32.mrb[111].mxu0  ;;  %v5133_v47 = vpop.f32.mrb[111].mxu1  ;;  %9999 = vmatprep.subr.bf16.mxu0 %v9998_v59  ;;  %v10010_v32 = vpack.c.bf16 %v8396_v9, %v8395_v43  ;;  %v8399_v38 = vld [vmem:[%s14148_s30 + $0x110] sm:$0xff]  ;;  %v5203_v19 = vld [vmem:[#allocation3 + $0x28] sm:$0xff] }
 0x627   : > { %v5234_v6 = vld [vmem:[#allocation3 + $0x31] sm:$0xff]  ;;  %v10018_v53 = vpack.c.bf16 %v8400_v51, %v8399_v38  ;;  %v8402_v5 = vld [vmem:[%s14148_s30 + $0x128] sm:$0xff] }
 0x628   : > { %5191 = vst.msk [vmem:[#allocation3 + $0x48] sm:$0xff] %vm5181_vm13, %v5174_v52  ;;  %8946 = vmatprep.mubr.msk.f32.mxu0 %vm5181_vm13, %v5234_v6  ;;  %v8401_v52 = vld [vmem:[%s14148_s30 + $0x120] sm:$0xff]  ;;  %v5204_v47 = vld [vmem:[#allocation3 + $0x30] sm:$0xff]  ;;  %v5205_v6 = vld [vmem:[#allocation3 + $0x38] sm:$0xff] }
 0x629   : > { %v4963_v58 = vpop.f32.mrb[112].mxu0  ;;  %v5136_v3 = vpop.f32.mrb[112].mxu1  ;;  %10001 = vmatpush3.bf16.msra.mxu0 %v9998_v59  ;;  %v5201_v59 = vld [vmem:[#allocation3 + $0x18] sm:$0xff] }
 0x62a   : > { %v5175_v27 = vmax.f32 %v4963_v58, %v5136_v3  ;;  %v4965_v15 = vpop.f32.mrb[113].mxu0  ;;  %v5138_v10 = vpop.f32.mrb[113].mxu1  ;;  %10003 = vmatprep.subr.bf16.mxu0 %v10002_v39  ;;  %v10026_v3 = vpack.c.bf16 %v8404_v44, %v8403_v35 }
 0x62b   : > { %v5235_v57 = vld [vmem:[#allocation3 + $0x39] sm:$0xff]  ;;  %v8406_v10 = vld [vmem:[%s14148_s30 + $0x148] sm:$0xff] }
 0x62c   : > { %5192 = vst.msk [vmem:[#allocation3 + $0x50] sm:$0xff] %vm5181_vm13, %v5175_v27  ;;  %8947 = vmatmul.mubr.msk.f32.gmra.mrb[130].mxu0 %vm5181_vm13, %v5235_v57  ;;  %v5206_v58 = vld [vmem:[#allocation3 + $0x40] sm:$0xff] }
 0x62d   : > { %v4968_v45 = vpop.f32.mrb[114].mxu0  ;;  %v5141_v36 = vpop.f32.mrb[114].mxu1  ;;  %10005 = vmatpush3.bf16.msra.mxu0 %v10002_v39  ;;  %v10022_v39 = vpack.c.bf16 %v8402_v5, %v8401_v52  ;;  %v8405_v15 = vld [vmem:[%s14148_s30 + $0x140] sm:$0xff] }
 0x62e   : > { %v5176_v16 = vmax.f32 %v4968_v45, %v5141_v36  ;;  %v4970_v0 = vpop.f32.mrb[115].mxu0  ;;  %v5143_v2 = vpop.f32.mrb[115].mxu1  ;;  %10007 = vmatprep.subr.bf16.mxu0 %v13282_v61  ;;  %v10030_v57 = vpack.c.bf16 %v8406_v10, %v8405_v15 }
 0x62f   : > { %v5236_v25 = vld [vmem:[#allocation3 + $0x41] sm:$0xff] }
 0x630   : > { %5193 = vst.msk [vmem:[#allocation3 + $0x58] sm:$0xff] %vm5181_vm13, %v5176_v16  ;;  %8949 = vmatprep.mubr.msk.f32.mxu0 %vm5181_vm13, %v5236_v25  ;;  %v5207_v27 = vld [vmem:[#allocation3 + $0x48] sm:$0xff] }
 0x631   : > { %v4973_v37 = vpop.f32.mrb[116].mxu0  ;;  %v5146_v4 = vpop.f32.mrb[116].mxu1  ;;  %v5645_v25 = vld [vmem:[#allocation3 + $0x2] sm:$0xff] }
 0x632   : > { %v5177_v1 = vmax.f32 %v4973_v37, %v5146_v4  ;;  %v4975_v50 = vpop.f32.mrb[117].mxu0  ;;  %v5148_v49 = vpop.f32.mrb[117].mxu1  ;;  %v5646_v37 = vld [vmem:[#allocation3 + $0xa] sm:$0xff]  ;;  %v5647_v4 = vld [vmem:[#allocation3 + $0x12] sm:$0xff] }
 0x633   : > { %v5237_v31 = vld [vmem:[#allocation3 + $0x49] sm:$0xff] }
 0x634   : > { %5194 = vst.msk [vmem:[#allocation3 + $0x60] sm:$0xff] %vm5181_vm13, %v5177_v1  ;;  %8950 = vmatmul.mubr.msk.f32.gmra.mrb[132].mxu0 %vm5181_vm13, %v5237_v31  ;;  %v5648_v1 = vld [vmem:[#allocation3 + $0x1a] sm:$0xff]  ;;  %v5649_v50 = vld [vmem:[#allocation3 + $0x22] sm:$0xff]  ;;  %v5650_v49 = vld [vmem:[#allocation3 + $0x2a] sm:$0xff] }
 0x635   : > { %v4978_v20 = vpop.f32.mrb[118].mxu0  ;;  %v5151_v55 = vpop.f32.mrb[118].mxu1  ;;  %v5651_v31 = vld [vmem:[#allocation3 + $0x32] sm:$0xff] }
 0x636   : > { %v5178_v8 = vmax.f32 %v4978_v20, %v5151_v55  ;;  %v4980_v46 = vpop.f32.mrb[119].mxu0  ;;  %v5153_v12 = vpop.f32.mrb[119].mxu1  ;;  %v5652_v20 = vld [vmem:[#allocation3 + $0x3a] sm:$0xff]  ;;  %v5653_v55 = vld [vmem:[#allocation3 + $0x42] sm:$0xff] }
 0x637   : > { %v5238_v40 = vld [vmem:[#allocation3 + $0x51] sm:$0xff] }
 0x638   : > { %5195 = vst.msk [vmem:[#allocation3 + $0x68] sm:$0xff] %vm5181_vm13, %v5178_v8  ;;  %8952 = vmatprep.mubr.msk.f32.mxu0 %vm5181_vm13, %v5238_v40  ;;  %v5209_v45 = vld [vmem:[#allocation3 + $0x58] sm:$0xff]  ;;  %v5654_v8 = vld [vmem:[#allocation3 + $0x4a] sm:$0xff] }
 0x639   : > { %v4983_v14 = vpop.f32.mrb[120].mxu0  ;;  %v5156_v29 = vpop.f32.mrb[120].mxu1  ;;  %v5655_v46 = vld [vmem:[#allocation3 + $0x52] sm:$0xff] }
 0x63a   : > { %v5179_v22 = vmax.f32 %v4983_v14, %v5156_v29  ;;  %v4985_v62 = vpop.f32.mrb[121].mxu0  ;;  %v5158_v13 = vpop.f32.mrb[121].mxu1 }
 0x63b   : > { %v5239_v60 = vld [vmem:[#allocation3 + $0x59] sm:$0xff]  ;;  %v8435_v13 = vld [vmem:[%s14149_s7 + $0xc8] sm:$0xff] }
 0x63c   : > { %5196 = vst.msk [vmem:[#allocation3 + $0x70] sm:$0xff] %vm5181_vm13, %v5179_v22  ;;  %8953 = vmatmul.mubr.msk.f32.gmra.mrb[134].mxu0 %vm5181_vm13, %v5239_v60  ;;  %v5210_v36 = vld [vmem:[#allocation3 + $0x60] sm:$0xff] }
 0x63d   : > { %v4988_v34 = vpop.f32.mrb[122].mxu0  ;;  %v5161_v11 = vpop.f32.mrb[122].mxu1  ;;  %v5656_v12 = vld [vmem:[#allocation3 + $0x5a] sm:$0xff] }
 0x63e   : > { %v5180_v21 = vmax.f32 %v4988_v34, %v5161_v11  ;;  %v4990_v56 = vpop.f32.mrb[123].mxu0  ;;  %v5163_v33 = vpop.f32.mrb[123].mxu1  ;;  %v8434_v62 = vld [vmem:[%s14149_s7 + $0xc0] sm:$0xff]  ;;  %v8436_v34 = vld [vmem:[%s14149_s7 + $0xd0] sm:$0xff]  ;;  %v8437_v11 = vld [vmem:[%s14149_s7 + $0xd8] sm:$0xff] }
 0x63f   : > { %v5240_v26 = vld [vmem:[#allocation3 + $0x61] sm:$0xff]  ;;  %v10054_v60 = vpack.c.bf16 %v8435_v13, %v8434_v62 }
 0x640   : > { %5197 = vst.msk [vmem:[#allocation3 + $0x78] sm:$0xff] %vm5181_vm13, %v5180_v21  ;;  %8955 = vmatprep.mubr.msk.f32.mxu0 %vm5181_vm13, %v5240_v26  ;;  %v5211_v16 = vld [vmem:[#allocation3 + $0x68] sm:$0xff]  ;;  %v10058_v21 = vpack.c.bf16 %v8437_v11, %v8436_v34  ;;  %v6072_v56 = vld [vmem:[%s14149_s7] sm:$0xff] }
 0x641   : > { %v5657_v40 = vld [vmem:[#allocation3 + $0x62] sm:$0xff]  ;;  %10055 = vmatprep.subr.bf16.mxu1 %v10054_v60 }
 0x642   : > { %10057 = vmatpush3.bf16.msra.mxu1 %v10054_v60  ;;  %v6073_v33 = vld [vmem:[%s14149_s7 + $0x8] sm:$0xff] }
 0x643   : > { %v5241_v63 = vld [vmem:[#allocation3 + $0x69] sm:$0xff]  ;;  %10059 = vmatprep.subr.bf16.mxu1 %v10058_v21  ;;  %v13388_v26 = vpack.c.bf16 %v6073_v33, %v6072_v56 }
 0x644   : > { %8956 = vmatmul.mubr.msk.f32.gmra.mrb[136].mxu0 %vm5181_vm13, %v5241_v63  ;;  %v5212_v0 = vld [vmem:[#allocation3 + $0x70] sm:$0xff]  ;;  %v14150_v63 = vmov 0.0  }
 0x645   : > { %v5658_v14 = vld [vmem:[#allocation3 + $0x6a] sm:$0xff]  ;;  %6037 = vst.msk [vmem:[#allocation4] sm:$0x1] %vm6036_vm14, %v14150_v63  ;;  %6038 = vst.msk [vmem:[#allocation4 + $0x7f] sm:$0x1] %vm6036_vm14, %v14150_v63 }
 0x646   : > { %10061 = vmatpush3.bf16.msra.mxu1 %v10058_v21 }
 0x647   : > { %v5242_v7 = vld [vmem:[#allocation3 + $0x71] sm:$0xff]  ;;  %v5243_v30 = vld [vmem:[#allocation3 + $0x79] sm:$0x3f]  ;;  %10063 = vmatprep.subr.bf16.mxu1 %v13388_v26 }
 0x648   : > { %8958 = vmatprep.mubr.msk.f32.mxu0 %vm5181_vm13, %v5242_v7  ;;  %v5213_v2 = vld [vmem:[#allocation3 + $0x78] sm:$0x3f]  ;;  %v5948_v7 = vpop.permute.xlu1 %5947 }
 0x649   : > { %8959 = vmatmul.mubr.msk.f32.gmra.mrb[138].mxu0 %vm5181_vm13, %v5243_v30  ;;  %v5659_v29 = vld [vmem:[#allocation3 + $0x72] sm:$0xff]  ;;  %v5660_v22 = vld [vmem:[#allocation3 + $0x7a] sm:$0x3f]  ;;  %v5943_v30 = vpop.permute.xlu0 %5942 }
 0x64a   : > { %8989 = vmatprep.mubr.msk.f32.mxu0 %vm5181_vm13, %v5198_v41  ;;  %v13396_v41 = vld [vmem:[%s14151_s6] ss:$0 sm:$0xff]  ;;  %s14154_s6 = smov %s14153_s27 }
 0x64c   : > { %v5958_v43 = vpop.permute.xlu1 %5957 }
 0x64d   : > { %8990 = vmatmul.mubr.msk.f32.vlgmr.msra.gmra.mrb[124].mxu0 %vm5181_vm13, %v5199_v24  ;;  %v5953_v9 = vpop.permute.xlu0 %5952 }
 0x64e   : > { %8992 = vmatprep.mubr.msk.f32.mxu0 %vm5181_vm13, %v5200_v18  ;;  %10009 = vmatpush3.bf16.msra.mxu0 %v13282_v61  ;;  %v5208_v61 = vld [vmem:[#allocation3 + $0x50] sm:$0xff] }
 0x64f   : > { %10011 = vmatprep.subr.bf16.mxu0 %v10010_v32 }
 0x650   : > { %v5968_v54 = vpop.permute.xlu1 %5967 }
 0x651   : > { %8993 = vmatmul.mubr.msk.f32.gmra.mrb[126].mxu0 %vm5181_vm13, %v5201_v59 }
 0x652   : > { %8995 = vmatprep.mubr.msk.f32.mxu0 %vm5181_vm13, %v5202_v23  ;;  %10013 = vmatpush3.bf16.msra.mxu0 %v10010_v32 }
 0x653   : > { %10015 = vmatprep.subr.bf16.mxu0 %v10014_v28 }
 0x655   : > { %8996 = vmatmul.mubr.msk.f32.gmra.mrb[128].mxu0 %vm5181_vm13, %v5203_v19 }
 0x656   : > { %8998 = vmatprep.mubr.msk.f32.mxu0 %vm5181_vm13, %v5204_v47  ;;  %10017 = vmatpush3.bf16.msra.mxu0 %v10014_v28  ;;  %v5963_v28 = vpop.permute.xlu0 %5962 }
 0x657   : > { %10019 = vmatprep.subr.bf16.mxu0 %v10018_v53 }
 0x659   : > { %8999 = vmatmul.mubr.msk.f32.gmra.mrb[130].mxu0 %vm5181_vm13, %v5205_v6 }
 0x65a   : > { %9001 = vmatprep.mubr.msk.f32.mxu0 %vm5181_vm13, %v5206_v58  ;;  %10021 = vmatpush3.bf16.msra.mxu0 %v10018_v53  ;;  %v5973_v44 = vpop.permute.xlu0 %5972 }
 0x65b   : > { %10023 = vmatprep.subr.bf16.mxu0 %v10022_v39 }
 0x65d   : > { %9002 = vmatmul.mubr.msk.f32.gmra.mrb[132].mxu0 %vm5181_vm13, %v5207_v27 }
 0x65e   : > { %9004 = vmatprep.mubr.msk.f32.mxu0 %vm5181_vm13, %v5208_v61  ;;  %10025 = vmatpush3.bf16.msra.mxu0 %v10022_v39  ;;  %v5978_v39 = vpop.permute.xlu1 %5977 }
 0x65f   : > { %10027 = vmatprep.subr.bf16.mxu0 %v10026_v3 }
 0x661   : > { %9005 = vmatmul.mubr.msk.f32.gmra.mrb[134].mxu0 %vm5181_vm13, %v5209_v45 }
 0x662   : > { %9007 = vmatprep.mubr.msk.f32.mxu0 %vm5181_vm13, %v5210_v36  ;;  %10029 = vmatpush3.bf16.msra.mxu0 %v10026_v3  ;;  %v6074_v36 = vld [vmem:[%s14149_s7 + $0x10] sm:$0xff] }
 0x663   : > { %10031 = vmatprep.subr.bf16.mxu0 %v10030_v57 }
 0x665   : > { %9008 = vmatmul.mubr.msk.f32.gmra.mrb[136].mxu0 %vm5181_vm13, %v5211_v16  ;;  %v6075_v16 = vld [vmem:[%s14149_s7 + $0x18] sm:$0xff] }
 0x666   : > { %9010 = vmatprep.mubr.msk.f32.mxu0 %vm5181_vm13, %v5212_v0  ;;  %10033 = vmatpush3.bf16.msra.mxu0 %v10030_v57 }
 0x667   : > { %10118 = vmatprep.subr.bf16.mxu0 %v10725_v17 }
 0x669   : > { %9011 = vmatmul.mubr.msk.f32.gmra.mrb[138].mxu0 %vm5181_vm13, %v5213_v2 }
 0x66a   : > { %9041 = vmatprep.mubr.msk.f32.mxu0 %vm5181_vm13, %v5645_v25 }
 0x66d   : > { %9042 = vmatmul.mubr.msk.f32.vlgmr.msra.gmra.mrb[124].mxu0 %vm5181_vm13, %v5646_v37  ;;  %v5988_v37 = vpop.permute.xlu1 %5987 }
 0x66e   : > { %9044 = vmatprep.mubr.msk.f32.mxu0 %vm5181_vm13, %v5647_v4 }
 0x671   : > { %9045 = vmatmul.mubr.msk.f32.gmra.mrb[126].mxu0 %vm5181_vm13, %v5648_v1  ;;  %v5998_v21 = vpop.permute.xlu1 %5997 }
 0x672   : > { %9047 = vmatprep.mubr.msk.f32.mxu0 %vm5181_vm13, %v5649_v50  ;;  %v5983_v50 = vpop.permute.xlu0 %5982 }
 0x675   : > { %9048 = vmatmul.mubr.msk.f32.gmra.mrb[128].mxu0 %vm5181_vm13, %v5650_v49 }
 0x676   : > { %9050 = vmatprep.mubr.msk.f32.mxu0 %vm5181_vm13, %v5651_v31 }
 0x679   : > { %9051 = vmatmul.mubr.msk.f32.gmra.mrb[130].mxu0 %vm5181_vm13, %v5652_v20  ;;  %v10066_v20 = vpack.c.bf16 %v6075_v16, %v6074_v36 }
 0x67a   : > { %9053 = vmatprep.mubr.msk.f32.mxu0 %vm5181_vm13, %v5653_v55 }
 0x67d   : > { %9054 = vmatmul.mubr.msk.f32.gmra.mrb[132].mxu0 %vm5181_vm13, %v5654_v8 }
 0x67e   : > { %9056 = vmatprep.mubr.msk.f32.mxu0 %vm5181_vm13, %v5655_v46 }
 0x681   : > { %9057 = vmatmul.mubr.msk.f32.gmra.mrb[134].mxu0 %vm5181_vm13, %v5656_v12  ;;  %v6076_v12 = vld [vmem:[%s14149_s7 + $0x20] sm:$0xff] }
 0x682   : > { %9059 = vmatprep.mubr.msk.f32.mxu0 %vm5181_vm13, %v5657_v40  ;;  %v6077_v40 = vld [vmem:[%s14149_s7 + $0x28] sm:$0xff] }
 0x683   : > { %v10070_v11 = vpack.c.bf16 %v6077_v40, %v6076_v12 }
 0x685   : > { %9060 = vmatmul.mubr.msk.f32.gmra.mrb[136].mxu0 %vm5181_vm13, %v5658_v14 }
 0x686   : > { %9062 = vmatprep.mubr.msk.f32.mxu0 %vm5181_vm13, %v5659_v29 }
 0x689   : > { %9063 = vmatmul.mubr.msk.f32.gmra.mrb[138].mxu0 %vm5181_vm13, %v5660_v22 }
 0x68a   : > { %9253 = vmatprep.mubr.msk.f32.mxu0 %vm10726_vm0, %v14150_v63 }
 0x740   : > { %v9043_v32 = vpop.f32.mrb[124].mxu0 }
 0x741   : > { %v5893_v24 = vadd.f32 %v9043_v32, %v13396_v41  ;;  %v5790_v42 = vpop.f32.mrb[125].mxu0 }
 0x742   : > { %v5892_v18 = vadd.f32 %v13396_v41, %v5790_v42 }
 0x743   : > { %v5909_v59 = vmax.f32 %v5893_v24, 0.0 }
 0x744   : > { %v5908_v38 = vmax.f32 %v5892_v18, 0.0  ;;  %v9046_v51 = vpop.f32.mrb[126].mxu0 }
 0x745   : > { %v6021_v23 = vmul.f32 %v5948_v7, %v5909_v59  ;;  %v5895_v53 = vadd.f32 %v9046_v51, %v13396_v41  ;;  %v5800_v19 = vpop.f32.mrb[127].mxu0 }
 0x746   : > { %v6020_v52 = vmul.f32 %v5943_v30, %v5908_v38  ;;  %v5894_v5 = vadd.f32 %v13396_v41, %v5800_v19  ;;  %v6078_v30 = vld [vmem:[%s14149_s7 + $0x30] sm:$0xff]  ;;  %v6081_v19 = vld [vmem:[%s14149_s7 + $0x48] sm:$0xff] }
 0x747   : > { %6040 = vst.msk [vmem:[#allocation4 + $0x9] sm:$0xff] %vm5181_vm13, %v6021_v23  ;;  %v5911_v47 = vmax.f32 %v5895_v53, 0.0  ;;  %v6080_v53 = vld [vmem:[%s14149_s7 + $0x40] sm:$0xff] }
 0x748   : > { %6039 = vst.msk [vmem:[#allocation4 + $0x1] sm:$0xff] %vm5181_vm13, %v6020_v52  ;;  %v5910_v6 = vmax.f32 %v5894_v5, 0.0  ;;  %v9049_v35 = vpop.f32.mrb[128].mxu0 }
 0x749   : > { %v6023_v58 = vmul.f32 %v5958_v43, %v5911_v47  ;;  %v5897_v3 = vadd.f32 %v9049_v35, %v13396_v41  ;;  %v5810_v27 = vpop.f32.mrb[129].mxu0  ;;  %v5993_v43 = vpop.permute.xlu0 %5992 }
 0x74a   : > { %v6022_v15 = vmul.f32 %v5953_v9, %v5910_v6  ;;  %v5896_v10 = vadd.f32 %v13396_v41, %v5810_v27  ;;  %v10078_v27 = vpack.c.bf16 %v6081_v19, %v6080_v53 }
 0x74b   : > { %6042 = vst.msk [vmem:[#allocation4 + $0x19] sm:$0xff] %vm5181_vm13, %v6023_v58  ;;  %v5913_v61 = vmax.f32 %v5897_v3, 0.0 }
 0x74c   : > { %6041 = vst.msk [vmem:[#allocation4 + $0x11] sm:$0xff] %vm5181_vm13, %v6022_v15  ;;  %v5912_v57 = vmax.f32 %v5896_v10, 0.0  ;;  %v9052_v45 = vpop.f32.mrb[130].mxu0 }
 0x74d   : > { %v6025_v0 = vmul.f32 %v5968_v54, %v5913_v61  ;;  %v5899_v2 = vadd.f32 %v9052_v45, %v13396_v41  ;;  %v5820_v25 = vpop.f32.mrb[131].mxu0  ;;  %v6083_v45 = vld [vmem:[%s14149_s7 + $0x58] sm:$0xff] }
 0x74e   : > { %v6024_v4 = vmul.f32 %v5963_v28, %v5912_v57  ;;  %v5898_v1 = vadd.f32 %v13396_v41, %v5820_v25  ;;  %v6087_v46 = vld [vmem:[#allocation4 + $0x9] sm:$0xff] }
 0x74f   : > { %6044 = vst.msk [vmem:[#allocation4 + $0x29] sm:$0xff] %vm5181_vm13, %v6025_v0  ;;  %v5915_v49 = vmax.f32 %v5899_v2, 0.0  ;;  %v6086_v31 = vld [vmem:[#allocation4 + $0x1] sm:$0xff]  ;;  %v6082_v57 = vld [vmem:[%s14149_s7 + $0x50] sm:$0xff] }
 0x750   : > { %6043 = vst.msk [vmem:[#allocation4 + $0x21] sm:$0xff] %vm5181_vm13, %v6024_v4  ;;  %v5914_v55 = vmax.f32 %v5898_v1, 0.0  ;;  %v9055_v8 = vpop.f32.mrb[132].mxu0  ;;  %9093 = vmatprep.mubr.msk.f32.mxu1 %vm5181_vm13, %v6086_v31  ;;  %v10082_v1 = vpack.c.bf16 %v6083_v45, %v6082_v57  ;;  %v6503_v45 = vld [vmem:[#allocation4 + $0x2] sm:$0xff] }
 0x751   : > { %v6027_v14 = vmul.f32 %v5978_v39, %v5915_v49  ;;  %v5901_v29 = vadd.f32 %v9055_v8, %v13396_v41  ;;  %v5830_v22 = vpop.f32.mrb[133].mxu0  ;;  %9094 = vmatmul.mubr.msk.f32.vlgmr.msra.gmra.mrb[124].mxu1 %vm5181_vm13, %v6087_v46  ;;  %v6008_v39 = vpop.permute.xlu1 %6007 }
 0x752   : > { %v6026_v62 = vmul.f32 %v5973_v44, %v5914_v55  ;;  %v5900_v13 = vadd.f32 %v13396_v41, %v5830_v22  ;;  %10065 = vmatpush3.bf16.msra.mxu1 %v13388_v26  ;;  %v6089_v7 = vld [vmem:[#allocation4 + $0x19] sm:$0xff]  ;;  %v6003_v44 = vpop.permute.xlu0 %6002  ;;  %v8471_v22 = vld [vmem:[%s14149_s7 + $0xe8] sm:$0xff] }
 0x753   : > { %6046 = vst.msk [vmem:[#allocation4 + $0x39] sm:$0xff] %vm5181_vm13, %v6027_v14  ;;  %v5917_v60 = vmax.f32 %v5901_v29, 0.0  ;;  %v6088_v34 = vld [vmem:[#allocation4 + $0x11] sm:$0xff]  ;;  %10067 = vmatprep.subr.bf16.mxu1 %v10066_v20  ;;  %v8470_v29 = vld [vmem:[%s14149_s7 + $0xe0] sm:$0xff] }
 0x754   : > { %6045 = vst.msk [vmem:[#allocation4 + $0x31] sm:$0xff] %vm5181_vm13, %v6026_v62  ;;  %v5916_v56 = vmax.f32 %v5900_v13, 0.0  ;;  %v9058_v33 = vpop.f32.mrb[134].mxu0  ;;  %9096 = vmatprep.mubr.msk.f32.mxu1 %vm5181_vm13, %v6088_v34  ;;  %v6079_v26 = vld [vmem:[%s14149_s7 + $0x38] sm:$0xff]  ;;  %v10090_v13 = vpack.c.bf16 %v8471_v22, %v8470_v29 }
 0x755   : > { %v6029_v9 = vmul.f32 %v5988_v37, %v5917_v60  ;;  %v5903_v32 = vadd.f32 %v9058_v33, %v13396_v41  ;;  %v5840_v24 = vpop.f32.mrb[135].mxu0  ;;  %9097 = vmatmul.mubr.msk.f32.gmra.mrb[126].mxu1 %vm5181_vm13, %v6089_v7  ;;  %v10074_v59 = vpack.c.bf16 %v6079_v26, %v6078_v30  ;;  %v6056_v33 = vld [vmem:[#allocation4] sm:$0xff]  ;;  %v6057_v30 = vld [vmem:[#allocation4 + $0x8] sm:$0xff] }
 0x756   : > { %v6028_v42 = vmul.f32 %v5983_v50, %v5916_v56  ;;  %v5902_v54 = vadd.f32 %v13396_v41, %v5840_v24  ;;  %10069 = vmatpush3.bf16.msra.mxu1 %v10066_v20  ;;  %v6091_v23 = vld [vmem:[#allocation4 + $0x29] sm:$0xff]  ;;  %v6018_v50 = vpop.permute.xlu1 %6017  ;;  %v6084_v20 = vld [vmem:[%s14149_s7 + $0x60] sm:$0xff]  ;;  %v6013_v55 = vpop.permute.xlu0 %6012  ;;  %v8473_v56 = vld [vmem:[%s14149_s7 + $0xf8] sm:$0xff] }
 0x757   : > { %6048 = vst.msk [vmem:[#allocation4 + $0x49] sm:$0xff] %vm5181_vm13, %v6029_v9  ;;  %v5919_v18 = vmax.f32 %v5903_v32, 0.0  ;;  %v6090_v28 = vld [vmem:[#allocation4 + $0x21] sm:$0xff]  ;;  %10071 = vmatprep.subr.bf16.mxu1 %v10070_v11  ;;  %v6058_v9 = vld [vmem:[#allocation4 + $0x10] sm:$0xff]  ;;  %v6059_v24 = vld [vmem:[#allocation4 + $0x18] sm:$0xff] }
 0x758   : > { %6047 = vst.msk [vmem:[#allocation4 + $0x41] sm:$0xff] %vm5181_vm13, %v6028_v42  ;;  %v5918_v38 = vmax.f32 %v5902_v54, 0.0  ;;  %v9061_v51 = vpop.f32.mrb[136].mxu0  ;;  %9099 = vmatprep.mubr.msk.f32.mxu1 %vm5181_vm13, %v6090_v28  ;;  %v8474_v26 = vld [vmem:[%s14149_s7 + $0x100] sm:$0xff]  ;;  %v8476_v42 = vld [vmem:[%s14149_s7 + $0x110] sm:$0xff]  ;;  %v8477_v54 = vld [vmem:[%s14149_s7 + $0x118] sm:$0xff] }
 0x759   : > { %v6031_v52 = vmul.f32 %v5998_v21, %v5919_v18  ;;  %v5905_v5 = vadd.f32 %v9061_v51, %v13396_v41  ;;  %v5850_v47 = vpop.f32.mrb[137].mxu0  ;;  %9100 = vmatmul.mubr.msk.f32.gmra.mrb[128].mxu1 %vm5181_vm13, %v6091_v23  ;;  %v8472_v21 = vld [vmem:[%s14149_s7 + $0xf0] sm:$0xff]  ;;  %v6060_v18 = vld [vmem:[#allocation4 + $0x20] sm:$0xff]  ;;  %v10102_v28 = vpack.c.bf16 %v8477_v54, %v8476_v42  ;;  %v8479_v51 = vld [vmem:[%s14149_s7 + $0x128] sm:$0xff] }
 0x75a   : > { %v6030_v6 = vmul.f32 %v5993_v43, %v5918_v38  ;;  %v5904_v35 = vadd.f32 %v13396_v41, %v5850_v47  ;;  %10073 = vmatpush3.bf16.msra.mxu1 %v10070_v11  ;;  %v6093_v61 = vld [vmem:[#allocation4 + $0x39] sm:$0xff]  ;;  %v10094_v7 = vpack.c.bf16 %v8473_v56, %v8472_v21  ;;  %v8475_v43 = vld [vmem:[%s14149_s7 + $0x108] sm:$0xff] }
 0x75b   : > { %6050 = vst.msk [vmem:[#allocation4 + $0x59] sm:$0xff] %vm5181_vm13, %v6031_v52  ;;  %v5921_v58 = vmax.f32 %v5905_v5, 0.0  ;;  %v6092_v3 = vld [vmem:[#allocation4 + $0x31] sm:$0xff]  ;;  %10075 = vmatprep.subr.bf16.mxu1 %v10074_v59  ;;  %v10098_v32 = vpack.c.bf16 %v8475_v43, %v8474_v26  ;;  %v8478_v38 = vld [vmem:[%s14149_s7 + $0x120] sm:$0xff] }
 0x75c   : > { %6049 = vst.msk [vmem:[#allocation4 + $0x51] sm:$0xff] %vm5181_vm13, %v6030_v6  ;;  %v5920_v15 = vmax.f32 %v5904_v35, 0.0  ;;  %v9064_v10 = vpop.f32.mrb[138].mxu0  ;;  %9102 = vmatprep.mubr.msk.f32.mxu1 %vm5181_vm13, %v6092_v3  ;;  %v6062_v23 = vld [vmem:[#allocation4 + $0x30] sm:$0xff]  ;;  %v10106_v53 = vpack.c.bf16 %v8479_v51, %v8478_v38  ;;  %v6063_v19 = vld [vmem:[#allocation4 + $0x38] sm:$0xff]  ;;  %v8482_v35 = vld [vmem:[%s14149_s7 + $0x140] sm:$0xff] }
 0x75d   : > { %v6033_v36 = vmul.f32 %v6008_v39, %v5921_v58  ;;  %v5907_v16 = vadd.f32 %v9064_v10, %v13396_v41  ;;  %v5860_v0 = vpop.f32.mrb[139].mxu0  ;;  %9103 = vmatmul.mubr.msk.f32.gmra.mrb[130].mxu1 %vm5181_vm13, %v6093_v61  ;;  %v8480_v52 = vld [vmem:[%s14149_s7 + $0x130] sm:$0xff]  ;;  %v8481_v5 = vld [vmem:[%s14149_s7 + $0x138] sm:$0xff] }
 0x75e   : > { %v6032_v2 = vmul.f32 %v6003_v44, %v5920_v15  ;;  %v5906_v25 = vadd.f32 %v13396_v41, %v5860_v0  ;;  %10077 = vmatpush3.bf16.msra.mxu1 %v10074_v59  ;;  %v6095_v31 = vld [vmem:[#allocation4 + $0x49] sm:$0xff]  ;;  %v10110_v39 = vpack.c.bf16 %v8481_v5, %v8480_v52  ;;  %v6506_v0 = vld [vmem:[#allocation4 + $0x1a] sm:$0xff] }
 0x75f   : > { %6052 = vst.msk [vmem:[#allocation4 + $0x69] sm:$0xff] %vm5181_vm13, %v6033_v36  ;;  %v5923_v37 = vmax.f32 %v5907_v16, 0.0  ;;  %v6094_v4 = vld [vmem:[#allocation4 + $0x41] sm:$0xff]  ;;  %10079 = vmatprep.subr.bf16.mxu1 %v10078_v27  ;;  %v6504_v36 = vld [vmem:[#allocation4 + $0xa] sm:$0xff]  ;;  %v6505_v16 = vld [vmem:[#allocation4 + $0x12] sm:$0xff] }
 0x760   : > { %6051 = vst.msk [vmem:[#allocation4 + $0x61] sm:$0xff] %vm5181_vm13, %v6032_v2  ;;  %v5922_v49 = vmax.f32 %v5906_v25, 0.0  ;;  %9105 = vmatprep.mubr.msk.f32.mxu1 %vm5181_vm13, %v6094_v4  ;;  %v6085_v41 = vld [vmem:[%s14149_s7 + $0x68] sm:$0xff]  ;;  %v6064_v47 = vld [vmem:[#allocation4 + $0x40] sm:$0xff] }
 0x761   : > { %v6035_v8 = vmul.f32 %v6018_v50, %v5923_v37  ;;  %9106 = vmatmul.mubr.msk.f32.gmra.mrb[132].mxu1 %vm5181_vm13, %v6095_v31  ;;  %v10086_v40 = vpack.c.bf16 %v6085_v41, %v6084_v20  ;;  %v6061_v59 = vld [vmem:[#allocation4 + $0x28] sm:$0xff]  ;;  %v6509_v37 = vld [vmem:[#allocation4 + $0x32] sm:$0xff]  ;;  %v6510_v4 = vld [vmem:[#allocation4 + $0x3a] sm:$0xff] }
 0x762   : > { %v6034_v46 = vmul.f32 %v6013_v55, %v5922_v49  ;;  %10081 = vmatpush3.bf16.msra.mxu1 %v10078_v27  ;;  %v6097_v14 = vld [vmem:[#allocation4 + $0x59] sm:$0xff]  ;;  %v6065_v6 = vld [vmem:[#allocation4 + $0x48] sm:$0xff] }
 0x763   : > { %6055 = vst.msk [vmem:[#allocation4 + $0x79] sm:$0x3f] %vm6054_vm15, %v6035_v8  ;;  %v6096_v12 = vld [vmem:[#allocation4 + $0x51] sm:$0xff]  ;;  %10083 = vmatprep.subr.bf16.mxu1 %v10082_v1  ;;  %v8483_v44 = vld [vmem:[%s14149_s7 + $0x148] sm:$0xff]  ;;  %s14037_s7 = scalar_lea.hbm %s14153_s27, %s8582_s29 }
 0x764   : > { %6053 = vst.msk [vmem:[#allocation4 + $0x71] sm:$0xff] %vm5181_vm13, %v6034_v46  ;;  %9108 = vmatprep.mubr.msk.f32.mxu1 %vm5181_vm13, %v6096_v12  ;;  %v6066_v58 = vld [vmem:[#allocation4 + $0x50] sm:$0xff]  ;;  %v10114_v3 = vpack.c.bf16 %v8483_v44, %v8482_v35  ;;  %v6067_v27 = vld [vmem:[#allocation4 + $0x58] sm:$0xff]  ;;  %v6507_v2 = vld [vmem:[#allocation4 + $0x22] sm:$0xff] }
 0x765   : > { %9109 = vmatmul.mubr.msk.f32.gmra.mrb[134].mxu1 %vm5181_vm13, %v6097_v14  ;;  %v6508_v25 = vld [vmem:[#allocation4 + $0x2a] sm:$0xff]  ;;  %v6513_v49 = vld [vmem:[#allocation4 + $0x52] sm:$0xff]  ;;  %v13564_v46 = vld [vmem:[%s14152_s8] ss:$0 sm:$0xff]  ;;  %s7887_s8 = scalar_lea.sflag [#allocation6], %s648_s0 }
 0x766   : > { %10085 = vmatpush3.bf16.msra.mxu1 %v10082_v1  ;;  %v6099_v60 = vld [vmem:[#allocation4 + $0x69] sm:$0xff] }
 0x767   : > { %v6098_v62 = vld [vmem:[#allocation4 + $0x61] sm:$0xff]  ;;  %10087 = vmatprep.subr.bf16.mxu1 %v10086_v40  ;;  %v6512_v50 = vld [vmem:[#allocation4 + $0x4a] sm:$0xff] }
 0x768   : > { %9111 = vmatprep.mubr.msk.f32.mxu1 %vm5181_vm13, %v6098_v62  ;;  %v6068_v15 = vld [vmem:[#allocation4 + $0x60] sm:$0xff]  ;;  %v6069_v10 = vld [vmem:[#allocation4 + $0x68] sm:$0xff] }
 0x769   : > { %9112 = vmatmul.mubr.msk.f32.gmra.mrb[136].mxu1 %vm5181_vm13, %v6099_v60  ;;  %v6511_v1 = vld [vmem:[#allocation4 + $0x42] sm:$0xff]  ;;  %v6514_v31 = vld [vmem:[#allocation4 + $0x5a] sm:$0xff] }
 0x76a   : > { %10089 = vmatpush3.bf16.msra.mxu1 %v10086_v40  ;;  %v6101_v11 = vld [vmem:[#allocation4 + $0x79] sm:$0x3f]  ;;  %v6515_v20 = vld [vmem:[#allocation4 + $0x62] sm:$0xff] }
 0x76b   : > { %v6100_v34 = vld [vmem:[#allocation4 + $0x71] sm:$0xff]  ;;  %10091 = vmatprep.subr.bf16.mxu1 %v10090_v13  ;;  %v6518_v8 = vld [vmem:[#allocation4 + $0x7a] sm:$0x3f] }
 0x76c   : > { %9114 = vmatprep.mubr.msk.f32.mxu1 %vm5181_vm13, %v6100_v34  ;;  %v6070_v61 = vld [vmem:[#allocation4 + $0x70] sm:$0xff]  ;;  %v6071_v57 = vld [vmem:[#allocation4 + $0x78] sm:$0x3f] }
 0x76d   : > { %9115 = vmatmul.mubr.msk.f32.gmra.mrb[138].mxu1 %vm5181_vm13, %v6101_v11  ;;  %v6516_v41 = vld [vmem:[#allocation4 + $0x6a] sm:$0xff]  ;;  %v6517_v55 = vld [vmem:[#allocation4 + $0x72] sm:$0xff] }
 0x76e   : > { %9145 = vmatprep.mubr.msk.f32.mxu1 %vm5181_vm13, %v6056_v33 }
 0x771   : > { %9146 = vmatmul.mubr.msk.f32.vlgmr.msra.gmra.mrb[124].mxu1 %vm5181_vm13, %v6057_v30 }
 0x772   : > { %9148 = vmatprep.mubr.msk.f32.mxu1 %vm5181_vm13, %v6058_v9  ;;  %10093 = vmatpush3.bf16.msra.mxu1 %v10090_v13 }
 0x773   : > { %10095 = vmatprep.subr.bf16.mxu1 %v10094_v7 }
 0x775   : > { %9149 = vmatmul.mubr.msk.f32.gmra.mrb[126].mxu1 %vm5181_vm13, %v6059_v24 }
 0x776   : > { %9151 = vmatprep.mubr.msk.f32.mxu1 %vm5181_vm13, %v6060_v18  ;;  %10097 = vmatpush3.bf16.msra.mxu1 %v10094_v7 }
 0x777   : > { %10099 = vmatprep.subr.bf16.mxu1 %v10098_v32 }
 0x779   : > { %9152 = vmatmul.mubr.msk.f32.gmra.mrb[128].mxu1 %vm5181_vm13, %v6061_v59 }
 0x77a   : > { %9154 = vmatprep.mubr.msk.f32.mxu1 %vm5181_vm13, %v6062_v23  ;;  %10101 = vmatpush3.bf16.msra.mxu1 %v10098_v32 }
 0x77b   : > { %10103 = vmatprep.subr.bf16.mxu1 %v10102_v28 }
 0x77d   : > { %9155 = vmatmul.mubr.msk.f32.gmra.mrb[130].mxu1 %vm5181_vm13, %v6063_v19 }
 0x77e   : > { %9157 = vmatprep.mubr.msk.f32.mxu1 %vm5181_vm13, %v6064_v47  ;;  %10105 = vmatpush3.bf16.msra.mxu1 %v10102_v28 }
 0x77f   : > { %10107 = vmatprep.subr.bf16.mxu1 %v10106_v53 }
 0x781   : > { %9158 = vmatmul.mubr.msk.f32.gmra.mrb[132].mxu1 %vm5181_vm13, %v6065_v6 }
 0x782   : > { %9160 = vmatprep.mubr.msk.f32.mxu1 %vm5181_vm13, %v6066_v58  ;;  %10109 = vmatpush3.bf16.msra.mxu1 %v10106_v53 }
 0x783   : > { %10111 = vmatprep.subr.bf16.mxu1 %v10110_v39 }
 0x785   : > { %9161 = vmatmul.mubr.msk.f32.gmra.mrb[134].mxu1 %vm5181_vm13, %v6067_v27 }
 0x786   : > { %9163 = vmatprep.mubr.msk.f32.mxu1 %vm5181_vm13, %v6068_v15  ;;  %10113 = vmatpush3.bf16.msra.mxu1 %v10110_v39 }
 0x787   : > { %10115 = vmatprep.subr.bf16.mxu1 %v10114_v3 }
 0x789   : > { %9164 = vmatmul.mubr.msk.f32.gmra.mrb[136].mxu1 %vm5181_vm13, %v6069_v10 }
 0x78a   : > { %9166 = vmatprep.mubr.msk.f32.mxu1 %vm5181_vm13, %v6070_v61  ;;  %10117 = vmatpush3.bf16.msra.mxu1 %v10114_v3 }
 0x78b   : > { %10168 = vmatprep.subr.bf16.mxu1 %v10725_v17 }
 0x78d   : > { %9167 = vmatmul.mubr.msk.f32.gmra.mrb[138].mxu1 %vm5181_vm13, %v6071_v57 }
 0x78e   : > { %9197 = vmatprep.mubr.msk.f32.mxu1 %vm5181_vm13, %v6503_v45 }
 0x791   : > { %9198 = vmatmul.mubr.msk.f32.vlgmr.msra.gmra.mrb[124].mxu1 %vm5181_vm13, %v6504_v36 }
 0x792   : > { %9200 = vmatprep.mubr.msk.f32.mxu1 %vm5181_vm13, %v6505_v16 }
 0x795   : > { %9201 = vmatmul.mubr.msk.f32.gmra.mrb[126].mxu1 %vm5181_vm13, %v6506_v0 }
 0x796   : > { %9203 = vmatprep.mubr.msk.f32.mxu1 %vm5181_vm13, %v6507_v2 }
 0x799   : > { %9204 = vmatmul.mubr.msk.f32.gmra.mrb[128].mxu1 %vm5181_vm13, %v6508_v25 }
 0x79a   : > { %9206 = vmatprep.mubr.msk.f32.mxu1 %vm5181_vm13, %v6509_v37 }
 0x79d   : > { %9207 = vmatmul.mubr.msk.f32.gmra.mrb[130].mxu1 %vm5181_vm13, %v6510_v4 }
 0x79e   : > { %9209 = vmatprep.mubr.msk.f32.mxu1 %vm5181_vm13, %v6511_v1 }
 0x7a1   : > { %9210 = vmatmul.mubr.msk.f32.gmra.mrb[132].mxu1 %vm5181_vm13, %v6512_v50 }
 0x7a2   : > { %9212 = vmatprep.mubr.msk.f32.mxu1 %vm5181_vm13, %v6513_v49 }
 0x7a5   : > { %9213 = vmatmul.mubr.msk.f32.gmra.mrb[134].mxu1 %vm5181_vm13, %v6514_v31 }
 0x7a6   : > { %9215 = vmatprep.mubr.msk.f32.mxu1 %vm5181_vm13, %v6515_v20  ;;  %v6782_v20 = vld [vmem:[%s14094_s15] sm:$0xff] }
 0x7a9   : > { %9216 = vmatmul.mubr.msk.f32.gmra.mrb[136].mxu1 %vm5181_vm13, %v6516_v41  ;;  %v6783_v41 = vld [vmem:[%s14094_s15 + $0x8] sm:$0xff] }
 0x7aa   : > { %9218 = vmatprep.mubr.msk.f32.mxu1 %vm5181_vm13, %v6517_v55  ;;  %v6784_v55 = vld [vmem:[%s14094_s15 + $0x10] sm:$0xff] }
 0x7ad   : > { %9219 = vmatmul.mubr.msk.f32.gmra.mrb[138].mxu1 %vm5181_vm13, %v6518_v8  ;;  %v6785_v8 = vld [vmem:[%s14094_s15 + $0x18] sm:$0xff] }
 0x7ae   : > { %9355 = vmatprep.mubr.msk.f32.mxu1 %vm10726_vm0, %v14150_v63 }
 0x864   : > { %v9199_v12 = vpop.f32.mrb[124].mxu1 }
 0x865   : > { %v6751_v40 = vadd.f32 %v9199_v12, %v13564_v46  ;;  %v6648_v14 = vpop.f32.mrb[125].mxu1  ;;  %v6787_v12 = vld [vmem:[%s14094_s15 + $0x28] sm:$0xff] }
 0x866   : > { %v6750_v29 = vadd.f32 %v13564_v46, %v6648_v14  ;;  %v6914_v14 = vld [vmem:[%s14095_s16] sm:$0xff] }
 0x867   : > { %v6767_v22 = vmax.f32 %v6751_v40, 0.0  ;;  %v6788_v40 = vld [vmem:[%s14094_s15 + $0x30] sm:$0xff] }
 0x868   : > { %v6766_v62 = vmax.f32 %v6750_v29, 0.0  ;;  %v9202_v13 = vpop.f32.mrb[126].mxu1  ;;  %v6915_v29 = vld [vmem:[%s14095_s16 + $0x8] sm:$0xff] }
 0x869   : > { %v6753_v60 = vadd.f32 %v9202_v13, %v13564_v46  ;;  %v6658_v34 = vpop.f32.mrb[127].mxu1  ;;  %v6919_v13 = vld [vmem:[%s14095_s16 + $0x28] sm:$0xff] }
 0x86a   : > { %v13569_v11 = vpack.c.bf16 %v6767_v22, %v6766_v62  ;;  %v6752_v21 = vadd.f32 %v13564_v46, %v6658_v34  ;;  %v6917_v22 = vld [vmem:[%s14095_s16 + $0x18] sm:$0xff]  ;;  %v6918_v62 = vld [vmem:[%s14095_s16 + $0x20] sm:$0xff] }
 0x86b   : > { %v6769_v56 = vmax.f32 %v6753_v60, 0.0  ;;  %v6920_v60 = vld [vmem:[%s14095_s16 + $0x30] sm:$0xff]  ;;  %v7049_v34 = vld [vmem:[%s14096_s17] sm:$0xff] }
 0x86c   : > { %v6768_v33 = vmax.f32 %v6752_v21, 0.0  ;;  %v9205_v7 = vpop.f32.mrb[128].mxu1  ;;  %10120 = vmatpush3.bf16.msra.mxu0 %v13569_v11  ;;  %v7184_v21 = vld [vmem:[%s14097_s18] sm:$0xff] }
 0x86d   : > { %v6755_v30 = vadd.f32 %v9205_v7, %v13564_v46  ;;  %v6668_v26 = vpop.f32.mrb[129].mxu1  ;;  %10121 = vmatprep.subr.bf16.mxu0 %v10725_v17 }
 0x86e   : > { %v10122_v43 = vpack.c.bf16 %v6769_v56, %v6768_v33  ;;  %v6754_v9 = vadd.f32 %v13564_v46, %v6668_v26  ;;  %v7185_v33 = vld [vmem:[%s14097_s18 + $0x8] sm:$0xff]  ;;  %v7052_v26 = vld [vmem:[%s14096_s17 + $0x18] sm:$0xff] }
 0x86f   : > { %v6771_v32 = vmax.f32 %v6755_v30, 0.0  ;;  %v10190_v7 = vpack.c.bf16 %v7185_v33, %v7184_v21  ;;  %v7051_v30 = vld [vmem:[%s14096_s17 + $0x10] sm:$0xff] }
 0x870   : > { %v6770_v24 = vmax.f32 %v6754_v9, 0.0  ;;  %v9208_v42 = vpop.f32.mrb[130].mxu1  ;;  %10123 = vmatpush3.bf16.msra.mxu0 %v10122_v43  ;;  %v10172_v9 = vpack.c.bf16 %v7052_v26, %v7051_v30  ;;  %v8534_v33 = vld [vmem:[%s14098_s19 + $0x50] sm:$0xff]  ;;  %v7308_v30 = vld [vmem:[%s14098_s19 + $0x18] sm:$0xff] }
 0x871   : > { %v6757_v54 = vadd.f32 %v9208_v42, %v13564_v46  ;;  %v6678_v18 = vpop.f32.mrb[131].mxu1  ;;  %10124 = vmatprep.subr.bf16.mxu0 %v10725_v17  ;;  %v7053_v42 = vld [vmem:[%s14096_s17 + $0x20] sm:$0xff] }
 0x872   : > { %v10125_v28 = vpack.c.bf16 %v6771_v32, %v6770_v24  ;;  %v6756_v59 = vadd.f32 %v13564_v46, %v6678_v18  ;;  %v7187_v32 = vld [vmem:[%s14097_s18 + $0x18] sm:$0xff]  ;;  %v7188_v18 = vld [vmem:[%s14097_s18 + $0x20] sm:$0xff] }
 0x873   : > { %v6773_v38 = vmax.f32 %v6757_v54, 0.0  ;;  %v7054_v54 = vld [vmem:[%s14096_s17 + $0x28] sm:$0xff] }
 0x874   : > { %v6772_v51 = vmax.f32 %v6756_v59, 0.0  ;;  %v9211_v23 = vpop.f32.mrb[132].mxu1  ;;  %10126 = vmatpush3.bf16.msra.mxu0 %v10125_v28  ;;  %v7189_v59 = vld [vmem:[%s14097_s18 + $0x28] sm:$0xff] }
 0x875   : > { %v6759_v53 = vadd.f32 %v9211_v23, %v13564_v46  ;;  %v6688_v19 = vpop.f32.mrb[133].mxu1  ;;  %10127 = vmatprep.subr.bf16.mxu0 %v10725_v17  ;;  %v7056_v23 = vld [vmem:[%s14096_s17 + $0x38] sm:$0xff] }
 0x876   : > { %v10128_v52 = vpack.c.bf16 %v6773_v38, %v6772_v51  ;;  %v6758_v5 = vadd.f32 %v13564_v46, %v6688_v19  ;;  %v10196_v38 = vpack.c.bf16 %v7189_v59, %v7188_v18  ;;  %v7055_v51 = vld [vmem:[%s14096_s17 + $0x30] sm:$0xff]  ;;  %v8535_v18 = vld [vmem:[%s14098_s19 + $0x58] sm:$0xff] }
 0x877   : > { %v6775_v47 = vmax.f32 %v6759_v53, 0.0  ;;  %v7190_v53 = vld [vmem:[%s14097_s18 + $0x30] sm:$0xff]  ;;  %v10178_v19 = vpack.c.bf16 %v7056_v23, %v7055_v51 }
 0x878   : > { %v6774_v39 = vmax.f32 %v6758_v5, 0.0  ;;  %v9214_v6 = vpop.f32.mrb[134].mxu1  ;;  %10129 = vmatpush3.bf16.msra.mxu0 %v10128_v52 }
 0x879   : > { %v6761_v35 = vadd.f32 %v9214_v6, %v13564_v46  ;;  %v6698_v44 = vpop.f32.mrb[135].mxu1  ;;  %10130 = vmatprep.subr.bf16.mxu0 %v10725_v17  ;;  %v7192_v6 = vld [vmem:[%s14097_s18 + $0x40] sm:$0xff] }
 0x87a   : > { %v10131_v58 = vpack.c.bf16 %v6775_v47, %v6774_v39  ;;  %v6760_v3 = vadd.f32 %v13564_v46, %v6698_v44  ;;  %v7057_v47 = vld [vmem:[%s14096_s17 + $0x40] sm:$0xff]  ;;  %v7058_v39 = vld [vmem:[%s14096_s17 + $0x48] sm:$0xff] }
 0x87b   : > { %v6777_v27 = vmax.f32 %v6761_v35, 0.0  ;;  %v10181_v35 = vpack.c.bf16 %v7058_v39, %v7057_v47  ;;  %v7193_v44 = vld [vmem:[%s14097_s18 + $0x48] sm:$0xff] }
 0x87c   : > { %v6776_v15 = vmax.f32 %v6760_v3, 0.0  ;;  %v9217_v10 = vpop.f32.mrb[136].mxu1  ;;  %10132 = vmatpush3.bf16.msra.mxu0 %v10131_v58  ;;  %v7059_v3 = vld [vmem:[%s14096_s17 + $0x50] sm:$0xff] }
 0x87d   : > { %v6763_v61 = vadd.f32 %v9217_v10, %v13564_v46  ;;  %v6708_v57 = vpop.f32.mrb[137].mxu1  ;;  %10133 = vmatprep.subr.bf16.mxu0 %v10725_v17 }
 0x87e   : > { %v10134_v45 = vpack.c.bf16 %v6777_v27, %v6776_v15  ;;  %v6762_v36 = vadd.f32 %v13564_v46, %v6708_v57  ;;  %v7060_v27 = vld [vmem:[%s14096_s17 + $0x58] sm:$0xff]  ;;  %v7194_v15 = vld [vmem:[%s14097_s18 + $0x50] sm:$0xff] }
 0x87f   : > { %v6779_v16 = vmax.f32 %v6763_v61, 0.0  ;;  %v10184_v10 = vpack.c.bf16 %v7060_v27, %v7059_v3  ;;  %v7195_v61 = vld [vmem:[%s14097_s18 + $0x58] sm:$0xff] }
 0x880   : > { %v6778_v0 = vmax.f32 %v6762_v36, 0.0  ;;  %v9220_v2 = vpop.f32.mrb[138].mxu1  ;;  %10135 = vmatpush3.bf16.msra.mxu0 %v10134_v45  ;;  %v10205_v57 = vpack.c.bf16 %v7195_v61, %v7194_v15  ;;  %v7062_v36 = vld [vmem:[%s14096_s17 + $0x68] sm:$0xff] }
 0x881   : > { %v6765_v25 = vadd.f32 %v9220_v2, %v13564_v46  ;;  %v6718_v37 = vpop.f32.mrb[139].mxu1  ;;  %10136 = vmatprep.subr.bf16.mxu0 %v10725_v17  ;;  %v7197_v2 = vld [vmem:[%s14097_s18 + $0x68] sm:$0xff] }
 0x882   : > { %v10137_v4 = vpack.c.bf16 %v6779_v16, %v6778_v0  ;;  %v6764_v1 = vadd.f32 %v13564_v46, %v6718_v37  ;;  %v6786_v46 = vld [vmem:[%s14094_s15 + $0x20] sm:$0xff]  ;;  %v8537_v61 = vld [vmem:[%s14098_s19 + $0x68] sm:$0xff] }
 0x883   : > { %v6781_v50 = vmax.f32 %v6765_v25, 0.0  ;;  %v7196_v16 = vld [vmem:[%s14097_s18 + $0x60] sm:$0xff] }
 0x884   : > { %v6780_v49 = vmax.f32 %v6764_v1, 0.0  ;;  %10138 = vmatpush3.bf16.msra.mxu0 %v10137_v4  ;;  %v10208_v25 = vpack.c.bf16 %v7197_v2, %v7196_v16  ;;  %v8540_v2 = vld [vmem:[%s14098_s19 + $0x70] sm:$0xff] }
 0x885   : > { %10139 = vmatprep.subr.bf16.mxu0 %v10725_v17 }
 0x886   : > { %v10140_v31 = vpack.c.bf16 %v6781_v50, %v6780_v49 }
 0x888   : > { %10142 = vmatpush3.bf16.msk.msra.mxu0 %vm12689_vm12, %v10140_v31 }
 0x889   : > { %10143 = vmatprep.subr.bf16.mxu0 %v10725_v17 }
 0x88b   : > { %9254 = vmatmul.mubr.msk.f32.vlgmr.msra.gmra.mrb[140].mxu0 %vm6789_vm1, %v6782_v20 }
 0x88c   : > { %10145 = vmatpush3.bf16.msra.mxu0 %v13569_v11  ;;  %9256 = vmatprep.mubr.msk.f32.mxu0 %vm10726_vm0, %v14150_v63  ;;  %v7050_v11 = vld [vmem:[%s14096_s17 + $0x8] sm:$0xff] }
 0x88d   : > { %10146 = vmatprep.subr.bf16.mxu0 %v10725_v17  ;;  %v10169_v56 = vpack.c.bf16 %v7050_v11, %v7049_v34 }
 0x88f   : > { %9257 = vmatmul.mubr.msk.f32.gmra.mrb[142].mxu0 %vm6789_vm1, %v6783_v41  ;;  %10170 = vmatpush3.bf16.msra.mxu1 %v10169_v56  ;;  %v8533_v56 = vld [vmem:[%s14098_s19 + $0x48] sm:$0xff] }
 0x890   : > { %10148 = vmatpush3.bf16.msra.mxu0 %v10122_v43  ;;  %9259 = vmatprep.mubr.msk.f32.mxu0 %vm10726_vm0, %v14150_v63  ;;  %v7186_v43 = vld [vmem:[%s14097_s18 + $0x10] sm:$0xff] }
 0x891   : > { %10149 = vmatprep.subr.bf16.mxu0 %v10725_v17  ;;  %10171 = vmatprep.subr.bf16.mxu1 %v10725_v17  ;;  %v10193_v24 = vpack.c.bf16 %v7187_v32, %v7186_v43  ;;  %v10214_v32 = vpack.c.bf16 %v8534_v33, %v8533_v56  ;;  %v8544_v56 = vld [vmem:[%s14098_s19 + $0x90] sm:$0xff]  ;;  %v8545_v33 = vld [vmem:[%s14098_s19 + $0x98] sm:$0xff] }
 0x893   : > { %9260 = vmatmul.mubr.msk.f32.gmra.mrb[144].mxu0 %vm6789_vm1, %v6784_v55  ;;  %10173 = vmatpush3.bf16.msra.mxu1 %v10172_v9 }
 0x894   : > { %10151 = vmatpush3.bf16.msra.mxu0 %v10125_v28  ;;  %9262 = vmatprep.mubr.msk.f32.mxu0 %vm10726_vm0, %v14150_v63  ;;  %v10175_v28 = vpack.c.bf16 %v7054_v54, %v7053_v42  ;;  %v7309_v42 = vld [vmem:[%s14098_s19 + $0x20] sm:$0xff]  ;;  %v7310_v54 = vld [vmem:[%s14098_s19 + $0x28] sm:$0xff] }
 0x895   : > { %10152 = vmatprep.subr.bf16.mxu0 %v10725_v17  ;;  %10174 = vmatprep.subr.bf16.mxu1 %v10725_v17  ;;  %v10226_v23 = vpack.c.bf16 %v7310_v54, %v7309_v42  ;;  %v8554_v54 = vld [vmem:[%s14098_s19 + $0xd8] sm:$0xff] }
 0x897   : > { %9263 = vmatmul.mubr.msk.f32.gmra.mrb[146].mxu0 %vm6789_vm1, %v6785_v8  ;;  %10176 = vmatpush3.bf16.msra.mxu1 %v10175_v28  ;;  %v8536_v28 = vld [vmem:[%s14098_s19 + $0x60] sm:$0xff] }
 0x898   : > { %10154 = vmatpush3.bf16.msra.mxu0 %v10128_v52  ;;  %9265 = vmatprep.mubr.msk.f32.mxu0 %vm10726_vm0, %v14150_v63  ;;  %v7191_v52 = vld [vmem:[%s14097_s18 + $0x38] sm:$0xff] }
 0x899   : > { %10155 = vmatprep.subr.bf16.mxu0 %v10725_v17  ;;  %10177 = vmatprep.subr.bf16.mxu1 %v10725_v17  ;;  %v10199_v5 = vpack.c.bf16 %v7191_v52, %v7190_v53  ;;  %v10217_v53 = vpack.c.bf16 %v8536_v28, %v8535_v18  ;;  %v8556_v28 = vld [vmem:[%s14098_s19 + $0xe0] sm:$0xff] }
 0x89b   : > { %9266 = vmatmul.mubr.msk.f32.gmra.mrb[148].mxu0 %vm6789_vm1, %v6786_v46  ;;  %10179 = vmatpush3.bf16.msra.mxu1 %v10178_v19 }
 0x89c   : > { %10157 = vmatpush3.bf16.msra.mxu0 %v10131_v58  ;;  %9268 = vmatprep.mubr.msk.f32.mxu0 %vm10726_vm0, %v14150_v63  ;;  %v10202_v58 = vpack.c.bf16 %v7193_v44, %v7192_v6 }
 0x89d   : > { %10158 = vmatprep.subr.bf16.mxu0 %v10725_v17  ;;  %10180 = vmatprep.subr.bf16.mxu1 %v10725_v17 }
 0x89f   : > { %9269 = vmatmul.mubr.msk.f32.gmra.mrb[150].mxu0 %vm6789_vm1, %v6787_v12  ;;  %10182 = vmatpush3.bf16.msra.mxu1 %v10181_v35 }
 0x8a0   : > { %10160 = vmatpush3.bf16.msra.mxu0 %v10134_v45  ;;  %9271 = vmatprep.mubr.msk.f32.mxu0 %vm10726_vm0, %v14150_v63  ;;  %v7061_v45 = vld [vmem:[%s14096_s17 + $0x60] sm:$0xff] }
 0x8a1   : > { %10161 = vmatprep.subr.bf16.mxu0 %v10725_v17  ;;  %10183 = vmatprep.subr.bf16.mxu1 %v10725_v17  ;;  %v10187_v0 = vpack.c.bf16 %v7062_v36, %v7061_v45  ;;  %v8549_v45 = vld [vmem:[%s14098_s19 + $0xb0] sm:$0xff] }
 0x8a3   : > { %9272 = vmatmul.mubr.msk.f32.gmra.mrb[152].mxu0 %vm6789_vm1, %v6788_v40  ;;  %10185 = vmatpush3.bf16.msra.mxu1 %v10184_v10  ;;  %v7311_v10 = vld [vmem:[%s14098_s19 + $0x30] sm:$0xff] }
 0x8a4   : > { %10163 = vmatpush3.bf16.msra.mxu0 %v10137_v4  ;;  %9306 = vmatprep.mubr.msk.f32.mxu0 %vm10726_vm0, %v14150_v63 }
 0x8a5   : > { %10164 = vmatprep.subr.bf16.mxu0 %v10725_v17  ;;  %10186 = vmatprep.subr.bf16.mxu1 %v10725_v17 }
 0x8a7   : > { %10188 = vmatpush3.bf16.msra.mxu1 %v10187_v0 }
 0x8a8   : > { %10167 = vmatpush3.bf16.msk.msra.mxu0 %vm12689_vm12, %v10140_v31  ;;  %10210 = vmatprep.subr.bf16.mxu1 %v10725_v17 }
 0x8a9   : > { %10189 = vmatprep.subr.bf16.mxu0 %v10725_v17 }
 0x8ab   : > { %9307 = vmatmul.mubr.msk.f32.vlgmr.msra.gmra.mrb[154].mxu0 %vm6789_vm1, %v6914_v14 }
 0x8ac   : > { %9309 = vmatprep.mubr.msk.f32.mxu0 %vm10726_vm0, %v14150_v63  ;;  %10191 = vmatpush3.bf16.msra.mxu0 %v10190_v7  ;;  %v7307_v7 = vld [vmem:[%s14098_s19 + $0x10] sm:$0xff] }
 0x8ad   : > { %10192 = vmatprep.subr.bf16.mxu0 %v10725_v17 }
 0x8af   : > { %9310 = vmatmul.mubr.msk.f32.gmra.mrb[156].mxu0 %vm6789_vm1, %v6915_v29  ;;  %v8531_v29 = vld [vmem:[%s14098_s19 + $0x38] sm:$0xff] }
 0x8b0   : > { %9312 = vmatprep.mubr.msk.f32.mxu0 %vm10726_vm0, %v14150_v63  ;;  %10194 = vmatpush3.bf16.msra.mxu0 %v10193_v24  ;;  %v10223_v24 = vpack.c.bf16 %v7308_v30, %v7307_v7  ;;  %v8564_v7 = vld [vmem:[%s14098_s19 + $0x118] sm:$0xff]  ;;  %v8565_v30 = vld [vmem:[%s14098_s19 + $0x120] sm:$0xff] }
 0x8b1   : > { %10195 = vmatprep.subr.bf16.mxu0 %v10725_v17  ;;  %v10256_v18 = vpack.c.bf16 %v8565_v30, %v8564_v7 }
 0x8b3   : > { %9313 = vmatmul.mubr.msk.f32.gmra.mrb[158].mxu0 %vm6789_vm1, %v6916_v48  ;;  %v8532_v48 = vld [vmem:[%s14098_s19 + $0x40] sm:$0xff] }
 0x8b4   : > { %9315 = vmatprep.mubr.msk.f32.mxu0 %vm10726_vm0, %v14150_v63  ;;  %10197 = vmatpush3.bf16.msra.mxu0 %v10196_v38  ;;  %v10211_v11 = vpack.c.bf16 %v8532_v48, %v8531_v29  ;;  %v8552_v29 = vld [vmem:[%s14098_s19 + $0xc8] sm:$0xff]  ;;  %v8553_v48 = vld [vmem:[%s14098_s19 + $0xd0] sm:$0xff] }
 0x8b5   : > { %10198 = vmatprep.subr.bf16.mxu0 %v10725_v17 }
 0x8b7   : > { %9316 = vmatmul.mubr.msk.f32.gmra.mrb[160].mxu0 %vm6789_vm1, %v6917_v22  ;;  %v7305_v22 = vld [vmem:[%s14098_s19] sm:$0xff] }
 0x8b8   : > { %9318 = vmatprep.mubr.msk.f32.mxu0 %vm10726_vm0, %v14150_v63  ;;  %10200 = vmatpush3.bf16.msra.mxu0 %v10199_v5 }
 0x8b9   : > { %10201 = vmatprep.subr.bf16.mxu0 %v10725_v17 }
 0x8bb   : > { %9319 = vmatmul.mubr.msk.f32.gmra.mrb[162].mxu0 %vm6789_vm1, %v6918_v62  ;;  %v7306_v62 = vld [vmem:[%s14098_s19 + $0x8] sm:$0xff] }
 0x8bc   : > { %9321 = vmatprep.mubr.msk.f32.mxu0 %vm10726_vm0, %v14150_v63  ;;  %10203 = vmatpush3.bf16.msra.mxu0 %v10202_v58  ;;  %v10220_v21 = vpack.c.bf16 %v7306_v62, %v7305_v22 }
 0x8bd   : > { %10204 = vmatprep.subr.bf16.mxu0 %v10725_v17 }
 0x8bf   : > { %9322 = vmatmul.mubr.msk.f32.gmra.mrb[164].mxu0 %vm6789_vm1, %v6919_v13 }
 0x8c0   : > { %9324 = vmatprep.mubr.msk.f32.mxu0 %vm10726_vm0, %v14150_v63  ;;  %10206 = vmatpush3.bf16.msra.mxu0 %v10205_v57  ;;  %v8548_v57 = vld [vmem:[%s14098_s19 + $0xa8] sm:$0xff] }
 0x8c1   : > { %10207 = vmatprep.subr.bf16.mxu0 %v10725_v17  ;;  %v10238_v0 = vpack.c.bf16 %v8549_v45, %v8548_v57 }
 0x8c3   : > { %9325 = vmatmul.mubr.msk.f32.gmra.mrb[166].mxu0 %vm6789_vm1, %v6920_v60 }
 0x8c4   : > { %9404 = vmatprep.mubr.msk.f32.mxu0 %vm10726_vm0, %v14150_v63  ;;  %10209 = vmatpush3.bf16.msra.mxu0 %v10208_v25 }
 0x8c5   : > { %10219 = vmatprep.subr.bf16.mxu0 %v10725_v17 }
 0x95e   : > { %v6880_v37 = vpop.f32.mrb[140].mxu0 }
 0x95f   : > { %v9255_v4 = vpop.f32.mrb[141].mxu0 }
 0x962   : > { %v6885_v1 = vpop.f32.mrb[142].mxu0 }
 0x963   : > { %v9258_v50 = vpop.f32.mrb[143].mxu0 }
 0x964   : > { %v8550_v50 = vld [vmem:[%s14098_s19 + $0xb8] sm:$0xff] }
 0x966   : > { %v6890_v49 = vpop.f32.mrb[144].mxu0 }
 0x967   : > { %v9261_v31 = vpop.f32.mrb[145].mxu0 }
 0x96a   : > { %v6895_v20 = vpop.f32.mrb[146].mxu0 }
 0x96b   : > { %v9264_v41 = vpop.f32.mrb[147].mxu0 }
 0x96e   : > { %v13788_v55 = vpop.f32.mrb[148].mxu0 }
 0x96f   : > { %v9267_v8 = vpop.f32.mrb[149].mxu0 }
 0x970   : > { %v8542_v8 = vld [vmem:[%s14098_s19 + $0x80] sm:$0xff] }
 0x972   : > { %v13790_v46 = vpop.f32.mrb[150].mxu0 }
 0x973   : > { %v9270_v12 = vpop.f32.mrb[151].mxu0 }
 0x976   : > { %v13792_v40 = vpop.f32.mrb[152].mxu0 }
 0x977   : > { %v9273_v14 = vpop.f32.mrb[153].mxu0 }
 0x978   : > { %v8543_v14 = vld [vmem:[%s14098_s19 + $0x88] sm:$0xff] }
 0x97e   : > { %v7008_v13 = vpop.f32.mrb[154].mxu0 }
 0x97f   : > { %v7042_v60 = vmax.f32 %v6880_v37, %v7008_v13  ;;  %v9308_v34 = vpop.f32.mrb[155].mxu0  ;;  %v10232_v13 = vpack.c.bf16 %v8543_v14, %v8542_v8  ;;  %v8574_v8 = vld [vmem:[%s14098_s19 + $0x160] sm:$0xff]  ;;  %v8577_v14 = vld [vmem:[%s14098_s19 + $0x178] sm:$0xff] }
 0x981   : > { %9356 = vmatmul.mubr.msk.f32.vlgmr.msra.gmra.mrb[140].mxu1 %vm5181_vm13, %v7042_v60  ;;  %9405 = vmatmul.mubr.msk.f32.vlgmr.msra.gmra.mrb[168].mxu0 %vm5181_vm13, %v7042_v60  ;;  %v10244_v60 = vpack.c.bf16 %v8553_v48, %v8552_v29  ;;  %v8578_v48 = vld [vmem:[%s14098_s19 + $0x180] sm:$0xff] }
 0x982   : > { %v7013_v26 = vpop.f32.mrb[156].mxu0  ;;  %9358 = vmatprep.mubr.msk.f32.mxu1 %vm10726_vm0, %v14150_v63  ;;  %9407 = vmatprep.mubr.msk.f32.mxu0 %vm10726_vm0, %v14150_v63 }
 0x983   : > { %v7043_v43 = vmax.f32 %v6885_v1, %v7013_v26  ;;  %v9311_v9 = vpop.f32.mrb[157].mxu0  ;;  %10212 = vmatpush3.bf16.msra.mxu1 %v10211_v11  ;;  %10221 = vmatpush3.bf16.msra.mxu0 %v10220_v21  ;;  %v8541_v1 = vld [vmem:[%s14098_s19 + $0x78] sm:$0xff] }
 0x984   : > { %10213 = vmatprep.subr.bf16.mxu1 %v10725_v17  ;;  %10222 = vmatprep.subr.bf16.mxu0 %v10725_v17  ;;  %v10229_v41 = vpack.c.bf16 %v8541_v1, %v8540_v2  ;;  %v10235_v9 = vpack.c.bf16 %v8545_v33, %v8544_v56 }
 0x985   : > { %9359 = vmatmul.mubr.msk.f32.gmra.mrb[142].mxu1 %vm5181_vm13, %v7043_v43  ;;  %9408 = vmatmul.mubr.msk.f32.gmra.mrb[170].mxu0 %vm5181_vm13, %v7043_v43 }
 0x986   : > { %v7018_v59 = vpop.f32.mrb[158].mxu0  ;;  %9361 = vmatprep.mubr.msk.f32.mxu1 %vm10726_vm0, %v14150_v63  ;;  %9410 = vmatprep.mubr.msk.f32.mxu0 %vm10726_vm0, %v14150_v63 }
 0x987   : > { %v7044_v38 = vmax.f32 %v6890_v49, %v7018_v59  ;;  %v9314_v51 = vpop.f32.mrb[159].mxu0  ;;  %10215 = vmatpush3.bf16.msra.mxu1 %v10214_v32  ;;  %10224 = vmatpush3.bf16.msra.mxu0 %v10223_v24  ;;  %v8551_v49 = vld [vmem:[%s14098_s19 + $0xc0] sm:$0xff]  ;;  %v8557_v59 = vld [vmem:[%s14098_s19 + $0xe8] sm:$0xff] }
 0x988   : > { %10225 = vmatprep.subr.bf16.mxu0 %v10725_v17  ;;  %10216 = vmatprep.subr.bf16.mxu1 %v10725_v17  ;;  %v8567_v51 = vld [vmem:[%s14098_s19 + $0x130] sm:$0xff] }
 0x989   : > { %9362 = vmatmul.mubr.msk.f32.gmra.mrb[144].mxu1 %vm5181_vm13, %v7044_v38  ;;  %9411 = vmatmul.mubr.msk.f32.gmra.mrb[172].mxu0 %vm5181_vm13, %v7044_v38  ;;  %v8566_v38 = vld [vmem:[%s14098_s19 + $0x128] sm:$0xff] }
 0x98a   : > { %v7023_v19 = vpop.f32.mrb[160].mxu0  ;;  %9364 = vmatprep.mubr.msk.f32.mxu1 %vm10726_vm0, %v14150_v63  ;;  %9413 = vmatprep.mubr.msk.f32.mxu0 %vm10726_vm0, %v14150_v63 }
 0x98b   : > { %v7045_v52 = vmax.f32 %v6895_v20, %v7023_v19  ;;  %v9317_v5 = vpop.f32.mrb[161].mxu0  ;;  %10227 = vmatpush3.bf16.msra.mxu0 %v10226_v23  ;;  %10218 = vmatpush3.bf16.msra.mxu1 %v10217_v53 }
 0x98c   : > { %9454 = vmatprep.subr.mxu0 %v14150_v63  ;;  %9437 = vmatprep.subr.mxu1 %v14150_v63 }
 0x98d   : > { %9365 = vmatmul.mubr.msk.f32.gmra.mrb[146].mxu1 %vm5181_vm13, %v7045_v52  ;;  %9414 = vmatmul.mubr.msk.f32.gmra.mrb[174].mxu0 %vm5181_vm13, %v7045_v52 }
 0x98e   : > { %v7028_v47 = vpop.f32.mrb[162].mxu0  ;;  %9367 = vmatprep.mubr.msk.f32.mxu1 %vm10726_vm0, %v14150_v63  ;;  %9416 = vmatprep.mubr.msk.f32.mxu0 %vm10726_vm0, %v14150_v63 }
 0x98f   : > { %v7046_v39 = vmax.f32 %v13788_v55, %v7028_v47  ;;  %v9320_v6 = vpop.f32.mrb[163].mxu0  ;;  %9455 = vmatpush3.msra.mxu0 %v7311_v10  ;;  %9438 = vmatpush3.msra.mxu1 %v8537_v61  ;;  %v10241_v55 = vpack.c.bf16 %v8551_v49, %v8550_v50  ;;  %v8546_v47 = vld [vmem:[%s14098_s19 + $0xa0] sm:$0xff]  ;;  %v8570_v49 = vld [vmem:[%s14098_s19 + $0x148] sm:$0xff] }
 0x990   : > { %10237 = vmatprep.subr.bf16.mxu0 %v10725_v17  ;;  %10228 = vmatprep.subr.bf16.mxu1 %v10725_v17  ;;  %v10259_v6 = vpack.c.bf16 %v8567_v51, %v8566_v38 }
 0x991   : > { %9368 = vmatmul.mubr.msk.f32.gmra.mrb[148].mxu1 %vm5181_vm13, %v7046_v39  ;;  %9417 = vmatmul.mubr.msk.f32.gmra.mrb[176].mxu0 %vm5181_vm13, %v7046_v39  ;;  %v10247_v39 = vpack.c.bf16 %v8557_v59, %v8556_v28 }
 0x992   : > { %v7033_v35 = vpop.f32.mrb[164].mxu0  ;;  %9370 = vmatprep.mubr.msk.f32.mxu1 %vm10726_vm0, %v14150_v63  ;;  %9419 = vmatprep.mubr.msk.f32.mxu0 %vm10726_vm0, %v14150_v63 }
 0x993   : > { %v7047_v44 = vmax.f32 %v13790_v46, %v7033_v35  ;;  %v9323_v58 = vpop.f32.mrb[165].mxu0  ;;  %v8558_v35 = vld [vmem:[%s14098_s19 + $0xf0] sm:$0xff] }
 0x994   : > { %v8568_v58 = vld [vmem:[%s14098_s19 + $0x138] sm:$0xff] }
 0x995   : > { %9371 = vmatmul.mubr.msk.f32.gmra.mrb[150].mxu1 %vm5181_vm13, %v7047_v44  ;;  %9420 = vmatmul.mubr.msk.f32.gmra.mrb[178].mxu0 %vm5181_vm13, %v7047_v44  ;;  %v8559_v44 = vld [vmem:[%s14098_s19 + $0xf8] sm:$0xff] }
 0x996   : > { %v7038_v3 = vpop.f32.mrb[166].mxu0  ;;  %9373 = vmatprep.mubr.msk.f32.mxu1 %vm10726_vm0, %v14150_v63  ;;  %9422 = vmatprep.mubr.msk.f32.mxu0 %vm10726_vm0, %v14150_v63  ;;  %v10250_v45 = vpack.c.bf16 %v8559_v44, %v8558_v35 }
 0x997   : > { %v7048_v27 = vmax.f32 %v13792_v40, %v7038_v3  ;;  %v9326_v15 = vpop.f32.mrb[167].mxu0  ;;  %v8569_v3 = vld [vmem:[%s14098_s19 + $0x140] sm:$0xff] }
 0x999   : > { %9374 = vmatmul.mubr.msk.f32.gmra.mrb[152].mxu1 %vm5181_vm13, %v7048_v27  ;;  %9423 = vmatmul.mubr.msk.f32.gmra.mrb[180].mxu0 %vm5181_vm13, %v7048_v27 }
 0x99a   : > { %9456 = vmatprep.mubr.msk.f32.mxu0 %vm10726_vm0, %v14150_v63  ;;  %9439 = vmatprep.mubr.msk.f32.mxu1 %vm10726_vm0, %v14150_v63 }
 0xa54   : > { %v7150_v36 = vpop.f32.mrb[140].mxu1  ;;  %v7264_v16 = vpop.f32.mrb[168].mxu0 }
 0xa55   : > { %v7298_v25 = vmax.f32 %v7150_v36, %v7264_v16  ;;  %v9357_v37 = vpop.f32.mrb[141].mxu1  ;;  %v9406_v4 = vpop.f32.mrb[169].mxu0  ;;  %v10262_v36 = vpack.c.bf16 %v8569_v3, %v8568_v58  ;;  %v8560_v16 = vld [vmem:[%s14098_s19 + $0x100] sm:$0xff] }
 0xa57   : > { %9457 = vmatmul.mubr.msk.f32.vlgmr.msra.gmra.mrb[182].mxu0 %vm7320_vm2, %v7298_v25 }
 0xa58   : > { %10239 = vmatpush3.bf16.msra.mxu0 %v10238_v0  ;;  %v7155_v31 = vpop.f32.mrb[142].mxu1  ;;  %v7269_v20 = vpop.f32.mrb[170].mxu0  ;;  %9490 = vmatprep.mubr.msk.f32.mxu0 %vm10726_vm0, %v14150_v63  ;;  %v8561_v0 = vld [vmem:[%s14098_s19 + $0x108] sm:$0xff] }
 0xa59   : > { %v7299_v46 = vmax.f32 %v7155_v31, %v7269_v20  ;;  %v9360_v12 = vpop.f32.mrb[143].mxu1  ;;  %v9409_v40 = vpop.f32.mrb[171].mxu0  ;;  %10240 = vmatprep.subr.bf16.mxu0 %v10725_v17  ;;  %v10253_v50 = vpack.c.bf16 %v8561_v0, %v8560_v16  ;;  %v8572_v31 = vld [vmem:[%s14098_s19 + $0x150] sm:$0xff]  ;;  %v8573_v20 = vld [vmem:[%s14098_s19 + $0x158] sm:$0xff] }
 0xa5a   : > { %v8576_v40 = vld [vmem:[%s14098_s19 + $0x170] sm:$0xff] }
 0xa5b   : > { %9440 = vmatmul.mubr.msk.f32.vlgmr.msra.gmra.mrb[154].mxu1 %vm7320_vm2, %v7299_v46  ;;  %v8575_v46 = vld [vmem:[%s14098_s19 + $0x168] sm:$0xff]  ;;  %v10271_v29 = vpack.c.bf16 %v8577_v14, %v8576_v40 }
 0xa5c   : > { %10230 = vmatpush3.bf16.msra.mxu1 %v10229_v41  ;;  %10242 = vmatpush3.bf16.msra.mxu0 %v10241_v55  ;;  %v7160_v22 = vpop.f32.mrb[144].mxu1  ;;  %v7274_v62 = vpop.f32.mrb[172].mxu0  ;;  %v8562_v41 = vld [vmem:[%s14098_s19 + $0x110] sm:$0xff]  ;;  %v10265_v55 = vpack.c.bf16 %v8573_v20, %v8572_v31  ;;  %v10268_v12 = vpack.c.bf16 %v8575_v46, %v8574_v8 }
 0xa5d   : > { %v7300_v34 = vmax.f32 %v7160_v22, %v7274_v62  ;;  %v9363_v11 = vpop.f32.mrb[145].mxu1  ;;  %v9412_v21 = vpop.f32.mrb[173].mxu0  ;;  %10231 = vmatprep.subr.bf16.mxu1 %v10725_v17  ;;  %10243 = vmatprep.subr.bf16.mxu0 %v10725_v17 }
 0xa5e   : > { %9473 = vmatprep.mubr.msk.f32.mxu1 %vm10726_vm0, %v14150_v63 }
 0xa60   : > { %10233 = vmatpush3.bf16.msra.mxu1 %v10232_v13  ;;  %10245 = vmatpush3.bf16.msra.mxu0 %v10244_v60  ;;  %v7165_v26 = vpop.f32.mrb[146].mxu1  ;;  %v7279_v43 = vpop.f32.mrb[174].mxu0 }
 0xa61   : > { %v7301_v32 = vmax.f32 %v7165_v26, %v7279_v43  ;;  %v9366_v24 = vpop.f32.mrb[147].mxu1  ;;  %v9415_v42 = vpop.f32.mrb[175].mxu0  ;;  %10234 = vmatprep.subr.bf16.mxu1 %v10725_v17  ;;  %9488 = vmatprep.subr.mxu0 %v14150_v63 }
 0xa62   : > { %v8580_v42 = vld [vmem:[%s14099_s20] ss:$0 sm:$0xff] }
 0xa64   : > { %10236 = vmatpush3.bf16.msra.mxu1 %v10235_v9  ;;  %9489 = vmatpush3.msra.mxu0 %v8554_v54  ;;  %v7170_v23 = vpop.f32.mrb[148].mxu1  ;;  %v7284_v53 = vpop.f32.mrb[176].mxu0 }
 0xa65   : > { %v7302_v19 = vmax.f32 %v7170_v23, %v7284_v53  ;;  %9491 = vmatmul.mubr.msk.f32.vlgmr.msra.gmra.mrb[184].mxu0 %vm7320_vm2, %v7301_v32  ;;  %10255 = vmatprep.subr.bf16.mxu0 %v10725_v17  ;;  %v9369_v52 = vpop.f32.mrb[149].mxu1  ;;  %v9418_v5 = vpop.f32.mrb[177].mxu0 }
 0xa66   : > { %10257 = vmatpush3.bf16.msra.mxu0 %v10256_v18  ;;  %9471 = vmatprep.subr.mxu1 %v14150_v63 }
 0xa67   : > { %10258 = vmatprep.subr.bf16.mxu0 %v10725_v17  ;;  %9524 = vmatprep.mubr.msk.f32.mxu0 %vm10726_vm0, %v14150_v63 }
 0xa68   : > { %9472 = vmatpush3.msra.mxu1 %v8546_v47  ;;  %v7175_v27 = vpop.f32.mrb[150].mxu1  ;;  %v7289_v15 = vpop.f32.mrb[178].mxu0 }
 0xa69   : > { %v7303_v10 = vmax.f32 %v7175_v27, %v7289_v15  ;;  %9474 = vmatmul.mubr.msk.f32.vlgmr.msra.gmra.mrb[156].mxu1 %vm7320_vm2, %v7300_v34  ;;  %10246 = vmatprep.subr.bf16.mxu1 %v10725_v17  ;;  %v9372_v61 = vpop.f32.mrb[151].mxu1  ;;  %v9421_v57 = vpop.f32.mrb[179].mxu0 }
 0xa6a   : > { %10248 = vmatpush3.bf16.msra.mxu1 %v10247_v39  ;;  %10260 = vmatpush3.bf16.msra.mxu0 %v10259_v6 }
 0xa6b   : > { %10249 = vmatprep.subr.bf16.mxu1 %v10725_v17  ;;  %10261 = vmatprep.subr.bf16.mxu0 %v10725_v17 }
 0xa6c   : > { %v7180_v2 = vpop.f32.mrb[152].mxu1  ;;  %v7294_v25 = vpop.f32.mrb[180].mxu0  ;;  %9507 = vmatprep.mubr.msk.f32.mxu1 %vm10726_vm0, %v14150_v63 }
 0xa6d   : > { %v7304_v37 = vmax.f32 %v7180_v2, %v7294_v25  ;;  %v9375_v4 = vpop.f32.mrb[153].mxu1  ;;  %v9424_v1 = vpop.f32.mrb[181].mxu0 }
 0xa6e   : > { %10251 = vmatpush3.bf16.msra.mxu1 %v10250_v45  ;;  %10263 = vmatpush3.bf16.msra.mxu0 %v10262_v36 }
 0xa6f   : > { %10252 = vmatprep.subr.bf16.mxu1 %v10725_v17  ;;  %9522 = vmatprep.subr.mxu0 %v14150_v63 }
 0xa72   : > { %10254 = vmatpush3.bf16.msra.mxu1 %v10253_v50  ;;  %9523 = vmatpush3.msra.mxu0 %v8570_v49 }
 0xa73   : > { %9525 = vmatmul.mubr.msk.f32.vlgmr.msra.gmra.mrb[186].mxu0 %vm7320_vm2, %v7303_v10  ;;  %9505 = vmatprep.subr.mxu1 %v14150_v63 }
 0xa76   : > { %9506 = vmatpush3.msra.mxu1 %v8562_v41 }
 0xa77   : > { %9508 = vmatmul.mubr.msk.f32.vlgmr.msra.gmra.mrb[158].mxu1 %vm7320_vm2, %v7302_v19  ;;  %10264 = vmatprep.subr.bf16.mxu1 %v10725_v17 }
 0xa78   : > { %10266 = vmatpush3.bf16.msra.mxu1 %v10265_v55  ;;  %9541 = vmatprep.mubr.msk.f32.mxu1 %vm10726_vm0, %v14150_v63 }
 0xa79   : > { %10267 = vmatprep.subr.bf16.mxu1 %v10725_v17 }
 0xa7c   : > { %10269 = vmatpush3.bf16.msra.mxu1 %v10268_v12 }
 0xa7d   : > { %10270 = vmatprep.subr.bf16.mxu1 %v10725_v17 }
 0xa80   : > { %10272 = vmatpush3.bf16.msra.mxu1 %v10271_v29 }
 0xa81   : > { %9539 = vmatprep.subr.mxu1 %v14150_v63 }
 0xa84   : > { %9540 = vmatpush3.msra.mxu1 %v8578_v48 }
 0xa85   : > { %9542 = vmatmul.mubr.msk.f32.vlgmr.msra.gmra.mrb[160].mxu1 %vm7320_vm2, %v7304_v37 }
 0xb2a   : > { %v7463_v22 = vpop.f32.mrb[182].mxu0 }
 0xb2b   : > { %v9458_v62 = vpop.f32.mrb[183].mxu0 }
 0xb2e   : > { %v7390_v13 = vpop.f32.mrb[154].mxu1 }
 0xb2f   : > { %v7464_v60 = vadd.f32 %v7463_v22, %v7390_v13  ;;  %v9441_v34 = vpop.f32.mrb[155].mxu1 }
 0xb38   : > { %v7626_v11 = vpop.f32.mrb[184].mxu0 }
 0xb39   : > { %v9492_v21 = vpop.f32.mrb[185].mxu0 }
 0xb3c   : > { %v7544_v17 = vpop.f32.mrb[156].mxu1 }
 0xb3d   : > { %v7548_v56 = vadd.f32 %v7544_v17, %v7464_v60  ;;  %v9475_v33 = vpop.f32.mrb[157].mxu1 }
 0xb3f   : > { %v7630_v63 = vadd.f32 %v7626_v11, %v7548_v56 }
 0xb46   : > { %v7790_v7 = vpop.f32.mrb[186].mxu0 }
 0xb47   : > { %v9526_v30 = vpop.f32.mrb[187].mxu0 }
 0xb4a   : > { %v7708_v26 = vpop.f32.mrb[158].mxu1 }
 0xb4b   : > { %v7712_v43 = vadd.f32 %v7708_v26, %v7630_v63  ;;  %v9509_v9 = vpop.f32.mrb[159].mxu1 }
 0xb4d   : > { %v7794_v32 = vadd.f32 %v7790_v7, %v7712_v43 }
 0xb58   : > { %v7872_v24 = vpop.f32.mrb[160].mxu1 }
 0xb59   : > { %v7876_v54 = vadd.f32 %v7872_v24, %v7794_v32  ;;  %v9543_v18 = vpop.f32.mrb[161].mxu1 }
 0xb5b   : > { %v7884_v28 = vadd.f32 %v8580_v42, %v7876_v54 }
 0xb5d   : > { %7885 = vst [vmem:[%s650_s26] sm:$0xff] %v7884_v28 }
 0xb5e   : > { %10671 = shalt.err (!%p10668_p3)
}
 0xb5f   : > { %s10672_s0 = scalar_lea.hbm %s14037_s7, 128  ;;  %s10676_s28 = scalar_lea.hbm %s14154_s6, 256 }
 0xb60   : > { %p10673_p4 = scmp.ne.s32.totalorder %s14037_s7, %s10672_s0  ;;  %p10677_p9 = scmp.lt.u32.totalorder %s14037_s7, %s14154_s6 }
 0xb61   : > { %p10678_p10 = scmp.lt.u32.totalorder %s10676_s28, %s10672_s0  ;;  %p10680_p12 = scmp.lt.u32.totalorder %s10672_s0, %s14037_s7 }
 0xb62   : > { %p10674_p7 = pnand %p10673_p4, %p10876_p5 }
 0xb63   : > { %p10679_p11 = por %p10678_p10, %p10677_p9 }
 0xb64   : > { %p10675_p8 = pneg %p10674_p7 }
 0xb65   : > { %p10681_p13 = por %p10680_p12, %p10679_p11 }
 0xb67   : > { %p10682_p0 = pnand %p10681_p13, %p10675_p8 }
 0xb69   : > { %10685 = shalt.err (!%p10682_p0)
}
 0xb6a   : > { %10577 = dma.vmem_to_hbm [thread:$0]  (%p10876_p5), %s14039_s2, 128, %s14037_s7, %s7887_s8  }
 0xb6b PF: > { %s14155_s23 = sld [smem:[#allocation10_spill]]  ;;  %s14156_s3 = sld [smem:[#allocation8_spill]] }
 0xb71   : > { %p10583_p1 = scmp.ge.s32.totalorder %s14155_s23, 2  ;;  %s7912_s1 = sand.u32 1, %s14156_s3  }
 0xb72   : > { %s7913_s29 = scalar_lea.sflag [#allocation6], %s7912_s1 }
 0xb73   : > { %p10580_p2 = pnand %p10583_p1, %p10880_p6 }
 0xb75   : > { %10703 = dma.done.wait (!%p10580_p2), %s7913_s29, 128  }
 0xb76   : > { %10705 = vsyncadd (!%p10580_p2), %s7913_s29, 4294967168  ;;  %s14158_s27 = sld [smem:[#allocation11_spill]]  ;;  %s14159_s0 = sld [smem:[#allocation9_spill]] }
 0xb77   : > { %s14160_s26 = sld [smem:[#allocation12_spill]]  ;;  %s14161_s2 = smov %s10712_s25 }
 0xb7c   : > { %p31_p3 = scmp.ge.s32.totalorder %s14158_s27, 4   ;;  %s14162_s25 = smov %s14159_s0 }
 0xb7e   :  { %33 = sbr.rel (!%p31_p3) target bundleno = 14 (0xe), region = 154 }
 0xb85   :  { %7918 = vsyncpa [#allocation6], 1 }
 0xb86   :  { %7920 = vsyncpa [#allocation6 + $0x1], 1 }

</bundles_post_ra>
